<compile_context>
chip_gen: v7x
topology: tpu7x:2x2x1
jax: 0.10.0
libtpu: 0.0.40
codegen_flags: <defaults>
</compile_context>

<pallas_src>
import numpy as np

import jax
import jax.numpy as jnp
from jax.experimental import pallas as pl
from jax.experimental.pallas import tpu as pltpu


# ----------------------------------------------------------------------------
# The fused forward kernel
# ----------------------------------------------------------------------------
def _critic_forward_kernel(x_ref, act_ref,
                           sel1_ref, band1_ref, bn1_ref,
                           sel2_ref, band2_ref, bn2_ref,
                           sel3_ref, band3_ref, bn3_ref,
                           w4x_ref, w4a_ref, b4_ref,
                           w5_ref, b5_ref, w6_ref, b6_ref,
                           out_ref):
    f32, bf16 = jnp.float32, jnp.bfloat16

    def conv_bn_relu(x_bf16, sel_ref, band_ref, bn_ref):
        """x_bf16: [B*Hi, Wi*Ci] -> [B*Ho, Wo*Co] (f32).  conv + bias + ReLU + BN."""
        k = sel_ref.shape[0]
        m = sel_ref.shape[1]            # B*Ho
        n = band_ref.shape[2]           # Wo*Co
        acc = jnp.zeros((m, n), f32)
        for ky in range(k):
            # Select the stride-s input rows for kernel row ky (exact 0/1 matmul).
            rows = jnp.dot(sel_ref[ky], x_bf16, preferred_element_type=f32)
            # Banded weight realizes the sliding window over the (W, C) axis.
            acc = acc + jnp.dot(rows.astype(bf16), band_ref[ky],
                                preferred_element_type=f32)
        bn = bn_ref[...]                                    # [3, Wo*Co] f32
        y = jnp.maximum(acc + bn[0:1, :], 0.0)              # conv bias + ReLU
        y = y * bn[1:2, :] + bn[2:3, :]                     # BatchNorm (eval) AFTER ReLU
        return y

    # Conv stack — activations never leave VMEM, layout [B*H, W*C] throughout.
    y = conv_bn_relu(x_ref[...], sel1_ref, band1_ref, bn1_ref)              # [B*37, 37*6]
    y = conv_bn_relu(y.astype(bf16), sel2_ref, band2_ref, bn2_ref)          # [B*17, 17*12]
    y = conv_bn_relu(y.astype(bf16), sel3_ref, band3_ref, bn3_ref)          # [B*8,  8*24]

    B = out_ref.shape[0]
    ho3 = w4x_ref.shape[0]              # 8 conv-3 output rows

    # dense4: split matmul — conv features (per conv-row block) + action term.
    act_term = jnp.dot(act_ref[...].astype(bf16), w4a_ref[...],
                       preferred_element_type=f32)                          # [B, fc1]
    rows = []
    for b in range(B):
        acc = act_term[b:b + 1, :]
        for oy in range(ho3):
            r = y[b * ho3 + oy:b * ho3 + oy + 1, :].astype(bf16)            # [1, Wo*C]
            acc = acc + jnp.dot(r, w4x_ref[oy], preferred_element_type=f32)
        rows.append(acc)
    h = jnp.concatenate(rows, axis=0) + b4_ref[...]
    h = jnp.maximum(h, 0.0)

    # dense5 + dense6.
    h = jnp.dot(h.astype(bf16), w5_ref[...], preferred_element_type=f32) + b5_ref[...]
    h = jnp.maximum(h, 0.0)
    out = jnp.dot(h.astype(bf16), w6_ref[...], preferred_element_type=f32) + b6_ref[...]
    out_ref[...] = out.astype(out_ref.dtype)


def critic_d4pg_forward(prep, state_nchw, action):
    """state_nchw: [B, C, H, W] (PyTorch layout), action: [B, action_size]."""
    B, C, H, W = state_nchw.shape
    # NCHW -> NHWC -> [B*H, W*C]; a pure layout shuffle of the raw input (no im2col).
    x2d = jnp.transpose(state_nchw, (0, 2, 3, 1)).astype(jnp.bfloat16).reshape(B * H, W * C)
    n_atoms = prep["w6"].shape[1]

    vmem = pl.BlockSpec(memory_space=pltpu.MemorySpace.VMEM)
    return pl.pallas_call(
        _critic_forward_kernel,
        out_shape=jax.ShapeDtypeStruct((B, n_atoms), jnp.float32),
        in_specs=[vmem] * 18,
        out_specs=vmem,
    )(x2d, action.astype(jnp.float32),
      prep["sel1"], prep["band1"], prep["bn1"],
      prep["sel2"], prep["band2"], prep["bn2"],
      prep["sel3"], prep["band3"], prep["bn3"],
      prep["w4x"], prep["w4a"], prep["b4"],
      prep["w5"], prep["b5"], prep["w6"], prep["b6"])


# ----------------------------------------------------------------------------
# Parameter init (deterministic, synthetic — mirrors the PyTorch shapes)
# ----------------------------------------------------------------------------
def init_params(key, state_size, action_size,
                fc1_units=128, fc2_units=128, n_atoms=51, v_min=-1.0, v_max=1.0):
    keys = iter(jax.random.split(key, 32))

    def uni(shape, fan_in):
        bound = 1.0 / jnp.sqrt(jnp.float32(fan_in))
        return jax.random.uniform(next(keys), shape, jnp.float32, -bound, bound)

    p = {}
    conv_defs = [(8, state_size, 6), (5, 6, 12), (3, 12, 24)]    # (k, Cin, Cout)
    for idx, (k, cin, cout) in enumerate(conv_defs, start=1):
        fan = cin * k * k
        p[f"conv{idx}_w"] = uni((k, k, cin, cout), fan)          # HWIO
        p[f"conv{idx}_b"] = uni((cout,), fan)
        p[f"bn{idx}_gamma"] = 1.0 + 0.1 * jax.random.normal(next(keys), (cout,), jnp.float32)
        p[f"bn{idx}_beta"] = 0.1 * jax.random.normal(next(keys), (cout,), jnp.float32)
        p[f"bn{idx}_mean"] = 0.1 * jax.random.normal(next(keys), (cout,), jnp.float32)
        p[f"bn{idx}_var"] = jax.random.uniform(next(keys), (cout,), jnp.float32, 0.5, 1.5)

    flat = 8 * 8 * 24
    dense_defs = [(flat + action_size, fc1_units), (fc1_units, fc2_units), (fc2_units, n_atoms)]
    for idx, (din, dout) in enumerate(dense_defs, start=4):
        p[f"fc{idx}_w"] = uni((din, dout), din)
        p[f"fc{idx}_b"] = uni((dout,), din)

    p["supports"] = jnp.linspace(v_min, v_max, n_atoms, dtype=jnp.float32)  # unused in forward
    return p


def _bn_scale_shift(params, idx, eps=1e-5):
    scale = params[f"bn{idx}_gamma"] / jnp.sqrt(params[f"bn{idx}_var"] + eps)
    shift = params[f"bn{idx}_beta"] - params[f"bn{idx}_mean"] * scale
    return scale, shift


# ----------------------------------------------------------------------------
# One-time host-side weight preprocessing (selection + banded conv matrices, etc.)
# ----------------------------------------------------------------------------
def prepare_params(params, batch, height, width, eps=1e-5):
    B = batch
    prep = {}
    Hi, Wi = height, width
    co_last = None
    for idx, k, s in ((1, 8, 2), (2, 5, 2), (3, 3, 2)):
        w = np.asarray(params[f"conv{idx}_w"], np.float32)       # [k, k, Ci, Co]
        bias = np.asarray(params[f"conv{idx}_b"], np.float32)
        gamma = np.asarray(params[f"bn{idx}_gamma"], np.float32)
        beta = np.asarray(params[f"bn{idx}_beta"], np.float32)
        mean = np.asarray(params[f"bn{idx}_mean"], np.float32)
        var = np.asarray(params[f"bn{idx}_var"], np.float32)
        Ci, Co = int(w.shape[2]), int(w.shape[3])
        Ho = (Hi - k) // s + 1
        Wo = (Wi - k) // s + 1

        # Row-selection matrices: sel[ky, b*Ho+oy, b*Hi + oy*s + ky] = 1.
        sel = np.zeros((k, B * Ho, B * Hi), np.float32)
        for ky in range(k):
            for b in range(B):
                for oy in range(Ho):
                    sel[ky, b * Ho + oy, b * Hi + oy * s + ky] = 1.0

        # Block-banded weights over the flattened (W, C) axis.
        band = np.zeros((k, Wi * Ci, Wo * Co), np.float32)
        for ky in range(k):
            for kx in range(k):
                for ox in range(Wo):
                    r0 = (ox * s + kx) * Ci
                    c0 = ox * Co
                    band[ky, r0:r0 + Ci, c0:c0 + Co] = w[ky, kx]

        scale = gamma / np.sqrt(var + eps)
        shift = beta - mean * scale
        bn = np.stack([np.tile(bias, Wo), np.tile(scale, Wo), np.tile(shift, Wo)], axis=0)

        prep[f"sel{idx}"] = jnp.asarray(sel, jnp.bfloat16)       # exact (0/1) in bf16
        prep[f"band{idx}"] = jnp.asarray(band, jnp.bfloat16)
        prep[f"bn{idx}"] = jnp.asarray(bn, jnp.float32)
        Hi, Wi, co_last = Ho, Wo, Co

    Ho3, Wo3, Co3 = Hi, Wi, co_last
    n_flat = Ho3 * Wo3 * Co3
    w4 = np.asarray(params["fc4_w"], np.float32)                 # [n_flat + A, fc1]
    fc1 = w4.shape[1]
    # Reorder fc4 rows from PyTorch NCHW flatten order (c, oy, ox) to per-oy blocks of (ox, c)
    # so it consumes the conv activation's native [B*Ho, Wo*C] layout.
    w4x = (w4[:n_flat]
           .reshape(Co3, Ho3, Wo3, fc1)
           .transpose(1, 2, 0, 3)
           .reshape(Ho3, Wo3 * Co3, fc1))
    prep["w4x"] = jnp.asarray(w4x, jnp.bfloat16)
    prep["w4a"] = jnp.asarray(w4[n_flat:], jnp.bfloat16)
    prep["b4"] = jnp.asarray(params["fc4_b"], jnp.float32).reshape(1, -1)
    prep["w5"] = jnp.asarray(params["fc5_w"], jnp.bfloat16)
    prep["b5"] = jnp.asarray(params["fc5_b"], jnp.float32).reshape(1, -1)
    prep["w6"] = jnp.asarray(params["fc6_w"], jnp.bfloat16)
    prep["b6"] = jnp.asarray(params["fc6_b"], jnp.float32).reshape(1, -1)
    return prep


# ----------------------------------------------------------------------------
# Pure-JAX f32 reference (for a loose numerical sanity check)
# ----------------------------------------------------------------------------
def reference_forward(params, state_nchw, action):
    hi = jax.lax.Precision.HIGHEST
    x = jnp.transpose(state_nchw.astype(jnp.float32), (0, 2, 3, 1))
    for idx, stride in ((1, 2), (2, 2), (3, 2)):
        y = jax.lax.conv_general_dilated(
            x, params[f"conv{idx}_w"], window_strides=(stride, stride), padding="VALID",
            dimension_numbers=("NHWC", "HWIO", "NHWC"), precision=hi)
        y = jnp.maximum(y + params[f"conv{idx}_b"], 0.0)
        scale, shift = _bn_scale_shift(params, idx)
        x = y * scale + shift
    B = x.shape[0]
    xs = jnp.transpose(x, (0, 3, 1, 2)).reshape(B, -1)           # PyTorch NCHW flatten
    h = jnp.concatenate([xs, action.astype(jnp.float32)], axis=1)
    h = jnp.maximum(jnp.dot(h, params["fc4_w"], precision=hi) + params["fc4_b"], 0.0)
    h = jnp.maximum(jnp.dot(h, params["fc5_w"], precision=hi) + params["fc5_b"], 0.0)
    return jnp.dot(h, params["fc6_w"], precision=hi) + params["fc6_b"]


# ----------------------------------------------------------------------------
if __name__ == "__main__":
    # Spatial size must be 80x80: the module's dense4 hard-codes 8*8*24 input features,
    # which is what the conv stack produces from 80x80.
    batch, state_size, action_size = 2, 4, 4
    H = W = 80

    key = jax.random.PRNGKey(0)
    k_params, k_state, k_action = jax.random.split(key, 3)

    params = init_params(k_params, state_size, action_size)
    state = jax.random.normal(k_state, (batch, state_size, H, W), jnp.float32)
    action = jax.random.normal(k_action, (batch, action_size), jnp.float32)

    prep = prepare_params(params, batch, H, W)

    fwd = jax.jit(critic_d4pg_forward)
    out = jax.block_until_ready(fwd(prep, state, action))

    assert out.shape == (batch, 51), out.shape
    assert bool(jnp.all(jnp.isfinite(out)))

    # Loose check against the f32 reference (kernel uses bf16 MXU inputs).
    ref = reference_forward(params, state, action)
    err = float(jnp.max(jnp.abs(out - ref)))
    assert err < 0.15, f"kernel/reference mismatch: max abs err = {err}"

    print("KERNEL_OK")
</pallas_src>

<mosaic_0001>
module attributes {stable_mosaic.version = 11 : i64} {
  func.func @_critic_forward_kernel(%arg0: memref<160x320xbf16, #tpu.memory_space<vmem>>, %arg1: memref<2x4xf32, #tpu.memory_space<vmem>>, %arg2: memref<8x74x160xbf16, #tpu.memory_space<vmem>>, %arg3: memref<8x320x222xbf16, #tpu.memory_space<vmem>>, %arg4: memref<3x222xf32, #tpu.memory_space<vmem>>, %arg5: memref<5x34x74xbf16, #tpu.memory_space<vmem>>, %arg6: memref<5x222x204xbf16, #tpu.memory_space<vmem>>, %arg7: memref<3x204xf32, #tpu.memory_space<vmem>>, %arg8: memref<3x16x34xbf16, #tpu.memory_space<vmem>>, %arg9: memref<3x204x192xbf16, #tpu.memory_space<vmem>>, %arg10: memref<3x192xf32, #tpu.memory_space<vmem>>, %arg11: memref<8x192x128xbf16, #tpu.memory_space<vmem>>, %arg12: memref<4x128xbf16, #tpu.memory_space<vmem>>, %arg13: memref<1x128xf32, #tpu.memory_space<vmem>>, %arg14: memref<128x128xbf16, #tpu.memory_space<vmem>>, %arg15: memref<1x128xf32, #tpu.memory_space<vmem>>, %arg16: memref<128x51xbf16, #tpu.memory_space<vmem>>, %arg17: memref<1x51xf32, #tpu.memory_space<vmem>>, %arg18: memref<2x51xf32, #tpu.memory_space<vmem>>) attributes {dimension_semantics = [], scalar_prefetch = 0 : i64, scratch_operands = 0 : i64, tpu.core_type = #tpu.core_type<tc>} {
    %c0 = arith.constant 0 : index
    %c0_0 = arith.constant 0 : index
    %0 = vector.load %arg0[%c0, %c0_0] : memref<160x320xbf16, #tpu.memory_space<vmem>>, vector<160x320xbf16>
    %cst = arith.constant 0.000000e+00 : f32
    %1 = vector.broadcast %cst : f32 to vector<74x222xf32>
    %c0_1 = arith.constant 0 : index
    %c0_2 = arith.constant 0 : index
    %c0_3 = arith.constant 0 : index
    %2 = vector.load %arg2[%c0_1, %c0_2, %c0_3] : memref<8x74x160xbf16, #tpu.memory_space<vmem>>, vector<1x74x160xbf16>
    %3 = vector.shape_cast %2 : vector<1x74x160xbf16> to vector<74x160xbf16>
    %cst_4 = arith.constant dense<0.000000e+00> : vector<74x320xf32>
    %4 = tpu.matmul %3, %0, %cst_4 {dimension_numbers = #tpu.dot_dimension_numbers<[1], [0], [0], [1], [0, 0, 1, 1], [], []>} : vector<74x160xbf16>, vector<160x320xbf16>, vector<74x320xf32> -> vector<74x320xf32>
    %5 = arith.truncf %4 : vector<74x320xf32> to vector<74x320xbf16>
    %c0_5 = arith.constant 0 : index
    %c0_6 = arith.constant 0 : index
    %c0_7 = arith.constant 0 : index
    %6 = vector.load %arg3[%c0_5, %c0_6, %c0_7] : memref<8x320x222xbf16, #tpu.memory_space<vmem>>, vector<1x320x222xbf16>
    %7 = vector.shape_cast %6 : vector<1x320x222xbf16> to vector<320x222xbf16>
    %cst_8 = arith.constant dense<0.000000e+00> : vector<74x222xf32>
    %8 = tpu.matmul %5, %7, %cst_8 {dimension_numbers = #tpu.dot_dimension_numbers<[1], [0], [0], [1], [0, 0, 1, 1], [], []>} : vector<74x320xbf16>, vector<320x222xbf16>, vector<74x222xf32> -> vector<74x222xf32>
    %9 = arith.addf %1, %8 : vector<74x222xf32>
    %c1 = arith.constant 1 : index
    %c0_9 = arith.constant 0 : index
    %c0_10 = arith.constant 0 : index
    %10 = vector.load %arg2[%c1, %c0_9, %c0_10] : memref<8x74x160xbf16, #tpu.memory_space<vmem>>, vector<1x74x160xbf16>
    %11 = vector.shape_cast %10 : vector<1x74x160xbf16> to vector<74x160xbf16>
    %cst_11 = arith.constant dense<0.000000e+00> : vector<74x320xf32>
    %12 = tpu.matmul %11, %0, %cst_11 {dimension_numbers = #tpu.dot_dimension_numbers<[1], [0], [0], [1], [0, 0, 1, 1], [], []>} : vector<74x160xbf16>, vector<160x320xbf16>, vector<74x320xf32> -> vector<74x320xf32>
    %13 = arith.truncf %12 : vector<74x320xf32> to vector<74x320xbf16>
    %c1_12 = arith.constant 1 : index
    %c0_13 = arith.constant 0 : index
    %c0_14 = arith.constant 0 : index
    %14 = vector.load %arg3[%c1_12, %c0_13, %c0_14] : memref<8x320x222xbf16, #tpu.memory_space<vmem>>, vector<1x320x222xbf16>
    %15 = vector.shape_cast %14 : vector<1x320x222xbf16> to vector<320x222xbf16>
    %cst_15 = arith.constant dense<0.000000e+00> : vector<74x222xf32>
    %16 = tpu.matmul %13, %15, %cst_15 {dimension_numbers = #tpu.dot_dimension_numbers<[1], [0], [0], [1], [0, 0, 1, 1], [], []>} : vector<74x320xbf16>, vector<320x222xbf16>, vector<74x222xf32> -> vector<74x222xf32>
    %17 = arith.addf %9, %16 : vector<74x222xf32>
    %c2 = arith.constant 2 : index
    %c0_16 = arith.constant 0 : index
    %c0_17 = arith.constant 0 : index
    %18 = vector.load %arg2[%c2, %c0_16, %c0_17] : memref<8x74x160xbf16, #tpu.memory_space<vmem>>, vector<1x74x160xbf16>
    %19 = vector.shape_cast %18 : vector<1x74x160xbf16> to vector<74x160xbf16>
    %cst_18 = arith.constant dense<0.000000e+00> : vector<74x320xf32>
    %20 = tpu.matmul %19, %0, %cst_18 {dimension_numbers = #tpu.dot_dimension_numbers<[1], [0], [0], [1], [0, 0, 1, 1], [], []>} : vector<74x160xbf16>, vector<160x320xbf16>, vector<74x320xf32> -> vector<74x320xf32>
    %21 = arith.truncf %20 : vector<74x320xf32> to vector<74x320xbf16>
    %c2_19 = arith.constant 2 : index
    %c0_20 = arith.constant 0 : index
    %c0_21 = arith.constant 0 : index
    %22 = vector.load %arg3[%c2_19, %c0_20, %c0_21] : memref<8x320x222xbf16, #tpu.memory_space<vmem>>, vector<1x320x222xbf16>
    %23 = vector.shape_cast %22 : vector<1x320x222xbf16> to vector<320x222xbf16>
    %cst_22 = arith.constant dense<0.000000e+00> : vector<74x222xf32>
    %24 = tpu.matmul %21, %23, %cst_22 {dimension_numbers = #tpu.dot_dimension_numbers<[1], [0], [0], [1], [0, 0, 1, 1], [], []>} : vector<74x320xbf16>, vector<320x222xbf16>, vector<74x222xf32> -> vector<74x222xf32>
    %25 = arith.addf %17, %24 : vector<74x222xf32>
    %c3 = arith.constant 3 : index
    %c0_23 = arith.constant 0 : index
    %c0_24 = arith.constant 0 : index
    %26 = vector.load %arg2[%c3, %c0_23, %c0_24] : memref<8x74x160xbf16, #tpu.memory_space<vmem>>, vector<1x74x160xbf16>
    %27 = vector.shape_cast %26 : vector<1x74x160xbf16> to vector<74x160xbf16>
    %cst_25 = arith.constant dense<0.000000e+00> : vector<74x320xf32>
    %28 = tpu.matmul %27, %0, %cst_25 {dimension_numbers = #tpu.dot_dimension_numbers<[1], [0], [0], [1], [0, 0, 1, 1], [], []>} : vector<74x160xbf16>, vector<160x320xbf16>, vector<74x320xf32> -> vector<74x320xf32>
    %29 = arith.truncf %28 : vector<74x320xf32> to vector<74x320xbf16>
    %c3_26 = arith.constant 3 : index
    %c0_27 = arith.constant 0 : index
    %c0_28 = arith.constant 0 : index
    %30 = vector.load %arg3[%c3_26, %c0_27, %c0_28] : memref<8x320x222xbf16, #tpu.memory_space<vmem>>, vector<1x320x222xbf16>
    %31 = vector.shape_cast %30 : vector<1x320x222xbf16> to vector<320x222xbf16>
    %cst_29 = arith.constant dense<0.000000e+00> : vector<74x222xf32>
    %32 = tpu.matmul %29, %31, %cst_29 {dimension_numbers = #tpu.dot_dimension_numbers<[1], [0], [0], [1], [0, 0, 1, 1], [], []>} : vector<74x320xbf16>, vector<320x222xbf16>, vector<74x222xf32> -> vector<74x222xf32>
    %33 = arith.addf %25, %32 : vector<74x222xf32>
    %c4 = arith.constant 4 : index
    %c0_30 = arith.constant 0 : index
    %c0_31 = arith.constant 0 : index
    %34 = vector.load %arg2[%c4, %c0_30, %c0_31] : memref<8x74x160xbf16, #tpu.memory_space<vmem>>, vector<1x74x160xbf16>
    %35 = vector.shape_cast %34 : vector<1x74x160xbf16> to vector<74x160xbf16>
    %cst_32 = arith.constant dense<0.000000e+00> : vector<74x320xf32>
    %36 = tpu.matmul %35, %0, %cst_32 {dimension_numbers = #tpu.dot_dimension_numbers<[1], [0], [0], [1], [0, 0, 1, 1], [], []>} : vector<74x160xbf16>, vector<160x320xbf16>, vector<74x320xf32> -> vector<74x320xf32>
    %37 = arith.truncf %36 : vector<74x320xf32> to vector<74x320xbf16>
    %c4_33 = arith.constant 4 : index
    %c0_34 = arith.constant 0 : index
    %c0_35 = arith.constant 0 : index
    %38 = vector.load %arg3[%c4_33, %c0_34, %c0_35] : memref<8x320x222xbf16, #tpu.memory_space<vmem>>, vector<1x320x222xbf16>
    %39 = vector.shape_cast %38 : vector<1x320x222xbf16> to vector<320x222xbf16>
    %cst_36 = arith.constant dense<0.000000e+00> : vector<74x222xf32>
    %40 = tpu.matmul %37, %39, %cst_36 {dimension_numbers = #tpu.dot_dimension_numbers<[1], [0], [0], [1], [0, 0, 1, 1], [], []>} : vector<74x320xbf16>, vector<320x222xbf16>, vector<74x222xf32> -> vector<74x222xf32>
    %41 = arith.addf %33, %40 : vector<74x222xf32>
    %c5 = arith.constant 5 : index
    %c0_37 = arith.constant 0 : index
    %c0_38 = arith.constant 0 : index
    %42 = vector.load %arg2[%c5, %c0_37, %c0_38] : memref<8x74x160xbf16, #tpu.memory_space<vmem>>, vector<1x74x160xbf16>
    %43 = vector.shape_cast %42 : vector<1x74x160xbf16> to vector<74x160xbf16>
    %cst_39 = arith.constant dense<0.000000e+00> : vector<74x320xf32>
    %44 = tpu.matmul %43, %0, %cst_39 {dimension_numbers = #tpu.dot_dimension_numbers<[1], [0], [0], [1], [0, 0, 1, 1], [], []>} : vector<74x160xbf16>, vector<160x320xbf16>, vector<74x320xf32> -> vector<74x320xf32>
    %45 = arith.truncf %44 : vector<74x320xf32> to vector<74x320xbf16>
    %c5_40 = arith.constant 5 : index
    %c0_41 = arith.constant 0 : index
    %c0_42 = arith.constant 0 : index
    %46 = vector.load %arg3[%c5_40, %c0_41, %c0_42] : memref<8x320x222xbf16, #tpu.memory_space<vmem>>, vector<1x320x222xbf16>
    %47 = vector.shape_cast %46 : vector<1x320x222xbf16> to vector<320x222xbf16>
    %cst_43 = arith.constant dense<0.000000e+00> : vector<74x222xf32>
    %48 = tpu.matmul %45, %47, %cst_43 {dimension_numbers = #tpu.dot_dimension_numbers<[1], [0], [0], [1], [0, 0, 1, 1], [], []>} : vector<74x320xbf16>, vector<320x222xbf16>, vector<74x222xf32> -> vector<74x222xf32>
    %49 = arith.addf %41, %48 : vector<74x222xf32>
    %c6 = arith.constant 6 : index
    %c0_44 = arith.constant 0 : index
    %c0_45 = arith.constant 0 : index
    %50 = vector.load %arg2[%c6, %c0_44, %c0_45] : memref<8x74x160xbf16, #tpu.memory_space<vmem>>, vector<1x74x160xbf16>
    %51 = vector.shape_cast %50 : vector<1x74x160xbf16> to vector<74x160xbf16>
    %cst_46 = arith.constant dense<0.000000e+00> : vector<74x320xf32>
    %52 = tpu.matmul %51, %0, %cst_46 {dimension_numbers = #tpu.dot_dimension_numbers<[1], [0], [0], [1], [0, 0, 1, 1], [], []>} : vector<74x160xbf16>, vector<160x320xbf16>, vector<74x320xf32> -> vector<74x320xf32>
    %53 = arith.truncf %52 : vector<74x320xf32> to vector<74x320xbf16>
    %c6_47 = arith.constant 6 : index
    %c0_48 = arith.constant 0 : index
    %c0_49 = arith.constant 0 : index
    %54 = vector.load %arg3[%c6_47, %c0_48, %c0_49] : memref<8x320x222xbf16, #tpu.memory_space<vmem>>, vector<1x320x222xbf16>
    %55 = vector.shape_cast %54 : vector<1x320x222xbf16> to vector<320x222xbf16>
    %cst_50 = arith.constant dense<0.000000e+00> : vector<74x222xf32>
    %56 = tpu.matmul %53, %55, %cst_50 {dimension_numbers = #tpu.dot_dimension_numbers<[1], [0], [0], [1], [0, 0, 1, 1], [], []>} : vector<74x320xbf16>, vector<320x222xbf16>, vector<74x222xf32> -> vector<74x222xf32>
    %57 = arith.addf %49, %56 : vector<74x222xf32>
    %c7 = arith.constant 7 : index
    %c0_51 = arith.constant 0 : index
    %c0_52 = arith.constant 0 : index
    %58 = vector.load %arg2[%c7, %c0_51, %c0_52] : memref<8x74x160xbf16, #tpu.memory_space<vmem>>, vector<1x74x160xbf16>
    %59 = vector.shape_cast %58 : vector<1x74x160xbf16> to vector<74x160xbf16>
    %cst_53 = arith.constant dense<0.000000e+00> : vector<74x320xf32>
    %60 = tpu.matmul %59, %0, %cst_53 {dimension_numbers = #tpu.dot_dimension_numbers<[1], [0], [0], [1], [0, 0, 1, 1], [], []>} : vector<74x160xbf16>, vector<160x320xbf16>, vector<74x320xf32> -> vector<74x320xf32>
    %61 = arith.truncf %60 : vector<74x320xf32> to vector<74x320xbf16>
    %c7_54 = arith.constant 7 : index
    %c0_55 = arith.constant 0 : index
    %c0_56 = arith.constant 0 : index
    %62 = vector.load %arg3[%c7_54, %c0_55, %c0_56] : memref<8x320x222xbf16, #tpu.memory_space<vmem>>, vector<1x320x222xbf16>
    %63 = vector.shape_cast %62 : vector<1x320x222xbf16> to vector<320x222xbf16>
    %cst_57 = arith.constant dense<0.000000e+00> : vector<74x222xf32>
    %64 = tpu.matmul %61, %63, %cst_57 {dimension_numbers = #tpu.dot_dimension_numbers<[1], [0], [0], [1], [0, 0, 1, 1], [], []>} : vector<74x320xbf16>, vector<320x222xbf16>, vector<74x222xf32> -> vector<74x222xf32>
    %65 = arith.addf %57, %64 : vector<74x222xf32>
    %c0_58 = arith.constant 0 : index
    %c0_59 = arith.constant 0 : index
    %66 = vector.load %arg4[%c0_58, %c0_59] : memref<3x222xf32, #tpu.memory_space<vmem>>, vector<3x222xf32>
    %67 = vector.extract_strided_slice %66 {offsets = [0, 0], sizes = [1, 222], strides = [1, 1]} : vector<3x222xf32> to vector<1x222xf32>
    %68 = vector.broadcast %67 : vector<1x222xf32> to vector<74x222xf32>
    %69 = arith.addf %65, %68 : vector<74x222xf32>
    %cst_60 = arith.constant 0.000000e+00 : f32
    %70 = vector.broadcast %cst_60 : f32 to vector<74x222xf32>
    %71 = arith.maximumf %69, %70 : vector<74x222xf32>
    %72 = vector.extract_strided_slice %66 {offsets = [1, 0], sizes = [1, 222], strides = [1, 1]} : vector<3x222xf32> to vector<1x222xf32>
    %73 = vector.broadcast %72 : vector<1x222xf32> to vector<74x222xf32>
    %74 = arith.mulf %71, %73 : vector<74x222xf32>
    %75 = vector.extract_strided_slice %66 {offsets = [2, 0], sizes = [1, 222], strides = [1, 1]} : vector<3x222xf32> to vector<1x222xf32>
    %76 = vector.broadcast %75 : vector<1x222xf32> to vector<74x222xf32>
    %77 = arith.addf %74, %76 : vector<74x222xf32>
    %78 = arith.truncf %77 : vector<74x222xf32> to vector<74x222xbf16>
    %cst_61 = arith.constant 0.000000e+00 : f32
    %79 = vector.broadcast %cst_61 : f32 to vector<34x204xf32>
    %c0_62 = arith.constant 0 : index
    %c0_63 = arith.constant 0 : index
    %c0_64 = arith.constant 0 : index
    %80 = vector.load %arg5[%c0_62, %c0_63, %c0_64] : memref<5x34x74xbf16, #tpu.memory_space<vmem>>, vector<1x34x74xbf16>
    %81 = vector.shape_cast %80 : vector<1x34x74xbf16> to vector<34x74xbf16>
    %cst_65 = arith.constant dense<0.000000e+00> : vector<34x222xf32>
    %82 = tpu.matmul %81, %78, %cst_65 {dimension_numbers = #tpu.dot_dimension_numbers<[1], [0], [0], [1], [0, 0, 1, 1], [], []>} : vector<34x74xbf16>, vector<74x222xbf16>, vector<34x222xf32> -> vector<34x222xf32>
    %83 = arith.truncf %82 : vector<34x222xf32> to vector<34x222xbf16>
    %c0_66 = arith.constant 0 : index
    %c0_67 = arith.constant 0 : index
    %c0_68 = arith.constant 0 : index
    %84 = vector.load %arg6[%c0_66, %c0_67, %c0_68] : memref<5x222x204xbf16, #tpu.memory_space<vmem>>, vector<1x222x204xbf16>
    %85 = vector.shape_cast %84 : vector<1x222x204xbf16> to vector<222x204xbf16>
    %cst_69 = arith.constant dense<0.000000e+00> : vector<34x204xf32>
    %86 = tpu.matmul %83, %85, %cst_69 {dimension_numbers = #tpu.dot_dimension_numbers<[1], [0], [0], [1], [0, 0, 1, 1], [], []>} : vector<34x222xbf16>, vector<222x204xbf16>, vector<34x204xf32> -> vector<34x204xf32>
    %87 = arith.addf %79, %86 : vector<34x204xf32>
    %c1_70 = arith.constant 1 : index
    %c0_71 = arith.constant 0 : index
    %c0_72 = arith.constant 0 : index
    %88 = vector.load %arg5[%c1_70, %c0_71, %c0_72] : memref<5x34x74xbf16, #tpu.memory_space<vmem>>, vector<1x34x74xbf16>
    %89 = vector.shape_cast %88 : vector<1x34x74xbf16> to vector<34x74xbf16>
    %cst_73 = arith.constant dense<0.000000e+00> : vector<34x222xf32>
    %90 = tpu.matmul %89, %78, %cst_73 {dimension_numbers = #tpu.dot_dimension_numbers<[1], [0], [0], [1], [0, 0, 1, 1], [], []>} : vector<34x74xbf16>, vector<74x222xbf16>, vector<34x222xf32> -> vector<34x222xf32>
    %91 = arith.truncf %90 : vector<34x222xf32> to vector<34x222xbf16>
    %c1_74 = arith.constant 1 : index
    %c0_75 = arith.constant 0 : index
    %c0_76 = arith.constant 0 : index
    %92 = vector.load %arg6[%c1_74, %c0_75, %c0_76] : memref<5x222x204xbf16, #tpu.memory_space<vmem>>, vector<1x222x204xbf16>
    %93 = vector.shape_cast %92 : vector<1x222x204xbf16> to vector<222x204xbf16>
    %cst_77 = arith.constant dense<0.000000e+00> : vector<34x204xf32>
    %94 = tpu.matmul %91, %93, %cst_77 {dimension_numbers = #tpu.dot_dimension_numbers<[1], [0], [0], [1], [0, 0, 1, 1], [], []>} : vector<34x222xbf16>, vector<222x204xbf16>, vector<34x204xf32> -> vector<34x204xf32>
    %95 = arith.addf %87, %94 : vector<34x204xf32>
    %c2_78 = arith.constant 2 : index
    %c0_79 = arith.constant 0 : index
    %c0_80 = arith.constant 0 : index
    %96 = vector.load %arg5[%c2_78, %c0_79, %c0_80] : memref<5x34x74xbf16, #tpu.memory_space<vmem>>, vector<1x34x74xbf16>
    %97 = vector.shape_cast %96 : vector<1x34x74xbf16> to vector<34x74xbf16>
    %cst_81 = arith.constant dense<0.000000e+00> : vector<34x222xf32>
    %98 = tpu.matmul %97, %78, %cst_81 {dimension_numbers = #tpu.dot_dimension_numbers<[1], [0], [0], [1], [0, 0, 1, 1], [], []>} : vector<34x74xbf16>, vector<74x222xbf16>, vector<34x222xf32> -> vector<34x222xf32>
    %99 = arith.truncf %98 : vector<34x222xf32> to vector<34x222xbf16>
    %c2_82 = arith.constant 2 : index
    %c0_83 = arith.constant 0 : index
    %c0_84 = arith.constant 0 : index
    %100 = vector.load %arg6[%c2_82, %c0_83, %c0_84] : memref<5x222x204xbf16, #tpu.memory_space<vmem>>, vector<1x222x204xbf16>
    %101 = vector.shape_cast %100 : vector<1x222x204xbf16> to vector<222x204xbf16>
    %cst_85 = arith.constant dense<0.000000e+00> : vector<34x204xf32>
    %102 = tpu.matmul %99, %101, %cst_85 {dimension_numbers = #tpu.dot_dimension_numbers<[1], [0], [0], [1], [0, 0, 1, 1], [], []>} : vector<34x222xbf16>, vector<222x204xbf16>, vector<34x204xf32> -> vector<34x204xf32>
    %103 = arith.addf %95, %102 : vector<34x204xf32>
    %c3_86 = arith.constant 3 : index
    %c0_87 = arith.constant 0 : index
    %c0_88 = arith.constant 0 : index
    %104 = vector.load %arg5[%c3_86, %c0_87, %c0_88] : memref<5x34x74xbf16, #tpu.memory_space<vmem>>, vector<1x34x74xbf16>
    %105 = vector.shape_cast %104 : vector<1x34x74xbf16> to vector<34x74xbf16>
    %cst_89 = arith.constant dense<0.000000e+00> : vector<34x222xf32>
    %106 = tpu.matmul %105, %78, %cst_89 {dimension_numbers = #tpu.dot_dimension_numbers<[1], [0], [0], [1], [0, 0, 1, 1], [], []>} : vector<34x74xbf16>, vector<74x222xbf16>, vector<34x222xf32> -> vector<34x222xf32>
    %107 = arith.truncf %106 : vector<34x222xf32> to vector<34x222xbf16>
    %c3_90 = arith.constant 3 : index
    %c0_91 = arith.constant 0 : index
    %c0_92 = arith.constant 0 : index
    %108 = vector.load %arg6[%c3_90, %c0_91, %c0_92] : memref<5x222x204xbf16, #tpu.memory_space<vmem>>, vector<1x222x204xbf16>
    %109 = vector.shape_cast %108 : vector<1x222x204xbf16> to vector<222x204xbf16>
    %cst_93 = arith.constant dense<0.000000e+00> : vector<34x204xf32>
    %110 = tpu.matmul %107, %109, %cst_93 {dimension_numbers = #tpu.dot_dimension_numbers<[1], [0], [0], [1], [0, 0, 1, 1], [], []>} : vector<34x222xbf16>, vector<222x204xbf16>, vector<34x204xf32> -> vector<34x204xf32>
    %111 = arith.addf %103, %110 : vector<34x204xf32>
    %c4_94 = arith.constant 4 : index
    %c0_95 = arith.constant 0 : index
    %c0_96 = arith.constant 0 : index
    %112 = vector.load %arg5[%c4_94, %c0_95, %c0_96] : memref<5x34x74xbf16, #tpu.memory_space<vmem>>, vector<1x34x74xbf16>
    %113 = vector.shape_cast %112 : vector<1x34x74xbf16> to vector<34x74xbf16>
    %cst_97 = arith.constant dense<0.000000e+00> : vector<34x222xf32>
    %114 = tpu.matmul %113, %78, %cst_97 {dimension_numbers = #tpu.dot_dimension_numbers<[1], [0], [0], [1], [0, 0, 1, 1], [], []>} : vector<34x74xbf16>, vector<74x222xbf16>, vector<34x222xf32> -> vector<34x222xf32>
    %115 = arith.truncf %114 : vector<34x222xf32> to vector<34x222xbf16>
    %c4_98 = arith.constant 4 : index
    %c0_99 = arith.constant 0 : index
    %c0_100 = arith.constant 0 : index
    %116 = vector.load %arg6[%c4_98, %c0_99, %c0_100] : memref<5x222x204xbf16, #tpu.memory_space<vmem>>, vector<1x222x204xbf16>
    %117 = vector.shape_cast %116 : vector<1x222x204xbf16> to vector<222x204xbf16>
    %cst_101 = arith.constant dense<0.000000e+00> : vector<34x204xf32>
    %118 = tpu.matmul %115, %117, %cst_101 {dimension_numbers = #tpu.dot_dimension_numbers<[1], [0], [0], [1], [0, 0, 1, 1], [], []>} : vector<34x222xbf16>, vector<222x204xbf16>, vector<34x204xf32> -> vector<34x204xf32>
    %119 = arith.addf %111, %118 : vector<34x204xf32>
    %c0_102 = arith.constant 0 : index
    %c0_103 = arith.constant 0 : index
    %120 = vector.load %arg7[%c0_102, %c0_103] : memref<3x204xf32, #tpu.memory_space<vmem>>, vector<3x204xf32>
    %121 = vector.extract_strided_slice %120 {offsets = [0, 0], sizes = [1, 204], strides = [1, 1]} : vector<3x204xf32> to vector<1x204xf32>
    %122 = vector.broadcast %121 : vector<1x204xf32> to vector<34x204xf32>
    %123 = arith.addf %119, %122 : vector<34x204xf32>
    %cst_104 = arith.constant 0.000000e+00 : f32
    %124 = vector.broadcast %cst_104 : f32 to vector<34x204xf32>
    %125 = arith.maximumf %123, %124 : vector<34x204xf32>
    %126 = vector.extract_strided_slice %120 {offsets = [1, 0], sizes = [1, 204], strides = [1, 1]} : vector<3x204xf32> to vector<1x204xf32>
    %127 = vector.broadcast %126 : vector<1x204xf32> to vector<34x204xf32>
    %128 = arith.mulf %125, %127 : vector<34x204xf32>
    %129 = vector.extract_strided_slice %120 {offsets = [2, 0], sizes = [1, 204], strides = [1, 1]} : vector<3x204xf32> to vector<1x204xf32>
    %130 = vector.broadcast %129 : vector<1x204xf32> to vector<34x204xf32>
    %131 = arith.addf %128, %130 : vector<34x204xf32>
    %132 = arith.truncf %131 : vector<34x204xf32> to vector<34x204xbf16>
    %cst_105 = arith.constant 0.000000e+00 : f32
    %133 = vector.broadcast %cst_105 : f32 to vector<16x192xf32>
    %c0_106 = arith.constant 0 : index
    %c0_107 = arith.constant 0 : index
    %c0_108 = arith.constant 0 : index
    %134 = vector.load %arg8[%c0_106, %c0_107, %c0_108] : memref<3x16x34xbf16, #tpu.memory_space<vmem>>, vector<1x16x34xbf16>
    %135 = vector.shape_cast %134 : vector<1x16x34xbf16> to vector<16x34xbf16>
    %cst_109 = arith.constant dense<0.000000e+00> : vector<16x204xf32>
    %136 = tpu.matmul %135, %132, %cst_109 {dimension_numbers = #tpu.dot_dimension_numbers<[1], [0], [0], [1], [0, 0, 1, 1], [], []>} : vector<16x34xbf16>, vector<34x204xbf16>, vector<16x204xf32> -> vector<16x204xf32>
    %137 = arith.truncf %136 : vector<16x204xf32> to vector<16x204xbf16>
    %c0_110 = arith.constant 0 : index
    %c0_111 = arith.constant 0 : index
    %c0_112 = arith.constant 0 : index
    %138 = vector.load %arg9[%c0_110, %c0_111, %c0_112] : memref<3x204x192xbf16, #tpu.memory_space<vmem>>, vector<1x204x192xbf16>
    %139 = vector.shape_cast %138 : vector<1x204x192xbf16> to vector<204x192xbf16>
    %cst_113 = arith.constant dense<0.000000e+00> : vector<16x192xf32>
    %140 = tpu.matmul %137, %139, %cst_113 {dimension_numbers = #tpu.dot_dimension_numbers<[1], [0], [0], [1], [0, 0, 1, 1], [], []>} : vector<16x204xbf16>, vector<204x192xbf16>, vector<16x192xf32> -> vector<16x192xf32>
    %141 = arith.addf %133, %140 : vector<16x192xf32>
    %c1_114 = arith.constant 1 : index
    %c0_115 = arith.constant 0 : index
    %c0_116 = arith.constant 0 : index
    %142 = vector.load %arg8[%c1_114, %c0_115, %c0_116] : memref<3x16x34xbf16, #tpu.memory_space<vmem>>, vector<1x16x34xbf16>
    %143 = vector.shape_cast %142 : vector<1x16x34xbf16> to vector<16x34xbf16>
    %cst_117 = arith.constant dense<0.000000e+00> : vector<16x204xf32>
    %144 = tpu.matmul %143, %132, %cst_117 {dimension_numbers = #tpu.dot_dimension_numbers<[1], [0], [0], [1], [0, 0, 1, 1], [], []>} : vector<16x34xbf16>, vector<34x204xbf16>, vector<16x204xf32> -> vector<16x204xf32>
    %145 = arith.truncf %144 : vector<16x204xf32> to vector<16x204xbf16>
    %c1_118 = arith.constant 1 : index
    %c0_119 = arith.constant 0 : index
    %c0_120 = arith.constant 0 : index
    %146 = vector.load %arg9[%c1_118, %c0_119, %c0_120] : memref<3x204x192xbf16, #tpu.memory_space<vmem>>, vector<1x204x192xbf16>
    %147 = vector.shape_cast %146 : vector<1x204x192xbf16> to vector<204x192xbf16>
    %cst_121 = arith.constant dense<0.000000e+00> : vector<16x192xf32>
    %148 = tpu.matmul %145, %147, %cst_121 {dimension_numbers = #tpu.dot_dimension_numbers<[1], [0], [0], [1], [0, 0, 1, 1], [], []>} : vector<16x204xbf16>, vector<204x192xbf16>, vector<16x192xf32> -> vector<16x192xf32>
    %149 = arith.addf %141, %148 : vector<16x192xf32>
    %c2_122 = arith.constant 2 : index
    %c0_123 = arith.constant 0 : index
    %c0_124 = arith.constant 0 : index
    %150 = vector.load %arg8[%c2_122, %c0_123, %c0_124] : memref<3x16x34xbf16, #tpu.memory_space<vmem>>, vector<1x16x34xbf16>
    %151 = vector.shape_cast %150 : vector<1x16x34xbf16> to vector<16x34xbf16>
    %cst_125 = arith.constant dense<0.000000e+00> : vector<16x204xf32>
    %152 = tpu.matmul %151, %132, %cst_125 {dimension_numbers = #tpu.dot_dimension_numbers<[1], [0], [0], [1], [0, 0, 1, 1], [], []>} : vector<16x34xbf16>, vector<34x204xbf16>, vector<16x204xf32> -> vector<16x204xf32>
    %153 = arith.truncf %152 : vector<16x204xf32> to vector<16x204xbf16>
    %c2_126 = arith.constant 2 : index
    %c0_127 = arith.constant 0 : index
    %c0_128 = arith.constant 0 : index
    %154 = vector.load %arg9[%c2_126, %c0_127, %c0_128] : memref<3x204x192xbf16, #tpu.memory_space<vmem>>, vector<1x204x192xbf16>
    %155 = vector.shape_cast %154 : vector<1x204x192xbf16> to vector<204x192xbf16>
    %cst_129 = arith.constant dense<0.000000e+00> : vector<16x192xf32>
    %156 = tpu.matmul %153, %155, %cst_129 {dimension_numbers = #tpu.dot_dimension_numbers<[1], [0], [0], [1], [0, 0, 1, 1], [], []>} : vector<16x204xbf16>, vector<204x192xbf16>, vector<16x192xf32> -> vector<16x192xf32>
    %157 = arith.addf %149, %156 : vector<16x192xf32>
    %c0_130 = arith.constant 0 : index
    %c0_131 = arith.constant 0 : index
    %158 = vector.load %arg10[%c0_130, %c0_131] : memref<3x192xf32, #tpu.memory_space<vmem>>, vector<3x192xf32>
    %159 = vector.extract_strided_slice %158 {offsets = [0, 0], sizes = [1, 192], strides = [1, 1]} : vector<3x192xf32> to vector<1x192xf32>
    %160 = vector.broadcast %159 : vector<1x192xf32> to vector<16x192xf32>
    %161 = arith.addf %157, %160 : vector<16x192xf32>
    %cst_132 = arith.constant 0.000000e+00 : f32
    %162 = vector.broadcast %cst_132 : f32 to vector<16x192xf32>
    %163 = arith.maximumf %161, %162 : vector<16x192xf32>
    %164 = vector.extract_strided_slice %158 {offsets = [1, 0], sizes = [1, 192], strides = [1, 1]} : vector<3x192xf32> to vector<1x192xf32>
    %165 = vector.broadcast %164 : vector<1x192xf32> to vector<16x192xf32>
    %166 = arith.mulf %163, %165 : vector<16x192xf32>
    %167 = vector.extract_strided_slice %158 {offsets = [2, 0], sizes = [1, 192], strides = [1, 1]} : vector<3x192xf32> to vector<1x192xf32>
    %168 = vector.broadcast %167 : vector<1x192xf32> to vector<16x192xf32>
    %169 = arith.addf %166, %168 : vector<16x192xf32>
    %c0_133 = arith.constant 0 : index
    %c0_134 = arith.constant 0 : index
    %170 = vector.load %arg1[%c0_133, %c0_134] : memref<2x4xf32, #tpu.memory_space<vmem>>, vector<2x4xf32>
    %171 = arith.truncf %170 : vector<2x4xf32> to vector<2x4xbf16>
    %c0_135 = arith.constant 0 : index
    %c0_136 = arith.constant 0 : index
    %172 = vector.load %arg12[%c0_135, %c0_136] : memref<4x128xbf16, #tpu.memory_space<vmem>>, vector<4x128xbf16>
    %cst_137 = arith.constant dense<0.000000e+00> : vector<2x128xf32>
    %173 = tpu.matmul %171, %172, %cst_137 {dimension_numbers = #tpu.dot_dimension_numbers<[1], [0], [0], [1], [0, 0, 1, 1], [], []>} : vector<2x4xbf16>, vector<4x128xbf16>, vector<2x128xf32> -> vector<2x128xf32>
    %174 = vector.extract_strided_slice %173 {offsets = [0, 0], sizes = [1, 128], strides = [1, 1]} : vector<2x128xf32> to vector<1x128xf32>
    %175 = vector.extract_strided_slice %169 {offsets = [0, 0], sizes = [1, 192], strides = [1, 1]} : vector<16x192xf32> to vector<1x192xf32>
    %176 = arith.truncf %175 : vector<1x192xf32> to vector<1x192xbf16>
    %c0_138 = arith.constant 0 : index
    %c0_139 = arith.constant 0 : index
    %c0_140 = arith.constant 0 : index
    %177 = vector.load %arg11[%c0_138, %c0_139, %c0_140] : memref<8x192x128xbf16, #tpu.memory_space<vmem>>, vector<1x192x128xbf16>
    %178 = vector.shape_cast %177 : vector<1x192x128xbf16> to vector<192x128xbf16>
    %cst_141 = arith.constant dense<0.000000e+00> : vector<1x128xf32>
    %179 = tpu.matmul %176, %178, %cst_141 {dimension_numbers = #tpu.dot_dimension_numbers<[1], [0], [0], [1], [0, 0, 1, 1], [], []>} : vector<1x192xbf16>, vector<192x128xbf16>, vector<1x128xf32> -> vector<1x128xf32>
    %180 = arith.addf %174, %179 : vector<1x128xf32>
    %181 = vector.extract_strided_slice %169 {offsets = [1, 0], sizes = [1, 192], strides = [1, 1]} : vector<16x192xf32> to vector<1x192xf32>
    %182 = arith.truncf %181 : vector<1x192xf32> to vector<1x192xbf16>
    %c1_142 = arith.constant 1 : index
    %c0_143 = arith.constant 0 : index
    %c0_144 = arith.constant 0 : index
    %183 = vector.load %arg11[%c1_142, %c0_143, %c0_144] : memref<8x192x128xbf16, #tpu.memory_space<vmem>>, vector<1x192x128xbf16>
    %184 = vector.shape_cast %183 : vector<1x192x128xbf16> to vector<192x128xbf16>
    %cst_145 = arith.constant dense<0.000000e+00> : vector<1x128xf32>
    %185 = tpu.matmul %182, %184, %cst_145 {dimension_numbers = #tpu.dot_dimension_numbers<[1], [0], [0], [1], [0, 0, 1, 1], [], []>} : vector<1x192xbf16>, vector<192x128xbf16>, vector<1x128xf32> -> vector<1x128xf32>
    %186 = arith.addf %180, %185 : vector<1x128xf32>
    %187 = vector.extract_strided_slice %169 {offsets = [2, 0], sizes = [1, 192], strides = [1, 1]} : vector<16x192xf32> to vector<1x192xf32>
    %188 = arith.truncf %187 : vector<1x192xf32> to vector<1x192xbf16>
    %c2_146 = arith.constant 2 : index
    %c0_147 = arith.constant 0 : index
    %c0_148 = arith.constant 0 : index
    %189 = vector.load %arg11[%c2_146, %c0_147, %c0_148] : memref<8x192x128xbf16, #tpu.memory_space<vmem>>, vector<1x192x128xbf16>
    %190 = vector.shape_cast %189 : vector<1x192x128xbf16> to vector<192x128xbf16>
    %cst_149 = arith.constant dense<0.000000e+00> : vector<1x128xf32>
    %191 = tpu.matmul %188, %190, %cst_149 {dimension_numbers = #tpu.dot_dimension_numbers<[1], [0], [0], [1], [0, 0, 1, 1], [], []>} : vector<1x192xbf16>, vector<192x128xbf16>, vector<1x128xf32> -> vector<1x128xf32>
    %192 = arith.addf %186, %191 : vector<1x128xf32>
    %193 = vector.extract_strided_slice %169 {offsets = [3, 0], sizes = [1, 192], strides = [1, 1]} : vector<16x192xf32> to vector<1x192xf32>
    %194 = arith.truncf %193 : vector<1x192xf32> to vector<1x192xbf16>
    %c3_150 = arith.constant 3 : index
    %c0_151 = arith.constant 0 : index
    %c0_152 = arith.constant 0 : index
    %195 = vector.load %arg11[%c3_150, %c0_151, %c0_152] : memref<8x192x128xbf16, #tpu.memory_space<vmem>>, vector<1x192x128xbf16>
    %196 = vector.shape_cast %195 : vector<1x192x128xbf16> to vector<192x128xbf16>
    %cst_153 = arith.constant dense<0.000000e+00> : vector<1x128xf32>
    %197 = tpu.matmul %194, %196, %cst_153 {dimension_numbers = #tpu.dot_dimension_numbers<[1], [0], [0], [1], [0, 0, 1, 1], [], []>} : vector<1x192xbf16>, vector<192x128xbf16>, vector<1x128xf32> -> vector<1x128xf32>
    %198 = arith.addf %192, %197 : vector<1x128xf32>
    %199 = vector.extract_strided_slice %169 {offsets = [4, 0], sizes = [1, 192], strides = [1, 1]} : vector<16x192xf32> to vector<1x192xf32>
    %200 = arith.truncf %199 : vector<1x192xf32> to vector<1x192xbf16>
    %c4_154 = arith.constant 4 : index
    %c0_155 = arith.constant 0 : index
    %c0_156 = arith.constant 0 : index
    %201 = vector.load %arg11[%c4_154, %c0_155, %c0_156] : memref<8x192x128xbf16, #tpu.memory_space<vmem>>, vector<1x192x128xbf16>
    %202 = vector.shape_cast %201 : vector<1x192x128xbf16> to vector<192x128xbf16>
    %cst_157 = arith.constant dense<0.000000e+00> : vector<1x128xf32>
    %203 = tpu.matmul %200, %202, %cst_157 {dimension_numbers = #tpu.dot_dimension_numbers<[1], [0], [0], [1], [0, 0, 1, 1], [], []>} : vector<1x192xbf16>, vector<192x128xbf16>, vector<1x128xf32> -> vector<1x128xf32>
    %204 = arith.addf %198, %203 : vector<1x128xf32>
    %205 = vector.extract_strided_slice %169 {offsets = [5, 0], sizes = [1, 192], strides = [1, 1]} : vector<16x192xf32> to vector<1x192xf32>
    %206 = arith.truncf %205 : vector<1x192xf32> to vector<1x192xbf16>
    %c5_158 = arith.constant 5 : index
    %c0_159 = arith.constant 0 : index
    %c0_160 = arith.constant 0 : index
    %207 = vector.load %arg11[%c5_158, %c0_159, %c0_160] : memref<8x192x128xbf16, #tpu.memory_space<vmem>>, vector<1x192x128xbf16>
    %208 = vector.shape_cast %207 : vector<1x192x128xbf16> to vector<192x128xbf16>
    %cst_161 = arith.constant dense<0.000000e+00> : vector<1x128xf32>
    %209 = tpu.matmul %206, %208, %cst_161 {dimension_numbers = #tpu.dot_dimension_numbers<[1], [0], [0], [1], [0, 0, 1, 1], [], []>} : vector<1x192xbf16>, vector<192x128xbf16>, vector<1x128xf32> -> vector<1x128xf32>
    %210 = arith.addf %204, %209 : vector<1x128xf32>
    %211 = vector.extract_strided_slice %169 {offsets = [6, 0], sizes = [1, 192], strides = [1, 1]} : vector<16x192xf32> to vector<1x192xf32>
    %212 = arith.truncf %211 : vector<1x192xf32> to vector<1x192xbf16>
    %c6_162 = arith.constant 6 : index
    %c0_163 = arith.constant 0 : index
    %c0_164 = arith.constant 0 : index
    %213 = vector.load %arg11[%c6_162, %c0_163, %c0_164] : memref<8x192x128xbf16, #tpu.memory_space<vmem>>, vector<1x192x128xbf16>
    %214 = vector.shape_cast %213 : vector<1x192x128xbf16> to vector<192x128xbf16>
    %cst_165 = arith.constant dense<0.000000e+00> : vector<1x128xf32>
    %215 = tpu.matmul %212, %214, %cst_165 {dimension_numbers = #tpu.dot_dimension_numbers<[1], [0], [0], [1], [0, 0, 1, 1], [], []>} : vector<1x192xbf16>, vector<192x128xbf16>, vector<1x128xf32> -> vector<1x128xf32>
    %216 = arith.addf %210, %215 : vector<1x128xf32>
    %217 = vector.extract_strided_slice %169 {offsets = [7, 0], sizes = [1, 192], strides = [1, 1]} : vector<16x192xf32> to vector<1x192xf32>
    %218 = arith.truncf %217 : vector<1x192xf32> to vector<1x192xbf16>
    %c7_166 = arith.constant 7 : index
    %c0_167 = arith.constant 0 : index
    %c0_168 = arith.constant 0 : index
    %219 = vector.load %arg11[%c7_166, %c0_167, %c0_168] : memref<8x192x128xbf16, #tpu.memory_space<vmem>>, vector<1x192x128xbf16>
    %220 = vector.shape_cast %219 : vector<1x192x128xbf16> to vector<192x128xbf16>
    %cst_169 = arith.constant dense<0.000000e+00> : vector<1x128xf32>
    %221 = tpu.matmul %218, %220, %cst_169 {dimension_numbers = #tpu.dot_dimension_numbers<[1], [0], [0], [1], [0, 0, 1, 1], [], []>} : vector<1x192xbf16>, vector<192x128xbf16>, vector<1x128xf32> -> vector<1x128xf32>
    %222 = arith.addf %216, %221 : vector<1x128xf32>
    %223 = vector.extract_strided_slice %173 {offsets = [1, 0], sizes = [1, 128], strides = [1, 1]} : vector<2x128xf32> to vector<1x128xf32>
    %224 = vector.extract_strided_slice %169 {offsets = [8, 0], sizes = [1, 192], strides = [1, 1]} : vector<16x192xf32> to vector<1x192xf32>
    %225 = arith.truncf %224 : vector<1x192xf32> to vector<1x192xbf16>
    %c0_170 = arith.constant 0 : index
    %c0_171 = arith.constant 0 : index
    %c0_172 = arith.constant 0 : index
    %226 = vector.load %arg11[%c0_170, %c0_171, %c0_172] : memref<8x192x128xbf16, #tpu.memory_space<vmem>>, vector<1x192x128xbf16>
    %227 = vector.shape_cast %226 : vector<1x192x128xbf16> to vector<192x128xbf16>
    %cst_173 = arith.constant dense<0.000000e+00> : vector<1x128xf32>
    %228 = tpu.matmul %225, %227, %cst_173 {dimension_numbers = #tpu.dot_dimension_numbers<[1], [0], [0], [1], [0, 0, 1, 1], [], []>} : vector<1x192xbf16>, vector<192x128xbf16>, vector<1x128xf32> -> vector<1x128xf32>
    %229 = arith.addf %223, %228 : vector<1x128xf32>
    %230 = vector.extract_strided_slice %169 {offsets = [9, 0], sizes = [1, 192], strides = [1, 1]} : vector<16x192xf32> to vector<1x192xf32>
    %231 = arith.truncf %230 : vector<1x192xf32> to vector<1x192xbf16>
    %c1_174 = arith.constant 1 : index
    %c0_175 = arith.constant 0 : index
    %c0_176 = arith.constant 0 : index
    %232 = vector.load %arg11[%c1_174, %c0_175, %c0_176] : memref<8x192x128xbf16, #tpu.memory_space<vmem>>, vector<1x192x128xbf16>
    %233 = vector.shape_cast %232 : vector<1x192x128xbf16> to vector<192x128xbf16>
    %cst_177 = arith.constant dense<0.000000e+00> : vector<1x128xf32>
    %234 = tpu.matmul %231, %233, %cst_177 {dimension_numbers = #tpu.dot_dimension_numbers<[1], [0], [0], [1], [0, 0, 1, 1], [], []>} : vector<1x192xbf16>, vector<192x128xbf16>, vector<1x128xf32> -> vector<1x128xf32>
    %235 = arith.addf %229, %234 : vector<1x128xf32>
    %236 = vector.extract_strided_slice %169 {offsets = [10, 0], sizes = [1, 192], strides = [1, 1]} : vector<16x192xf32> to vector<1x192xf32>
    %237 = arith.truncf %236 : vector<1x192xf32> to vector<1x192xbf16>
    %c2_178 = arith.constant 2 : index
    %c0_179 = arith.constant 0 : index
    %c0_180 = arith.constant 0 : index
    %238 = vector.load %arg11[%c2_178, %c0_179, %c0_180] : memref<8x192x128xbf16, #tpu.memory_space<vmem>>, vector<1x192x128xbf16>
    %239 = vector.shape_cast %238 : vector<1x192x128xbf16> to vector<192x128xbf16>
    %cst_181 = arith.constant dense<0.000000e+00> : vector<1x128xf32>
    %240 = tpu.matmul %237, %239, %cst_181 {dimension_numbers = #tpu.dot_dimension_numbers<[1], [0], [0], [1], [0, 0, 1, 1], [], []>} : vector<1x192xbf16>, vector<192x128xbf16>, vector<1x128xf32> -> vector<1x128xf32>
    %241 = arith.addf %235, %240 : vector<1x128xf32>
    %242 = vector.extract_strided_slice %169 {offsets = [11, 0], sizes = [1, 192], strides = [1, 1]} : vector<16x192xf32> to vector<1x192xf32>
    %243 = arith.truncf %242 : vector<1x192xf32> to vector<1x192xbf16>
    %c3_182 = arith.constant 3 : index
    %c0_183 = arith.constant 0 : index
    %c0_184 = arith.constant 0 : index
    %244 = vector.load %arg11[%c3_182, %c0_183, %c0_184] : memref<8x192x128xbf16, #tpu.memory_space<vmem>>, vector<1x192x128xbf16>
    %245 = vector.shape_cast %244 : vector<1x192x128xbf16> to vector<192x128xbf16>
    %cst_185 = arith.constant dense<0.000000e+00> : vector<1x128xf32>
    %246 = tpu.matmul %243, %245, %cst_185 {dimension_numbers = #tpu.dot_dimension_numbers<[1], [0], [0], [1], [0, 0, 1, 1], [], []>} : vector<1x192xbf16>, vector<192x128xbf16>, vector<1x128xf32> -> vector<1x128xf32>
    %247 = arith.addf %241, %246 : vector<1x128xf32>
    %248 = vector.extract_strided_slice %169 {offsets = [12, 0], sizes = [1, 192], strides = [1, 1]} : vector<16x192xf32> to vector<1x192xf32>
    %249 = arith.truncf %248 : vector<1x192xf32> to vector<1x192xbf16>
    %c4_186 = arith.constant 4 : index
    %c0_187 = arith.constant 0 : index
    %c0_188 = arith.constant 0 : index
    %250 = vector.load %arg11[%c4_186, %c0_187, %c0_188] : memref<8x192x128xbf16, #tpu.memory_space<vmem>>, vector<1x192x128xbf16>
    %251 = vector.shape_cast %250 : vector<1x192x128xbf16> to vector<192x128xbf16>
    %cst_189 = arith.constant dense<0.000000e+00> : vector<1x128xf32>
    %252 = tpu.matmul %249, %251, %cst_189 {dimension_numbers = #tpu.dot_dimension_numbers<[1], [0], [0], [1], [0, 0, 1, 1], [], []>} : vector<1x192xbf16>, vector<192x128xbf16>, vector<1x128xf32> -> vector<1x128xf32>
    %253 = arith.addf %247, %252 : vector<1x128xf32>
    %254 = vector.extract_strided_slice %169 {offsets = [13, 0], sizes = [1, 192], strides = [1, 1]} : vector<16x192xf32> to vector<1x192xf32>
    %255 = arith.truncf %254 : vector<1x192xf32> to vector<1x192xbf16>
    %c5_190 = arith.constant 5 : index
    %c0_191 = arith.constant 0 : index
    %c0_192 = arith.constant 0 : index
    %256 = vector.load %arg11[%c5_190, %c0_191, %c0_192] : memref<8x192x128xbf16, #tpu.memory_space<vmem>>, vector<1x192x128xbf16>
    %257 = vector.shape_cast %256 : vector<1x192x128xbf16> to vector<192x128xbf16>
    %cst_193 = arith.constant dense<0.000000e+00> : vector<1x128xf32>
    %258 = tpu.matmul %255, %257, %cst_193 {dimension_numbers = #tpu.dot_dimension_numbers<[1], [0], [0], [1], [0, 0, 1, 1], [], []>} : vector<1x192xbf16>, vector<192x128xbf16>, vector<1x128xf32> -> vector<1x128xf32>
    %259 = arith.addf %253, %258 : vector<1x128xf32>
    %260 = vector.extract_strided_slice %169 {offsets = [14, 0], sizes = [1, 192], strides = [1, 1]} : vector<16x192xf32> to vector<1x192xf32>
    %261 = arith.truncf %260 : vector<1x192xf32> to vector<1x192xbf16>
    %c6_194 = arith.constant 6 : index
    %c0_195 = arith.constant 0 : index
    %c0_196 = arith.constant 0 : index
    %262 = vector.load %arg11[%c6_194, %c0_195, %c0_196] : memref<8x192x128xbf16, #tpu.memory_space<vmem>>, vector<1x192x128xbf16>
    %263 = vector.shape_cast %262 : vector<1x192x128xbf16> to vector<192x128xbf16>
    %cst_197 = arith.constant dense<0.000000e+00> : vector<1x128xf32>
    %264 = tpu.matmul %261, %263, %cst_197 {dimension_numbers = #tpu.dot_dimension_numbers<[1], [0], [0], [1], [0, 0, 1, 1], [], []>} : vector<1x192xbf16>, vector<192x128xbf16>, vector<1x128xf32> -> vector<1x128xf32>
    %265 = arith.addf %259, %264 : vector<1x128xf32>
    %266 = vector.extract_strided_slice %169 {offsets = [15, 0], sizes = [1, 192], strides = [1, 1]} : vector<16x192xf32> to vector<1x192xf32>
    %267 = arith.truncf %266 : vector<1x192xf32> to vector<1x192xbf16>
    %c7_198 = arith.constant 7 : index
    %c0_199 = arith.constant 0 : index
    %c0_200 = arith.constant 0 : index
    %268 = vector.load %arg11[%c7_198, %c0_199, %c0_200] : memref<8x192x128xbf16, #tpu.memory_space<vmem>>, vector<1x192x128xbf16>
    %269 = vector.shape_cast %268 : vector<1x192x128xbf16> to vector<192x128xbf16>
    %cst_201 = arith.constant dense<0.000000e+00> : vector<1x128xf32>
    %270 = tpu.matmul %267, %269, %cst_201 {dimension_numbers = #tpu.dot_dimension_numbers<[1], [0], [0], [1], [0, 0, 1, 1], [], []>} : vector<1x192xbf16>, vector<192x128xbf16>, vector<1x128xf32> -> vector<1x128xf32>
    %271 = arith.addf %265, %270 : vector<1x128xf32>
    %272 = tpu.concatenate %222, %271 in 0 : vector<1x128xf32>, vector<1x128xf32> -> vector<2x128xf32>
    %c0_202 = arith.constant 0 : index
    %c0_203 = arith.constant 0 : index
    %273 = vector.load %arg13[%c0_202, %c0_203] : memref<1x128xf32, #tpu.memory_space<vmem>>, vector<1x128xf32>
    %274 = vector.broadcast %273 : vector<1x128xf32> to vector<2x128xf32>
    %275 = arith.addf %272, %274 : vector<2x128xf32>
    %cst_204 = arith.constant 0.000000e+00 : f32
    %276 = vector.broadcast %cst_204 : f32 to vector<2x128xf32>
    %277 = arith.maximumf %275, %276 : vector<2x128xf32>
    %278 = arith.truncf %277 : vector<2x128xf32> to vector<2x128xbf16>
    %c0_205 = arith.constant 0 : index
    %c0_206 = arith.constant 0 : index
    %279 = vector.load %arg14[%c0_205, %c0_206] : memref<128x128xbf16, #tpu.memory_space<vmem>>, vector<128x128xbf16>
    %cst_207 = arith.constant dense<0.000000e+00> : vector<2x128xf32>
    %280 = tpu.matmul %278, %279, %cst_207 {dimension_numbers = #tpu.dot_dimension_numbers<[1], [0], [0], [1], [0, 0, 1, 1], [], []>} : vector<2x128xbf16>, vector<128x128xbf16>, vector<2x128xf32> -> vector<2x128xf32>
    %c0_208 = arith.constant 0 : index
    %c0_209 = arith.constant 0 : index
    %281 = vector.load %arg15[%c0_208, %c0_209] : memref<1x128xf32, #tpu.memory_space<vmem>>, vector<1x128xf32>
    %282 = vector.broadcast %281 : vector<1x128xf32> to vector<2x128xf32>
    %283 = arith.addf %280, %282 : vector<2x128xf32>
    %cst_210 = arith.constant 0.000000e+00 : f32
    %284 = vector.broadcast %cst_210 : f32 to vector<2x128xf32>
    %285 = arith.maximumf %283, %284 : vector<2x128xf32>
    %286 = arith.truncf %285 : vector<2x128xf32> to vector<2x128xbf16>
    %c0_211 = arith.constant 0 : index
    %c0_212 = arith.constant 0 : index
    %287 = vector.load %arg16[%c0_211, %c0_212] : memref<128x51xbf16, #tpu.memory_space<vmem>>, vector<128x51xbf16>
    %cst_213 = arith.constant dense<0.000000e+00> : vector<2x51xf32>
    %288 = tpu.matmul %286, %287, %cst_213 {dimension_numbers = #tpu.dot_dimension_numbers<[1], [0], [0], [1], [0, 0, 1, 1], [], []>} : vector<2x128xbf16>, vector<128x51xbf16>, vector<2x51xf32> -> vector<2x51xf32>
    %c0_214 = arith.constant 0 : index
    %c0_215 = arith.constant 0 : index
    %289 = vector.load %arg17[%c0_214, %c0_215] : memref<1x51xf32, #tpu.memory_space<vmem>>, vector<1x51xf32>
    %290 = vector.broadcast %289 : vector<1x51xf32> to vector<2x51xf32>
    %291 = arith.addf %288, %290 : vector<2x51xf32>
    %c0_216 = arith.constant 0 : index
    %c0_217 = arith.constant 0 : index
    %292 = vector.load %arg18[%c0_216, %c0_217] : memref<2x51xf32, #tpu.memory_space<vmem>>, vector<2x51xf32>
    tpu.vector_store %arg18[%c0_216, %c0_217], %291 {strides = array<i32>} : memref<2x51xf32, #tpu.memory_space<vmem>>, vector<2x51xf32>,
    return
  }
}

</mosaic_0001>

<bundles_post_ra>
// kernel: critic_d4pg_forward.1
= control target key start
LH: loop header
LB: loop body
LE: loop exit
PB: predicated region body
PF: predicated region fallthrough
CT: control target
= control target key end

     0   :  { %s18956_s0 = inlined_call_operand.vmem [shape: bf16[160,320], index: 0, kind: input, shape index: {}]   ;;  %s18957_s1 = inlined_call_operand.vmem [shape: f32[2,4], index: 1, kind: input, shape index: {}]   ;;  %s18958_s2 = inlined_call_operand.vmem [shape: bf16[8,74,160], index: 2, kind: input, shape index: {}]   ;;  %s18959_s3 = inlined_call_operand.vmem [shape: bf16[8,320,222], index: 3, kind: input, shape index: {}]   ;;  %s18960_s4 = inlined_call_operand.vmem [shape: f32[3,222], index: 4, kind: input, shape index: {}]   ;;  %s18961_s5 = inlined_call_operand.vmem [shape: bf16[5,34,74], index: 5, kind: input, shape index: {}]   ;;  %s18962_s6 = inlined_call_operand.vmem [shape: bf16[5,222,204], index: 6, kind: input, shape index: {}]   ;;  %s18963_s7 = inlined_call_operand.vmem [shape: f32[3,204], index: 7, kind: input, shape index: {}]   ;;  %s18964_s8 = inlined_call_operand.vmem [shape: bf16[3,16,34], index: 8, kind: input, shape index: {}]   ;;  %s18965_s9 = inlined_call_operand.vmem [shape: bf16[3,204,192], index: 9, kind: input, shape index: {}]   ;;  %s18966_s10 = inlined_call_operand.vmem [shape: f32[3,192], index: 10, kind: input, shape index: {}]   ;;  %s18967_s11 = inlined_call_operand.vmem [shape: bf16[8,192,128], index: 11, kind: input, shape index: {}]   ;;  %s18968_s12 = inlined_call_operand.vmem [shape: bf16[4,128], index: 12, kind: input, shape index: {}]   ;;  %s18969_s13 = inlined_call_operand.vmem [shape: f32[1,128], index: 13, kind: input, shape index: {}]   ;;  %s18970_s14 = inlined_call_operand.vmem [shape: bf16[128,128], index: 14, kind: input, shape index: {}]   ;;  %s18971_s15 = inlined_call_operand.vmem [shape: f32[1,128], index: 15, kind: input, shape index: {}]   ;;  %s18972_s16 = inlined_call_operand.vmem [shape: bf16[128,51], index: 16, kind: input, shape index: {}]   ;;  %s18973_s17 = inlined_call_operand.vmem [shape: f32[1,51], index: 17, kind: input, shape index: {}]   ;;  %s18974_s18 = inlined_call_operand.hbm [shape: f32[2,51], index: 18, kind: output, shape index: {}]  }
   0x1   :  { %19027 = sst [smem:[#allocation35_spill]] %s18956_s0 }
   0x2   :  { %19028 = sst [smem:[#allocation36_spill]] %s18957_s1 }
   0x3   :  { %19029 = sst [smem:[#allocation37_spill]] %s18958_s2 }
   0x4   :  { %s19030_s29 = sld [smem:[#allocation35_spill]]  ;;  %v18979_v2 = vmov 0   ;;  %vm316_vm0 = vcmask 261120   ;;  %s19031_s22 = sld [smem:[#allocation37_spill]]  ;;  %v12590_v42 = vld [vmem:[%s18959_s3 + $0x144] ss:$8 sps:$4 sm:$0xff]  }
   0x5   :  { %415 = vmatprep.subr.bf16.mxu1 %v18979_v2  ;;  %v12588_v45 = vld [vmem:[%s18959_s3 + $0x140] ss:$8 sps:$4 sm:$0xff]   ;;  %v12593_v46 = vld [vmem:[%s18959_s3 + $0x154] ss:$8 sps:$4 sm:$0xff]   ;;  %v12591_v47 = vld [vmem:[%s18959_s3 + $0x150] ss:$8 sps:$4 sm:$0xff]  }
   0x6   :  { %v12596_v48 = vld [vmem:[%s18959_s3 + $0x164] ss:$8 sps:$4 sm:$0xff]   ;;  %v12594_v51 = vld [vmem:[%s18959_s3 + $0x160] ss:$8 sps:$4 sm:$0xff]   ;;  %v12599_v52 = vld [vmem:[%s18959_s3 + $0x174] ss:$8 sps:$4 sm:$0xff]  }
   0x7   :  { %v12597_v53 = vld [vmem:[%s18959_s3 + $0x170] ss:$8 sps:$4 sm:$0xff]   ;;  %v12602_v54 = vld [vmem:[%s18959_s3 + $0x184] ss:$8 sps:$4 sm:$0xff]   ;;  %v12600_v57 = vld [vmem:[%s18959_s3 + $0x180] ss:$8 sps:$4 sm:$0xff]  }
   0x8   :  { %v12605_v61 = vld [vmem:[%s18959_s3 + $0x194] ss:$8 sps:$4 sm:$0xff]   ;;  %v12603_v62 = vld [vmem:[%s18959_s3 + $0x190] ss:$8 sps:$4 sm:$0xff]   ;;  %v12606_v63 = vld [vmem:[%s18959_s3 + $0x1a0] ss:$8 sps:$4 sm:$0xff]  }
   0x9   :  { %vm1026_vm1 = vcmask 523264  }
   0xa   :  { %v13811_v0 = vld [vmem:[%s19030_s29 + $0x4] ss:$12 sps:$4 sm:$0xff]   ;;  %v13816_v1 = vld [vmem:[%s19030_s29] ss:$12 sps:$4 sm:$0xff]   ;;  %v13823_v3 = vld [vmem:[%s19030_s29 + $0x1c] ss:$12 sps:$4 sm:$0xff]  }
   0xb   :  { %332 = vmatprep.subr.bf16.mxu0 %v13811_v0  ;;  %v13829_v4 = vld [vmem:[%s19030_s29 + $0x18] ss:$12 sps:$4 sm:$0xff]   ;;  %v13835_v5 = vld [vmem:[%s19030_s29 + $0x34] ss:$12 sps:$4 sm:$0xff]   ;;  %v13841_v6 = vld [vmem:[%s19030_s29 + $0x30] ss:$12 sps:$4 sm:$0xff]  }
   0xc   :  { %333 = vmatpush1.bf16.msra.mxu0 %v13816_v1  ;;  %v13847_v7 = vld [vmem:[%s19030_s29 + $0x4c] ss:$12 sps:$4 sm:$0xff]   ;;  %v13853_v8 = vld [vmem:[%s19030_s29 + $0x48] ss:$12 sps:$4 sm:$0xff]   ;;  %v13859_v9 = vld [vmem:[%s19030_s29 + $0x64] ss:$12 sps:$4 sm:$0xff]  }
   0xd   :  { %334 = vmatprep.subr.bf16.mxu0 %v13823_v3  ;;  %v13864_v10 = vld [vmem:[%s19030_s29 + $0x60] ss:$12 sps:$4 sm:$0xff]   ;;  %v13873_v12 = vld [vmem:[%s19030_s29 + $0x8] ss:$12 sps:$4 sm:$0xff]   ;;  %v13894_v15 = vld [vmem:[%s19030_s29 + $0x78] ss:$12 sps:$4 sm:$0xff]  }
   0xe   :  { %v12550_v11 = vld [vmem:[%s19031_s22 + $0x4] ss:$8 sps:$4 sm:$0xff]   ;;  %v13879_v13 = vld [vmem:[%s19030_s29 + $0x7c] ss:$12 sps:$4 sm:$0xff]   ;;  %416 = vmatpush1.bf16.msra.mxu1 %v13873_v12  ;;  %v13900_v16 = vld [vmem:[%s19030_s29 + $0x94] ss:$12 sps:$4 sm:$0xff]  }
   0xf   :  { %10443 = vmatprep.mubr.msk.bf16.mxu0 %vm316_vm0, %v12550_v11  ;;  %v13886_v14 = vld [vmem:[%s19030_s29 + $0x20] ss:$12 sps:$4 sm:$0xff]   ;;  %10448 = vmatprep.mubr.msk.bf16.mxu1 %vm316_vm0, %v12550_v11  ;;  %v13906_v17 = vld [vmem:[%s19030_s29 + $0x38] ss:$12 sps:$4 sm:$0xff]   ;;  %v13913_v18 = vld [vmem:[%s19030_s29 + $0x90] ss:$12 sps:$4 sm:$0xff]  }
  0x10   :  { %335 = vmatpush1.bf16.msra.mxu0 %v13829_v4  ;;  %417 = vmatprep.subr.bf16.mxu1 %v18979_v2  ;;  %v13919_v19 = vld [vmem:[%s19030_s29 + $0xac] ss:$12 sps:$4 sm:$0xff]   ;;  %v13925_v20 = vld [vmem:[%s19030_s29 + $0x50] ss:$12 sps:$4 sm:$0xff]   ;;  %v13932_v21 = vld [vmem:[%s19030_s29 + $0xa8] ss:$12 sps:$4 sm:$0xff]  }
  0x11   :  { %336 = vmatprep.subr.bf16.mxu0 %v13835_v5  ;;  %v13938_v22 = vld [vmem:[%s19030_s29 + $0xc4] ss:$12 sps:$4 sm:$0xff]   ;;  %v13944_v23 = vld [vmem:[%s19030_s29 + $0x68] ss:$12 sps:$4 sm:$0xff]   ;;  %v13951_v24 = vld [vmem:[%s19030_s29 + $0xc0] ss:$12 sps:$4 sm:$0xff]  }
  0x12   :  { %418 = vmatpush1.bf16.msra.mxu1 %v13886_v14  ;;  %v13957_v25 = vld [vmem:[%s19030_s29 + $0xdc] ss:$12 sps:$4 sm:$0xff]   ;;  %v13963_v26 = vld [vmem:[%s19030_s29 + $0x80] ss:$12 sps:$4 sm:$0xff]   ;;  %v13970_v27 = vld [vmem:[%s19030_s29 + $0xd8] ss:$12 sps:$4 sm:$0xff]  }
  0x13   :  { %419 = vmatprep.subr.bf16.mxu1 %v18979_v2  ;;  %v13977_v28 = vld [vmem:[%s19030_s29 + $0x98] ss:$12 sps:$4 sm:$0xff]   ;;  %v12548_v29 = vld [vmem:[%s19031_s22] ss:$8 sps:$4 sm:$0xff]   ;;  %v12553_v30 = vld [vmem:[%s19031_s22 + $0x14] ss:$8 sps:$4 sm:$0xff]  }
  0x14   :  { %337 = vmatpush1.bf16.msra.mxu0 %v13841_v6  ;;  %v13992_v31 = vld [vmem:[%s19030_s29 + $0xb0] ss:$12 sps:$4 sm:$0xff]   ;;  %v14000_v32 = vld [vmem:[%s19030_s29 + $0xc8] ss:$12 sps:$4 sm:$0xff]   ;;  %v12558_v34 = vld [vmem:[%s19031_s22 + $0x24] ss:$8 sps:$4 sm:$0xff]  }
  0x15   :  { %338 = vmatprep.subr.bf16.mxu0 %v13847_v7  ;;  %v12555_v33 = vld [vmem:[%s19031_s22 + $0x10] ss:$8 sps:$4 sm:$0xff]   ;;  %v14015_v35 = vld [vmem:[%s19030_s29 + $0xe0] ss:$12 sps:$4 sm:$0xff]   ;;  %v12563_v37 = vld [vmem:[%s19031_s22 + $0x34] ss:$8 sps:$4 sm:$0xff]  }
  0x16   :  { %420 = vmatpush1.bf16.msra.mxu1 %v13906_v17  ;;  %v12560_v36 = vld [vmem:[%s19031_s22 + $0x20] ss:$8 sps:$4 sm:$0xff]   ;;  %v12565_v38 = vld [vmem:[%s19031_s22 + $0x30] ss:$8 sps:$4 sm:$0xff]   ;;  %v12575_v41 = vld [vmem:[%s19031_s22 + $0x54] ss:$8 sps:$4 sm:$0xff]  }
  0x17   :  { %421 = vmatprep.subr.bf16.mxu1 %v18979_v2  ;;  %v12568_v39 = vld [vmem:[%s19031_s22 + $0x44] ss:$8 sps:$4 sm:$0x1f]   ;;  %v12570_v40 = vld [vmem:[%s19031_s22 + $0x40] ss:$8 sps:$4 sm:$0x1f]  }
  0x18   :  { %339 = vmatpush1.bf16.msra.mxu0 %v13853_v8  ;;  %v12573_v43 = vld [vmem:[%s19031_s22 + $0x50] ss:$8 sps:$4 sm:$0xff]   ;;  %v12576_v44 = vld [vmem:[%s19031_s22 + $0x64] ss:$8 sps:$4 sm:$0xff]   ;;  %v12578_v49 = vld [vmem:[%s19031_s22 + $0x60] ss:$8 sps:$4 sm:$0xff]  }
  0x19   :  { %340 = vmatprep.subr.bf16.mxu0 %v13859_v9  ;;  %v12579_v50 = vld [vmem:[%s19031_s22 + $0x74] ss:$8 sps:$4 sm:$0xff]   ;;  %v12581_v55 = vld [vmem:[%s19031_s22 + $0x70] ss:$8 sps:$4 sm:$0xff]   ;;  %v12582_v56 = vld [vmem:[%s19031_s22 + $0x84] ss:$8 sps:$4 sm:$0xff]  }
  0x1a   :  { %422 = vmatpush1.bf16.msra.mxu1 %v13925_v20  ;;  %v12584_v58 = vld [vmem:[%s19031_s22 + $0x80] ss:$8 sps:$4 sm:$0xff]   ;;  %v12585_v59 = vld [vmem:[%s19031_s22 + $0x94] ss:$8 sps:$4 sm:$0x1f]  }
  0x1b   :  { %423 = vmatprep.subr.bf16.mxu1 %v18979_v2  ;;  %v12587_v60 = vld [vmem:[%s19031_s22 + $0x90] ss:$8 sps:$4 sm:$0x1f]  }
  0x1c   :  { %341 = vmatpush1.bf16.msra.mxu0 %v13864_v10  ;;  %v12621_v11 = vld [vmem:[%s18959_s3 + $0x1f0] ss:$8 sps:$4 sm:$0xff]  }
  0x1d   :  { %342 = vmatprep.subr.bf16.mxu0 %v13879_v13 }
  0x1e   :  { %424 = vmatpush1.bf16.msra.mxu1 %v13944_v23 }
  0x1f   :  { %425 = vmatprep.subr.bf16.mxu1 %v18979_v2 }
  0x20   :  { %343 = vmatpush1.bf16.msra.mxu0 %v13894_v15 }
  0x21   :  { %344 = vmatprep.subr.bf16.mxu0 %v13900_v16 }
  0x22   :  { %426 = vmatpush1.bf16.msra.mxu1 %v13963_v26 }
  0x23   :  { %427 = vmatprep.subr.bf16.mxu1 %v18979_v2 }
  0x24   :  { %345 = vmatpush1.bf16.msra.mxu0 %v13913_v18 }
  0x25   :  { %346 = vmatprep.subr.bf16.mxu0 %v13919_v19 }
  0x26   :  { %428 = vmatpush1.bf16.msra.mxu1 %v13977_v28 }
  0x27   :  { %429 = vmatprep.subr.bf16.mxu1 %v18979_v2 }
  0x28   :  { %347 = vmatpush1.bf16.msra.mxu0 %v13932_v21 }
  0x29   :  { %348 = vmatprep.subr.bf16.mxu0 %v13938_v22 }
  0x2a   :  { %430 = vmatpush1.bf16.msra.mxu1 %v13992_v31 }
  0x2b   :  { %431 = vmatprep.subr.bf16.mxu1 %v18979_v2 }
  0x2c   :  { %349 = vmatpush1.bf16.msra.mxu0 %v13951_v24 }
  0x2d   :  { %350 = vmatprep.subr.bf16.mxu0 %v13957_v25 }
  0x2e   :  { %432 = vmatpush1.bf16.msra.mxu1 %v14000_v32 }
  0x2f   :  { %433 = vmatprep.subr.bf16.mxu1 %v18979_v2 }
  0x30   :  { %351 = vmatpush1.bf16.msra.mxu0 %v13970_v27 }
  0x31   :  { %614 = vmatprep.subr.bf16.mxu0 %v13811_v0 }
  0x32   :  { %434 = vmatpush1.bf16.msra.mxu1 %v14015_v35 }
  0x33   :  { %365 = vmatmul.mubr.bf16.vlgmr.msra.gmra.mrb[0].mxu0 %v12548_v29  ;;  %697 = vmatprep.subr.bf16.mxu1 %v18979_v2 }
  0x34   :  { %615 = vmatpush1.bf16.msra.mxu0 %v13816_v1  ;;  %10444 = vmatprep.mubr.msk.bf16.mxu0 %vm316_vm0, %v12553_v30 }
  0x35   :  { %616 = vmatprep.subr.bf16.mxu0 %v13823_v3  ;;  %448 = vmatmul.mubr.bf16.vlgmr.msra.gmra.mrb[0].mxu1 %v12548_v29  ;;  %v12644_v29 = vld [vmem:[%s19031_s22 + $0xc0] ss:$8 sps:$4 sm:$0xff]  }
  0x36   :  { %698 = vmatpush1.bf16.msra.mxu1 %v13873_v12  ;;  %10449 = vmatprep.mubr.msk.bf16.mxu1 %vm316_vm0, %v12553_v30  ;;  %v12624_v12 = vld [vmem:[%s18959_s3 + $0x200] ss:$8 sps:$4 sm:$0xff]  }
  0x37   :  { %699 = vmatprep.subr.bf16.mxu1 %v18979_v2  ;;  %v14290_v30 = vld [vmem:[%s19030_s29 + $0x68] ss:$12 sps:$4 sm:$0xff]  }
  0x38   :  { %617 = vmatpush1.bf16.msra.mxu0 %v13829_v4 }
  0x39   :  { %618 = vmatprep.subr.bf16.mxu0 %v13835_v5 }
  0x3a   :  { %700 = vmatpush1.bf16.msra.mxu1 %v13886_v14  ;;  %v14220_v14 = vld [vmem:[%s19031_s22 + $0xa0] ss:$8 sps:$4 sm:$0xff]  }
  0x3b   :  { %375 = vmatmul.mubr.bf16.gmra.mrb[4].mxu0 %v12555_v33  ;;  %701 = vmatprep.subr.bf16.mxu1 %v18979_v2 }
  0x3c   :  { %619 = vmatpush1.bf16.msra.mxu0 %v13841_v6  ;;  %10445 = vmatprep.mubr.msk.bf16.mxu0 %vm316_vm0, %v12558_v34 }
  0x3d   :  { %620 = vmatprep.subr.bf16.mxu0 %v13847_v7  ;;  %456 = vmatmul.mubr.bf16.gmra.mrb[4].mxu1 %v12555_v33  ;;  %v12647_v33 = vld [vmem:[%s19031_s22 + $0xd0] ss:$8 sps:$4 sm:$0xff]  }
  0x3e   :  { %702 = vmatpush1.bf16.msra.mxu1 %v13906_v17  ;;  %10450 = vmatprep.mubr.msk.bf16.mxu1 %vm316_vm0, %v12558_v34  ;;  %v14233_v17 = vld [vmem:[%s19030_s29 + $0x8] ss:$12 sps:$4 sm:$0xff]   ;;  %v14311_v34 = vld [vmem:[%s19030_s29 + $0x98] ss:$12 sps:$4 sm:$0xff]  }
  0x3f   :  { %703 = vmatprep.subr.bf16.mxu1 %v18979_v2 }
  0x40   :  { %621 = vmatpush1.bf16.msra.mxu0 %v13853_v8 }
  0x41   :  { %622 = vmatprep.subr.bf16.mxu0 %v13859_v9 }
  0x42   :  { %704 = vmatpush1.bf16.msra.mxu1 %v13925_v20  ;;  %v12635_v20 = vld [vmem:[%s18959_s3 + $0x224] ss:$8 sps:$4 sm:$0xff]  }
  0x43   :  { %385 = vmatmul.mubr.bf16.gmra.mrb[8].mxu0 %v12560_v36  ;;  %705 = vmatprep.subr.bf16.mxu1 %v18979_v2 }
  0x44   :  { %623 = vmatpush1.bf16.msra.mxu0 %v13864_v10  ;;  %10446 = vmatprep.mubr.msk.bf16.mxu0 %vm316_vm0, %v12563_v37 }
  0x45   :  { %624 = vmatprep.subr.bf16.mxu0 %v13879_v13  ;;  %464 = vmatmul.mubr.bf16.gmra.mrb[8].mxu1 %v12560_v36  ;;  %v14321_v36 = vld [vmem:[%s19030_s29 + $0xb0] ss:$12 sps:$4 sm:$0xff]  }
  0x46   :  { %706 = vmatpush1.bf16.msra.mxu1 %v13944_v23  ;;  %10451 = vmatprep.mubr.msk.bf16.mxu1 %vm316_vm0, %v12563_v37  ;;  %v12638_v23 = vld [vmem:[%s19031_s22 + $0xb0] ss:$8 sps:$4 sm:$0xff]   ;;  %v12650_v37 = vld [vmem:[%s19031_s22 + $0xe0] ss:$8 sps:$4 sm:$0x1f]  }
  0x47   :  { %707 = vmatprep.subr.bf16.mxu1 %v18979_v2 }
  0x48   :  { %625 = vmatpush1.bf16.msra.mxu0 %v13894_v15 }
  0x49   :  { %626 = vmatprep.subr.bf16.mxu0 %v13900_v16 }
  0x4a   :  { %708 = vmatpush1.bf16.msra.mxu1 %v13963_v26  ;;  %v12639_v26 = vld [vmem:[%s18959_s3 + $0x230] ss:$8 sps:$4 sm:$0xff]  }
  0x4b   :  { %395 = vmatmul.mubr.bf16.gmra.mrb[12].mxu0 %v12565_v38  ;;  %709 = vmatprep.subr.bf16.mxu1 %v18979_v2 }
  0x4c   :  { %627 = vmatpush1.bf16.msra.mxu0 %v13913_v18  ;;  %10447 = vmatprep.mubr.msk.bf16.mxu0 %vm316_vm0, %v12568_v39 }
  0x4d   :  { %628 = vmatprep.subr.bf16.mxu0 %v13919_v19  ;;  %472 = vmatmul.mubr.bf16.gmra.mrb[12].mxu1 %v12565_v38  ;;  %v14332_v38 = vld [vmem:[%s19030_s29 + $0xc8] ss:$12 sps:$4 sm:$0xff]  }
  0x4e   :  { %710 = vmatpush1.bf16.msra.mxu1 %v13977_v28  ;;  %10452 = vmatprep.mubr.msk.bf16.mxu1 %vm316_vm0, %v12568_v39  ;;  %v14279_v28 = vld [vmem:[%s19030_s29 + $0x50] ss:$12 sps:$4 sm:$0xff]   ;;  %v12653_v39 = vld [vmem:[%s18959_s3 + $0x244] ss:$8 sps:$4 sm:$0xff]  }
  0x4f   :  { %711 = vmatprep.subr.bf16.mxu1 %v18979_v2 }
  0x50   :  { %629 = vmatpush1.bf16.msra.mxu0 %v13932_v21 }
  0x51   :  { %630 = vmatprep.subr.bf16.mxu0 %v13938_v22 }
  0x52   :  { %712 = vmatpush1.bf16.msra.mxu1 %v13992_v31  ;;  %v12645_v31 = vld [vmem:[%s19031_s22 + $0xd4] ss:$8 sps:$4 sm:$0xff]  }
  0x53   :  { %405 = vmatmul.mubr.bf16.gmra.mrb[16].mxu0 %v12570_v40  ;;  %713 = vmatprep.subr.bf16.mxu1 %v18979_v2 }
  0x54   :  { %631 = vmatpush1.bf16.msra.mxu0 %v13951_v24  ;;  %10473 = vmatprep.mubr.msk.bf16.mxu0 %vm316_vm0, %v12575_v41 }
  0x55   :  { %632 = vmatprep.subr.bf16.mxu0 %v13957_v25  ;;  %480 = vmatmul.mubr.bf16.gmra.mrb[16].mxu1 %v12570_v40  ;;  %v14343_v40 = vld [vmem:[%s19030_s29 + $0xe0] ss:$12 sps:$4 sm:$0xff]  }
  0x56   :  { %714 = vmatpush1.bf16.msra.mxu1 %v14000_v32  ;;  %10478 = vmatprep.mubr.msk.bf16.mxu1 %vm316_vm0, %v12575_v41  ;;  %v14300_v32 = vld [vmem:[%s19030_s29 + $0x80] ss:$12 sps:$4 sm:$0xff]   ;;  %v14349_v41 = vld [vmem:[%s19030_s29 + $0x4] ss:$12 sps:$4 sm:$0xff]  }
  0x57   :  { %715 = vmatprep.subr.bf16.mxu1 %v18979_v2 }
  0x58   :  { %633 = vmatpush1.bf16.msra.mxu0 %v13970_v27 }
  0x59   :  { %1042 = vmatprep.subr.bf16.mxu0 %v12590_v42  ;;  %v14356_v42 = vld [vmem:[%s19030_s29] ss:$12 sps:$4 sm:$0xff]  }
  0x5a   :  { %716 = vmatpush1.bf16.msra.mxu1 %v14015_v35  ;;  %v12648_v35 = vld [vmem:[%s19031_s22 + $0xe4] ss:$8 sps:$4 sm:$0x1f]  }
  0x5b   :  { %647 = vmatmul.mubr.bf16.vlgmr.msra.gmra.mrb[20].mxu0 %v12573_v43  ;;  %1660 = vmatprep.subr.bf16.mxu1 %v13811_v0  ;;  %v12608_v0 = vld [vmem:[%s18959_s3 + $0x1a4] ss:$8 sps:$4 sm:$0xff]  }
  0x5c   :  { %10474 = vmatprep.mubr.msk.bf16.mxu0 %vm316_vm0, %v12576_v44  ;;  %1043 = vmatpush1.bf16.msra.mxu0 %v12588_v45  ;;  %v14375_v45 = vld [vmem:[%s19030_s29 + $0x34] ss:$12 sps:$4 sm:$0xff]  }
  0x5d   :  { %1044 = vmatprep.subr.bf16.mxu0 %v12593_v46  ;;  %730 = vmatmul.mubr.bf16.vlgmr.msra.gmra.mrb[20].mxu1 %v12573_v43  ;;  %v14363_v43 = vld [vmem:[%s19030_s29 + $0x1c] ss:$12 sps:$4 sm:$0xff]  }
  0x5e   :  { %10479 = vmatprep.mubr.msk.bf16.mxu1 %vm316_vm0, %v12576_v44  ;;  %1661 = vmatpush1.bf16.msra.mxu1 %v13816_v1  ;;  %v12611_v1 = vld [vmem:[%s18959_s3 + $0x1b4] ss:$8 sps:$4 sm:$0xff]   ;;  %v14369_v44 = vld [vmem:[%s19030_s29 + $0x18] ss:$12 sps:$4 sm:$0xff]  }
  0x5f   :  { %1662 = vmatprep.subr.bf16.mxu1 %v13823_v3  ;;  %v12609_v3 = vld [vmem:[%s18959_s3 + $0x1b0] ss:$8 sps:$4 sm:$0xff]  }
  0x60   :  { %1045 = vmatpush1.bf16.msra.mxu0 %v12591_v47  ;;  %v14381_v46 = vld [vmem:[%s19030_s29 + $0x30] ss:$12 sps:$4 sm:$0xff]   ;;  %v14388_v47 = vld [vmem:[%s19030_s29 + $0x4c] ss:$12 sps:$4 sm:$0xff]  }
  0x61   :  { %1046 = vmatprep.subr.bf16.mxu0 %v12596_v48  ;;  %v14394_v48 = vld [vmem:[%s19030_s29 + $0x48] ss:$12 sps:$4 sm:$0xff]  }
  0x62   :  { %1663 = vmatpush1.bf16.msra.mxu1 %v13829_v4  ;;  %v12612_v4 = vld [vmem:[%s18959_s3 + $0x1c0] ss:$8 sps:$4 sm:$0xff]  }
  0x63   :  { %657 = vmatmul.mubr.bf16.gmra.mrb[24].mxu0 %v12578_v49  ;;  %1664 = vmatprep.subr.bf16.mxu1 %v13835_v5  ;;  %v12614_v5 = vld [vmem:[%s18959_s3 + $0x1c4] ss:$8 sps:$4 sm:$0xff]  }
  0x64   :  { %10475 = vmatprep.mubr.msk.bf16.mxu0 %vm316_vm0, %v12579_v50  ;;  %1047 = vmatpush1.bf16.msra.mxu0 %v12594_v51  ;;  %v14413_v51 = vld [vmem:[%s19030_s29 + $0x7c] ss:$12 sps:$4 sm:$0xff]  }
  0x65   :  { %1048 = vmatprep.subr.bf16.mxu0 %v12599_v52  ;;  %738 = vmatmul.mubr.bf16.gmra.mrb[24].mxu1 %v12578_v49  ;;  %v14400_v49 = vld [vmem:[%s19030_s29 + $0x64] ss:$12 sps:$4 sm:$0xff]  }
  0x66   :  { %10480 = vmatprep.mubr.msk.bf16.mxu1 %vm316_vm0, %v12579_v50  ;;  %1665 = vmatpush1.bf16.msra.mxu1 %v13841_v6  ;;  %v12617_v6 = vld [vmem:[%s18959_s3 + $0x1d4] ss:$8 sps:$4 sm:$0xff]   ;;  %v14406_v50 = vld [vmem:[%s19030_s29 + $0x60] ss:$12 sps:$4 sm:$0xff]   ;;  %v14419_v52 = vld [vmem:[%s19030_s29 + $0x78] ss:$12 sps:$4 sm:$0xff]  }
  0x67   :  { %1666 = vmatprep.subr.bf16.mxu1 %v13847_v7  ;;  %v12615_v7 = vld [vmem:[%s18959_s3 + $0x1d0] ss:$8 sps:$4 sm:$0xff]  }
  0x68   :  { %1049 = vmatpush1.bf16.msra.mxu0 %v12597_v53  ;;  %v14425_v53 = vld [vmem:[%s19030_s29 + $0x94] ss:$12 sps:$4 sm:$0xff]  }
  0x69   :  { %1050 = vmatprep.subr.bf16.mxu0 %v12602_v54  ;;  %v14431_v54 = vld [vmem:[%s19030_s29 + $0x90] ss:$12 sps:$4 sm:$0xff]  }
  0x6a   :  { %1667 = vmatpush1.bf16.msra.mxu1 %v13853_v8  ;;  %v12618_v8 = vld [vmem:[%s18959_s3 + $0x1e0] ss:$8 sps:$4 sm:$0xff]  }
  0x6b   :  { %667 = vmatmul.mubr.bf16.gmra.mrb[28].mxu0 %v12581_v55  ;;  %1668 = vmatprep.subr.bf16.mxu1 %v13859_v9  ;;  %v12620_v9 = vld [vmem:[%s18959_s3 + $0x1e4] ss:$8 sps:$4 sm:$0xff]  }
  0x6c   :  { %10476 = vmatprep.mubr.msk.bf16.mxu0 %vm316_vm0, %v12582_v56  ;;  %1051 = vmatpush1.bf16.msra.mxu0 %v12600_v57  ;;  %v14450_v57 = vld [vmem:[%s19030_s29 + $0xc4] ss:$12 sps:$4 sm:$0xff]  }
  0x6d   :  { %746 = vmatmul.mubr.bf16.gmra.mrb[28].mxu1 %v12581_v55  ;;  %1052 = vmatprep.subr.bf16.mxu0 %v12605_v61  ;;  %v14438_v55 = vld [vmem:[%s19030_s29 + $0xac] ss:$12 sps:$4 sm:$0xff]  }
  0x6e   :  { %10481 = vmatprep.mubr.msk.bf16.mxu1 %vm316_vm0, %v12582_v56  ;;  %1669 = vmatpush1.bf16.msra.mxu1 %v13864_v10  ;;  %v12623_v10 = vld [vmem:[%s18959_s3 + $0x1f4] ss:$8 sps:$4 sm:$0xff]  }
  0x6f   :  { %1670 = vmatprep.subr.bf16.mxu1 %v13879_v13  ;;  %v12626_v13 = vld [vmem:[%s18959_s3 + $0x204] ss:$8 sps:$4 sm:$0xff]   ;;  %v14444_v56 = vld [vmem:[%s19030_s29 + $0xa8] ss:$12 sps:$4 sm:$0xff]  }
  0x70   :  { %1053 = vmatpush1.bf16.msra.mxu0 %v12603_v62 }
  0x71   :  { %1054 = vmatprep.subr.bf16.mxu0 %v12608_v0 }
  0x72   :  { %1671 = vmatpush1.bf16.msra.mxu1 %v13894_v15  ;;  %v12629_v15 = vld [vmem:[%s19031_s22 + $0xa4] ss:$8 sps:$4 sm:$0xff]  }
  0x73   :  { %677 = vmatmul.mubr.bf16.gmra.mrb[32].mxu0 %v12584_v58  ;;  %1672 = vmatprep.subr.bf16.mxu1 %v13900_v16  ;;  %v12632_v16 = vld [vmem:[%s18959_s3 + $0x214] ss:$8 sps:$4 sm:$0xff]  }
  0x74   :  { %10477 = vmatprep.mubr.msk.bf16.mxu0 %vm316_vm0, %v12585_v59  ;;  %1055 = vmatpush1.bf16.msra.mxu0 %v12606_v63 }
  0x75   :  { %754 = vmatmul.mubr.bf16.gmra.mrb[32].mxu1 %v12584_v58  ;;  %1056 = vmatprep.subr.bf16.mxu0 %v12611_v1  ;;  %v14456_v58 = vld [vmem:[%s19030_s29 + $0xc0] ss:$12 sps:$4 sm:$0xff]  }
  0x76   :  { %10482 = vmatprep.mubr.msk.bf16.mxu1 %vm316_vm0, %v12585_v59  ;;  %1673 = vmatpush1.bf16.msra.mxu1 %v13913_v18  ;;  %v12630_v18 = vld [vmem:[%s18959_s3 + $0x210] ss:$8 sps:$4 sm:$0xff]   ;;  %v14462_v59 = vld [vmem:[%s19030_s29 + $0xdc] ss:$12 sps:$4 sm:$0xff]  }
  0x77   :  { %1674 = vmatprep.subr.bf16.mxu1 %v13919_v19  ;;  %v12633_v19 = vld [vmem:[%s18959_s3 + $0x220] ss:$8 sps:$4 sm:$0xff]  }
  0x78   :  { %1057 = vmatpush1.bf16.msra.mxu0 %v12609_v3  ;;  %v14619_v3 = vld [vmem:[%s19031_s22 + $0x134] ss:$8 sps:$4 sm:$0x1f]  }
  0x79   :  { %1058 = vmatprep.subr.bf16.mxu0 %v12614_v5  ;;  %v14492_v5 = vld [vmem:[%s19031_s22 + $0xf4] ss:$8 sps:$4 sm:$0xff]  }
  0x7a   :  { %1675 = vmatpush1.bf16.msra.mxu1 %v13932_v21  ;;  %v12636_v21 = vld [vmem:[%s19031_s22 + $0xb4] ss:$8 sps:$4 sm:$0xff]  }
  0x7b   :  { %687 = vmatmul.mubr.bf16.gmra.mrb[36].mxu0 %v12587_v60  ;;  %1676 = vmatprep.subr.bf16.mxu1 %v13938_v22  ;;  %v14252_v22 = vld [vmem:[%s19030_s29 + $0x20] ss:$12 sps:$4 sm:$0xff]  }
  0x7c   :  { %1059 = vmatpush1.bf16.msra.mxu0 %v12612_v4  ;;  %v14487_v4 = vld [vmem:[%s19031_s22 + $0xf0] ss:$8 sps:$4 sm:$0xff]  }
  0x7d   :  { %762 = vmatmul.mubr.bf16.gmra.mrb[36].mxu1 %v12587_v60  ;;  %1060 = vmatprep.subr.bf16.mxu0 %v12617_v6  ;;  %v14468_v60 = vld [vmem:[%s19030_s29 + $0xd8] ss:$12 sps:$4 sm:$0xff]  }
  0x7e   :  { %1677 = vmatpush1.bf16.msra.mxu1 %v13951_v24  ;;  %10633 = vmatprep.mubr.msk.bf16.mxu1 %vm316_vm0, %v12629_v15  ;;  %v12641_v24 = vld [vmem:[%s18959_s3 + $0x234] ss:$8 sps:$4 sm:$0xff]  }
  0x7f   :  { %1678 = vmatprep.subr.bf16.mxu1 %v13957_v25  ;;  %v14266_v25 = vld [vmem:[%s19030_s29 + $0x38] ss:$12 sps:$4 sm:$0xff]  }
  0x80   :  { %1061 = vmatpush1.bf16.msra.mxu0 %v12615_v7 }
  0x81   :  { %1062 = vmatprep.subr.bf16.mxu0 %v12620_v9 }
  0x82   :  { %1679 = vmatpush1.bf16.msra.mxu1 %v13970_v27  ;;  %v12642_v27 = vld [vmem:[%s19031_s22 + $0xc4] ss:$8 sps:$4 sm:$0xff]  }
  0x83   :  { %1743 = vmatprep.subr.bf16.mxu1 %v18979_v2 }
  0x84   :  { %1063 = vmatpush1.bf16.msra.mxu0 %v12618_v8 }
  0x85   :  { %1064 = vmatprep.subr.bf16.mxu0 %v12623_v10  ;;  %1693 = vmatmul.mubr.bf16.vlgmr.msra.gmra.mrb[40].mxu1 %v14220_v14 }
  0x86   :  { %1744 = vmatpush1.bf16.msra.mxu1 %v14233_v17  ;;  %10634 = vmatprep.mubr.msk.bf16.mxu1 %vm316_vm0, %v12636_v21 }
  0x87   :  { %1745 = vmatprep.subr.bf16.mxu1 %v18979_v2 }
  0x88   :  { %1065 = vmatpush1.bf16.msra.mxu0 %v12621_v11 }
  0x89   :  { %1066 = vmatprep.subr.bf16.mxu0 %v12626_v13 }
  0x8a   :  { %1746 = vmatpush1.bf16.msra.mxu1 %v14252_v22 }
  0x8b   :  { %1747 = vmatprep.subr.bf16.mxu1 %v18979_v2 }
  0x8c   :  { %1067 = vmatpush1.bf16.msra.mxu0 %v12624_v12  ;;  %v14514_v12 = vld [vmem:[%s19031_s22 + $0x104] ss:$8 sps:$4 sm:$0xff]  }
  0x8d   :  { %1068 = vmatprep.subr.bf16.mxu0 %v12632_v16  ;;  %1703 = vmatmul.mubr.bf16.gmra.mrb[44].mxu1 %v12638_v23 }
  0x8e   :  { %1748 = vmatpush1.bf16.msra.mxu1 %v14266_v25  ;;  %10635 = vmatprep.mubr.msk.bf16.mxu1 %vm316_vm0, %v12642_v27 }
  0x8f   :  { %1749 = vmatprep.subr.bf16.mxu1 %v18979_v2 }
  0x90   :  { %1069 = vmatpush1.bf16.msra.mxu0 %v12630_v18 }
  0x91   :  { %1070 = vmatprep.subr.bf16.mxu0 %v12635_v20 }
  0x92   :  { %1750 = vmatpush1.bf16.msra.mxu1 %v14279_v28 }
  0x93   :  { %1751 = vmatprep.subr.bf16.mxu1 %v18979_v2 }
  0x94   :  { %1071 = vmatpush1.bf16.msra.mxu0 %v12633_v19  ;;  %v14584_v19 = vld [vmem:[%s19031_s22 + $0x124] ss:$8 sps:$4 sm:$0xff]  }
  0x95   :  { %1072 = vmatprep.subr.bf16.mxu0 %v12641_v24  ;;  %1713 = vmatmul.mubr.bf16.gmra.mrb[48].mxu1 %v12644_v29 }
  0x96   :  { %1752 = vmatpush1.bf16.msra.mxu1 %v14290_v30  ;;  %10636 = vmatprep.mubr.msk.bf16.mxu1 %vm316_vm0, %v12645_v31 }
  0x97   :  { %1753 = vmatprep.subr.bf16.mxu1 %v18979_v2 }
  0x98   :  { %1073 = vmatpush1.bf16.msra.mxu0 %v12639_v26  ;;  %v14549_v26 = vld [vmem:[%s19031_s22 + $0x114] ss:$8 sps:$4 sm:$0xff]  }
  0x99   :  { %1125 = vmatprep.subr.bf16.mxu0 %v12653_v39 }
  0x9a   :  { %1754 = vmatpush1.bf16.msra.mxu1 %v14300_v32 }
  0x9b   :  { %1755 = vmatprep.subr.bf16.mxu1 %v18979_v2 }
  0x9d   :  { %1723 = vmatmul.mubr.bf16.gmra.mrb[52].mxu1 %v12647_v33 }
  0x9e   :  { %1756 = vmatpush1.bf16.msra.mxu1 %v14311_v34  ;;  %10637 = vmatprep.mubr.msk.bf16.mxu1 %vm316_vm0, %v12648_v35 }
  0x9f   :  { %1757 = vmatprep.subr.bf16.mxu1 %v18979_v2 }
  0xa2   :  { %1758 = vmatpush1.bf16.msra.mxu1 %v14321_v36 }
  0xa3   :  { %1759 = vmatprep.subr.bf16.mxu1 %v18979_v2 }
  0xa5   :  { %1733 = vmatmul.mubr.bf16.gmra.mrb[56].mxu1 %v12650_v37 }
  0xa6   :  { %1760 = vmatpush1.bf16.msra.mxu1 %v14332_v38  ;;  %10638 = vmatprep.mubr.msk.bf16.mxu1 %vm316_vm0, %v12629_v15 }
  0xa7   :  { %1761 = vmatprep.subr.bf16.mxu1 %v18979_v2 }
  0xaa   :  { %1762 = vmatpush1.bf16.msra.mxu1 %v14343_v40 }
  0xab   :  { %2344 = vmatprep.subr.bf16.mxu1 %v14349_v41 }
  0xad   :  { %1776 = vmatmul.mubr.bf16.vlgmr.msra.gmra.mrb[60].mxu1 %v14220_v14  ;;  %v14522_v14 = vld [vmem:[%s19031_s22 + $0x100] ss:$8 sps:$4 sm:$0xff]  }
  0xae   :  { %2345 = vmatpush1.bf16.msra.mxu1 %v14356_v42  ;;  %10639 = vmatprep.mubr.msk.bf16.mxu1 %vm316_vm0, %v12636_v21 }
  0xaf   :  { %2346 = vmatprep.subr.bf16.mxu1 %v14363_v43 }
  0xb2   :  { %2347 = vmatpush1.bf16.msra.mxu1 %v14369_v44 }
  0xb3   :  { %2348 = vmatprep.subr.bf16.mxu1 %v14375_v45 }
  0xb5   :  { %1784 = vmatmul.mubr.bf16.gmra.mrb[64].mxu1 %v12638_v23 }
  0xb6   :  { %2349 = vmatpush1.bf16.msra.mxu1 %v14381_v46  ;;  %10640 = vmatprep.mubr.msk.bf16.mxu1 %vm316_vm0, %v12642_v27  ;;  %v14557_v27 = vld [vmem:[%s19031_s22 + $0x110] ss:$8 sps:$4 sm:$0xff]  }
  0xb7   :  { %2350 = vmatprep.subr.bf16.mxu1 %v14388_v47 }
  0xba   :  { %2351 = vmatpush1.bf16.msra.mxu1 %v14394_v48 }
  0xbb   :  { %2352 = vmatprep.subr.bf16.mxu1 %v14400_v49 }
  0xbd   :  { %1792 = vmatmul.mubr.bf16.gmra.mrb[68].mxu1 %v12644_v29 }
  0xbe   :  { %2353 = vmatpush1.bf16.msra.mxu1 %v14406_v50  ;;  %10641 = vmatprep.mubr.msk.bf16.mxu1 %vm316_vm0, %v12645_v31 }
  0xbf   :  { %2354 = vmatprep.subr.bf16.mxu1 %v14413_v51 }
  0xc2   :  { %2355 = vmatpush1.bf16.msra.mxu1 %v14419_v52 }
  0xc3   :  { %2356 = vmatprep.subr.bf16.mxu1 %v14425_v53 }
  0xc5   :  { %1800 = vmatmul.mubr.bf16.gmra.mrb[72].mxu1 %v12647_v33 }
  0xc6   :  { %2357 = vmatpush1.bf16.msra.mxu1 %v14431_v54  ;;  %10642 = vmatprep.mubr.msk.bf16.mxu1 %vm316_vm0, %v12648_v35 }
  0xc7   :  { %2358 = vmatprep.subr.bf16.mxu1 %v14438_v55 }
  0xca   :  { %2359 = vmatpush1.bf16.msra.mxu1 %v14444_v56 }
  0xcb   :  { %2360 = vmatprep.subr.bf16.mxu1 %v14450_v57 }
  0xcd   :  { %1808 = vmatmul.mubr.bf16.gmra.mrb[76].mxu1 %v12650_v37 }
  0xce   :  { %2361 = vmatpush1.bf16.msra.mxu1 %v14456_v58  ;;  %10748 = vmatprep.mubr.msk.bf16.mxu1 %vm316_vm0, %v14492_v5 }
  0xcf   :  { %2362 = vmatprep.subr.bf16.mxu1 %v14462_v59 }
  0xd2   :  { %2363 = vmatpush1.bf16.msra.mxu1 %v14468_v60 }
  0xd3   :  { %2427 = vmatprep.subr.bf16.mxu1 %v18979_v2 }
  0xd5   :  { %2377 = vmatmul.mubr.bf16.vlgmr.msra.gmra.mrb[80].mxu1 %v14487_v4 }
  0xd6   :  { %2428 = vmatpush1.bf16.msra.mxu1 %v14233_v17  ;;  %10749 = vmatprep.mubr.msk.bf16.mxu1 %vm316_vm0, %v14514_v12 }
  0xd7   :  { %2429 = vmatprep.subr.bf16.mxu1 %v18979_v2 }
  0xda   :  { %2430 = vmatpush1.bf16.msra.mxu1 %v14252_v22 }
  0xdb   :  { %2431 = vmatprep.subr.bf16.mxu1 %v18979_v2 }
  0xdd   :  { %2387 = vmatmul.mubr.bf16.gmra.mrb[84].mxu1 %v14522_v14 }
  0xde   :  { %2432 = vmatpush1.bf16.msra.mxu1 %v14266_v25  ;;  %10750 = vmatprep.mubr.msk.bf16.mxu1 %vm316_vm0, %v14549_v26 }
  0xdf   :  { %2433 = vmatprep.subr.bf16.mxu1 %v18979_v2 }
  0xe2   :  { %2434 = vmatpush1.bf16.msra.mxu1 %v14279_v28 }
  0xe3   :  { %2435 = vmatprep.subr.bf16.mxu1 %v18979_v2 }
  0xe5   :  { %2397 = vmatmul.mubr.bf16.gmra.mrb[88].mxu1 %v14557_v27 }
  0xe6   :  { %2436 = vmatpush1.bf16.msra.mxu1 %v14290_v30  ;;  %10751 = vmatprep.mubr.msk.bf16.mxu1 %vm316_vm0, %v14584_v19 }
  0xe7   :  { %2437 = vmatprep.subr.bf16.mxu1 %v18979_v2 }
  0xea   :  { %2438 = vmatpush1.bf16.msra.mxu1 %v14300_v32 }
  0xeb   :  { %2439 = vmatprep.subr.bf16.mxu1 %v18979_v2 }
  0xee   :  { %2440 = vmatpush1.bf16.msra.mxu1 %v14311_v34 }
  0xef   :  { %2441 = vmatprep.subr.bf16.mxu1 %v18979_v2 }
  0xf2   :  { %2442 = vmatpush1.bf16.msra.mxu1 %v14321_v36 }
  0xf3   :  { %2443 = vmatprep.subr.bf16.mxu1 %v18979_v2 }
  0xf6   :  { %2444 = vmatpush1.bf16.msra.mxu1 %v14332_v38 }
 0x106   :  { %v14472_v61 = vpop.f32.mrb[0].mxu0 }
 0x107   :  { %v14474_v62 = vpop.f32.mrb[1].mxu0 }
 0x108   :  { %v14476_v63 = vpop.f32.mrb[2].mxu0  ;;  %v14517_v13 = vpop.f32.mrb[0].mxu1 }
 0x109   :  { %v14480_v1 = vpop.f32.mrb[3].mxu0  ;;  %19032 = vst [vmem:[#allocation5_spill] sm:$0xff] %v14517_v13  ;;  %v451_v15 = vpop.f32.mrb[1].mxu1 }
 0x10a   :  { %v14529_v17 = vpop.f32.mrb[2].mxu1 }
 0x10b   :  { %19033 = vst [vmem:[#allocation6_spill] sm:$0xff] %v14529_v17  ;;  %v454_v20 = vpop.f32.mrb[3].mxu1  ;;  %v12656_v17 = vld [vmem:[%s18959_s3 + $0x254] ss:$8 sps:$4 sm:$0xff]  }
 0x10e   :  { %v14496_v6 = vpop.f32.mrb[4].mxu0 }
 0x10f   :  { %v14499_v7 = vpop.f32.mrb[5].mxu0 }
 0x110   :  { %v14502_v8 = vpop.f32.mrb[6].mxu0  ;;  %v14552_v25 = vpop.f32.mrb[4].mxu1 }
 0x111   :  { %v14507_v10 = vpop.f32.mrb[7].mxu0  ;;  %19034 = vst [vmem:[#allocation7_spill] sm:$0xff] %v14552_v25  ;;  %v459_v29 = vpop.f32.mrb[5].mxu1  ;;  %v19039_v25 = vmov 0  }
 0x112   :  { %v14564_v33 = vpop.f32.mrb[6].mxu1  ;;  %2445 = vmatprep.subr.bf16.mxu1 %v19039_v25 }
 0x113   :  { %19035 = vst [vmem:[#allocation8_spill] sm:$0xff] %v14564_v33  ;;  %v462_v37 = vpop.f32.mrb[7].mxu1  ;;  %2446 = vmatpush1.bf16.msra.mxu1 %v14343_v40 }
 0x114   :  { %v14592_v37 = vld [vmem:[%s19031_s22 + $0x120] ss:$8 sps:$4 sm:$0xff]   ;;  %3028 = vmatprep.subr.bf16.mxu1 %v14349_v41  ;;  %v12659_v41 = vld [vmem:[%s18959_s3 + $0x264] ss:$8 sps:$4 sm:$0xff]  }
 0x115   :  { %2407 = vmatmul.mubr.bf16.gmra.mrb[92].mxu1 %v14592_v37 }
 0x116   :  { %v14527_v16 = vpop.f32.mrb[8].mxu0  ;;  %10752 = vmatprep.mubr.msk.bf16.mxu1 %vm316_vm0, %v14619_v3 }
 0x117   :  { %v14532_v18 = vpop.f32.mrb[9].mxu0 }
 0x118   :  { %v14537_v21 = vpop.f32.mrb[10].mxu0  ;;  %v14587_v30 = vpop.f32.mrb[8].mxu1 }
 0x119   :  { %v14542_v23 = vpop.f32.mrb[11].mxu0  ;;  %19036 = vst [vmem:[#allocation9_spill] sm:$0xff] %v14587_v30  ;;  %v467_v35 = vpop.f32.mrb[9].mxu1 }
 0x11a   :  { %v14599_v29 = vpop.f32.mrb[10].mxu1 }
 0x11b   :  { %19037 = vst [vmem:[#allocation10_spill] sm:$0xff] %v14599_v29  ;;  %v470_v24 = vpop.f32.mrb[11].mxu1 }
 0x11c   :  { %v14627_v24 = vld [vmem:[%s19031_s22 + $0x130] ss:$8 sps:$4 sm:$0x1f]  }
 0x11d   :  { %2417 = vmatmul.mubr.bf16.gmra.mrb[96].mxu1 %v14627_v24 }
 0x11e   :  { %v14562_v31 = vpop.f32.mrb[12].mxu0  ;;  %10753 = vmatprep.mubr.msk.bf16.mxu1 %vm316_vm0, %v14492_v5 }
 0x11f   :  { %v14567_v28 = vpop.f32.mrb[13].mxu0 }
 0x120   :  { %v14572_v39 = vpop.f32.mrb[14].mxu0  ;;  %v14622_v34 = vpop.f32.mrb[12].mxu1 }
 0x121   :  { %v14577_v20 = vpop.f32.mrb[15].mxu0  ;;  %19038 = vst [vmem:[#allocation11_spill] sm:$0xff] %v14622_v34  ;;  %v475_v22 = vpop.f32.mrb[13].mxu1 }
 0x122   :  { %v14632_v0 = vpop.f32.mrb[14].mxu1  ;;  %v12651_v22 = vld [vmem:[%s18959_s3 + $0x240] ss:$8 sps:$4 sm:$0xff]  }
 0x123   :  { %v478_v29 = vpop.f32.mrb[15].mxu1 }
 0x125   :  { %2460 = vmatmul.mubr.bf16.vlgmr.msra.gmra.mrb[100].mxu1 %v14487_v4 }
 0x126   :  { %v14597_v15 = vpop.f32.mrb[16].mxu0  ;;  %3029 = vmatpush1.bf16.msra.mxu1 %v14356_v42  ;;  %10754 = vmatprep.mubr.msk.bf16.mxu1 %vm316_vm0, %v14514_v12 }
 0x127   :  { %v14602_v32 = vpop.f32.mrb[17].mxu0  ;;  %3030 = vmatprep.subr.bf16.mxu1 %v14363_v43 }
 0x128   :  { %v14607_v9 = vpop.f32.mrb[18].mxu0  ;;  %v14648_v38 = vpop.f32.mrb[16].mxu1 }
 0x129   :  { %v14612_v11 = vpop.f32.mrb[19].mxu0  ;;  %v483_v5 = vpop.f32.mrb[17].mxu1 }
 0x12a   :  { %v14651_v34 = vpop.f32.mrb[18].mxu1  ;;  %3031 = vmatpush1.bf16.msra.mxu1 %v14369_v44 }
 0x12b   :  { %3032 = vmatprep.subr.bf16.mxu1 %v14375_v45 }
 0x12d   :  { %2468 = vmatmul.mubr.bf16.gmra.mrb[104].mxu1 %v14522_v14 }
 0x12e   :  { %v648_v35 = vpop.f32.mrb[20].mxu0  ;;  %3033 = vmatpush1.bf16.msra.mxu1 %v14381_v46  ;;  %10755 = vmatprep.mubr.msk.bf16.mxu1 %vm316_vm0, %v14549_v26 }
 0x12f   :  { %v650_v30 = vpop.f32.mrb[21].mxu0  ;;  %3034 = vmatprep.subr.bf16.mxu1 %v14388_v47 }
 0x130   :  { %v652_v2 = vpop.f32.mrb[22].mxu0 }
 0x131   :  { %v770_v33 = vpack.c.bf16 %v652_v2, %v648_v35  ;;  %v654_v13 = vpop.f32.mrb[23].mxu0  ;;  %v12654_v2 = vld [vmem:[%s18959_s3 + $0x250] ss:$8 sps:$4 sm:$0xff]   ;;  %v12657_v35 = vld [vmem:[%s18959_s3 + $0x260] ss:$8 sps:$4 sm:$0xff]  }
 0x132   :  { %v771_v36 = vpack.c.bf16 %v654_v13, %v650_v30  ;;  %v486_v30 = vpop.f32.mrb[19].mxu1  ;;  %3035 = vmatpush1.bf16.msra.mxu1 %v14394_v48 }
 0x133   :  { %v14673_v42 = vpop.f32.mrb[20].mxu1  ;;  %3036 = vmatprep.subr.bf16.mxu1 %v14400_v49 }
 0x134   :  { %1074 = vmatprep.mubr.bf16.mxu0 %v771_v36  ;;  %v733_v43 = vpop.f32.mrb[21].mxu1 }
 0x135   :  { %1075 = vmatmul.mubr.bf16.vlgmr.msra.gmra.mrb[40].mxu0 %v770_v33  ;;  %v14676_v12 = vpop.f32.mrb[22].mxu1  ;;  %2476 = vmatmul.mubr.bf16.gmra.mrb[108].mxu1 %v14557_v27 }
 0x136   :  { %v658_v29 = vpop.f32.mrb[24].mxu0  ;;  %1126 = vmatpush1.bf16.msra.mxu0 %v12651_v22  ;;  %v772_v45 = vpack.c.bf16 %v14676_v12, %v14673_v42  ;;  %3037 = vmatpush1.bf16.msra.mxu1 %v14406_v50  ;;  %v12669_v42 = vld [vmem:[%s18959_s3 + $0x20] ss:$8 sps:$4 sm:$0xff]   ;;  %v12674_v12 = vld [vmem:[%s18959_s3 + $0x34] ss:$8 sps:$4 sm:$0xff]  }
 0x137   :  { %v660_v13 = vpop.f32.mrb[25].mxu0  ;;  %1127 = vmatprep.subr.bf16.mxu0 %v12656_v17  ;;  %v12662_v17 = vld [vmem:[%s18959_s3 + $0x274] ss:$8 sps:$4 sm:$0xff]   ;;  %10756 = vmatprep.mubr.msk.bf16.mxu1 %vm316_vm0, %v14584_v19 }
 0x138   :  { %v662_v33 = vpop.f32.mrb[26].mxu0  ;;  %3038 = vmatprep.subr.bf16.mxu1 %v14413_v51 }
 0x139   :  { %v773_v4 = vpack.c.bf16 %v662_v33, %v658_v29  ;;  %v664_v36 = vpop.f32.mrb[27].mxu0  ;;  %v12660_v29 = vld [vmem:[%s18959_s3 + $0x270] ss:$8 sps:$4 sm:$0xff]  }
 0x13a   :  { %v774_v22 = vpack.c.bf16 %v664_v36, %v660_v13  ;;  %1128 = vmatpush1.bf16.msra.mxu0 %v12654_v2  ;;  %v12665_v2 = vld [vmem:[%s18959_s3 + $0x4] ss:$8 sps:$4 sm:$0xff]   ;;  %v736_v13 = vpop.f32.mrb[23].mxu1  ;;  %3039 = vmatpush1.bf16.msra.mxu1 %v14419_v52 }
 0x13b   :  { %1129 = vmatprep.subr.bf16.mxu0 %v12659_v41  ;;  %v14692_v14 = vpop.f32.mrb[24].mxu1  ;;  %3040 = vmatprep.subr.bf16.mxu1 %v14425_v53 }
 0x13c   :  { %1084 = vmatprep.mubr.bf16.mxu0 %v774_v22  ;;  %v741_v46 = vpop.f32.mrb[25].mxu1 }
 0x13d   :  { %1085 = vmatmul.mubr.bf16.gmra.mrb[44].mxu0 %v773_v4  ;;  %v14695_v36 = vpop.f32.mrb[26].mxu1  ;;  %2484 = vmatmul.mubr.bf16.gmra.mrb[112].mxu1 %v14592_v37  ;;  %v12675_v46 = vld [vmem:[%s18959_s3 + $0x40] ss:$8 sps:$4 sm:$0xff]  }
 0x13e   :  { %v668_v5 = vpop.f32.mrb[28].mxu0  ;;  %1130 = vmatpush1.bf16.msra.mxu0 %v12657_v35  ;;  %v775_v26 = vpack.c.bf16 %v14695_v36, %v14692_v14  ;;  %3041 = vmatpush1.bf16.msra.mxu1 %v14431_v54  ;;  %v12677_v14 = vld [vmem:[%s18959_s3 + $0x44] ss:$8 sps:$4 sm:$0xff]   ;;  %v12678_v36 = vld [vmem:[%s18959_s3 + $0x50] ss:$8 sps:$4 sm:$0xff]  }
 0x13f   :  { %v670_v44 = vpop.f32.mrb[29].mxu0  ;;  %1131 = vmatprep.subr.bf16.mxu0 %v12662_v17  ;;  %v744_v17 = vpop.f32.mrb[27].mxu1  ;;  %10757 = vmatprep.mubr.msk.bf16.mxu1 %vm316_vm0, %v14619_v3 }
 0x140   :  { %v672_v30 = vpop.f32.mrb[30].mxu0  ;;  %v747_v27 = vpop.f32.mrb[28].mxu1  ;;  %3042 = vmatprep.subr.bf16.mxu1 %v14438_v55  ;;  %v12663_v55 = vld [vmem:[%s18959_s3] ss:$8 sps:$4 sm:$0xff]   ;;  %v12686_v17 = vld [vmem:[%s18959_s3 + $0x74] ss:$8 sps:$4 sm:$0xff]  }
 0x141   :  { %v776_v41 = vpack.c.bf16 %v672_v30, %v668_v5  ;;  %v674_v33 = vpop.f32.mrb[31].mxu0  ;;  %v749_v5 = vpop.f32.mrb[29].mxu1 }
 0x142   :  { %v777_v35 = vpack.c.bf16 %v674_v33, %v670_v44  ;;  %1132 = vmatpush1.bf16.msra.mxu0 %v12660_v29  ;;  %3043 = vmatpush1.bf16.msra.mxu1 %v14444_v56  ;;  %v12668_v56 = vld [vmem:[%s18959_s3 + $0x14] ss:$8 sps:$4 sm:$0xff]   ;;  %v12687_v5 = vld [vmem:[%s18959_s3 + $0x80] ss:$8 sps:$4 sm:$0xff]  }
 0x143   :  { %1423 = vmatprep.subr.bf16.mxu0 %v12665_v2  ;;  %v750_v2 = vpop.f32.mrb[30].mxu1  ;;  %3044 = vmatprep.subr.bf16.mxu1 %v14450_v57 }
 0x144   :  { %1094 = vmatprep.mubr.bf16.mxu0 %v777_v35  ;;  %v778_v19 = vpack.c.bf16 %v750_v2, %v747_v27  ;;  %v752_v44 = vpop.f32.mrb[31].mxu1  ;;  %v14794_v27 = vld [vmem:[%s19030_s29 + $0x8] ss:$12 sps:$4 sm:$0xff]  }
 0x145   :  { %1095 = vmatmul.mubr.bf16.gmra.mrb[48].mxu0 %v776_v41  ;;  %2492 = vmatmul.mubr.bf16.gmra.mrb[116].mxu1 %v14627_v24  ;;  %19040 = vst [vmem:[#allocation12_spill] sm:$0xff] %v14794_v27 }
 0x146   :  { %v678_v4 = vpop.f32.mrb[32].mxu0  ;;  %3045 = vmatpush1.bf16.msra.mxu1 %v14456_v58 }
 0x147   :  { %v680_v47 = vpop.f32.mrb[33].mxu0  ;;  %3046 = vmatprep.subr.bf16.mxu1 %v14462_v59  ;;  %v12666_v59 = vld [vmem:[%s18959_s3 + $0x10] ss:$8 sps:$4 sm:$0xff]  }
 0x148   :  { %v682_v48 = vpop.f32.mrb[34].mxu0  ;;  %v755_v30 = vpop.f32.mrb[32].mxu1 }
 0x149   :  { %v779_v49 = vpack.c.bf16 %v682_v48, %v678_v4  ;;  %v684_v22 = vpop.f32.mrb[35].mxu0  ;;  %v757_v37 = vpop.f32.mrb[33].mxu1  ;;  %v12680_v4 = vld [vmem:[%s18959_s3 + $0x54] ss:$8 sps:$4 sm:$0xff]   ;;  %v14773_v48 = vld [vmem:[%s19031_s22 + $0x140] ss:$8 sps:$4 sm:$0xff]  }
 0x14a   :  { %v780_v43 = vpack.c.bf16 %v684_v22, %v680_v47  ;;  %v758_v54 = vpop.f32.mrb[34].mxu1  ;;  %3047 = vmatpush1.bf16.msra.mxu1 %v14468_v60  ;;  %v12671_v60 = vld [vmem:[%s18959_s3 + $0x24] ss:$8 sps:$4 sm:$0xff]   ;;  %v12684_v22 = vld [vmem:[%s18959_s3 + $0x70] ss:$8 sps:$4 sm:$0xff]  }
 0x14b   :  { %v781_v3 = vpack.c.bf16 %v758_v54, %v755_v30  ;;  %v760_v41 = vpop.f32.mrb[35].mxu1  ;;  %3111 = vmatprep.subr.bf16.mxu1 %v19039_v25  ;;  %v12683_v47 = vld [vmem:[%s18959_s3 + $0x64] ss:$8 sps:$4 sm:$0xff]   ;;  %v19042_v30 = vpack.c.bf16 %v14480_v1, %v14474_v62  ;;  %v12690_v37 = vld [vmem:[%s18959_s3 + $0x90] ss:$8 sps:$4 sm:$0xff]  }
 0x14c   :  { %1104 = vmatprep.mubr.bf16.mxu0 %v780_v43  ;;  %v12689_v43 = vld [vmem:[%s18959_s3 + $0x84] ss:$8 sps:$4 sm:$0xff]   ;;  %v12693_v41 = vld [vmem:[%s18959_s3 + $0xa0] ss:$8 sps:$4 sm:$0xff]   ;;  %v12698_v62 = vld [vmem:[%s18959_s3 + $0xb4] ss:$8 sps:$4 sm:$0xff]  }
 0x14d   :  { %1105 = vmatmul.mubr.bf16.gmra.mrb[52].mxu0 %v779_v49  ;;  %v14778_v49 = vld [vmem:[%s19031_s22 + $0x144] ss:$8 sps:$4 sm:$0xff]  }
 0x14e   :  { %v688_v29 = vpop.f32.mrb[36].mxu0  ;;  %10863 = vmatprep.mubr.msk.bf16.mxu1 %vm316_vm0, %v14778_v49  ;;  %v12695_v54 = vld [vmem:[%s18959_s3 + $0xa4] ss:$8 sps:$4 sm:$0xff]  }
 0x14f   :  { %v690_v50 = vpop.f32.mrb[37].mxu0  ;;  %3061 = vmatmul.mubr.bf16.vlgmr.msra.gmra.mrb[120].mxu1 %v14773_v48  ;;  %v14855_v1 = vld [vmem:[%s19030_s29 + $0x38] ss:$12 sps:$4 sm:$0xff]  }
 0x150   :  { %v692_v51 = vpop.f32.mrb[38].mxu0  ;;  %v763_v57 = vpop.f32.mrb[36].mxu1  ;;  %3112 = vmatpush1.bf16.msra.mxu1 %v14794_v27 }
 0x151   :  { %v782_v52 = vpack.c.bf16 %v692_v51, %v688_v29  ;;  %v694_v13 = vpop.f32.mrb[39].mxu0  ;;  %v765_v58 = vpop.f32.mrb[37].mxu1  ;;  %3113 = vmatprep.subr.bf16.mxu1 %v19039_v25  ;;  %v12692_v29 = vld [vmem:[%s18959_s3 + $0x94] ss:$8 sps:$4 sm:$0xff]   ;;  %v14818_v51 = vld [vmem:[%s19030_s29 + $0x20] ss:$12 sps:$4 sm:$0xff]  }
 0x152   :  { %v783_v53 = vpack.c.bf16 %v694_v13, %v690_v50  ;;  %v766_v24 = vpop.f32.mrb[38].mxu1  ;;  %19041 = vst [vmem:[#allocation13_spill] sm:$0xff] %v14818_v51  ;;  %v12696_v58 = vld [vmem:[%s18959_s3 + $0xb0] ss:$8 sps:$4 sm:$0xff]  }
 0x153   :  { %v784_v33 = vpack.c.bf16 %v766_v24, %v763_v57  ;;  %v768_v35 = vpop.f32.mrb[39].mxu1  ;;  %v14866_v57 = vld [vmem:[%s19031_s22 + $0x164] ss:$8 sps:$4 sm:$0xff]  }
 0x154   :  { %1114 = vmatprep.mubr.bf16.mxu0 %v783_v53  ;;  %3114 = vmatpush1.bf16.msra.mxu1 %v14818_v51  ;;  %v12701_v24 = vld [vmem:[%s18959_s3 + $0xc4] ss:$8 sps:$4 sm:$0xff]   ;;  %v14888_v35 = vld [vmem:[%s19030_s29 + $0x50] ss:$12 sps:$4 sm:$0xff]  }
 0x155   :  { %1115 = vmatmul.mubr.bf16.gmra.mrb[56].mxu0 %v782_v52  ;;  %v14824_v52 = vld [vmem:[%s19031_s22 + $0x150] ss:$8 sps:$4 sm:$0xff]   ;;  %3115 = vmatprep.subr.bf16.mxu1 %v19039_v25 }
 0x156   :  { %1157 = vmatprep.mubr.bf16.mxu0 %v19039_v25 }
 0x158   :  { %v14804_v2 = vpop.f32.mrb[40].mxu1  ;;  %3116 = vmatpush1.bf16.msra.mxu1 %v14855_v1 }
 0x159   :  { %v14806_v50 = vpop.f32.mrb[41].mxu1  ;;  %3117 = vmatprep.subr.bf16.mxu1 %v19039_v25 }
 0x15a   :  { %v14813_v44 = vpop.f32.mrb[42].mxu1 }
 0x15b   :  { %v14831_v53 = vpop.f32.mrb[43].mxu1 }
 0x15c   :  { %3118 = vmatpush1.bf16.msra.mxu1 %v14888_v35 }
 0x15d   :  { %10563 = vmatmul.mubr.msk.bf16.vlgmr.msra.gmra.mrb[40].mxu0 %vm1026_vm1, %v772_v45  ;;  %v12672_v45 = vld [vmem:[%s18959_s3 + $0x30] ss:$8 sps:$4 sm:$0xff]   ;;  %3119 = vmatprep.subr.bf16.mxu1 %v19039_v25 }
 0x15e   :  { %1424 = vmatpush1.bf16.msra.mxu0 %v12663_v55  ;;  %1167 = vmatprep.mubr.bf16.mxu0 %v19039_v25 }
 0x15f   :  { %1425 = vmatprep.subr.bf16.mxu0 %v12668_v56 }
 0x160   :  { %v14858_v55 = vpop.f32.mrb[44].mxu1 }
 0x161   :  { %v14861_v56 = vpop.f32.mrb[45].mxu1 }
 0x162   :  { %1426 = vmatpush1.bf16.msra.mxu0 %v12666_v59  ;;  %v14871_v59 = vpop.f32.mrb[46].mxu1 }
 0x163   :  { %1427 = vmatprep.subr.bf16.mxu0 %v12671_v60  ;;  %v14876_v60 = vld [vmem:[%s19031_s22 + $0x160] ss:$8 sps:$4 sm:$0xff]  }
 0x165   :  { %10564 = vmatmul.mubr.msk.bf16.gmra.mrb[44].mxu0 %vm1026_vm1, %v775_v26  ;;  %v12681_v26 = vld [vmem:[%s18959_s3 + $0x60] ss:$8 sps:$4 sm:$0xff]  }
 0x166   :  { %1428 = vmatpush1.bf16.msra.mxu0 %v12669_v42  ;;  %1177 = vmatprep.mubr.bf16.mxu0 %v19039_v25  ;;  %v14891_v42 = vpop.f32.mrb[47].mxu1 }
 0x167   :  { %1429 = vmatprep.subr.bf16.mxu0 %v12674_v12 }
 0x16a   :  { %1430 = vmatpush1.bf16.msra.mxu0 %v12672_v45  ;;  %v12699_v45 = vld [vmem:[%s18959_s3 + $0xc0] ss:$8 sps:$4 sm:$0xff]  }
 0x16b   :  { %1431 = vmatprep.subr.bf16.mxu0 %v12677_v14  ;;  %v12707_v14 = vld [vmem:[%s18959_s3 + $0xd4] ss:$8 sps:$4 sm:$0xff]  }
 0x16d   :  { %10565 = vmatmul.mubr.msk.bf16.gmra.mrb[48].mxu0 %vm1026_vm1, %v778_v19  ;;  %v14811_v19 = vld [vmem:[%s19031_s22 + $0x154] ss:$8 sps:$4 sm:$0xff]  }
 0x16e   :  { %1432 = vmatpush1.bf16.msra.mxu0 %v12675_v46  ;;  %1187 = vmatprep.mubr.bf16.mxu0 %v19039_v25  ;;  %v14906_v46 = vld [vmem:[%s19030_s29 + $0x68] ss:$12 sps:$4 sm:$0xff]  }
 0x16f   :  { %1433 = vmatprep.subr.bf16.mxu0 %v12680_v4  ;;  %10864 = vmatprep.mubr.msk.bf16.mxu1 %vm316_vm0, %v14811_v19  ;;  %v14909_v4 = vpop.f32.mrb[48].mxu1 }
 0x170   :  { %3071 = vmatmul.mubr.bf16.gmra.mrb[124].mxu1 %v14824_v52 }
 0x171   :  { %10865 = vmatprep.mubr.msk.bf16.mxu1 %vm316_vm0, %v14866_v57  ;;  %3120 = vmatpush1.bf16.msra.mxu1 %v14906_v46 }
 0x172   :  { %1434 = vmatpush1.bf16.msra.mxu0 %v12678_v36  ;;  %v14911_v36 = vpop.f32.mrb[49].mxu1  ;;  %3121 = vmatprep.subr.bf16.mxu1 %v19039_v25 }
 0x173   :  { %1435 = vmatprep.subr.bf16.mxu0 %v12683_v47  ;;  %v14914_v47 = vpop.f32.mrb[50].mxu1 }
 0x175   :  { %10566 = vmatmul.mubr.msk.bf16.gmra.mrb[52].mxu0 %vm1026_vm1, %v781_v3 }
 0x176   :  { %1436 = vmatpush1.bf16.msra.mxu0 %v12681_v26  ;;  %1197 = vmatprep.mubr.bf16.mxu0 %v19039_v25  ;;  %v14919_v26 = vld [vmem:[%s19031_s22 + $0x174] ss:$8 sps:$4 sm:$0xff]  }
 0x177   :  { %1437 = vmatprep.subr.bf16.mxu0 %v12686_v17  ;;  %v14924_v17 = vld [vmem:[%s19031_s22 + $0x170] ss:$8 sps:$4 sm:$0xff]  }
 0x178   :  { %3081 = vmatmul.mubr.bf16.gmra.mrb[128].mxu1 %v14876_v60 }
 0x179   :  { %10866 = vmatprep.mubr.msk.bf16.mxu1 %vm316_vm0, %v14919_v26 }
 0x17a   :  { %1438 = vmatpush1.bf16.msra.mxu0 %v12684_v22  ;;  %v14931_v22 = vld [vmem:[%s19030_s29 + $0x80] ss:$12 sps:$4 sm:$0xff]  }
 0x17b   :  { %1439 = vmatprep.subr.bf16.mxu0 %v12689_v43  ;;  %19043 = vst [vmem:[#allocation14_spill] sm:$0xff] %v14931_v22  ;;  %3122 = vmatpush1.bf16.msra.mxu1 %v14931_v22  ;;  %v14934_v43 = vpop.f32.mrb[51].mxu1 }
 0x17c   :  { %3123 = vmatprep.subr.bf16.mxu1 %v19039_v25 }
 0x17d   :  { %10567 = vmatmul.mubr.msk.bf16.gmra.mrb[56].mxu0 %vm1026_vm1, %v784_v33 }
 0x17e   :  { %1440 = vmatpush1.bf16.msra.mxu0 %v12687_v5  ;;  %1455 = vmatprep.mubr.bf16.mxu0 %v19042_v30  ;;  %v12705_v5 = vld [vmem:[%s18959_s3 + $0xd0] ss:$8 sps:$4 sm:$0xff]  }
 0x17f   :  { %1441 = vmatprep.subr.bf16.mxu0 %v12692_v29 }
 0x182   :  { %1442 = vmatpush1.bf16.msra.mxu0 %v12690_v37 }
 0x183   :  { %1443 = vmatprep.subr.bf16.mxu0 %v12695_v54 }
 0x186   :  { %1444 = vmatpush1.bf16.msra.mxu0 %v12693_v41 }
 0x187   :  { %1445 = vmatprep.subr.bf16.mxu0 %v12698_v62 }
 0x18a   :  { %1446 = vmatpush1.bf16.msra.mxu0 %v12696_v58 }
 0x18b   :  { %1447 = vmatprep.subr.bf16.mxu0 %v12701_v24 }
 0x18e   :  { %1448 = vmatpush1.bf16.msra.mxu0 %v12699_v45 }
 0x18f   :  { %23 = vsyncpa [#allocation3], 0  ;;  %1449 = vmatprep.subr.bf16.mxu0 %v12707_v14  ;;  %v12710_v37 = vld [vmem:[%s18959_s3 + $0xe4] ss:$8 sps:$4 sm:$0xff]   ;;  %3091 = vmatmul.mubr.bf16.gmra.mrb[132].mxu1 %v14924_v17  ;;  %v14954_v41 = vpop.f32.mrb[52].mxu1  ;;  %vm5867_vm2 = vcmask 1044480  }
 0x190   :  { %v14951_v54 = vld [vmem:[%s19030_s29 + $0x98] ss:$12 sps:$4 sm:$0xff]   ;;  %19045 = vst [vmem:[#allocation16_spill] sm:$0xff] %v14954_v41  ;;  %v12708_v62 = vld [vmem:[%s18959_s3 + $0xe0] ss:$8 sps:$4 sm:$0xff]   ;;  %v14959_v58 = vpop.f32.mrb[53].mxu1 }
 0x191   :  { %19044 = vst [vmem:[#allocation15_spill] sm:$0xff] %v14951_v54  ;;  %3124 = vmatpush1.bf16.msra.mxu1 %v14951_v54  ;;  %v12716_v24 = vld [vmem:[%s18959_s3 + $0xf4] ss:$8 sps:$4 sm:$0xff]   ;;  %v14965_v45 = vpop.f32.mrb[54].mxu1  ;;  %v12714_v29 = vld [vmem:[%s18959_s3 + $0xf0] ss:$8 sps:$4 sm:$0xff]  }
 0x192   :  { %1450 = vmatpush1.bf16.msra.mxu0 %v12705_v5  ;;  %3125 = vmatprep.subr.bf16.mxu1 %v19039_v25  ;;  %19046 = vst [vmem:[#allocation17_spill] sm:$0xff] %v14965_v45  ;;  %v14970_v14 = vld [vmem:[%s19031_s22 + $0x184] ss:$8 sps:$4 sm:$0x1f]   ;;  %v14985_v30 = vpop.f32.mrb[55].mxu1  ;;  %v19050_v45 = vpack.c.bf16 %v14507_v10, %v14499_v7  ;;  %vm5857_vm3 = vcmask 605184  }
 0x193   :  { %1451 = vmatprep.subr.bf16.mxu0 %v12710_v37  ;;  %v14975_v5 = vld [vmem:[%s19031_s22 + $0x180] ss:$8 sps:$4 sm:$0x1f]   ;;  %10867 = vmatprep.mubr.msk.bf16.mxu1 %vm316_vm0, %v14970_v14  ;;  %v14982_v37 = vld [vmem:[%s19030_s29 + $0xb0] ss:$12 sps:$4 sm:$0xff]   ;;  %v15007_v33 = vpop.f32.mrb[56].mxu1 }
 0x194   :  { %v12728_v13 = vld [vmem:[%s18959_s3 + $0x104] ss:$8 sps:$4 sm:$0xff]   ;;  %19048 = vst [vmem:[#allocation19_spill] sm:$0xff] %v15007_v33  ;;  %v15012_v12 = vpop.f32.mrb[57].mxu1  ;;  %v12729_v40 = vld [vmem:[%s18959_s3 + $0x110] ss:$8 sps:$4 sm:$0xff]  }
 0x195   :  { %3126 = vmatpush1.bf16.msra.mxu1 %v14982_v37  ;;  %v15018_v3 = vpop.f32.mrb[58].mxu1  ;;  %v15028_v41 = vld [vmem:[%s19030_s29 + $0xe0] ss:$12 sps:$4 sm:$0xff]   ;;  %vm6241_vm4 = vcmask 1046528   ;;  %vm6231_vm5 = vcmask 769024   ;;  %vm7680_vm6 = vcmask 1040384  }
 0x196   :  { %1452 = vmatpush1.bf16.msra.mxu0 %v12708_v62  ;;  %3127 = vmatprep.subr.bf16.mxu1 %v19039_v25  ;;  %v15004_v62 = vld [vmem:[%s19030_s29 + $0xc8] ss:$12 sps:$4 sm:$0xff]   ;;  %v15056_v10 = vld [vmem:[%s19030_s29] ss:$12 sps:$4 sm:$0xff]   ;;  %vm7676_vm7 = vcmask 277504   ;;  %vm7973_vm8 = vcmask 1045504  }
 0x197   :  { %1453 = vmatprep.subr.bf16.mxu0 %v12716_v24  ;;  %3101 = vmatmul.mubr.bf16.gmra.mrb[136].mxu1 %v14975_v5  ;;  %19047 = vst [vmem:[#allocation18_spill] sm:$0xff] %v15004_v62  ;;  %v12726_v24 = vld [vmem:[%s18959_s3 + $0x100] ss:$8 sps:$4 sm:$0xff]   ;;  %vm8549_vm9 = vcmask 1041408   ;;  %vm13711_vm10 = vmmov 0   ;;  %s19204_s20 = sld [smem:[#allocation36_spill]] }
 0x198   :  { %10868 = vmatprep.mubr.msk.bf16.mxu1 %vm316_vm0, %v14778_v49  ;;  %v12731_v49 = vld [vmem:[%s18959_s3 + $0x114] ss:$8 sps:$4 sm:$0xff]   ;;  %vm8545_vm11 = vcmask 31744   ;;  %vm7969_vm12 = vcmask 621568   ;;  %vm10387_vm13 = vcmask 410624  }
 0x199   :  { %3128 = vmatpush1.bf16.msra.mxu1 %v15004_v62  ;;  %v15098_v33 = vld [vmem:[%s19030_s29 + $0x34] ss:$12 sps:$4 sm:$0xff]  }
 0x19a   :  { %1454 = vmatpush1.bf16.msra.mxu0 %v12714_v29  ;;  %3129 = vmatprep.subr.bf16.mxu1 %v19039_v25  ;;  %v19049_v29 = vpack.c.bf16 %v14476_v63, %v14472_v61  ;;  %v12734_v63 = vld [vmem:[%s18959_s3 + $0x124] ss:$8 sps:$4 sm:$0xff]   ;;  %v12735_v61 = vld [vmem:[%s18959_s3 + $0x130] ss:$8 sps:$4 sm:$0xff]  }
 0x19b   :  { %1506 = vmatprep.subr.bf16.mxu0 %v12728_v13  ;;  %v15031_v13 = vpop.f32.mrb[59].mxu1 }
 0x19c   :  { %v15051_v7 = vpop.f32.mrb[60].mxu1 }
 0x19d   :  { %1456 = vmatmul.mubr.bf16.vlgmr.msra.gmra.mrb[40].mxu0 %v19049_v29  ;;  %3130 = vmatpush1.bf16.msra.mxu1 %v15028_v41  ;;  %v15047_v29 = vld [vmem:[%s19030_s29 + $0x4] ss:$12 sps:$4 sm:$0xff]  }
 0x19e   :  { %1465 = vmatprep.mubr.bf16.mxu0 %v19050_v45  ;;  %1507 = vmatpush1.bf16.msra.mxu0 %v12726_v24  ;;  %v12732_v45 = vld [vmem:[%s18959_s3 + $0x120] ss:$8 sps:$4 sm:$0xff]   ;;  %v1779_v24 = vpop.f32.mrb[61].mxu1 }
 0x19f   :  { %1508 = vmatprep.subr.bf16.mxu0 %v12731_v49  ;;  %3712 = vmatprep.subr.bf16.mxu1 %v15047_v29  ;;  %v12737_v49 = vld [vmem:[%s18959_s3 + $0x134] ss:$8 sps:$4 sm:$0xff]   ;;  %v15081_v24 = vld [vmem:[%s19030_s29 + $0x18] ss:$12 sps:$4 sm:$0xff]  }
 0x1a0   :  { %3144 = vmatmul.mubr.bf16.vlgmr.msra.gmra.mrb[140].mxu1 %v14773_v48  ;;  %v15067_v48 = vld [vmem:[%s19030_s29 + $0x1c] ss:$12 sps:$4 sm:$0xff]  }
 0x1a1   :  { %3713 = vmatpush1.bf16.msra.mxu1 %v15056_v10  ;;  %10869 = vmatprep.mubr.msk.bf16.mxu1 %vm316_vm0, %v14811_v19  ;;  %v15076_v19 = vpop.f32.mrb[62].mxu1 }
 0x1a2   :  { %1509 = vmatpush1.bf16.msra.mxu0 %v12729_v40  ;;  %3714 = vmatprep.subr.bf16.mxu1 %v15067_v48  ;;  %v19051_v40 = vpack.c.bf16 %v14502_v8, %v14496_v6  ;;  %v1782_v8 = vpop.f32.mrb[63].mxu1  ;;  %v19066_v6 = vld [vmem:[#allocation7_spill] sm:$0xff] }
 0x1a3   :  { %1510 = vmatprep.subr.bf16.mxu0 %v12734_v63  ;;  %v19052_v63 = vpack.c.bf16 %v14542_v23, %v14532_v18  ;;  %v15105_v18 = vld [vmem:[%s19030_s29 + $0x30] ss:$12 sps:$4 sm:$0xff]   ;;  %v15113_v23 = vld [vmem:[%s19030_s29 + $0x4c] ss:$12 sps:$4 sm:$0xff]  }
 0x1a5   :  { %1466 = vmatmul.mubr.bf16.gmra.mrb[44].mxu0 %v19051_v40  ;;  %3715 = vmatpush1.bf16.msra.mxu1 %v15081_v24  ;;  %v12740_v40 = vld [vmem:[%s18959_s3 + $0x284] ss:$8 sps:$4 sm:$0xff]  }
 0x1a6   :  { %1475 = vmatprep.mubr.bf16.mxu0 %v19052_v63  ;;  %1511 = vmatpush1.bf16.msra.mxu0 %v12732_v45  ;;  %v15122_v45 = vld [vmem:[%s19030_s29 + $0x48] ss:$12 sps:$4 sm:$0xff]  }
 0x1a7   :  { %1512 = vmatprep.subr.bf16.mxu0 %v12737_v49  ;;  %3716 = vmatprep.subr.bf16.mxu1 %v15098_v33  ;;  %v15213_v49 = vld [vmem:[%s19030_s29 + $0xdc] ss:$12 sps:$4 sm:$0xff]  }
 0x1a8   :  { %3152 = vmatmul.mubr.bf16.gmra.mrb[144].mxu1 %v14824_v52  ;;  %v19053_v52 = vpack.c.bf16 %v14537_v21, %v14527_v16  ;;  %v15138_v16 = vld [vmem:[%s19030_s29 + $0x60] ss:$12 sps:$4 sm:$0xff]   ;;  %v15146_v21 = vld [vmem:[%s19030_s29 + $0x7c] ss:$12 sps:$4 sm:$0xff]  }
 0x1a9   :  { %3717 = vmatpush1.bf16.msra.mxu1 %v15105_v18  ;;  %10870 = vmatprep.mubr.msk.bf16.mxu1 %vm316_vm0, %v14866_v57  ;;  %v19054_v57 = vpack.c.bf16 %v14577_v20, %v14567_v28  ;;  %v19055_v28 = vpack.c.bf16 %v14572_v39, %v14562_v31  ;;  %v15155_v20 = vld [vmem:[%s19030_s29 + $0x78] ss:$12 sps:$4 sm:$0xff]   ;;  %v15171_v31 = vld [vmem:[%s19030_s29 + $0x90] ss:$12 sps:$4 sm:$0xff]   ;;  %v19057_v39 = vpack.c.bf16 %v14607_v9, %v14597_v15  ;;  %v15202_v9 = vld [vmem:[%s19030_s29 + $0xc0] ss:$12 sps:$4 sm:$0xff]  }
 0x1aa   :  { %1513 = vmatpush1.bf16.msra.mxu0 %v12735_v61  ;;  %3718 = vmatprep.subr.bf16.mxu1 %v15113_v23  ;;  %v15131_v61 = vld [vmem:[%s19030_s29 + $0x64] ss:$12 sps:$4 sm:$0xff]   ;;  %v12738_v15 = vld [vmem:[%s18959_s3 + $0x280] ss:$8 sps:$4 sm:$0xff]  }
 0x1ab   :  { %2087 = vmatprep.subr.bf16.mxu0 %v12740_v40  ;;  %v19060_v40 = vld [vmem:[#allocation6_spill] sm:$0xff] }
 0x1ad   :  { %1476 = vmatmul.mubr.bf16.gmra.mrb[48].mxu0 %v19053_v52  ;;  %3719 = vmatpush1.bf16.msra.mxu1 %v15122_v45  ;;  %v19061_v52 = vld [vmem:[#allocation5_spill] sm:$0xff] }
 0x1ae   :  { %1485 = vmatprep.mubr.bf16.mxu0 %v19054_v57  ;;  %3720 = vmatprep.subr.bf16.mxu1 %v15131_v61  ;;  %v19062_v57 = vpack.c.bf16 %v19060_v40, %v19061_v52  ;;  %v12746_v40 = vld [vmem:[%s18959_s3 + $0x2a4] ss:$8 sps:$4 sm:$0xff]   ;;  %v12744_v52 = vld [vmem:[%s18959_s3 + $0x2a0] ss:$8 sps:$4 sm:$0xff]  }
 0x1b0   :  { %3160 = vmatmul.mubr.bf16.gmra.mrb[148].mxu1 %v14876_v60  ;;  %v19056_v60 = vpack.c.bf16 %v14612_v11, %v14602_v32  ;;  %v15179_v11 = vld [vmem:[%s19030_s29 + $0xac] ss:$12 sps:$4 sm:$0xff]   ;;  %v15188_v32 = vld [vmem:[%s19030_s29 + $0xa8] ss:$12 sps:$4 sm:$0xff]  }
 0x1b1   :  { %3721 = vmatpush1.bf16.msra.mxu1 %v15138_v16  ;;  %10871 = vmatprep.mubr.msk.bf16.mxu1 %vm316_vm0, %v14919_v26  ;;  %v15164_v26 = vld [vmem:[%s19030_s29 + $0x94] ss:$12 sps:$4 sm:$0xff]  }
 0x1b2   :  { %3722 = vmatprep.subr.bf16.mxu1 %v15146_v21 }
 0x1b5   :  { %1486 = vmatmul.mubr.bf16.gmra.mrb[52].mxu0 %v19055_v28  ;;  %3723 = vmatpush1.bf16.msra.mxu1 %v15155_v20  ;;  %v19065_v28 = vld [vmem:[#allocation8_spill] sm:$0xff] }
 0x1b6   :  { %1495 = vmatprep.mubr.bf16.mxu0 %v19056_v60  ;;  %3724 = vmatprep.subr.bf16.mxu1 %v15164_v26 }
 0x1b8   :  { %3168 = vmatmul.mubr.bf16.gmra.mrb[152].mxu1 %v14924_v17  ;;  %v15195_v17 = vld [vmem:[%s19030_s29 + $0xc4] ss:$12 sps:$4 sm:$0xff]  }
 0x1b9   :  { %3725 = vmatpush1.bf16.msra.mxu1 %v15171_v31  ;;  %10872 = vmatprep.mubr.msk.bf16.mxu1 %vm316_vm0, %v14970_v14  ;;  %v15208_v14 = vpop.f32.mrb[64].mxu1 }
 0x1ba   :  { %3726 = vmatprep.subr.bf16.mxu1 %v15179_v11  ;;  %19058 = vst [vmem:[#allocation20_spill] sm:$0xff] %v15208_v14  ;;  %v1787_v63 = vpop.f32.mrb[65].mxu1  ;;  %v19067_v14 = vpack.c.bf16 %v19065_v28, %v19066_v6  ;;  %v12750_v6 = vld [vmem:[%s18959_s3 + $0x2c0] ss:$8 sps:$4 sm:$0xff]  }
 0x1bb   :  { %v15219_v8 = vpop.f32.mrb[66].mxu1  ;;  %v12741_v63 = vld [vmem:[%s18959_s3 + $0x290] ss:$8 sps:$4 sm:$0xff]  }
 0x1bc   :  { %19059 = vst [vmem:[#allocation21_spill] sm:$0xff] %v15219_v8  ;;  %v1790_v60 = vpop.f32.mrb[67].mxu1 }
 0x1bd   :  { %1496 = vmatmul.mubr.bf16.gmra.mrb[56].mxu0 %v19057_v39  ;;  %3727 = vmatpush1.bf16.msra.mxu1 %v15188_v32  ;;  %v15230_v39 = vld [vmem:[%s19030_s29 + $0xd8] ss:$12 sps:$4 sm:$0xff]  }
 0x1be   :  { %1538 = vmatprep.mubr.bf16.mxu0 %v19039_v25  ;;  %3728 = vmatprep.subr.bf16.mxu1 %v15195_v17 }
 0x1c0   :  { %3176 = vmatmul.mubr.bf16.gmra.mrb[156].mxu1 %v14975_v5  ;;  %v12743_v5 = vld [vmem:[%s18959_s3 + $0x294] ss:$8 sps:$4 sm:$0xff]  }
 0x1c1   :  { %3729 = vmatpush1.bf16.msra.mxu1 %v15202_v9 }
 0x1c2   :  { %3730 = vmatprep.subr.bf16.mxu1 %v15213_v49 }
 0x1c5   :  { %10608 = vmatmul.mubr.msk.bf16.vlgmr.msra.gmra.mrb[40].mxu0 %vm1026_vm1, %v19062_v57  ;;  %3731 = vmatpush1.bf16.msra.mxu1 %v15230_v39  ;;  %v15244_v57 = vpop.f32.mrb[68].mxu1 }
 0x1c6   :  { %2088 = vmatpush1.bf16.msra.mxu0 %v12738_v15  ;;  %1548 = vmatprep.mubr.bf16.mxu0 %v19039_v25  ;;  %19063 = vst [vmem:[#allocation6_spill] sm:$0xff] %v15244_v57  ;;  %v12749_v15 = vld [vmem:[%s18959_s3 + $0x2b4] ss:$8 sps:$4 sm:$0xff]   ;;  %v1795_v60 = vpop.f32.mrb[69].mxu1 }
 0x1c7   :  { %2089 = vmatprep.subr.bf16.mxu0 %v12743_v5  ;;  %3795 = vmatprep.subr.bf16.mxu1 %v19039_v25  ;;  %v15249_v5 = vpop.f32.mrb[70].mxu1  ;;  %v12752_v60 = vld [vmem:[%s18959_s3 + $0x2c4] ss:$8 sps:$4 sm:$0xff]  }
 0x1c8   :  { %19064 = vst [vmem:[#allocation5_spill] sm:$0xff] %v15249_v5  ;;  %v1798_v8 = vpop.f32.mrb[71].mxu1 }
 0x1c9   :  { %v12755_v8 = vld [vmem:[%s18959_s3 + $0x2d4] ss:$8 sps:$4 sm:$0xff]  }
 0x1ca   :  { %2090 = vmatpush1.bf16.msra.mxu0 %v12741_v63  ;;  %v19071_v63 = vld [vmem:[#allocation9_spill] sm:$0xff] }
 0x1cb   :  { %2091 = vmatprep.subr.bf16.mxu0 %v12746_v40  ;;  %v12747_v40 = vld [vmem:[%s18959_s3 + $0x2b0] ss:$8 sps:$4 sm:$0xff]  }
 0x1cd   :  { %10609 = vmatmul.mubr.msk.bf16.gmra.mrb[44].mxu0 %vm1026_vm1, %v19067_v14  ;;  %v15267_v14 = vpop.f32.mrb[72].mxu1 }
 0x1ce   :  { %2092 = vmatpush1.bf16.msra.mxu0 %v12744_v52  ;;  %1558 = vmatprep.mubr.bf16.mxu0 %v19039_v25  ;;  %19068 = vst [vmem:[#allocation8_spill] sm:$0xff] %v15267_v14  ;;  %v1803_v28 = vpop.f32.mrb[73].mxu1 }
 0x1cf   :  { %2093 = vmatprep.subr.bf16.mxu0 %v12749_v15  ;;  %v15272_v52 = vpop.f32.mrb[74].mxu1  ;;  %v19070_v15 = vld [vmem:[#allocation10_spill] sm:$0xff] }
 0x1d0   :  { %19069 = vst [vmem:[#allocation7_spill] sm:$0xff] %v15272_v52  ;;  %v19072_v57 = vpack.c.bf16 %v19070_v15, %v19071_v63  ;;  %v1806_v5 = vpop.f32.mrb[75].mxu1  ;;  %v12758_v28 = vld [vmem:[%s18959_s3 + $0x2e4] ss:$8 sps:$4 sm:$0xff]   ;;  %v15303_v15 = vld [vmem:[%s19031_s22 + $0x194] ss:$8 sps:$4 sm:$0xff]  }
 0x1d1   :  { %v12761_v5 = vld [vmem:[%s18959_s3 + $0x2f4] ss:$8 sps:$4 sm:$0xff]   ;;  %v15293_v63 = vpop.f32.mrb[76].mxu1  ;;  %10978 = vmatprep.mubr.msk.bf16.mxu1 %vm316_vm0, %v15303_v15  ;;  %v12759_v52 = vld [vmem:[%s18959_s3 + $0x2f0] ss:$8 sps:$4 sm:$0xff]  }
 0x1d2   :  { %2094 = vmatpush1.bf16.msra.mxu0 %v12747_v40  ;;  %19073 = vst [vmem:[#allocation10_spill] sm:$0xff] %v15293_v63  ;;  %v19075_v40 = vld [vmem:[#allocation11_spill] sm:$0xff] }
 0x1d3   :  { %2095 = vmatprep.subr.bf16.mxu0 %v12752_v60  ;;  %v12753_v60 = vld [vmem:[%s18959_s3 + $0x2d0] ss:$8 sps:$4 sm:$0xff]   ;;  %v19076_v14 = vpack.c.bf16 %v14632_v0, %v19075_v40  ;;  %v12764_v0 = vld [vmem:[%s18959_s3 + $0x304] ss:$8 sps:$4 sm:$0xff]  }
 0x1d5   :  { %10610 = vmatmul.mubr.msk.bf16.gmra.mrb[48].mxu0 %vm1026_vm1, %v19072_v57  ;;  %v12756_v57 = vld [vmem:[%s18959_s3 + $0x2e0] ss:$8 sps:$4 sm:$0xff]  }
 0x1d6   :  { %2096 = vmatpush1.bf16.msra.mxu0 %v12750_v6  ;;  %1568 = vmatprep.mubr.bf16.mxu0 %v19039_v25  ;;  %v1811_v6 = vpop.f32.mrb[77].mxu1 }
 0x1d7   :  { %2097 = vmatprep.subr.bf16.mxu0 %v12755_v8  ;;  %v15298_v8 = vld [vmem:[%s19031_s22 + $0x190] ss:$8 sps:$4 sm:$0xff]  }
 0x1d8   :  { %3745 = vmatmul.mubr.bf16.vlgmr.msra.gmra.mrb[160].mxu1 %v15298_v8 }
 0x1d9   :  { %3796 = vmatpush1.bf16.msra.mxu1 %v14794_v27  ;;  %v19080_v27 = vpack.c.bf16 %v14831_v53, %v14806_v50  ;;  %v12768_v50 = vld [vmem:[%s18959_s3 + $0x320] ss:$8 sps:$4 sm:$0xff]   ;;  %v12773_v53 = vld [vmem:[%s18959_s3 + $0x334] ss:$8 sps:$4 sm:$0xff]  }
 0x1da   :  { %2098 = vmatpush1.bf16.msra.mxu0 %v12753_v60  ;;  %v15305_v60 = vpop.f32.mrb[78].mxu1  ;;  %3797 = vmatprep.subr.bf16.mxu1 %v19039_v25 }
 0x1db   :  { %2099 = vmatprep.subr.bf16.mxu0 %v12758_v28  ;;  %19074 = vst [vmem:[#allocation9_spill] sm:$0xff] %v15305_v60  ;;  %v1814_v6 = vpop.f32.mrb[79].mxu1 }
 0x1dc   :  { %v15328_v40 = vpop.f32.mrb[80].mxu1  ;;  %v15338_v6 = vld [vmem:[%s19031_s22 + $0x1a4] ss:$8 sps:$4 sm:$0xff]  }
 0x1dd   :  { %10611 = vmatmul.mubr.msk.bf16.gmra.mrb[52].mxu0 %vm1026_vm1, %v19076_v14  ;;  %v12762_v14 = vld [vmem:[%s18959_s3 + $0x300] ss:$8 sps:$4 sm:$0xff]   ;;  %19077 = vst [vmem:[#allocation11_spill] sm:$0xff] %v15328_v40  ;;  %3798 = vmatpush1.bf16.msra.mxu1 %v14818_v51  ;;  %v12765_v51 = vld [vmem:[%s18959_s3 + $0x310] ss:$8 sps:$4 sm:$0xff]  }
 0x1de   :  { %2100 = vmatpush1.bf16.msra.mxu0 %v12756_v57  ;;  %1578 = vmatprep.mubr.bf16.mxu0 %v19039_v25  ;;  %v12767_v57 = vld [vmem:[%s18959_s3 + $0x314] ss:$8 sps:$4 sm:$0xff]  }
 0x1df   :  { %2101 = vmatprep.subr.bf16.mxu0 %v12761_v5  ;;  %v15333_v5 = vpop.f32.mrb[81].mxu1  ;;  %10979 = vmatprep.mubr.msk.bf16.mxu1 %vm316_vm0, %v15338_v6 }
 0x1e0   :  { %v15340_v28 = vpop.f32.mrb[82].mxu1  ;;  %3799 = vmatprep.subr.bf16.mxu1 %v19039_v25 }
 0x1e1   :  { %19078 = vst [vmem:[#allocation22_spill] sm:$0xff] %v15340_v28  ;;  %v15356_v60 = vpop.f32.mrb[83].mxu1  ;;  %3800 = vmatpush1.bf16.msra.mxu1 %v14855_v1  ;;  %v12780_v28 = vld [vmem:[%s18959_s3 + $0x350] ss:$8 sps:$4 sm:$0xff]  }
 0x1e2   :  { %2102 = vmatpush1.bf16.msra.mxu0 %v12759_v52  ;;  %v15346_v52 = vld [vmem:[%s19031_s22 + $0x1a0] ss:$8 sps:$4 sm:$0xff]   ;;  %3801 = vmatprep.subr.bf16.mxu1 %v19039_v25 }
 0x1e3   :  { %2103 = vmatprep.subr.bf16.mxu0 %v12764_v0  ;;  %v19079_v0 = vpack.c.bf16 %v14651_v34, %v14648_v38  ;;  %v12770_v38 = vld [vmem:[%s18959_s3 + $0x324] ss:$8 sps:$4 sm:$0xff]   ;;  %3755 = vmatmul.mubr.bf16.gmra.mrb[164].mxu1 %v15346_v52  ;;  %v12771_v34 = vld [vmem:[%s18959_s3 + $0x330] ss:$8 sps:$4 sm:$0xff]  }
 0x1e5   :  { %10612 = vmatmul.mubr.msk.bf16.gmra.mrb[56].mxu0 %vm1026_vm1, %v19079_v0  ;;  %v15393_v0 = vld [vmem:[%s19031_s22 + $0x1b0] ss:$8 sps:$4 sm:$0xff]   ;;  %3802 = vmatpush1.bf16.msra.mxu1 %v14888_v35 }
 0x1e6   :  { %2104 = vmatpush1.bf16.msra.mxu0 %v12762_v14  ;;  %2119 = vmatprep.mubr.bf16.mxu0 %v19080_v27  ;;  %v15375_v27 = vpop.f32.mrb[84].mxu1 }
 0x1e7   :  { %2105 = vmatprep.subr.bf16.mxu0 %v12767_v57  ;;  %19081 = vst [vmem:[#allocation23_spill] sm:$0xff] %v15375_v27  ;;  %v15381_v14 = vpop.f32.mrb[85].mxu1  ;;  %v15386_v57 = vld [vmem:[%s19031_s22 + $0x1b4] ss:$8 sps:$4 sm:$0xff]   ;;  %3803 = vmatprep.subr.bf16.mxu1 %v19039_v25 }
 0x1e8   :  { %19082 = vst [vmem:[#allocation24_spill] sm:$0xff] %v15381_v14  ;;  %10980 = vmatprep.mubr.msk.bf16.mxu1 %vm316_vm0, %v15386_v57  ;;  %v15429_v14 = vld [vmem:[%s19031_s22 + $0x1c4] ss:$8 sps:$4 sm:$0xff]  }
 0x1e9   :  { %3804 = vmatpush1.bf16.msra.mxu1 %v14906_v46 }
 0x1ea   :  { %2106 = vmatpush1.bf16.msra.mxu0 %v12765_v51  ;;  %v15388_v51 = vpop.f32.mrb[86].mxu1  ;;  %3805 = vmatprep.subr.bf16.mxu1 %v19039_v25 }
 0x1eb   :  { %2107 = vmatprep.subr.bf16.mxu0 %v12770_v38  ;;  %19083 = vst [vmem:[#allocation25_spill] sm:$0xff] %v15388_v51  ;;  %v15400_v63 = vpop.f32.mrb[87].mxu1  ;;  %v12776_v38 = vld [vmem:[%s18959_s3 + $0x344] ss:$8 sps:$4 sm:$0xff]   ;;  %3765 = vmatmul.mubr.bf16.gmra.mrb[168].mxu1 %v15393_v0 }
 0x1ec   :  { %19084 = vst [vmem:[#allocation26_spill] sm:$0xff] %v15400_v63  ;;  %v15413_v27 = vpop.f32.mrb[88].mxu1  ;;  %v15436_v63 = vld [vmem:[%s19031_s22 + $0x1c0] ss:$8 sps:$4 sm:$0xff]   ;;  %10981 = vmatprep.mubr.msk.bf16.mxu1 %vm316_vm0, %v15429_v14 }
 0x1ed   :  { %19085 = vst [vmem:[#allocation27_spill] sm:$0xff] %v15413_v27  ;;  %v15418_v51 = vpop.f32.mrb[89].mxu1  ;;  %3806 = vmatpush1.bf16.msra.mxu1 %v14931_v22  ;;  %v12785_v27 = vld [vmem:[%s18959_s3 + $0x364] ss:$8 sps:$4 sm:$0xff]  }
 0x1ee   :  { %2108 = vmatpush1.bf16.msra.mxu0 %v12768_v50  ;;  %v12774_v50 = vld [vmem:[%s18959_s3 + $0x340] ss:$8 sps:$4 sm:$0xff]   ;;  %19086 = vst [vmem:[#allocation28_spill] sm:$0xff] %v15418_v51  ;;  %v15424_v40 = vpop.f32.mrb[90].mxu1  ;;  %3807 = vmatprep.subr.bf16.mxu1 %v19039_v25 }
 0x1ef   :  { %2109 = vmatprep.subr.bf16.mxu0 %v12773_v53  ;;  %v12782_v53 = vld [vmem:[%s18959_s3 + $0x354] ss:$8 sps:$4 sm:$0xff]   ;;  %19087 = vst [vmem:[#allocation29_spill] sm:$0xff] %v15424_v40 }
 0x1f0   :  { %v15470_v51 = vld [vmem:[%s19031_s22 + $0x1d4] ss:$8 sps:$4 sm:$0x1f]  }
 0x1f1   :  { %3808 = vmatpush1.bf16.msra.mxu1 %v14951_v54  ;;  %v12789_v54 = vld [vmem:[%s18959_s3 + $0x370] ss:$8 sps:$4 sm:$0xff]  }
 0x1f2   :  { %2110 = vmatpush1.bf16.msra.mxu0 %v12771_v34  ;;  %3809 = vmatprep.subr.bf16.mxu1 %v19039_v25 }
 0x1f3   :  { %2111 = vmatprep.subr.bf16.mxu0 %v12776_v38  ;;  %v15441_v38 = vpop.f32.mrb[91].mxu1  ;;  %3775 = vmatmul.mubr.bf16.gmra.mrb[172].mxu1 %v15436_v63 }
 0x1f4   :  { %19088 = vst [vmem:[#allocation30_spill] sm:$0xff] %v15441_v38  ;;  %v15454_v40 = vpop.f32.mrb[92].mxu1  ;;  %v15477_v38 = vld [vmem:[%s19031_s22 + $0x1d0] ss:$8 sps:$4 sm:$0x1f]   ;;  %10982 = vmatprep.mubr.msk.bf16.mxu1 %vm316_vm0, %v15470_v51 }
 0x1f5   :  { %19089 = vst [vmem:[#allocation31_spill] sm:$0xff] %v15454_v40  ;;  %v15459_v22 = vpop.f32.mrb[93].mxu1  ;;  %3810 = vmatpush1.bf16.msra.mxu1 %v14982_v37  ;;  %v12803_v40 = vld [vmem:[%s18959_s3 + $0x384] ss:$8 sps:$4 sm:$0xff]  }
 0x1f6   :  { %2112 = vmatpush1.bf16.msra.mxu0 %v12774_v50  ;;  %v12783_v50 = vld [vmem:[%s18959_s3 + $0x360] ss:$8 sps:$4 sm:$0xff]   ;;  %19090 = vst [vmem:[#allocation32_spill] sm:$0xff] %v15459_v22  ;;  %v15465_v34 = vpop.f32.mrb[94].mxu1  ;;  %3811 = vmatprep.subr.bf16.mxu1 %v19039_v25 }
 0x1f7   :  { %2113 = vmatprep.subr.bf16.mxu0 %v12782_v53  ;;  %v12791_v53 = vld [vmem:[%s18959_s3 + $0x374] ss:$8 sps:$4 sm:$0xff]   ;;  %19091 = vst [vmem:[#allocation33_spill] sm:$0xff] %v15465_v34 }
 0x1f9   :  { %3812 = vmatpush1.bf16.msra.mxu1 %v15004_v62  ;;  %v12804_v62 = vld [vmem:[%s18959_s3 + $0x390] ss:$8 sps:$4 sm:$0xff]  }
 0x1fa   :  { %2114 = vmatpush1.bf16.msra.mxu0 %v12780_v28  ;;  %v12801_v28 = vld [vmem:[%s18959_s3 + $0x380] ss:$8 sps:$4 sm:$0xff]   ;;  %3813 = vmatprep.subr.bf16.mxu1 %v19039_v25 }
 0x1fb   :  { %2115 = vmatprep.subr.bf16.mxu0 %v12785_v27  ;;  %v15482_v27 = vpop.f32.mrb[95].mxu1  ;;  %3785 = vmatmul.mubr.bf16.gmra.mrb[176].mxu1 %v15477_v38 }
 0x1fc   :  { %19092 = vst [vmem:[#allocation34_spill] sm:$0xff] %v15482_v27  ;;  %10983 = vmatprep.mubr.msk.bf16.mxu1 %vm316_vm0, %v15303_v15 }
 0x1fd   :  { %3814 = vmatpush1.bf16.msra.mxu1 %v15028_v41 }
 0x1fe   :  { %2116 = vmatpush1.bf16.msra.mxu0 %v12783_v50  ;;  %v15497_v50 = vpop.f32.mrb[96].mxu1  ;;  %4396 = vmatprep.subr.bf16.mxu1 %v15047_v29 }
 0x1ff   :  { %2117 = vmatprep.subr.bf16.mxu0 %v12791_v53  ;;  %v15502_v34 = vpop.f32.mrb[97].mxu1  ;;  %v12806_v53 = vld [vmem:[%s18959_s3 + $0x394] ss:$8 sps:$4 sm:$0xff]  }
 0x200   :  { %v15508_v22 = vpop.f32.mrb[98].mxu1 }
 0x201   :  { %v15516_v27 = vpop.f32.mrb[99].mxu1 }
 0x202   :  { %2118 = vmatpush1.bf16.msra.mxu0 %v12789_v54  ;;  %v19093_v54 = vpack.c.bf16 %v14813_v44, %v14804_v2  ;;  %v12809_v2 = vld [vmem:[%s18959_s3 + $0x3a4] ss:$8 sps:$4 sm:$0xff]   ;;  %v15531_v44 = vpop.f32.mrb[100].mxu1 }
 0x203   :  { %2170 = vmatprep.subr.bf16.mxu0 %v12803_v40  ;;  %v19094_v40 = vpack.c.bf16 %v14891_v42, %v14861_v56  ;;  %3828 = vmatmul.mubr.bf16.vlgmr.msra.gmra.mrb[180].mxu1 %v15298_v8  ;;  %v12807_v56 = vld [vmem:[%s18959_s3 + $0x3a0] ss:$8 sps:$4 sm:$0xff]   ;;  %v2463_v42 = vpop.f32.mrb[101].mxu1  ;;  %v12812_v8 = vld [vmem:[%s18959_s3 + $0x3b4] ss:$8 sps:$4 sm:$0xff]  }
 0x204   :  { %4397 = vmatpush1.bf16.msra.mxu1 %v15056_v10  ;;  %10984 = vmatprep.mubr.msk.bf16.mxu1 %vm316_vm0, %v15338_v6  ;;  %v12810_v6 = vld [vmem:[%s18959_s3 + $0x3b0] ss:$8 sps:$4 sm:$0xff]  }
 0x205   :  { %2120 = vmatmul.mubr.bf16.vlgmr.msra.gmra.mrb[40].mxu0 %v19093_v54  ;;  %4398 = vmatprep.subr.bf16.mxu1 %v15067_v48 }
 0x206   :  { %2129 = vmatprep.mubr.bf16.mxu0 %v19094_v40  ;;  %2171 = vmatpush1.bf16.msra.mxu0 %v12801_v28  ;;  %v19095_v28 = vpack.c.bf16 %v14871_v59, %v14858_v55  ;;  %v12815_v55 = vld [vmem:[%s18959_s3 + $0x3c4] ss:$8 sps:$4 sm:$0xff]   ;;  %v19097_v59 = vpack.c.bf16 %v14914_v47, %v14909_v4  ;;  %v19100_v4 = vld [vmem:[#allocation16_spill] sm:$0xff] }
 0x207   :  { %2172 = vmatprep.subr.bf16.mxu0 %v12806_v53  ;;  %v15546_v53 = vpop.f32.mrb[102].mxu1 }
 0x208   :  { %4399 = vmatpush1.bf16.msra.mxu1 %v15081_v24  ;;  %v2466_v40 = vpop.f32.mrb[103].mxu1 }
 0x209   :  { %4400 = vmatprep.subr.bf16.mxu1 %v15098_v33 }
 0x20a   :  { %2173 = vmatpush1.bf16.msra.mxu0 %v12804_v62  ;;  %v19096_v62 = vpack.c.bf16 %v14934_v43, %v14911_v36  ;;  %v19098_v36 = vpack.c.bf16 %v14985_v30, %v14959_v58  ;;  %v19099_v43 = vld [vmem:[#allocation17_spill] sm:$0xff]  ;;  %v19102_v30 = vpack.c.bf16 %v15031_v13, %v15012_v12  ;;  %v19103_v58 = vld [vmem:[#allocation19_spill] sm:$0xff]  ;;  %v15603_v13 = vpop.f32.mrb[104].mxu1 }
 0x20b   :  { %2174 = vmatprep.subr.bf16.mxu0 %v12809_v2  ;;  %3836 = vmatmul.mubr.bf16.gmra.mrb[184].mxu1 %v15346_v52  ;;  %v19101_v47 = vpack.c.bf16 %v19099_v43, %v19100_v4  ;;  %v19104_v52 = vpack.c.bf16 %v15018_v3, %v19103_v58  ;;  %v12813_v12 = vld [vmem:[%s18959_s3 + $0x3c0] ss:$8 sps:$4 sm:$0xff]   ;;  %v12818_v3 = vld [vmem:[%s18959_s3 + $0x3d4] ss:$8 sps:$4 sm:$0xff]  }
 0x20c   :  { %4401 = vmatpush1.bf16.msra.mxu1 %v15105_v18  ;;  %10985 = vmatprep.mubr.msk.bf16.mxu1 %vm316_vm0, %v15386_v57  ;;  %v19105_v57 = vpack.c.bf16 %v15076_v19, %v15051_v7  ;;  %v12821_v7 = vld [vmem:[%s18959_s3 + $0x3e4] ss:$8 sps:$4 sm:$0xff]   ;;  %v12819_v19 = vld [vmem:[%s18959_s3 + $0x3e0] ss:$8 sps:$4 sm:$0xff]  }
 0x20d   :  { %2130 = vmatmul.mubr.bf16.gmra.mrb[44].mxu0 %v19095_v28  ;;  %4402 = vmatprep.subr.bf16.mxu1 %v15113_v23  ;;  %v19106_v28 = vld [vmem:[#allocation21_spill] sm:$0xff] }
 0x20e   :  { %2139 = vmatprep.mubr.bf16.mxu0 %v19096_v62  ;;  %2175 = vmatpush1.bf16.msra.mxu0 %v12807_v56  ;;  %v12824_v56 = vld [vmem:[%s18959_s3 + $0x3f4] ss:$8 sps:$4 sm:$0xff]   ;;  %v12825_v43 = vld [vmem:[%s18959_s3 + $0x400] ss:$8 sps:$4 sm:$0xff]  }
 0x20f   :  { %2176 = vmatprep.subr.bf16.mxu0 %v12812_v8  ;;  %v19107_v62 = vld [vmem:[#allocation20_spill] sm:$0xff] }
 0x210   :  { %4403 = vmatpush1.bf16.msra.mxu1 %v15122_v45 }
 0x211   :  { %4404 = vmatprep.subr.bf16.mxu1 %v15131_v61 }
 0x212   :  { %2177 = vmatpush1.bf16.msra.mxu0 %v12810_v6  ;;  %v19108_v6 = vpack.c.bf16 %v19106_v28, %v19107_v62  ;;  %v15683_v28 = vld [vmem:[%s19031_s22 + $0x1e0] ss:$8 sps:$4 sm:$0xff]   ;;  %v15688_v62 = vld [vmem:[%s19031_s22 + $0x1e4] ss:$8 sps:$4 sm:$0xff]  }
 0x213   :  { %2771 = vmatprep.subr.bf16.mxu0 %v12815_v55  ;;  %3844 = vmatmul.mubr.bf16.gmra.mrb[188].mxu1 %v15393_v0 }
 0x214   :  { %4405 = vmatpush1.bf16.msra.mxu1 %v15138_v16  ;;  %10986 = vmatprep.mubr.msk.bf16.mxu1 %vm316_vm0, %v15429_v14 }
 0x215   :  { %2140 = vmatmul.mubr.bf16.gmra.mrb[48].mxu0 %v19097_v59  ;;  %4406 = vmatprep.subr.bf16.mxu1 %v15146_v21  ;;  %v12822_v59 = vld [vmem:[%s18959_s3 + $0x3f0] ss:$8 sps:$4 sm:$0xff]  }
 0x216   :  { %2149 = vmatprep.mubr.bf16.mxu0 %v19098_v36  ;;  %v12827_v36 = vld [vmem:[%s18959_s3 + $0x404] ss:$8 sps:$4 sm:$0xff]  }
 0x218   :  { %4407 = vmatpush1.bf16.msra.mxu1 %v15155_v20 }
 0x219   :  { %4408 = vmatprep.subr.bf16.mxu1 %v15164_v26 }
 0x21b   :  { %3852 = vmatmul.mubr.bf16.gmra.mrb[192].mxu1 %v15436_v63  ;;  %v2471_v63 = vpop.f32.mrb[105].mxu1 }
 0x21c   :  { %4409 = vmatpush1.bf16.msra.mxu1 %v15171_v31  ;;  %10987 = vmatprep.mubr.msk.bf16.mxu1 %vm316_vm0, %v15470_v51  ;;  %v15609_v14 = vpop.f32.mrb[106].mxu1  ;;  %v19127_v63 = vld [vmem:[#allocation14_spill] sm:$0xff] }
 0x21d   :  { %2150 = vmatmul.mubr.bf16.gmra.mrb[52].mxu0 %v19101_v47  ;;  %4410 = vmatprep.subr.bf16.mxu1 %v15179_v11  ;;  %v2474_v0 = vpop.f32.mrb[107].mxu1  ;;  %v12830_v47 = vld [vmem:[%s18959_s3 + $0x414] ss:$8 sps:$4 sm:$0xff]   ;;  %v12855_v51 = vld [vmem:[%s18959_s3 + $0x490] ss:$8 sps:$4 sm:$0xff]  }
 0x21e   :  { %2159 = vmatprep.mubr.bf16.mxu0 %v19102_v30  ;;  %v15629_v2 = vpop.f32.mrb[108].mxu1  ;;  %v12828_v0 = vld [vmem:[%s18959_s3 + $0x410] ss:$8 sps:$4 sm:$0xff]  }
 0x21f   :  { %v2479_v42 = vpop.f32.mrb[109].mxu1 }
 0x220   :  { %4411 = vmatpush1.bf16.msra.mxu1 %v15188_v32  ;;  %v15634_v8 = vpop.f32.mrb[110].mxu1 }
 0x221   :  { %4412 = vmatprep.subr.bf16.mxu1 %v15195_v17  ;;  %v2482_v55 = vpop.f32.mrb[111].mxu1 }
 0x222   :  { %v15652_v4 = vpop.f32.mrb[112].mxu1  ;;  %v19112_v55 = vld [vmem:[#allocation7_spill] sm:$0xff] }
 0x223   :  { %3860 = vmatmul.mubr.bf16.gmra.mrb[196].mxu1 %v15477_v38  ;;  %v12816_v38 = vld [vmem:[%s18959_s3 + $0x3d0] ss:$8 sps:$4 sm:$0xff]   ;;  %v2487_v30 = vpop.f32.mrb[113].mxu1 }
 0x224   :  { %4413 = vmatpush1.bf16.msra.mxu1 %v15202_v9  ;;  %v15657_v58 = vpop.f32.mrb[114].mxu1  ;;  %11093 = vmatprep.mubr.msk.bf16.mxu1 %vm316_vm0, %v15688_v62  ;;  %v12834_v30 = vld [vmem:[%s18959_s3 + $0x430] ss:$8 sps:$4 sm:$0xff]  }
 0x225   :  { %2160 = vmatmul.mubr.bf16.gmra.mrb[56].mxu0 %v19104_v52  ;;  %4414 = vmatprep.subr.bf16.mxu1 %v15213_v49  ;;  %v19109_v52 = vld [vmem:[#allocation5_spill] sm:$0xff] }
 0x226   :  { %2202 = vmatprep.mubr.bf16.mxu0 %v19039_v25 }
 0x228   :  { %4415 = vmatpush1.bf16.msra.mxu1 %v15230_v39 }
 0x229   :  { %4479 = vmatprep.subr.bf16.mxu1 %v19039_v25 }
 0x22b   :  { %4429 = vmatmul.mubr.bf16.vlgmr.msra.gmra.mrb[200].mxu1 %v15683_v28 }
 0x22d   :  { %10723 = vmatmul.mubr.msk.bf16.vlgmr.msra.gmra.mrb[40].mxu0 %vm1026_vm1, %v19105_v57  ;;  %v2490_v57 = vpop.f32.mrb[115].mxu1 }
 0x22e   :  { %2772 = vmatpush1.bf16.msra.mxu0 %v12813_v12  ;;  %2212 = vmatprep.mubr.bf16.mxu0 %v19039_v25  ;;  %v19110_v12 = vld [vmem:[#allocation6_spill] sm:$0xff] }
 0x22f   :  { %2773 = vmatprep.subr.bf16.mxu0 %v12818_v3  ;;  %v19111_v3 = vpack.c.bf16 %v19109_v52, %v19110_v12  ;;  %v12839_v52 = vld [vmem:[%s18959_s3 + $0x444] ss:$8 sps:$4 sm:$0xff]   ;;  %v19115_v12 = vld [vmem:[#allocation12_spill] sm:$0xff] }
 0x230   :  { %4480 = vmatpush1.bf16.msra.mxu1 %v19115_v12  ;;  %v12840_v12 = vld [vmem:[%s18959_s3 + $0x450] ss:$8 sps:$4 sm:$0xff]  }
 0x231   :  { %4481 = vmatprep.subr.bf16.mxu1 %v19039_v25 }
 0x232   :  { %2774 = vmatpush1.bf16.msra.mxu0 %v12816_v38  ;;  %v12833_v38 = vld [vmem:[%s18959_s3 + $0x424] ss:$8 sps:$4 sm:$0xff]  }
 0x233   :  { %2775 = vmatprep.subr.bf16.mxu0 %v12821_v7  ;;  %v12831_v7 = vld [vmem:[%s18959_s3 + $0x420] ss:$8 sps:$4 sm:$0xff]  }
 0x235   :  { %10724 = vmatmul.mubr.msk.bf16.gmra.mrb[44].mxu0 %vm1026_vm1, %v19108_v6 }
 0x236   :  { %2776 = vmatpush1.bf16.msra.mxu0 %v12819_v19  ;;  %2222 = vmatprep.mubr.bf16.mxu0 %v19039_v25  ;;  %v12836_v19 = vld [vmem:[%s18959_s3 + $0x434] ss:$8 sps:$4 sm:$0xff]  }
 0x237   :  { %2777 = vmatprep.subr.bf16.mxu0 %v12824_v56  ;;  %v15678_v56 = vpop.f32.mrb[116].mxu1 }
 0x238   :  { %v2495_v42 = vpop.f32.mrb[117].mxu1 }
 0x239   :  { %v15690_v6 = vpop.f32.mrb[118].mxu1  ;;  %v19116_v42 = vld [vmem:[#allocation13_spill] sm:$0xff] }
 0x23a   :  { %2778 = vmatpush1.bf16.msra.mxu0 %v12822_v59  ;;  %v19113_v59 = vld [vmem:[#allocation8_spill] sm:$0xff]  ;;  %4482 = vmatpush1.bf16.msra.mxu1 %v19116_v42  ;;  %v19120_v42 = vpack.c.bf16 %v15356_v60, %v15333_v5 }
 0x23b   :  { %2779 = vmatprep.subr.bf16.mxu0 %v12827_v36  ;;  %v19114_v36 = vpack.c.bf16 %v19112_v55, %v19113_v59  ;;  %v15731_v55 = vld [vmem:[%s19031_s22 + $0x1f0] ss:$8 sps:$4 sm:$0xff]   ;;  %v19117_v59 = vld [vmem:[#allocation9_spill] sm:$0xff]  ;;  %4483 = vmatprep.subr.bf16.mxu1 %v19039_v25 }
 0x23c   :  { %v12843_v60 = vld [vmem:[%s18959_s3 + $0x460] ss:$8 sps:$4 sm:$0xff]  }
 0x23d   :  { %10725 = vmatmul.mubr.msk.bf16.gmra.mrb[48].mxu0 %vm1026_vm1, %v19111_v3  ;;  %v12837_v3 = vld [vmem:[%s18959_s3 + $0x440] ss:$8 sps:$4 sm:$0xff]  }
 0x23e   :  { %2780 = vmatpush1.bf16.msra.mxu0 %v12825_v43  ;;  %2232 = vmatprep.mubr.bf16.mxu0 %v19039_v25 }
 0x23f   :  { %2781 = vmatprep.subr.bf16.mxu0 %v12830_v47  ;;  %v2498_v47 = vpop.f32.mrb[119].mxu1  ;;  %4484 = vmatpush1.bf16.msra.mxu1 %v14855_v1  ;;  %v15771_v1 = vld [vmem:[%s19031_s22 + $0x204] ss:$8 sps:$4 sm:$0xff]  }
 0x240   :  { %v15713_v57 = vpop.f32.mrb[120].mxu1  ;;  %4485 = vmatprep.subr.bf16.mxu1 %v19039_v25 }
 0x242   :  { %2782 = vmatpush1.bf16.msra.mxu0 %v12828_v0  ;;  %v12842_v0 = vld [vmem:[%s18959_s3 + $0x454] ss:$8 sps:$4 sm:$0xff]  }
 0x243   :  { %2783 = vmatprep.subr.bf16.mxu0 %v12833_v38  ;;  %v15718_v38 = vpop.f32.mrb[121].mxu1  ;;  %4486 = vmatpush1.bf16.msra.mxu1 %v14888_v35  ;;  %v12851_v35 = vld [vmem:[%s18959_s3 + $0x484] ss:$8 sps:$4 sm:$0xff]  }
 0x244   :  { %4487 = vmatprep.subr.bf16.mxu1 %v19039_v25 }
 0x245   :  { %10726 = vmatmul.mubr.msk.bf16.gmra.mrb[52].mxu0 %vm1026_vm1, %v19114_v36  ;;  %v19118_v36 = vld [vmem:[#allocation10_spill] sm:$0xff] }
 0x246   :  { %2784 = vmatpush1.bf16.msra.mxu0 %v12831_v7  ;;  %2242 = vmatprep.mubr.bf16.mxu0 %v19039_v25  ;;  %v15723_v7 = vld [vmem:[%s19031_s22 + $0x1f4] ss:$8 sps:$4 sm:$0xff]   ;;  %v19119_v47 = vpack.c.bf16 %v19117_v59, %v19118_v36  ;;  %v12845_v36 = vld [vmem:[%s18959_s3 + $0x464] ss:$8 sps:$4 sm:$0xff]  }
 0x247   :  { %2785 = vmatprep.subr.bf16.mxu0 %v12836_v19  ;;  %v15725_v19 = vpop.f32.mrb[122].mxu1  ;;  %11094 = vmatprep.mubr.msk.bf16.mxu1 %vm316_vm0, %v15723_v7 }
 0x248   :  { %4439 = vmatmul.mubr.bf16.gmra.mrb[204].mxu1 %v15731_v55 }
 0x249   :  { %11095 = vmatprep.mubr.msk.bf16.mxu1 %vm316_vm0, %v15771_v1  ;;  %4488 = vmatpush1.bf16.msra.mxu1 %v14906_v46  ;;  %v15812_v46 = vld [vmem:[%s19031_s22 + $0x214] ss:$8 sps:$4 sm:$0xff]  }
 0x24a   :  { %2786 = vmatpush1.bf16.msra.mxu0 %v12834_v30  ;;  %4489 = vmatprep.subr.bf16.mxu1 %v19039_v25  ;;  %v15819_v30 = vld [vmem:[%s19031_s22 + $0x210] ss:$8 sps:$4 sm:$0xff]  }
 0x24b   :  { %2787 = vmatprep.subr.bf16.mxu0 %v12839_v52  ;;  %v15741_v52 = vpop.f32.mrb[123].mxu1 }
 0x24c   :  { %v15760_v5 = vpop.f32.mrb[124].mxu1 }
 0x24d   :  { %10727 = vmatmul.mubr.msk.bf16.gmra.mrb[56].mxu0 %vm1026_vm1, %v19119_v47  ;;  %19121 = vst [vmem:[#allocation17_spill] sm:$0xff] %v15760_v5  ;;  %4490 = vmatpush1.bf16.msra.mxu1 %v19127_v63  ;;  %v19129_v63 = vld [vmem:[#allocation15_spill] sm:$0xff]  ;;  %v19139_v5 = vld [vmem:[#allocation24_spill] sm:$0xff] }
 0x24e   :  { %2788 = vmatpush1.bf16.msra.mxu0 %v12837_v3  ;;  %2803 = vmatprep.mubr.bf16.mxu0 %v19120_v42  ;;  %v12848_v3 = vld [vmem:[%s18959_s3 + $0x474] ss:$8 sps:$4 sm:$0xff]  }
 0x24f   :  { %2789 = vmatprep.subr.bf16.mxu0 %v12842_v0  ;;  %v15766_v0 = vpop.f32.mrb[125].mxu1  ;;  %4491 = vmatprep.subr.bf16.mxu1 %v19039_v25 }
 0x250   :  { %19122 = vst [vmem:[#allocation16_spill] sm:$0xff] %v15766_v0  ;;  %v15773_v47 = vpop.f32.mrb[126].mxu1  ;;  %v12879_v0 = vld [vmem:[%s18959_s3 + $0x4d0] ss:$8 sps:$4 sm:$0xff]  }
 0x251   :  { %19123 = vst [vmem:[#allocation19_spill] sm:$0xff] %v15773_v47  ;;  %v15783_v42 = vpop.f32.mrb[127].mxu1  ;;  %4492 = vmatpush1.bf16.msra.mxu1 %v19129_v63  ;;  %v15853_v63 = vld [vmem:[%s19031_s22 + $0x224] ss:$8 sps:$4 sm:$0x1f]  }
 0x252   :  { %2790 = vmatpush1.bf16.msra.mxu0 %v12840_v12  ;;  %v15778_v12 = vld [vmem:[%s19031_s22 + $0x200] ss:$8 sps:$4 sm:$0xff]   ;;  %v15801_v43 = vpop.f32.mrb[128].mxu1  ;;  %4493 = vmatprep.subr.bf16.mxu1 %v19039_v25 }
 0x253   :  { %2791 = vmatprep.subr.bf16.mxu0 %v12845_v36  ;;  %v12846_v36 = vld [vmem:[%s18959_s3 + $0x470] ss:$8 sps:$4 sm:$0xff]   ;;  %4449 = vmatmul.mubr.bf16.gmra.mrb[208].mxu1 %v15778_v12  ;;  %19124 = vst [vmem:[#allocation21_spill] sm:$0xff] %v15801_v43  ;;  %v15807_v59 = vpop.f32.mrb[129].mxu1 }
 0x254   :  { %19125 = vst [vmem:[#allocation20_spill] sm:$0xff] %v15807_v59  ;;  %11096 = vmatprep.mubr.msk.bf16.mxu1 %vm316_vm0, %v15812_v46  ;;  %v15860_v43 = vld [vmem:[%s19031_s22 + $0x220] ss:$8 sps:$4 sm:$0x1f]   ;;  %v12864_v59 = vld [vmem:[%s18959_s3 + $0x4b0] ss:$8 sps:$4 sm:$0xff]  }
 0x255   :  { %4494 = vmatpush1.bf16.msra.mxu1 %v14982_v37  ;;  %v19134_v37 = vld [vmem:[#allocation18_spill] sm:$0xff] }
 0x256   :  { %2792 = vmatpush1.bf16.msra.mxu0 %v12843_v60  ;;  %v12849_v60 = vld [vmem:[%s18959_s3 + $0x480] ss:$8 sps:$4 sm:$0xff]   ;;  %4495 = vmatprep.subr.bf16.mxu1 %v19039_v25 }
 0x257   :  { %2793 = vmatprep.subr.bf16.mxu0 %v12848_v3  ;;  %v12857_v3 = vld [vmem:[%s18959_s3 + $0x494] ss:$8 sps:$4 sm:$0xff]  }
 0x259   :  { %4496 = vmatpush1.bf16.msra.mxu1 %v19134_v37  ;;  %v19136_v37 = vld [vmem:[#allocation11_spill] sm:$0xff] }
 0x25a   :  { %2794 = vmatpush1.bf16.msra.mxu0 %v12846_v36  ;;  %v15814_v36 = vpop.f32.mrb[130].mxu1  ;;  %4497 = vmatprep.subr.bf16.mxu1 %v19039_v25 }
 0x25b   :  { %2795 = vmatprep.subr.bf16.mxu0 %v12851_v35  ;;  %19126 = vst [vmem:[#allocation5_spill] sm:$0xff] %v15814_v36  ;;  %v15826_v40 = vpop.f32.mrb[131].mxu1  ;;  %v12860_v35 = vld [vmem:[%s18959_s3 + $0x4a4] ss:$8 sps:$4 sm:$0xff]   ;;  %4459 = vmatmul.mubr.bf16.gmra.mrb[212].mxu1 %v15819_v30 }
 0x25c   :  { %19128 = vst [vmem:[#allocation6_spill] sm:$0xff] %v15826_v40  ;;  %11097 = vmatprep.mubr.msk.bf16.mxu1 %vm316_vm0, %v15853_v63 }
 0x25d   :  { %4498 = vmatpush1.bf16.msra.mxu1 %v15028_v41  ;;  %v12882_v41 = vld [vmem:[%s18959_s3 + $0x4e0] ss:$8 sps:$4 sm:$0xff]  }
 0x25e   :  { %2796 = vmatpush1.bf16.msra.mxu0 %v12849_v60  ;;  %v12858_v60 = vld [vmem:[%s18959_s3 + $0x4a0] ss:$8 sps:$4 sm:$0xff]   ;;  %5080 = vmatprep.subr.bf16.mxu1 %v15047_v29 }
 0x25f   :  { %2797 = vmatprep.subr.bf16.mxu0 %v12857_v3  ;;  %v12866_v3 = vld [vmem:[%s18959_s3 + $0x4b4] ss:$8 sps:$4 sm:$0xff]  }
 0x262   :  { %2798 = vmatpush1.bf16.msra.mxu0 %v12855_v51  ;;  %v15842_v15 = vpop.f32.mrb[132].mxu1 }
 0x263   :  { %19130 = vst [vmem:[#allocation7_spill] sm:$0xff] %v15842_v15  ;;  %2799 = vmatprep.subr.bf16.mxu0 %v12860_v35  ;;  %v15848_v54 = vpop.f32.mrb[133].mxu1  ;;  %v12878_v35 = vld [vmem:[%s18959_s3 + $0x4c4] ss:$8 sps:$4 sm:$0xff]   ;;  %4469 = vmatmul.mubr.bf16.gmra.mrb[216].mxu1 %v15860_v43 }
 0x264   :  { %19131 = vst [vmem:[#allocation8_spill] sm:$0xff] %v15848_v54  ;;  %v15855_v51 = vpop.f32.mrb[134].mxu1  ;;  %11098 = vmatprep.mubr.msk.bf16.mxu1 %vm316_vm0, %v15688_v62  ;;  %v19135_v62 = vld [vmem:[#allocation22_spill] sm:$0xff] }
 0x265   :  { %19132 = vst [vmem:[#allocation12_spill] sm:$0xff] %v15855_v51  ;;  %v15867_v36 = vpop.f32.mrb[135].mxu1 }
 0x266   :  { %19133 = vst [vmem:[#allocation13_spill] sm:$0xff] %v15867_v36  ;;  %2800 = vmatpush1.bf16.msra.mxu0 %v12858_v60  ;;  %v12876_v60 = vld [vmem:[%s18959_s3 + $0x4c0] ss:$8 sps:$4 sm:$0xff]  }
 0x267   :  { %2801 = vmatprep.subr.bf16.mxu0 %v12866_v3  ;;  %v12881_v3 = vld [vmem:[%s18959_s3 + $0x4d4] ss:$8 sps:$4 sm:$0xff]  }
 0x26a   :  { %2802 = vmatpush1.bf16.msra.mxu0 %v12864_v59  ;;  %v15885_v40 = vpop.f32.mrb[136].mxu1  ;;  %v19137_v59 = vpack.c.bf16 %v19135_v62, %v19136_v37  ;;  %v12884_v37 = vld [vmem:[%s18959_s3 + $0x4e4] ss:$8 sps:$4 sm:$0xff]  }
 0x26b   :  { %2854 = vmatprep.subr.bf16.mxu0 %v12878_v35  ;;  %v15891_v15 = vpop.f32.mrb[137].mxu1  ;;  %v19138_v35 = vld [vmem:[#allocation26_spill] sm:$0xff]  ;;  %4512 = vmatmul.mubr.bf16.vlgmr.msra.gmra.mrb[220].mxu1 %v15683_v28 }
 0x26c   :  { %v15893_v51 = vpop.f32.mrb[138].mxu1  ;;  %v19140_v47 = vpack.c.bf16 %v19138_v35, %v19139_v5  ;;  %5081 = vmatpush1.bf16.msra.mxu1 %v15056_v10  ;;  %11099 = vmatprep.mubr.msk.bf16.mxu1 %vm316_vm0, %v15723_v7  ;;  %v12887_v5 = vld [vmem:[%s18959_s3 + $0x4f4] ss:$8 sps:$4 sm:$0xff]  }
 0x26d   :  { %2804 = vmatmul.mubr.bf16.vlgmr.msra.gmra.mrb[40].mxu0 %v19137_v59  ;;  %v3196_v54 = vpack.c.bf16 %v15893_v51, %v15885_v40  ;;  %v15901_v36 = vpop.f32.mrb[139].mxu1  ;;  %5082 = vmatprep.subr.bf16.mxu1 %v15067_v48  ;;  %v19142_v10 = vld [vmem:[#allocation23_spill] sm:$0xff] }
 0x26e   :  { %2813 = vmatprep.mubr.bf16.mxu0 %v19140_v47  ;;  %2855 = vmatpush1.bf16.msra.mxu0 %v12876_v60  ;;  %v3197_v62 = vpack.c.bf16 %v15901_v36, %v15891_v15  ;;  %v19141_v47 = vld [vmem:[#allocation25_spill] sm:$0xff]  ;;  %v12885_v48 = vld [vmem:[%s18959_s3 + $0x4f0] ss:$8 sps:$4 sm:$0xff]  }
 0x26f   :  { %2856 = vmatprep.subr.bf16.mxu0 %v12881_v3  ;;  %v19143_v60 = vpack.c.bf16 %v19141_v47, %v19142_v10  ;;  %v19145_v3 = vld [vmem:[#allocation28_spill] sm:$0xff]  ;;  %v19150_v47 = vld [vmem:[#allocation34_spill] sm:$0xff] }
 0x270   :  { %5083 = vmatpush1.bf16.msra.mxu1 %v15081_v24  ;;  %v19147_v24 = vld [vmem:[#allocation29_spill] sm:$0xff]  ;;  %v19151_v10 = vld [vmem:[#allocation32_spill] sm:$0xff] }
 0x271   :  { %5084 = vmatprep.subr.bf16.mxu1 %v15098_v33  ;;  %v19152_v33 = vpack.c.bf16 %v19150_v47, %v19151_v10  ;;  %v19161_v47 = vpack.c.bf16 %v15657_v58, %v15652_v4  ;;  %v12914_v4 = vld [vmem:[%s18959_s3 + $0x584] ss:$8 sps:$4 sm:$0xff]   ;;  %v13675_v58 = vld [vmem:[%s19030_s29 + $0x8] ss:$12 sps:$4 sm:$0xff]   ;;  %v12966_v51 = vld [vmem:[%s18959_s3 + $0x650] ss:$8 sps:$4 sm:$0xff]  }
 0x272   :  { %2857 = vmatpush1.bf16.msra.mxu0 %v12879_v0  ;;  %v19144_v0 = vld [vmem:[#allocation30_spill] sm:$0xff] }
 0x273   :  { %2858 = vmatprep.subr.bf16.mxu0 %v12884_v37  ;;  %v15926_v29 = vpop.f32.mrb[140].mxu1  ;;  %v19146_v59 = vpack.c.bf16 %v19144_v0, %v19145_v3  ;;  %4520 = vmatmul.mubr.bf16.gmra.mrb[224].mxu1 %v15731_v55  ;;  %v12963_v15 = vld [vmem:[%s18959_s3 + $0x640] ss:$8 sps:$4 sm:$0xff]  }
 0x274   :  { %v3147_v28 = vpop.f32.mrb[141].mxu1  ;;  %5085 = vmatpush1.bf16.msra.mxu1 %v15105_v18  ;;  %11100 = vmatprep.mubr.msk.bf16.mxu1 %vm316_vm0, %v15771_v1  ;;  %v19153_v18 = vld [vmem:[#allocation33_spill] sm:$0xff] }
 0x275   :  { %2814 = vmatmul.mubr.bf16.gmra.mrb[44].mxu0 %v19143_v60  ;;  %v15931_v7 = vpop.f32.mrb[142].mxu1  ;;  %v12890_v28 = vld [vmem:[%s18959_s3 + $0x504] ss:$8 sps:$4 sm:$0xff]   ;;  %5086 = vmatprep.subr.bf16.mxu1 %v15113_v23  ;;  %v19154_v23 = vld [vmem:[#allocation31_spill] sm:$0xff]  ;;  %v19160_v60 = vpack.c.bf16 %v15634_v8, %v15629_v2  ;;  %v12906_v2 = vld [vmem:[%s18959_s3 + $0x560] ss:$8 sps:$4 sm:$0xff]  }
 0x276   :  { %2823 = vmatprep.mubr.bf16.mxu0 %v19146_v59  ;;  %2859 = vmatpush1.bf16.msra.mxu0 %v12882_v41  ;;  %v3186_v35 = vpack.c.bf16 %v15931_v7, %v15926_v29  ;;  %v3150_v37 = vpop.f32.mrb[143].mxu1  ;;  %v19148_v41 = vld [vmem:[#allocation27_spill] sm:$0xff]  ;;  %v19155_v55 = vpack.c.bf16 %v19153_v18, %v19154_v23  ;;  %v12902_v1 = vld [vmem:[%s18959_s3 + $0x544] ss:$8 sps:$4 sm:$0xff]   ;;  %v12912_v23 = vld [vmem:[%s18959_s3 + $0x580] ss:$8 sps:$4 sm:$0xff]  }
 0x277   :  { %2860 = vmatprep.subr.bf16.mxu0 %v12887_v5  ;;  %v19149_v5 = vpack.c.bf16 %v19147_v24, %v19148_v41  ;;  %v12903_v59 = vld [vmem:[%s18959_s3 + $0x550] ss:$8 sps:$4 sm:$0xff]   ;;  %v12911_v8 = vld [vmem:[%s18959_s3 + $0x574] ss:$8 sps:$4 sm:$0xff]   ;;  %v12969_v29 = vld [vmem:[%s18959_s3 + $0x660] ss:$8 sps:$4 sm:$0xff]  }
 0x278   :  { %5087 = vmatpush1.bf16.msra.mxu1 %v15122_v45  ;;  %v19156_v45 = vpack.c.bf16 %v15516_v27, %v15502_v34  ;;  %v12899_v34 = vld [vmem:[%s18959_s3 + $0x534] ss:$8 sps:$4 sm:$0xff]   ;;  %v16068_v24 = vld [vmem:[%s19031_s22 + $0x230] ss:$8 sps:$4 sm:$0xff]  }
 0x279   :  { %5088 = vmatprep.subr.bf16.mxu1 %v15131_v61  ;;  %v19157_v61 = vpack.c.bf16 %v15508_v22, %v15497_v50  ;;  %v12893_v22 = vld [vmem:[%s18959_s3 + $0x514] ss:$8 sps:$4 sm:$0xff]   ;;  %v12909_v18 = vld [vmem:[%s18959_s3 + $0x570] ss:$8 sps:$4 sm:$0xff]  }
 0x27a   :  { %2861 = vmatpush1.bf16.msra.mxu0 %v12885_v48  ;;  %v12908_v48 = vld [vmem:[%s18959_s3 + $0x564] ss:$8 sps:$4 sm:$0xff]   ;;  %v16073_v41 = vld [vmem:[%s19031_s22 + $0x234] ss:$8 sps:$4 sm:$0xff]  }
 0x27b   :  { %3455 = vmatprep.subr.bf16.mxu0 %v12890_v28  ;;  %4528 = vmatmul.mubr.bf16.gmra.mrb[228].mxu1 %v15778_v12  ;;  %v12905_v12 = vld [vmem:[%s18959_s3 + $0x554] ss:$8 sps:$4 sm:$0xff]  }
 0x27c   :  { %5089 = vmatpush1.bf16.msra.mxu1 %v15138_v16  ;;  %11101 = vmatprep.mubr.msk.bf16.mxu1 %vm316_vm0, %v15812_v46  ;;  %v12888_v16 = vld [vmem:[%s18959_s3 + $0x500] ss:$8 sps:$4 sm:$0xff]  }
 0x27d   :  { %2824 = vmatmul.mubr.bf16.gmra.mrb[48].mxu0 %v19149_v5  ;;  %5090 = vmatprep.subr.bf16.mxu1 %v15146_v21  ;;  %v15988_v21 = vpop.f32.mrb[144].mxu1 }
 0x27e   :  { %2833 = vmatprep.mubr.bf16.mxu0 %v19152_v33 }
 0x280   :  { %5091 = vmatpush1.bf16.msra.mxu1 %v15155_v20  ;;  %v3155_v20 = vpop.f32.mrb[145].mxu1 }
 0x281   :  { %5092 = vmatprep.subr.bf16.mxu1 %v15164_v26  ;;  %v15994_v26 = vpop.f32.mrb[146].mxu1  ;;  %v13676_v20 = vld [vmem:[%s19030_s29 + $0x20] ss:$12 sps:$4 sm:$0xff]  }
 0x283   :  { %4536 = vmatmul.mubr.bf16.gmra.mrb[232].mxu1 %v15819_v30  ;;  %v12897_v30 = vld [vmem:[%s18959_s3 + $0x530] ss:$8 sps:$4 sm:$0xff]  }
 0x284   :  { %5093 = vmatpush1.bf16.msra.mxu1 %v15171_v31  ;;  %11102 = vmatprep.mubr.msk.bf16.mxu1 %vm316_vm0, %v15853_v63  ;;  %v19158_v31 = vpack.c.bf16 %v15546_v53, %v15531_v44  ;;  %v19159_v44 = vpack.c.bf16 %v15609_v14, %v15603_v13  ;;  %v12900_v13 = vld [vmem:[%s18959_s3 + $0x540] ss:$8 sps:$4 sm:$0xff]  }
 0x285   :  { %2834 = vmatmul.mubr.bf16.gmra.mrb[52].mxu0 %v19155_v55  ;;  %5094 = vmatprep.subr.bf16.mxu1 %v15179_v11  ;;  %v3189_v11 = vpack.c.bf16 %v15994_v26, %v15988_v21  ;;  %v12975_v21 = vld [vmem:[%s18959_s3 + $0x680] ss:$8 sps:$4 sm:$0xff]  }
 0x286   :  { %2843 = vmatprep.mubr.bf16.mxu0 %v19156_v45  ;;  %v12917_v45 = vld [vmem:[%s18959_s3 + $0x594] ss:$8 sps:$4 sm:$0xff]  }
 0x288   :  { %5095 = vmatpush1.bf16.msra.mxu1 %v15188_v32  ;;  %v3158_v32 = vpop.f32.mrb[147].mxu1 }
 0x289   :  { %5096 = vmatprep.subr.bf16.mxu1 %v15195_v17  ;;  %v12891_v17 = vld [vmem:[%s18959_s3 + $0x510] ss:$8 sps:$4 sm:$0xff]   ;;  %v19162_v32 = vpack.c.bf16 %v15690_v6, %v15678_v56  ;;  %v12920_v6 = vld [vmem:[%s18959_s3 + $0x5a4] ss:$8 sps:$4 sm:$0xff]  }
 0x28b   :  { %4544 = vmatmul.mubr.bf16.gmra.mrb[236].mxu1 %v15860_v43 }
 0x28c   :  { %5097 = vmatpush1.bf16.msra.mxu1 %v15202_v9  ;;  %v12896_v9 = vld [vmem:[%s18959_s3 + $0x524] ss:$8 sps:$4 sm:$0xff]   ;;  %11208 = vmatprep.mubr.msk.bf16.mxu1 %vm316_vm0, %v16073_v41 }
 0x28d   :  { %2844 = vmatmul.mubr.bf16.gmra.mrb[56].mxu0 %v19157_v61  ;;  %5098 = vmatprep.subr.bf16.mxu1 %v15213_v49  ;;  %v12894_v49 = vld [vmem:[%s18959_s3 + $0x520] ss:$8 sps:$4 sm:$0xff]  }
 0x28e   :  { %2886 = vmatprep.mubr.bf16.mxu0 %v19039_v25 }
 0x290   :  { %5099 = vmatpush1.bf16.msra.mxu1 %v15230_v39  ;;  %v16014_v39 = vpop.f32.mrb[148].mxu1 }
 0x291   :  { %5163 = vmatprep.subr.bf16.mxu1 %v19039_v25  ;;  %v3163_v27 = vpop.f32.mrb[149].mxu1 }
 0x292   :  { %v16019_v50 = vpop.f32.mrb[150].mxu1  ;;  %v13677_v27 = vld [vmem:[%s19030_s29 + $0x38] ss:$12 sps:$4 sm:$0xff]  }
 0x293   :  { %v3192_v53 = vpack.c.bf16 %v16019_v50, %v16014_v39  ;;  %v3166_v43 = vpop.f32.mrb[151].mxu1  ;;  %5113 = vmatmul.mubr.bf16.vlgmr.msra.gmra.mrb[240].mxu1 %v16068_v24  ;;  %v12981_v39 = vld [vmem:[%s18959_s3 + $0x6a0] ss:$8 sps:$4 sm:$0xff]  }
 0x294   :  { %v16037_v14 = vpop.f32.mrb[152].mxu1  ;;  %5164 = vmatpush1.bf16.msra.mxu1 %v13675_v58  ;;  %v16214_v58 = vld [vmem:[%s19031_s22 + $0x260] ss:$8 sps:$4 sm:$0xff]  }
 0x295   :  { %10838 = vmatmul.mubr.msk.bf16.vlgmr.msra.gmra.mrb[40].mxu0 %vm1026_vm1, %v19158_v31  ;;  %v3171_v46 = vpop.f32.mrb[153].mxu1  ;;  %5165 = vmatprep.subr.bf16.mxu1 %v19039_v25  ;;  %v16120_v31 = vld [vmem:[%s19031_s22 + $0x240] ss:$8 sps:$4 sm:$0xff]  }
 0x296   :  { %3456 = vmatpush1.bf16.msra.mxu0 %v12888_v16  ;;  %2896 = vmatprep.mubr.bf16.mxu0 %v19039_v25  ;;  %v16042_v63 = vpop.f32.mrb[154].mxu1  ;;  %v16110_v16 = vld [vmem:[%s19031_s22 + $0x244] ss:$8 sps:$4 sm:$0xff]   ;;  %v13678_v46 = vld [vmem:[%s19030_s29 + $0x50] ss:$12 sps:$4 sm:$0xff]  }
 0x297   :  { %3457 = vmatprep.subr.bf16.mxu0 %v12893_v22  ;;  %v3195_v0 = vpack.c.bf16 %v16042_v63, %v16037_v14  ;;  %v3174_v3 = vpop.f32.mrb[155].mxu1  ;;  %11209 = vmatprep.mubr.msk.bf16.mxu1 %vm316_vm0, %v16110_v16  ;;  %v12987_v14 = vld [vmem:[%s18959_s3 + $0x6c0] ss:$8 sps:$4 sm:$0xff]  }
 0x298   :  { %v16063_v37 = vpop.f32.mrb[156].mxu1  ;;  %5166 = vmatpush1.bf16.msra.mxu1 %v13676_v20  ;;  %v12921_v3 = vld [vmem:[%s18959_s3 + $0x5b0] ss:$8 sps:$4 sm:$0xff]  }
 0x299   :  { %v3179_v28 = vpop.f32.mrb[157].mxu1  ;;  %5167 = vmatprep.subr.bf16.mxu1 %v19039_v25 }
 0x29a   :  { %3458 = vmatpush1.bf16.msra.mxu0 %v12891_v17  ;;  %v16075_v5 = vpop.f32.mrb[158].mxu1 }
 0x29b   :  { %3459 = vmatprep.subr.bf16.mxu0 %v12896_v9  ;;  %v3198_v10 = vpack.c.bf16 %v16075_v5, %v16063_v37  ;;  %v3182_v33 = vpop.f32.mrb[159].mxu1  ;;  %5123 = vmatmul.mubr.bf16.gmra.mrb[244].mxu1 %v16120_v31  ;;  %v12995_v37 = vld [vmem:[%s18959_s3 + $0x6e4] ss:$8 sps:$4 sm:$0xff]   ;;  %v12993_v5 = vld [vmem:[%s18959_s3 + $0x6e0] ss:$8 sps:$4 sm:$0xff]  }
 0x29c   :  { %5168 = vmatpush1.bf16.msra.mxu1 %v13677_v27  ;;  %v12933_v27 = vld [vmem:[%s18959_s3 + $0x5e0] ss:$8 sps:$4 sm:$0xff]  }
 0x29d   :  { %10839 = vmatmul.mubr.msk.bf16.gmra.mrb[44].mxu0 %vm1026_vm1, %v19159_v44  ;;  %5169 = vmatprep.subr.bf16.mxu1 %v19039_v25  ;;  %v12923_v44 = vld [vmem:[%s18959_s3 + $0x5b4] ss:$8 sps:$4 sm:$0xff]  }
 0x29e   :  { %3460 = vmatpush1.bf16.msra.mxu0 %v12894_v49  ;;  %2906 = vmatprep.mubr.bf16.mxu0 %v19039_v25  ;;  %v12915_v49 = vld [vmem:[%s18959_s3 + $0x590] ss:$8 sps:$4 sm:$0xff]  }
 0x29f   :  { %3461 = vmatprep.subr.bf16.mxu0 %v12899_v34  ;;  %v19163_v34 = vpack.c.bf16 %v15741_v52, %v15718_v38  ;;  %v12918_v38 = vld [vmem:[%s18959_s3 + $0x5a0] ss:$8 sps:$4 sm:$0xff]  }
 0x2a0   :  { %5170 = vmatpush1.bf16.msra.mxu1 %v13678_v46 }
 0x2a1   :  { %5171 = vmatprep.subr.bf16.mxu1 %v19039_v25 }
 0x2a2   :  { %3462 = vmatpush1.bf16.msra.mxu0 %v12897_v30  ;;  %v16162_v30 = vld [vmem:[%s19031_s22 + $0x254] ss:$8 sps:$4 sm:$0xff]  }
 0x2a3   :  { %3463 = vmatprep.subr.bf16.mxu0 %v12902_v1  ;;  %11210 = vmatprep.mubr.msk.bf16.mxu1 %vm316_vm0, %v16162_v30 }
 0x2a5   :  { %10840 = vmatmul.mubr.msk.bf16.gmra.mrb[48].mxu0 %vm1026_vm1, %v19160_v60 }
 0x2a6   :  { %3464 = vmatpush1.bf16.msra.mxu0 %v12900_v13  ;;  %2916 = vmatprep.mubr.bf16.mxu0 %v19039_v25  ;;  %v16169_v13 = vld [vmem:[%s19031_s22 + $0x250] ss:$8 sps:$4 sm:$0xff]  }
 0x2a7   :  { %3465 = vmatprep.subr.bf16.mxu0 %v12905_v12  ;;  %5133 = vmatmul.mubr.bf16.gmra.mrb[248].mxu1 %v16169_v13 }
 0x2aa   :  { %3466 = vmatpush1.bf16.msra.mxu0 %v12903_v59 }
 0x2ab   :  { %3467 = vmatprep.subr.bf16.mxu0 %v12908_v48  ;;  %v16100_v55 = vpop.f32.mrb[160].mxu1  ;;  %v12926_v48 = vld [vmem:[%s18959_s3 + $0x5c4] ss:$8 sps:$4 sm:$0xff]  }
 0x2ac   :  { %v16105_v61 = vpop.f32.mrb[161].mxu1 }
 0x2ad   :  { %10841 = vmatmul.mubr.msk.bf16.gmra.mrb[52].mxu0 %vm1026_vm1, %v19161_v47  ;;  %v16112_v22 = vpop.f32.mrb[162].mxu1  ;;  %v12932_v47 = vld [vmem:[%s18959_s3 + $0x5d4] ss:$8 sps:$4 sm:$0xff]  }
 0x2ae   :  { %3468 = vmatpush1.bf16.msra.mxu0 %v12906_v2  ;;  %2926 = vmatprep.mubr.bf16.mxu0 %v19039_v25  ;;  %v16130_v9 = vpop.f32.mrb[163].mxu1  ;;  %v13679_v2 = vld [vmem:[%s19030_s29 + $0x68] ss:$12 sps:$4 sm:$0xff]  }
 0x2af   :  { %3469 = vmatprep.subr.bf16.mxu0 %v12911_v8  ;;  %v3869_v56 = vpack.c.bf16 %v16130_v9, %v16105_v61  ;;  %5172 = vmatpush1.bf16.msra.mxu1 %v13679_v2  ;;  %v12924_v8 = vld [vmem:[%s18959_s3 + $0x5c0] ss:$8 sps:$4 sm:$0xff]   ;;  %v16259_v2 = vld [vmem:[%s19031_s22 + $0x270] ss:$8 sps:$4 sm:$0x1f]  }
 0x2b0   :  { %5173 = vmatprep.subr.bf16.mxu1 %v19039_v25  ;;  %v12998_v61 = vld [vmem:[%s18959_s3 + $0x6f4] ss:$8 sps:$4 sm:$0xff]  }
 0x2b2   :  { %3470 = vmatpush1.bf16.msra.mxu0 %v12909_v18  ;;  %v16207_v18 = vld [vmem:[%s19031_s22 + $0x264] ss:$8 sps:$4 sm:$0xff]  }
 0x2b3   :  { %3471 = vmatprep.subr.bf16.mxu0 %v12914_v4  ;;  %11211 = vmatprep.mubr.msk.bf16.mxu1 %vm316_vm0, %v16207_v18 }
 0x2b4   :  { %5143 = vmatmul.mubr.bf16.gmra.mrb[252].mxu1 %v16214_v58 }
 0x2b5   :  { %10842 = vmatmul.mubr.msk.bf16.gmra.mrb[56].mxu0 %vm1026_vm1, %v19162_v32  ;;  %v12930_v32 = vld [vmem:[%s18959_s3 + $0x5d0] ss:$8 sps:$4 sm:$0xff]  }
 0x2b6   :  { %3472 = vmatpush1.bf16.msra.mxu0 %v12912_v23  ;;  %3487 = vmatprep.mubr.bf16.mxu0 %v19163_v34  ;;  %v16151_v52 = vpop.f32.mrb[164].mxu1  ;;  %v12935_v34 = vld [vmem:[%s18959_s3 + $0x5e4] ss:$8 sps:$4 sm:$0xff]  }
 0x2b7   :  { %3473 = vmatprep.subr.bf16.mxu0 %v12917_v45  ;;  %v16157_v43 = vpop.f32.mrb[165].mxu1  ;;  %v13680_v45 = vld [vmem:[%s19030_s29 + $0x80] ss:$12 sps:$4 sm:$0xff]  }
 0x2b8   :  { %v16164_v1 = vpop.f32.mrb[166].mxu1  ;;  %5174 = vmatpush1.bf16.msra.mxu1 %v13680_v45  ;;  %v13684_v23 = vld [vmem:[%s19030_s29 + $0xe0] ss:$12 sps:$4 sm:$0xff]  }
 0x2b9   :  { %v16178_v60 = vpop.f32.mrb[167].mxu1  ;;  %5175 = vmatprep.subr.bf16.mxu1 %v19039_v25 }
 0x2ba   :  { %3474 = vmatpush1.bf16.msra.mxu0 %v12915_v49  ;;  %v19165_v49 = vld [vmem:[#allocation16_spill] sm:$0xff] }
 0x2bb   :  { %3475 = vmatprep.subr.bf16.mxu0 %v12920_v6  ;;  %v13681_v6 = vld [vmem:[%s19030_s29 + $0x98] ss:$12 sps:$4 sm:$0xff]   ;;  %v19166_v12 = vpack.c.bf16 %v15783_v42, %v19165_v49  ;;  %v12957_v42 = vld [vmem:[%s18959_s3 + $0x620] ss:$8 sps:$4 sm:$0xff]  }
 0x2bc   :  { %5176 = vmatpush1.bf16.msra.mxu1 %v13681_v6  ;;  %v12953_v6 = vld [vmem:[%s18959_s3 + $0x604] ss:$8 sps:$4 sm:$0xff]  }
 0x2bd   :  { %5177 = vmatprep.subr.bf16.mxu1 %v19039_v25 }
 0x2be   :  { %3476 = vmatpush1.bf16.msra.mxu0 %v12918_v38  ;;  %v16196_v28 = vpop.f32.mrb[168].mxu1 }
 0x2bf   :  { %3477 = vmatprep.subr.bf16.mxu0 %v12923_v44  ;;  %v16202_v33 = vpop.f32.mrb[169].mxu1  ;;  %v12941_v44 = vld [vmem:[%s18959_s3 + $0x5f4] ss:$8 sps:$4 sm:$0xff]  }
 0x2c0   :  { %v16209_v4 = vpop.f32.mrb[170].mxu1 }
 0x2c1   :  { %v16223_v20 = vpop.f32.mrb[171].mxu1 }
 0x2c2   :  { %3478 = vmatpush1.bf16.msra.mxu0 %v12921_v3  ;;  %v16252_v3 = vld [vmem:[%s19031_s22 + $0x274] ss:$8 sps:$4 sm:$0x1f]  }
 0x2c3   :  { %3479 = vmatprep.subr.bf16.mxu0 %v12926_v48  ;;  %11212 = vmatprep.mubr.msk.bf16.mxu1 %vm316_vm0, %v16252_v3 }
 0x2c4   :  { %5153 = vmatmul.mubr.bf16.gmra.mrb[0].mxu1 %v16259_v2 }
 0x2c5   :  { %11213 = vmatprep.mubr.msk.bf16.mxu1 %vm316_vm0, %v16073_v41 }
 0x2c6   :  { %3480 = vmatpush1.bf16.msra.mxu0 %v12924_v8  ;;  %v16241_v38 = vpop.f32.mrb[172].mxu1  ;;  %v12956_v8 = vld [vmem:[%s18959_s3 + $0x614] ss:$8 sps:$4 sm:$0xff]  }
 0x2c7   :  { %3481 = vmatprep.subr.bf16.mxu0 %v12932_v47  ;;  %v16247_v46 = vpop.f32.mrb[173].mxu1  ;;  %v13682_v47 = vld [vmem:[%s19030_s29 + $0xb0] ss:$12 sps:$4 sm:$0xff]  }
 0x2c8   :  { %v16254_v48 = vpop.f32.mrb[174].mxu1  ;;  %5178 = vmatpush1.bf16.msra.mxu1 %v13682_v47  ;;  %v12951_v47 = vld [vmem:[%s18959_s3 + $0x600] ss:$8 sps:$4 sm:$0xff]  }
 0x2c9   :  { %v16268_v45 = vpop.f32.mrb[175].mxu1  ;;  %5179 = vmatprep.subr.bf16.mxu1 %v19039_v25 }
 0x2ca   :  { %3482 = vmatpush1.bf16.msra.mxu0 %v12930_v32  ;;  %v12939_v32 = vld [vmem:[%s18959_s3 + $0x5f0] ss:$8 sps:$4 sm:$0xff]  }
 0x2cb   :  { %3483 = vmatprep.subr.bf16.mxu0 %v12935_v34 }
 0x2ce   :  { %3484 = vmatpush1.bf16.msra.mxu0 %v12933_v27  ;;  %v13683_v27 = vld [vmem:[%s19030_s29 + $0xc8] ss:$12 sps:$4 sm:$0xff]  }
 0x2cf   :  { %3485 = vmatprep.subr.bf16.mxu0 %v12941_v44  ;;  %5180 = vmatpush1.bf16.msra.mxu1 %v13683_v27  ;;  %v16288_v44 = vpop.f32.mrb[176].mxu1 }
 0x2d0   :  { %5181 = vmatprep.subr.bf16.mxu1 %v19039_v25  ;;  %v16294_v41 = vpop.f32.mrb[177].mxu1 }
 0x2d1   :  { %v16296_v34 = vpop.f32.mrb[178].mxu1 }
 0x2d2   :  { %3486 = vmatpush1.bf16.msra.mxu0 %v12939_v32  ;;  %v19164_v32 = vpack.c.bf16 %v15725_v19, %v15713_v57  ;;  %v12954_v57 = vld [vmem:[%s18959_s3 + $0x610] ss:$8 sps:$4 sm:$0xff]  }
 0x2d3   :  { %3538 = vmatprep.subr.bf16.mxu0 %v12953_v6  ;;  %5182 = vmatpush1.bf16.msra.mxu1 %v13684_v23  ;;  %v16306_v6 = vpop.f32.mrb[179].mxu1 }
 0x2d5   :  { %3488 = vmatmul.mubr.bf16.vlgmr.msra.gmra.mrb[40].mxu0 %v19164_v32  ;;  %v12959_v32 = vld [vmem:[%s18959_s3 + $0x624] ss:$8 sps:$4 sm:$0xff]  }
 0x2d6   :  { %3497 = vmatprep.mubr.bf16.mxu0 %v19166_v12  ;;  %3539 = vmatpush1.bf16.msra.mxu0 %v12951_v47  ;;  %v12962_v12 = vld [vmem:[%s18959_s3 + $0x634] ss:$8 sps:$4 sm:$0xff]   ;;  %v16328_v23 = vpop.f32.mrb[180].mxu1  ;;  %v19168_v47 = vld [vmem:[#allocation17_spill] sm:$0xff] }
 0x2d7   :  { %3540 = vmatprep.subr.bf16.mxu0 %v12956_v8  ;;  %5196 = vmatmul.mubr.bf16.vlgmr.msra.gmra.mrb[4].mxu1 %v16068_v24  ;;  %v3831_v49 = vpop.f32.mrb[181].mxu1  ;;  %v19167_v8 = vld [vmem:[#allocation19_spill] sm:$0xff] }
 0x2d8   :  { %11214 = vmatprep.mubr.msk.bf16.mxu1 %vm316_vm0, %v16110_v16  ;;  %v19169_v27 = vpack.c.bf16 %v19167_v8, %v19168_v47  ;;  %v16333_v24 = vpop.f32.mrb[182].mxu1  ;;  %v19170_v16 = vld [vmem:[#allocation6_spill] sm:$0xff]  ;;  %v19176_v8 = vld [vmem:[#allocation13_spill] sm:$0xff]  ;;  %v19177_v47 = vld [vmem:[#allocation8_spill] sm:$0xff] }
 0x2d9   :  { %v3870_v59 = vpack.c.bf16 %v16333_v24, %v16328_v23  ;;  %v3834_v17 = vpop.f32.mrb[183].mxu1  ;;  %v13049_v23 = vld [vmem:[%s18959_s3 + $0x7b4] ss:$8 sps:$4 sm:$0xff]  }
 0x2da   :  { %3541 = vmatpush1.bf16.msra.mxu0 %v12954_v57  ;;  %v19171_v57 = vld [vmem:[#allocation20_spill] sm:$0xff] }
 0x2db   :  { %3542 = vmatprep.subr.bf16.mxu0 %v12959_v32  ;;  %v19172_v19 = vpack.c.bf16 %v19170_v16, %v19171_v57  ;;  %v12960_v32 = vld [vmem:[%s18959_s3 + $0x630] ss:$8 sps:$4 sm:$0xff]   ;;  %v19178_v16 = vpack.c.bf16 %v19176_v8, %v19177_v47 }
 0x2dc   :  { %v19179_v17 = vld [vmem:[#allocation12_spill] sm:$0xff] }
 0x2dd   :  { %3498 = vmatmul.mubr.bf16.gmra.mrb[44].mxu0 %v19169_v27  ;;  %v12965_v27 = vld [vmem:[%s18959_s3 + $0x644] ss:$8 sps:$4 sm:$0xff]   ;;  %v12978_v47 = vld [vmem:[%s18959_s3 + $0x690] ss:$8 sps:$4 sm:$0xff]  }
 0x2de   :  { %3507 = vmatprep.mubr.bf16.mxu0 %v19172_v19  ;;  %3543 = vmatpush1.bf16.msra.mxu0 %v12957_v42  ;;  %v19173_v19 = vld [vmem:[#allocation5_spill] sm:$0xff]  ;;  %v16376_v36 = vpop.f32.mrb[184].mxu1 }
 0x2df   :  { %3544 = vmatprep.subr.bf16.mxu0 %v12962_v12  ;;  %5204 = vmatmul.mubr.bf16.gmra.mrb[8].mxu1 %v16120_v31  ;;  %v19174_v42 = vld [vmem:[#allocation21_spill] sm:$0xff]  ;;  %v19180_v31 = vld [vmem:[#allocation7_spill] sm:$0xff] }
 0x2e0   :  { %11215 = vmatprep.mubr.msk.bf16.mxu1 %vm316_vm0, %v16162_v30  ;;  %v19175_v49 = vpack.c.bf16 %v19173_v19, %v19174_v42  ;;  %v19181_v12 = vpack.c.bf16 %v19179_v17, %v19180_v31  ;;  %v3839_v30 = vpop.f32.mrb[185].mxu1 }
 0x2e1   :  { %v12989_v30 = vld [vmem:[%s18959_s3 + $0x6c4] ss:$8 sps:$4 sm:$0xff]  }
 0x2e2   :  { %3545 = vmatpush1.bf16.msra.mxu0 %v12960_v32  ;;  %v12972_v32 = vld [vmem:[%s18959_s3 + $0x670] ss:$8 sps:$4 sm:$0xff]  }
 0x2e3   :  { %4139 = vmatprep.subr.bf16.mxu0 %v12965_v27  ;;  %v12977_v27 = vld [vmem:[%s18959_s3 + $0x684] ss:$8 sps:$4 sm:$0xff]  }
 0x2e5   :  { %3508 = vmatmul.mubr.bf16.gmra.mrb[48].mxu0 %v19175_v49 }
 0x2e6   :  { %3517 = vmatprep.mubr.bf16.mxu0 %v19178_v16  ;;  %v12983_v16 = vld [vmem:[%s18959_s3 + $0x6a4] ss:$8 sps:$4 sm:$0xff]  }
 0x2e7   :  { %5212 = vmatmul.mubr.bf16.gmra.mrb[12].mxu1 %v16169_v13  ;;  %v16381_v13 = vpop.f32.mrb[186].mxu1 }
 0x2e8   :  { %11216 = vmatprep.mubr.msk.bf16.mxu1 %vm316_vm0, %v16207_v18  ;;  %v3842_v40 = vpop.f32.mrb[187].mxu1  ;;  %v12971_v18 = vld [vmem:[%s18959_s3 + $0x664] ss:$8 sps:$4 sm:$0xff]  }
 0x2e9   :  { %v16399_v7 = vpop.f32.mrb[188].mxu1 }
 0x2ed   :  { %3518 = vmatmul.mubr.bf16.gmra.mrb[52].mxu0 %v19181_v12 }
 0x2ee   :  { %3527 = vmatprep.mubr.bf16.mxu0 %v3197_v62  ;;  %v12968_v62 = vld [vmem:[%s18959_s3 + $0x654] ss:$8 sps:$4 sm:$0xff]  }
 0x2ef   :  { %5220 = vmatmul.mubr.bf16.gmra.mrb[16].mxu1 %v16214_v58  ;;  %v3847_v58 = vpop.f32.mrb[189].mxu1 }
 0x2f0   :  { %11217 = vmatprep.mubr.msk.bf16.mxu1 %vm316_vm0, %v16252_v3  ;;  %v16404_v3 = vpop.f32.mrb[190].mxu1 }
 0x2f1   :  { %v3850_v57 = vpop.f32.mrb[191].mxu1 }
 0x2f2   :  { %v16422_v26 = vpop.f32.mrb[192].mxu1 }
 0x2f3   :  { %v3855_v19 = vpop.f32.mrb[193].mxu1 }
 0x2f4   :  { %v16427_v42 = vpop.f32.mrb[194].mxu1  ;;  %v12999_v19 = vld [vmem:[%s18959_s3 + $0x700] ss:$8 sps:$4 sm:$0xff]  }
 0x2f5   :  { %3528 = vmatmul.mubr.bf16.gmra.mrb[56].mxu0 %v3196_v54  ;;  %v3873_v54 = vpack.c.bf16 %v16381_v13, %v16376_v36  ;;  %v3879_v49 = vpack.c.bf16 %v16427_v42, %v16422_v26  ;;  %v3858_v8 = vpop.f32.mrb[195].mxu1  ;;  %v13050_v36 = vld [vmem:[%s18959_s3 + $0x7c0] ss:$8 sps:$4 sm:$0xff]  }
 0x2f6   :  { %3570 = vmatprep.mubr.bf16.mxu0 %v19039_v25  ;;  %v16445_v50 = vpop.f32.mrb[196].mxu1  ;;  %v13062_v26 = vld [vmem:[%s18959_s3 + $0x800] ss:$8 sps:$4 sm:$0xff]  }
 0x2f7   :  { %5228 = vmatmul.mubr.bf16.gmra.mrb[20].mxu1 %v16259_v2  ;;  %v3876_v2 = vpack.c.bf16 %v16404_v3, %v16399_v7  ;;  %v3863_v17 = vpop.f32.mrb[197].mxu1  ;;  %v13056_v7 = vld [vmem:[%s18959_s3 + $0x7e0] ss:$8 sps:$4 sm:$0xff]  }
 0x2f8   :  { %5906 = vmatprep.mubr.bf16.mxu1 %v19039_v25  ;;  %v16450_v31 = vpop.f32.mrb[198].mxu1 }
 0x2f9   :  { %v3882_v12 = vpack.c.bf16 %v16450_v31, %v16445_v50  ;;  %v13070_v50 = vld [vmem:[%s18959_s3 + $0x824] ss:$8 sps:$4 sm:$0xff]   ;;  %v13068_v31 = vld [vmem:[%s18959_s3 + $0x820] ss:$8 sps:$4 sm:$0xff]  }
 0x2fd   :  { %10953 = vmatmul.mubr.msk.bf16.vlgmr.msra.gmra.mrb[40].mxu0 %vm1026_vm1, %v3186_v35  ;;  %v12974_v35 = vld [vmem:[%s18959_s3 + $0x674] ss:$8 sps:$4 sm:$0xff]  }
 0x2fe   :  { %4140 = vmatpush1.bf16.msra.mxu0 %v12963_v15  ;;  %3580 = vmatprep.mubr.bf16.mxu0 %v19039_v25  ;;  %v3866_v15 = vpop.f32.mrb[199].mxu1 }
 0x2ff   :  { %4141 = vmatprep.subr.bf16.mxu0 %v12968_v62  ;;  %v12984_v62 = vld [vmem:[%s18959_s3 + $0x6b0] ss:$8 sps:$4 sm:$0xff]   ;;  %v16468_v63 = vpop.f32.mrb[200].mxu1 }
 0x300   :  { %v16473_v40 = vpop.f32.mrb[201].mxu1  ;;  %v13005_v15 = vld [vmem:[%s18959_s3 + $0x710] ss:$8 sps:$4 sm:$0xff]  }
 0x302   :  { %4142 = vmatpush1.bf16.msra.mxu0 %v12966_v51  ;;  %v16475_v51 = vpop.f32.mrb[202].mxu1 }
 0x303   :  { %4143 = vmatprep.subr.bf16.mxu0 %v12971_v18  ;;  %v4552_v18 = vpack.c.bf16 %v16475_v51, %v16468_v63  ;;  %v13094_v63 = vld [vmem:[%s18959_s3 + $0x8a4] ss:$8 sps:$4 sm:$0xff]   ;;  %v13092_v51 = vld [vmem:[%s18959_s3 + $0x8a0] ss:$8 sps:$4 sm:$0xff]  }
 0x305   :  { %10954 = vmatmul.mubr.msk.bf16.gmra.mrb[44].mxu0 %vm1026_vm1, %v3189_v11  ;;  %v12980_v11 = vld [vmem:[%s18959_s3 + $0x694] ss:$8 sps:$4 sm:$0xff]  }
 0x306   :  { %4144 = vmatpush1.bf16.msra.mxu0 %v12969_v29  ;;  %3590 = vmatprep.mubr.bf16.mxu0 %v19039_v25  ;;  %v16483_v29 = vpop.f32.mrb[203].mxu1 }
 0x307   :  { %4145 = vmatprep.subr.bf16.mxu0 %v12974_v35  ;;  %v12990_v35 = vld [vmem:[%s18959_s3 + $0x6d0] ss:$8 sps:$4 sm:$0xff]   ;;  %v4553_v58 = vpack.c.bf16 %v16483_v29, %v16473_v40  ;;  %v13073_v40 = vld [vmem:[%s18959_s3 + $0x834] ss:$8 sps:$4 sm:$0xff]  }
 0x30a   :  { %4146 = vmatpush1.bf16.msra.mxu0 %v12972_v32 }
 0x30b   :  { %4147 = vmatprep.subr.bf16.mxu0 %v12977_v27  ;;  %v12996_v27 = vld [vmem:[%s18959_s3 + $0x6f0] ss:$8 sps:$4 sm:$0xff]  }
 0x30d   :  { %10955 = vmatmul.mubr.msk.bf16.gmra.mrb[48].mxu0 %vm1026_vm1, %v3192_v53  ;;  %v12986_v53 = vld [vmem:[%s18959_s3 + $0x6b4] ss:$8 sps:$4 sm:$0xff]  }
 0x30e   :  { %4148 = vmatpush1.bf16.msra.mxu0 %v12975_v21  ;;  %3600 = vmatprep.mubr.bf16.mxu0 %v19039_v25 }
 0x30f   :  { %4149 = vmatprep.subr.bf16.mxu0 %v12980_v11  ;;  %v13001_v11 = vld [vmem:[%s18959_s3 + $0x704] ss:$8 sps:$4 sm:$0xff]  }
 0x312   :  { %4150 = vmatpush1.bf16.msra.mxu0 %v12978_v47  ;;  %v13007_v47 = vld [vmem:[%s18959_s3 + $0x714] ss:$8 sps:$4 sm:$0xff]  }
 0x313   :  { %4151 = vmatprep.subr.bf16.mxu0 %v12983_v16 }
 0x315   :  { %10956 = vmatmul.mubr.msk.bf16.gmra.mrb[52].mxu0 %vm1026_vm1, %v3195_v0  ;;  %v12992_v0 = vld [vmem:[%s18959_s3 + $0x6d4] ss:$8 sps:$4 sm:$0xff]  }
 0x316   :  { %4152 = vmatpush1.bf16.msra.mxu0 %v12981_v39  ;;  %3610 = vmatprep.mubr.bf16.mxu0 %v19039_v25 }
 0x317   :  { %4153 = vmatprep.subr.bf16.mxu0 %v12986_v53 }
 0x31a   :  { %4154 = vmatpush1.bf16.msra.mxu0 %v12984_v62  ;;  %v13029_v62 = vld [vmem:[%s18959_s3 + $0x750] ss:$8 sps:$4 sm:$0xff]  }
 0x31b   :  { %4155 = vmatprep.subr.bf16.mxu0 %v12989_v30  ;;  %v13010_v30 = vld [vmem:[%s18959_s3 + $0x724] ss:$8 sps:$4 sm:$0xff]  }
 0x31d   :  { %10957 = vmatmul.mubr.msk.bf16.gmra.mrb[56].mxu0 %vm1026_vm1, %v3198_v10  ;;  %v16499_v10 = vpop.f32.mrb[204].mxu1 }
 0x31e   :  { %4156 = vmatpush1.bf16.msra.mxu0 %v12987_v14  ;;  %4171 = vmatprep.mubr.bf16.mxu0 %v3869_v56  ;;  %v16504_v9 = vpop.f32.mrb[205].mxu1  ;;  %v13008_v14 = vld [vmem:[%s18959_s3 + $0x720] ss:$8 sps:$4 sm:$0xff]  }
 0x31f   :  { %4157 = vmatprep.subr.bf16.mxu0 %v12992_v0  ;;  %v16506_v56 = vpop.f32.mrb[206].mxu1 }
 0x320   :  { %v16510_v32 = vpop.f32.mrb[207].mxu1 }
 0x321   :  { %v4556_v21 = vpack.c.bf16 %v16510_v32, %v16504_v9 }
 0x322   :  { %4158 = vmatpush1.bf16.msra.mxu0 %v12990_v35  ;;  %v13016_v35 = vld [vmem:[%s18959_s3 + $0x734] ss:$8 sps:$4 sm:$0xff]  }
 0x323   :  { %4159 = vmatprep.subr.bf16.mxu0 %v12995_v37 }
 0x326   :  { %4160 = vmatpush1.bf16.msra.mxu0 %v12993_v5  ;;  %v16523_v8 = vpop.f32.mrb[208].mxu1 }
 0x327   :  { %4161 = vmatprep.subr.bf16.mxu0 %v12998_v61  ;;  %v16528_v16 = vpop.f32.mrb[209].mxu1 }
 0x328   :  { %v16530_v39 = vpop.f32.mrb[210].mxu1 }
 0x329   :  { %v16534_v17 = vpop.f32.mrb[211].mxu1 }
 0x32a   :  { %4162 = vmatpush1.bf16.msra.mxu0 %v12996_v27 }
 0x32b   :  { %4163 = vmatprep.subr.bf16.mxu0 %v13001_v11  ;;  %v13014_v11 = vld [vmem:[%s18959_s3 + $0x730] ss:$8 sps:$4 sm:$0xff]  }
 0x32e   :  { %4164 = vmatpush1.bf16.msra.mxu0 %v12999_v19  ;;  %v16547_v0 = vpop.f32.mrb[212].mxu1 }
 0x32f   :  { %4165 = vmatprep.subr.bf16.mxu0 %v13007_v47  ;;  %v16552_v37 = vpop.f32.mrb[213].mxu1  ;;  %v13028_v47 = vld [vmem:[%s18959_s3 + $0x744] ss:$8 sps:$4 sm:$0xff]  }
 0x330   :  { %v16554_v5 = vpop.f32.mrb[214].mxu1 }
 0x331   :  { %v16558_v27 = vpop.f32.mrb[215].mxu1 }
 0x332   :  { %4166 = vmatpush1.bf16.msra.mxu0 %v13005_v15  ;;  %v13026_v15 = vld [vmem:[%s18959_s3 + $0x740] ss:$8 sps:$4 sm:$0xff]  }
 0x333   :  { %4167 = vmatprep.subr.bf16.mxu0 %v13010_v30 }
 0x336   :  { %4168 = vmatpush1.bf16.msra.mxu0 %v13008_v14  ;;  %v16571_v30 = vpop.f32.mrb[216].mxu1  ;;  %v13031_v14 = vld [vmem:[%s18959_s3 + $0x754] ss:$8 sps:$4 sm:$0xff]  }
 0x337   :  { %4169 = vmatprep.subr.bf16.mxu0 %v13016_v35  ;;  %v16576_v61 = vpop.f32.mrb[217].mxu1  ;;  %v19182_v35 = vpack.c.bf16 %v16112_v22, %v16100_v55  ;;  %v13034_v55 = vld [vmem:[%s18959_s3 + $0x764] ss:$8 sps:$4 sm:$0xff]   ;;  %v13032_v22 = vld [vmem:[%s18959_s3 + $0x760] ss:$8 sps:$4 sm:$0xff]  }
 0x338   :  { %v16578_v19 = vpop.f32.mrb[218].mxu1 }
 0x339   :  { %v16585_v53 = vpop.f32.mrb[219].mxu1 }
 0x33a   :  { %4170 = vmatpush1.bf16.msra.mxu0 %v13014_v11  ;;  %v4565_v57 = vpack.c.bf16 %v16585_v53, %v16576_v61 }
 0x33b   :  { %4222 = vmatprep.subr.bf16.mxu0 %v13028_v47  ;;  %v19183_v47 = vpack.c.bf16 %v16178_v60, %v16157_v43  ;;  %v13037_v43 = vld [vmem:[%s18959_s3 + $0x774] ss:$8 sps:$4 sm:$0xff]  }
 0x33d   :  { %4172 = vmatmul.mubr.bf16.vlgmr.msra.gmra.mrb[40].mxu0 %v19182_v35 }
 0x33e   :  { %4181 = vmatprep.mubr.bf16.mxu0 %v19183_v47  ;;  %4223 = vmatpush1.bf16.msra.mxu0 %v13026_v15  ;;  %v16604_v60 = vpop.f32.mrb[220].mxu1  ;;  %v13035_v47 = vld [vmem:[%s18959_s3 + $0x770] ss:$8 sps:$4 sm:$0xff]  }
 0x33f   :  { %4224 = vmatprep.subr.bf16.mxu0 %v13031_v14  ;;  %v4515_v15 = vpop.f32.mrb[221].mxu1  ;;  %v19184_v14 = vpack.c.bf16 %v16164_v1, %v16151_v52  ;;  %v13040_v52 = vld [vmem:[%s18959_s3 + $0x784] ss:$8 sps:$4 sm:$0xff]   ;;  %v19186_v1 = vpack.c.bf16 %v16209_v4, %v16196_v28  ;;  %v13038_v28 = vld [vmem:[%s18959_s3 + $0x780] ss:$8 sps:$4 sm:$0xff]  }
 0x340   :  { %v16609_v35 = vpop.f32.mrb[222].mxu1 }
 0x341   :  { %v4518_v11 = vpop.f32.mrb[223].mxu1 }
 0x342   :  { %4225 = vmatpush1.bf16.msra.mxu0 %v13029_v62  ;;  %v19185_v62 = vpack.c.bf16 %v16223_v20, %v16202_v33  ;;  %v19187_v33 = vpack.c.bf16 %v16268_v45, %v16247_v46  ;;  %v19188_v20 = vpack.c.bf16 %v16254_v48, %v16241_v38  ;;  %v19189_v11 = vpack.c.bf16 %v16306_v6, %v16294_v41  ;;  %v13043_v38 = vld [vmem:[%s18959_s3 + $0x794] ss:$8 sps:$4 sm:$0xff]   ;;  %v13046_v41 = vld [vmem:[%s18959_s3 + $0x7a4] ss:$8 sps:$4 sm:$0xff]  }
 0x343   :  { %4226 = vmatprep.subr.bf16.mxu0 %v13034_v55  ;;  %v4554_v55 = vpack.c.bf16 %v16609_v35, %v16604_v60  ;;  %v13106_v60 = vld [vmem:[%s18959_s3 + $0x8e4] ss:$8 sps:$4 sm:$0xff]   ;;  %v13104_v35 = vld [vmem:[%s18959_s3 + $0x8e0] ss:$8 sps:$4 sm:$0xff]  }
 0x345   :  { %4182 = vmatmul.mubr.bf16.gmra.mrb[44].mxu0 %v19184_v14 }
 0x346   :  { %4191 = vmatprep.mubr.bf16.mxu0 %v19185_v62  ;;  %4227 = vmatpush1.bf16.msra.mxu0 %v13032_v22  ;;  %v19190_v22 = vpack.c.bf16 %v16296_v34, %v16288_v44  ;;  %v16641_v4 = vpop.f32.mrb[224].mxu1  ;;  %v13041_v44 = vld [vmem:[%s18959_s3 + $0x790] ss:$8 sps:$4 sm:$0xff]  }
 0x347   :  { %4228 = vmatprep.subr.bf16.mxu0 %v13037_v43  ;;  %v4523_v46 = vpop.f32.mrb[225].mxu1  ;;  %v13047_v62 = vld [vmem:[%s18959_s3 + $0x7b0] ss:$8 sps:$4 sm:$0xff]  }
 0x348   :  { %v16646_v48 = vpop.f32.mrb[226].mxu1 }
 0x349   :  { %v4557_v45 = vpack.c.bf16 %v16646_v48, %v16641_v4  ;;  %v4526_v34 = vpop.f32.mrb[227].mxu1  ;;  %v13115_v4 = vld [vmem:[%s18959_s3 + $0x914] ss:$8 sps:$4 sm:$0xff]   ;;  %v13113_v48 = vld [vmem:[%s18959_s3 + $0x910] ss:$8 sps:$4 sm:$0xff]  }
 0x34a   :  { %4229 = vmatpush1.bf16.msra.mxu0 %v13035_v47  ;;  %v13052_v47 = vld [vmem:[%s18959_s3 + $0x7c4] ss:$8 sps:$4 sm:$0xff]  }
 0x34b   :  { %4823 = vmatprep.subr.bf16.mxu0 %v13040_v52 }
 0x34d   :  { %4192 = vmatmul.mubr.bf16.gmra.mrb[48].mxu0 %v19186_v1 }
 0x34e   :  { %4201 = vmatprep.mubr.bf16.mxu0 %v19187_v33  ;;  %v16664_v6 = vpop.f32.mrb[228].mxu1 }
 0x34f   :  { %v4531_v24 = vpop.f32.mrb[229].mxu1 }
 0x350   :  { %v16669_v43 = vpop.f32.mrb[230].mxu1 }
 0x351   :  { %v4560_v15 = vpack.c.bf16 %v16669_v43, %v16664_v6  ;;  %v4534_v14 = vpop.f32.mrb[231].mxu1  ;;  %v13121_v6 = vld [vmem:[%s18959_s3 + $0x934] ss:$8 sps:$4 sm:$0xff]   ;;  %v13119_v43 = vld [vmem:[%s18959_s3 + $0x930] ss:$8 sps:$4 sm:$0xff]  }
 0x355   :  { %4202 = vmatmul.mubr.bf16.gmra.mrb[52].mxu0 %v19188_v20 }
 0x356   :  { %4211 = vmatprep.mubr.bf16.mxu0 %v19189_v11  ;;  %v16687_v13 = vpop.f32.mrb[232].mxu1  ;;  %v13053_v11 = vld [vmem:[%s18959_s3 + $0x7d0] ss:$8 sps:$4 sm:$0xff]  }
 0x357   :  { %v4539_v52 = vpop.f32.mrb[233].mxu1 }
 0x358   :  { %v16692_v1 = vpop.f32.mrb[234].mxu1  ;;  %v13071_v52 = vld [vmem:[%s18959_s3 + $0x830] ss:$8 sps:$4 sm:$0xff]  }
 0x359   :  { %v4563_v33 = vpack.c.bf16 %v16692_v1, %v16687_v13  ;;  %v4542_v20 = vpop.f32.mrb[235].mxu1  ;;  %v13127_v13 = vld [vmem:[%s18959_s3 + $0x954] ss:$8 sps:$4 sm:$0xff]   ;;  %v13125_v1 = vld [vmem:[%s18959_s3 + $0x950] ss:$8 sps:$4 sm:$0xff]  }
 0x35d   :  { %4212 = vmatmul.mubr.bf16.gmra.mrb[56].mxu0 %v19190_v22  ;;  %v13058_v22 = vld [vmem:[%s18959_s3 + $0x7e4] ss:$8 sps:$4 sm:$0xff]  }
 0x35e   :  { %4254 = vmatprep.mubr.bf16.mxu0 %v19039_v25  ;;  %v16710_v3 = vpop.f32.mrb[236].mxu1 }
 0x365   :  { %11068 = vmatmul.mubr.msk.bf16.vlgmr.msra.gmra.mrb[40].mxu0 %vm1026_vm1, %v3870_v59  ;;  %v13044_v59 = vld [vmem:[%s18959_s3 + $0x7a0] ss:$8 sps:$4 sm:$0xff]  }
 0x366   :  { %4824 = vmatpush1.bf16.msra.mxu0 %v13038_v28  ;;  %4264 = vmatprep.mubr.bf16.mxu0 %v19039_v25  ;;  %v4547_v28 = vpop.f32.mrb[237].mxu1 }
 0x367   :  { %4825 = vmatprep.subr.bf16.mxu0 %v13043_v38  ;;  %v16715_v38 = vpop.f32.mrb[238].mxu1 }
 0x368   :  { %v4566_v46 = vpack.c.bf16 %v16715_v38, %v16710_v3  ;;  %v4550_v34 = vpop.f32.mrb[239].mxu1  ;;  %v13128_v3 = vld [vmem:[%s18959_s3 + $0x960] ss:$8 sps:$4 sm:$0xff]   ;;  %v13133_v38 = vld [vmem:[%s18959_s3 + $0x974] ss:$8 sps:$4 sm:$0xff]  }
 0x369   :  { %v16733_v42 = vpop.f32.mrb[240].mxu1 }
 0x36a   :  { %4826 = vmatpush1.bf16.msra.mxu0 %v13041_v44  ;;  %v13059_v44 = vld [vmem:[%s18959_s3 + $0x7f0] ss:$8 sps:$4 sm:$0xff]  }
 0x36b   :  { %4827 = vmatprep.subr.bf16.mxu0 %v13046_v41  ;;  %v13064_v41 = vld [vmem:[%s18959_s3 + $0x804] ss:$8 sps:$4 sm:$0xff]  }
 0x36d   :  { %11069 = vmatmul.mubr.msk.bf16.gmra.mrb[44].mxu0 %vm1026_vm1, %v3873_v54  ;;  %v13055_v54 = vld [vmem:[%s18959_s3 + $0x7d4] ss:$8 sps:$4 sm:$0xff]  }
 0x36e   :  { %4828 = vmatpush1.bf16.msra.mxu0 %v13044_v59  ;;  %4274 = vmatprep.mubr.bf16.mxu0 %v19039_v25  ;;  %v16738_v59 = vpop.f32.mrb[241].mxu1 }
 0x36f   :  { %4829 = vmatprep.subr.bf16.mxu0 %v13049_v23  ;;  %v16740_v23 = vpop.f32.mrb[242].mxu1 }
 0x370   :  { %v5236_v24 = vpack.c.bf16 %v16740_v23, %v16733_v42  ;;  %v16748_v14 = vpop.f32.mrb[243].mxu1  ;;  %v13152_v42 = vld [vmem:[%s18959_s3 + $0x9e0] ss:$8 sps:$4 sm:$0xff]   ;;  %v13157_v23 = vld [vmem:[%s18959_s3 + $0x9f4] ss:$8 sps:$4 sm:$0xff]  }
 0x372   :  { %4830 = vmatpush1.bf16.msra.mxu0 %v13047_v62  ;;  %v13065_v62 = vld [vmem:[%s18959_s3 + $0x810] ss:$8 sps:$4 sm:$0xff]  }
 0x373   :  { %4831 = vmatprep.subr.bf16.mxu0 %v13052_v47  ;;  %v5237_v47 = vpack.c.bf16 %v16748_v14, %v16738_v59  ;;  %v13136_v59 = vld [vmem:[%s18959_s3 + $0x984] ss:$8 sps:$4 sm:$0xff]   ;;  %v13134_v14 = vld [vmem:[%s18959_s3 + $0x980] ss:$8 sps:$4 sm:$0xff]  }
 0x375   :  { %11070 = vmatmul.mubr.msk.bf16.gmra.mrb[48].mxu0 %vm1026_vm1, %v3876_v2  ;;  %v13061_v2 = vld [vmem:[%s18959_s3 + $0x7f4] ss:$8 sps:$4 sm:$0xff]  }
 0x376   :  { %4832 = vmatpush1.bf16.msra.mxu0 %v13050_v36  ;;  %4284 = vmatprep.mubr.bf16.mxu0 %v19039_v25 }
 0x377   :  { %4833 = vmatprep.subr.bf16.mxu0 %v13055_v54 }
 0x37a   :  { %4834 = vmatpush1.bf16.msra.mxu0 %v13053_v11  ;;  %v13076_v11 = vld [vmem:[%s18959_s3 + $0x844] ss:$8 sps:$4 sm:$0xff]  }
 0x37b   :  { %4835 = vmatprep.subr.bf16.mxu0 %v13058_v22  ;;  %v13074_v22 = vld [vmem:[%s18959_s3 + $0x840] ss:$8 sps:$4 sm:$0xff]  }
 0x37d   :  { %11071 = vmatmul.mubr.msk.bf16.gmra.mrb[52].mxu0 %vm1026_vm1, %v3879_v49  ;;  %v13067_v49 = vld [vmem:[%s18959_s3 + $0x814] ss:$8 sps:$4 sm:$0xff]  }
 0x37e   :  { %4836 = vmatpush1.bf16.msra.mxu0 %v13056_v7  ;;  %4294 = vmatprep.mubr.bf16.mxu0 %v19039_v25 }
 0x37f   :  { %4837 = vmatprep.subr.bf16.mxu0 %v13061_v2  ;;  %v13079_v2 = vld [vmem:[%s18959_s3 + $0x854] ss:$8 sps:$4 sm:$0xff]  }
 0x382   :  { %4838 = vmatpush1.bf16.msra.mxu0 %v13059_v44  ;;  %v13088_v44 = vld [vmem:[%s18959_s3 + $0x884] ss:$8 sps:$4 sm:$0xff]  }
 0x383   :  { %4839 = vmatprep.subr.bf16.mxu0 %v13064_v41 }
 0x385   :  { %11072 = vmatmul.mubr.msk.bf16.gmra.mrb[56].mxu0 %vm1026_vm1, %v3882_v12  ;;  %v16764_v12 = vpop.f32.mrb[244].mxu1 }
 0x386   :  { %4840 = vmatpush1.bf16.msra.mxu0 %v13062_v26  ;;  %4855 = vmatprep.mubr.bf16.mxu0 %v4553_v58  ;;  %v16769_v29 = vpop.f32.mrb[245].mxu1  ;;  %v13077_v26 = vld [vmem:[%s18959_s3 + $0x850] ss:$8 sps:$4 sm:$0xff]  }
 0x387   :  { %4841 = vmatprep.subr.bf16.mxu0 %v13067_v49  ;;  %v16771_v58 = vpop.f32.mrb[246].mxu1 }
 0x388   :  { %v16775_v54 = vpop.f32.mrb[247].mxu1 }
 0x389   :  { %v16788_v7 = vpop.f32.mrb[248].mxu1 }
 0x38a   :  { %4842 = vmatpush1.bf16.msra.mxu0 %v13065_v62  ;;  %v16793_v28 = vpop.f32.mrb[249].mxu1  ;;  %v13082_v62 = vld [vmem:[%s18959_s3 + $0x864] ss:$8 sps:$4 sm:$0xff]  }
 0x38b   :  { %4843 = vmatprep.subr.bf16.mxu0 %v13070_v50  ;;  %v16795_v34 = vpop.f32.mrb[250].mxu1  ;;  %v13080_v50 = vld [vmem:[%s18959_s3 + $0x860] ss:$8 sps:$4 sm:$0xff]  }
 0x38c   :  { %v16799_v41 = vpop.f32.mrb[251].mxu1 }
 0x38e   :  { %4844 = vmatpush1.bf16.msra.mxu0 %v13068_v31  ;;  %v16812_v31 = vpop.f32.mrb[252].mxu1 }
 0x38f   :  { %4845 = vmatprep.subr.bf16.mxu0 %v13073_v40  ;;  %v13085_v40 = vld [vmem:[%s18959_s3 + $0x874] ss:$8 sps:$4 sm:$0xff]  }
 0x392   :  { %4846 = vmatpush1.bf16.msra.mxu0 %v13071_v52  ;;  %v16817_v52 = vpop.f32.mrb[253].mxu1 }
 0x393   :  { %4847 = vmatprep.subr.bf16.mxu0 %v13076_v11  ;;  %v16819_v11 = vpop.f32.mrb[254].mxu1 }
 0x396   :  { %4848 = vmatpush1.bf16.msra.mxu0 %v13074_v22  ;;  %v13086_v22 = vld [vmem:[%s18959_s3 + $0x880] ss:$8 sps:$4 sm:$0xff]  }
 0x397   :  { %4849 = vmatprep.subr.bf16.mxu0 %v13079_v2  ;;  %v16823_v2 = vpop.f32.mrb[255].mxu1 }
 0x398   :  { %v16836_v49 = vpop.f32.mrb[0].mxu1 }
 0x399   :  { %v16841_v36 = vpop.f32.mrb[1].mxu1 }
 0x39a   :  { %4850 = vmatpush1.bf16.msra.mxu0 %v13077_v26  ;;  %v13083_v26 = vld [vmem:[%s18959_s3 + $0x870] ss:$8 sps:$4 sm:$0xff]  }
 0x39b   :  { %4851 = vmatprep.subr.bf16.mxu0 %v13082_v62  ;;  %v16843_v62 = vpop.f32.mrb[2].mxu1 }
 0x39e   :  { %4852 = vmatpush1.bf16.msra.mxu0 %v13080_v50  ;;  %v13091_v50 = vld [vmem:[%s18959_s3 + $0x894] ss:$8 sps:$4 sm:$0xff]  }
 0x39f   :  { %4853 = vmatprep.subr.bf16.mxu0 %v13085_v40 }
 0x3a2   :  { %4854 = vmatpush1.bf16.msra.mxu0 %v13083_v26  ;;  %v16850_v26 = vpop.f32.mrb[3].mxu1 }
 0x3a3   :  { %4906 = vmatprep.subr.bf16.mxu0 %v13088_v44  ;;  %v13089_v44 = vld [vmem:[%s18959_s3 + $0x890] ss:$8 sps:$4 sm:$0xff]   ;;  %v5249_v20 = vpack.c.bf16 %v16850_v26, %v16841_v36  ;;  %v5695_v36 = vlaneseq }
 0x3a5   :  { %4856 = vmatmul.mubr.bf16.vlgmr.msra.gmra.mrb[40].mxu0 %v4552_v18  ;;  %v13097_v18 = vld [vmem:[%s18959_s3 + $0x8b4] ss:$8 sps:$4 sm:$0xff]  }
 0x3a6   :  { %4865 = vmatprep.mubr.bf16.mxu0 %v4556_v21  ;;  %4907 = vmatpush1.bf16.msra.mxu0 %v13086_v22  ;;  %v19191_v21 = vpack.c.bf16 %v16506_v56, %v16499_v10  ;;  %v13100_v10 = vld [vmem:[%s18959_s3 + $0x8c4] ss:$8 sps:$4 sm:$0xff]  }
 0x3a7   :  { %4908 = vmatprep.subr.bf16.mxu0 %v13091_v50  ;;  %v19192_v50 = vpack.c.bf16 %v16534_v17, %v16528_v16  ;;  %v19193_v17 = vpack.c.bf16 %v16530_v39, %v16523_v8 }
 0x3aa   :  { %4909 = vmatpush1.bf16.msra.mxu0 %v13089_v44  ;;  %v16869_v9 = vpop.f32.mrb[4].mxu1  ;;  %v13095_v44 = vld [vmem:[%s18959_s3 + $0x8b0] ss:$8 sps:$4 sm:$0xff]  }
 0x3ab   :  { %4910 = vmatprep.subr.bf16.mxu0 %v13094_v63  ;;  %v5199_v32 = vpop.f32.mrb[5].mxu1 }
 0x3ac   :  { %v16874_v22 = vpop.f32.mrb[6].mxu1  ;;  %v19194_v32 = vpack.c.bf16 %v16558_v27, %v16552_v37 }
 0x3ad   :  { %4866 = vmatmul.mubr.bf16.gmra.mrb[44].mxu0 %v19191_v21  ;;  %v5238_v63 = vpack.c.bf16 %v16874_v22, %v16869_v9  ;;  %v5202_v40 = vpop.f32.mrb[7].mxu1 }
 0x3ae   :  { %4875 = vmatprep.mubr.bf16.mxu0 %v19192_v50  ;;  %4911 = vmatpush1.bf16.msra.mxu0 %v13092_v51 }
 0x3af   :  { %4912 = vmatprep.subr.bf16.mxu0 %v13097_v18 }
 0x3b2   :  { %4913 = vmatpush1.bf16.msra.mxu0 %v13095_v44  ;;  %v16887_v56 = vpop.f32.mrb[8].mxu1  ;;  %v19195_v44 = vpack.c.bf16 %v16554_v5, %v16547_v0  ;;  %v13103_v5 = vld [vmem:[%s18959_s3 + $0x8d4] ss:$8 sps:$4 sm:$0xff]  }
 0x3b3   :  { %5507 = vmatprep.subr.bf16.mxu0 %v13100_v10  ;;  %v5207_v16 = vpop.f32.mrb[9].mxu1 }
 0x3b4   :  { %v16892_v51 = vpop.f32.mrb[10].mxu1  ;;  %v19196_v16 = vpack.c.bf16 %v16578_v19, %v16571_v30 }
 0x3b5   :  { %4876 = vmatmul.mubr.bf16.gmra.mrb[48].mxu0 %v19193_v17  ;;  %v5241_v40 = vpack.c.bf16 %v16892_v51, %v16887_v56  ;;  %v5210_v18 = vpop.f32.mrb[11].mxu1 }
 0x3b6   :  { %4885 = vmatprep.mubr.bf16.mxu0 %v19194_v32  ;;  %v13101_v32 = vld [vmem:[%s18959_s3 + $0x8d0] ss:$8 sps:$4 sm:$0xff]  }
 0x3ba   :  { %v16899_v21 = vpop.f32.mrb[12].mxu1 }
 0x3bb   :  { %v5215_v50 = vpop.f32.mrb[13].mxu1 }
 0x3bc   :  { %v16904_v10 = vpop.f32.mrb[14].mxu1 }
 0x3bd   :  { %4886 = vmatmul.mubr.bf16.gmra.mrb[52].mxu0 %v19195_v44  ;;  %v5244_v8 = vpack.c.bf16 %v16904_v10, %v16899_v21  ;;  %v5218_v39 = vpop.f32.mrb[15].mxu1  ;;  %v13107_v44 = vld [vmem:[%s18959_s3 + $0x8f0] ss:$8 sps:$4 sm:$0xff]  }
 0x3be   :  { %4895 = vmatprep.mubr.bf16.mxu0 %v4565_v57  ;;  %v13098_v57 = vld [vmem:[%s18959_s3 + $0x8c0] ss:$8 sps:$4 sm:$0xff]   ;;  %v13112_v39 = vld [vmem:[%s18959_s3 + $0x904] ss:$8 sps:$4 sm:$0xff]  }
 0x3c2   :  { %v16911_v37 = vpop.f32.mrb[16].mxu1 }
 0x3c3   :  { %v5223_v27 = vpop.f32.mrb[17].mxu1 }
 0x3c4   :  { %v16916_v17 = vpop.f32.mrb[18].mxu1  ;;  %v13110_v27 = vld [vmem:[%s18959_s3 + $0x900] ss:$8 sps:$4 sm:$0xff]  }
 0x3c5   :  { %4896 = vmatmul.mubr.bf16.gmra.mrb[56].mxu0 %v19196_v16  ;;  %v5247_v0 = vpack.c.bf16 %v16916_v17, %v16911_v37  ;;  %v5226_v53 = vpop.f32.mrb[19].mxu1  ;;  %v13116_v16 = vld [vmem:[%s18959_s3 + $0x920] ss:$8 sps:$4 sm:$0xff]  }
 0x3c6   :  { %4938 = vmatprep.mubr.bf16.mxu0 %v19039_v25  ;;  %v13122_v53 = vld [vmem:[%s18959_s3 + $0x940] ss:$8 sps:$4 sm:$0xff]  }
 0x3ca   :  { %v16927_v61 = vpop.f32.mrb[20].mxu1 }
 0x3cb   :  { %v5231_v19 = vpop.f32.mrb[21].mxu1 }
 0x3cc   :  { %v16933_v30 = vpop.f32.mrb[22].mxu1  ;;  %v13140_v19 = vld [vmem:[%s18959_s3 + $0x9a0] ss:$8 sps:$4 sm:$0xff]  }
 0x3cd   :  { %11183 = vmatmul.mubr.msk.bf16.vlgmr.msra.gmra.mrb[40].mxu0 %vm1026_vm1, %v4554_v55  ;;  %v5250_v18 = vpack.c.bf16 %v16933_v30, %v16927_v61  ;;  %v5234_v50 = vpop.f32.mrb[23].mxu1  ;;  %v13109_v55 = vld [vmem:[%s18959_s3 + $0x8f4] ss:$8 sps:$4 sm:$0xff]  }
 0x3ce   :  { %5508 = vmatpush1.bf16.msra.mxu0 %v13098_v57  ;;  %4948 = vmatprep.mubr.bf16.mxu0 %v19039_v25  ;;  %v13137_v57 = vld [vmem:[%s18959_s3 + $0x990] ss:$8 sps:$4 sm:$0xff]  }
 0x3cf   :  { %5509 = vmatprep.subr.bf16.mxu0 %v13103_v5  ;;  %v13142_v5 = vld [vmem:[%s18959_s3 + $0x9a4] ss:$8 sps:$4 sm:$0xff]   ;;  %v13143_v50 = vld [vmem:[%s18959_s3 + $0x9b0] ss:$8 sps:$4 sm:$0xff]  }
 0x3d2   :  { %5510 = vmatpush1.bf16.msra.mxu0 %v13101_v32  ;;  %v13145_v32 = vld [vmem:[%s18959_s3 + $0x9b4] ss:$8 sps:$4 sm:$0xff]  }
 0x3d3   :  { %5511 = vmatprep.subr.bf16.mxu0 %v13106_v60  ;;  %v13148_v60 = vld [vmem:[%s18959_s3 + $0x9c4] ss:$8 sps:$4 sm:$0xff]  }
 0x3d5   :  { %11184 = vmatmul.mubr.msk.bf16.gmra.mrb[44].mxu0 %vm1026_vm1, %v4557_v45  ;;  %v13118_v45 = vld [vmem:[%s18959_s3 + $0x924] ss:$8 sps:$4 sm:$0xff]  }
 0x3d6   :  { %5512 = vmatpush1.bf16.msra.mxu0 %v13104_v35  ;;  %4958 = vmatprep.mubr.bf16.mxu0 %v19039_v25  ;;  %v13146_v35 = vld [vmem:[%s18959_s3 + $0x9c0] ss:$8 sps:$4 sm:$0xff]  }
 0x3d7   :  { %5513 = vmatprep.subr.bf16.mxu0 %v13109_v55  ;;  %v13151_v55 = vld [vmem:[%s18959_s3 + $0x9d4] ss:$8 sps:$4 sm:$0xff]  }
 0x3da   :  { %5514 = vmatpush1.bf16.msra.mxu0 %v13107_v44  ;;  %v19197_v44 = vpack.c.bf16 %v16775_v54, %v16769_v29  ;;  %v19199_v29 = vpack.c.bf16 %v16799_v41, %v16793_v28  ;;  %v13155_v54 = vld [vmem:[%s18959_s3 + $0x9f0] ss:$8 sps:$4 sm:$0xff]   ;;  %v5693_v28 = vld [vmem:[%s18960_s4] sm:$0x77] }
 0x3db   :  { %5515 = vmatprep.subr.bf16.mxu0 %v13112_v39  ;;  %v13149_v39 = vld [vmem:[%s18959_s3 + $0x9d0] ss:$8 sps:$4 sm:$0xff]  }
 0x3dd   :  { %11185 = vmatmul.mubr.msk.bf16.gmra.mrb[48].mxu0 %vm1026_vm1, %v4560_v15  ;;  %v13124_v15 = vld [vmem:[%s18959_s3 + $0x944] ss:$8 sps:$4 sm:$0xff]  }
 0x3de   :  { %5516 = vmatpush1.bf16.msra.mxu0 %v13110_v27  ;;  %4968 = vmatprep.mubr.bf16.mxu0 %v19039_v25  ;;  %v13154_v27 = vld [vmem:[%s18959_s3 + $0x9e4] ss:$8 sps:$4 sm:$0xff]  }
 0x3df   :  { %5517 = vmatprep.subr.bf16.mxu0 %v13115_v4  ;;  %v19200_v4 = vpack.c.bf16 %v16795_v34, %v16788_v7 }
 0x3e2   :  { %5518 = vmatpush1.bf16.msra.mxu0 %v13113_v48  ;;  %v19201_v48 = vpack.c.bf16 %v16823_v2, %v16817_v52 }
 0x3e3   :  { %5519 = vmatprep.subr.bf16.mxu0 %v13118_v45 }
 0x3e5   :  { %11186 = vmatmul.mubr.msk.bf16.gmra.mrb[52].mxu0 %vm1026_vm1, %v4563_v33  ;;  %v13130_v33 = vld [vmem:[%s18959_s3 + $0x964] ss:$8 sps:$4 sm:$0xff]  }
 0x3e6   :  { %5520 = vmatpush1.bf16.msra.mxu0 %v13116_v16  ;;  %4978 = vmatprep.mubr.bf16.mxu0 %v19039_v25 }
 0x3e7   :  { %5521 = vmatprep.subr.bf16.mxu0 %v13121_v6 }
 0x3ea   :  { %5522 = vmatpush1.bf16.msra.mxu0 %v13119_v43 }
 0x3eb   :  { %5523 = vmatprep.subr.bf16.mxu0 %v13124_v15 }
 0x3ed   :  { %11187 = vmatmul.mubr.msk.bf16.gmra.mrb[56].mxu0 %vm1026_vm1, %v4566_v46  ;;  %v13131_v46 = vld [vmem:[%s18959_s3 + $0x970] ss:$8 sps:$4 sm:$0xff]  }
 0x3ee   :  { %5524 = vmatpush1.bf16.msra.mxu0 %v13122_v53  ;;  %5539 = vmatprep.mubr.bf16.mxu0 %v5237_v47  ;;  %v13139_v47 = vld [vmem:[%s18959_s3 + $0x994] ss:$8 sps:$4 sm:$0xff]  }
 0x3ef   :  { %5525 = vmatprep.subr.bf16.mxu0 %v13127_v13 }
 0x3f2   :  { %5526 = vmatpush1.bf16.msra.mxu0 %v13125_v1 }
 0x3f3   :  { %5527 = vmatprep.subr.bf16.mxu0 %v13130_v33 }
 0x3f6   :  { %5528 = vmatpush1.bf16.msra.mxu0 %v13128_v3 }
 0x3f7   :  { %5529 = vmatprep.subr.bf16.mxu0 %v13133_v38 }
 0x3fa   :  { %5530 = vmatpush1.bf16.msra.mxu0 %v13131_v46 }
 0x3fb   :  { %5531 = vmatprep.subr.bf16.mxu0 %v13136_v59 }
 0x3fe   :  { %5532 = vmatpush1.bf16.msra.mxu0 %v13134_v14 }
 0x3ff   :  { %5533 = vmatprep.subr.bf16.mxu0 %v13139_v47 }
 0x402   :  { %5534 = vmatpush1.bf16.msra.mxu0 %v13137_v57 }
 0x403   :  { %5535 = vmatprep.subr.bf16.mxu0 %v13142_v5 }
 0x406   :  { %5536 = vmatpush1.bf16.msra.mxu0 %v13140_v19 }
 0x407   :  { %5537 = vmatprep.subr.bf16.mxu0 %v13145_v32 }
 0x40a   :  { %5538 = vmatpush1.bf16.msra.mxu0 %v13143_v50 }
 0x40b   :  { %5590 = vmatprep.subr.bf16.mxu0 %v13148_v60 }
 0x40d   :  { %5540 = vmatmul.mubr.bf16.vlgmr.msra.gmra.mrb[40].mxu0 %v5236_v24  ;;  %v19198_v24 = vpack.c.bf16 %v16771_v58, %v16764_v12  ;;  %v19202_v12 = vpack.c.bf16 %v16819_v11, %v16812_v31  ;;  %v19203_v58 = vpack.c.bf16 %v16843_v62, %v16836_v49 }
 0x40e   :  { %5549 = vmatprep.mubr.bf16.mxu0 %v19197_v44  ;;  %5591 = vmatpush1.bf16.msra.mxu0 %v13146_v35 }
 0x40f   :  { %5592 = vmatprep.subr.bf16.mxu0 %v13151_v55 }
 0x412   :  { %5593 = vmatpush1.bf16.msra.mxu0 %v13149_v39 }
 0x413   :  { %5594 = vmatprep.subr.bf16.mxu0 %v13154_v27 }
 0x415   :  { %5550 = vmatmul.mubr.bf16.gmra.mrb[44].mxu0 %v19198_v24 }
 0x416   :  { %5559 = vmatprep.mubr.bf16.mxu0 %v19199_v29  ;;  %5595 = vmatpush1.bf16.msra.mxu0 %v13152_v42 }
 0x417   :  { %5596 = vmatprep.subr.bf16.mxu0 %v13157_v23 }
 0x41a   :  { %5597 = vmatpush1.bf16.msra.mxu0 %v13155_v54 }
 0x41d   :  { %5560 = vmatmul.mubr.bf16.gmra.mrb[48].mxu0 %v19200_v4 }
 0x41e   :  { %5569 = vmatprep.mubr.bf16.mxu0 %v19201_v48 }
 0x425   :  { %5570 = vmatmul.mubr.bf16.gmra.mrb[52].mxu0 %v19202_v12 }
 0x426   :  { %5579 = vmatprep.mubr.bf16.mxu0 %v5249_v20  ;;  %v5696_v20 = vshrl.u32 %v5695_v36, 7 }
 0x428   :  { %v17124_v7 = vsub.s32 0, %v5696_v20  ;;  %v17129_v34 = vsub.s32 4, %v5696_v20  ;;  %v17132_v49 = vsub.s32 1, %v5696_v20  ;;  %v17135_v52 = vsub.s32 5, %v5696_v20 }
 0x429   :  { %v17141_v62 = vsub.s32 2, %v5696_v20  ;;  %v17147_v22 = vsub.s32 6, %v5696_v20 }
 0x42a   :  { %v5698_v41 = vrot.slane %v5693_v28, %v17124_v7  ;;  %v5702_v31 = vrot.slane %v5693_v28, %v17129_v34  ;;  %v5756_v2 = vrot.slane %v5693_v28, %v17132_v49  ;;  %v5760_v9 = vrot.slane %v5693_v28, %v17135_v52 }
 0x42b   :  { %v5798_v37 = vrot.slane %v5693_v28, %v17147_v22 }
 0x42c   :  { %v17138_v11 = vrot.slane %v5698_v41, %v17124_v7  ;;  %v17144_v26 = vrot.slane %v5702_v31, %v17124_v7  ;;  %v17151_v51 = vrot.slane %v5756_v2, %v17132_v49 }
 0x42d   :  { %5580 = vmatmul.mubr.bf16.gmra.mrb[56].mxu0 %v19203_v58  ;;  %v17167_v53 = vrot.slane %v5798_v37, %v17141_v62 }
 0x42e   :  { %5622 = vmatprep.mubr.bf16.mxu0 %v19039_v25 }
 0x435   :  { %11298 = vmatmul.mubr.msk.bf16.vlgmr.msra.gmra.mrb[40].mxu0 %vm1026_vm1, %v5238_v63 }
 0x436   :  { %5632 = vmatprep.mubr.bf16.mxu0 %v19039_v25 }
 0x43d   :  { %11299 = vmatmul.mubr.msk.bf16.gmra.mrb[44].mxu0 %vm1026_vm1, %v5241_v40  ;;  %v5794_v40 = vrot.slane %v5693_v28, %v17141_v62 }
 0x43e   :  { %5642 = vmatprep.mubr.bf16.mxu0 %v19039_v25 }
 0x43f   :  { %v17163_v6 = vrot.slane %v5794_v40, %v17141_v62 }
 0x445   :  { %11300 = vmatmul.mubr.msk.bf16.gmra.mrb[48].mxu0 %vm1026_vm1, %v5244_v8  ;;  %v17156_v8 = vrot.slane %v5760_v9, %v17132_v49 }
 0x446   :  { %5652 = vmatprep.mubr.bf16.mxu0 %v19039_v25 }
 0x44d   :  { %11301 = vmatmul.mubr.msk.bf16.gmra.mrb[52].mxu0 %vm1026_vm1, %v5247_v0 }
 0x44e   :  { %5662 = vmatprep.mubr.bf16.mxu0 %v19039_v25 }
 0x455   :  { %11302 = vmatmul.mubr.msk.bf16.gmra.mrb[56].mxu0 %vm1026_vm1, %v5250_v18 }
 0x456   :  { %7801 = vmatprep.mubr.bf16.mxu0 %v19039_v25 }
 0x508   :  { %v5624_v63 = vpop.f32.mrb[40].mxu0 }
 0x509   :  { %v5713_v56 = vadd.f32 %v17138_v11, %v5624_v63  ;;  %v5626_v21 = vpop.f32.mrb[41].mxu0 }
 0x50a   :  { %v5714_v10 = vadd.f32 %v17144_v26, %v5626_v21  ;;  %v5628_v17 = vpop.f32.mrb[42].mxu0 }
 0x50b   :  { %v5733_v0 = vmax.f32 %v5713_v56, 0.0  ;;  %v5715_v61 = vadd.f32 %v17138_v11, %v5628_v17  ;;  %v5630_v30 = vpop.f32.mrb[43].mxu0 }
 0x50c   :  { %v5734_v18 = vmax.f32 %v5714_v10, 0.0  ;;  %v5716_v45 = vadd.f32 %v17144_v26, %v5630_v30 }
 0x50d   :  { %v5771_v16 = vmul.f32 %v17151_v51, %v5733_v0  ;;  %v5735_v43 = vmax.f32 %v5715_v61, 0.0 }
 0x50e   :  { %v5772_v15 = vmul.f32 %v17156_v8, %v5734_v18  ;;  %v5736_v13 = vmax.f32 %v5716_v45, 0.0 }
 0x50f   :  { %v5773_v1 = vmul.f32 %v17151_v51, %v5735_v43  ;;  %v5809_v38 = vadd.f32 %v17163_v6, %v5771_v16 }
 0x510   :  { %v5774_v33 = vmul.f32 %v17156_v8, %v5736_v13  ;;  %v5634_v3 = vpop.f32.mrb[44].mxu0  ;;  %v5810_v47 = vadd.f32 %v17167_v53, %v5772_v15 }
 0x511   :  { %v5811_v46 = vadd.f32 %v17163_v6, %v5773_v1  ;;  %v5717_v59 = vadd.f32 %v17138_v11, %v5634_v3  ;;  %v5636_v14 = vpop.f32.mrb[45].mxu0 }
 0x512   :  { %v5812_v57 = vadd.f32 %v17167_v53, %v5774_v33  ;;  %v5718_v5 = vadd.f32 %v17144_v26, %v5636_v14  ;;  %v5638_v19 = vpop.f32.mrb[46].mxu0 }
 0x513   :  { %v17177_v32 = vpack.c.bf16 %v5811_v46, %v5809_v38  ;;  %v5737_v50 = vmax.f32 %v5717_v59, 0.0  ;;  %v5719_v60 = vadd.f32 %v17138_v11, %v5638_v19  ;;  %v5640_v35 = vpop.f32.mrb[47].mxu0 }
 0x514   :  { %v17180_v55 = vpack.c.bf16 %v5812_v57, %v5810_v47  ;;  %v5738_v44 = vmax.f32 %v5718_v5, 0.0  ;;  %v5720_v39 = vadd.f32 %v17144_v26, %v5640_v35 }
 0x515   :  { %v5775_v27 = vmul.f32 %v17151_v51, %v5737_v50  ;;  %v5739_v42 = vmax.f32 %v5719_v60, 0.0 }
 0x516   :  { %v5776_v23 = vmul.f32 %v17156_v8, %v5738_v44  ;;  %v5740_v24 = vmax.f32 %v5720_v39, 0.0  ;;  %5874 = vmatprep.subr.bf16.mxu1 %v17180_v55 }
 0x517   :  { %v5777_v29 = vmul.f32 %v17151_v51, %v5739_v42  ;;  %5875 = vmatpush1.bf16.msra.mxu1 %v17177_v32  ;;  %v5813_v48 = vadd.f32 %v17163_v6, %v5775_v27 }
 0x518   :  { %v5778_v54 = vmul.f32 %v17156_v8, %v5740_v24  ;;  %v5644_v4 = vpop.f32.mrb[48].mxu0  ;;  %v5814_v20 = vadd.f32 %v17167_v53, %v5776_v23 }
 0x519   :  { %v5815_v12 = vadd.f32 %v17163_v6, %v5777_v29  ;;  %v5721_v58 = vadd.f32 %v17138_v11, %v5644_v4  ;;  %v5646_v36 = vpop.f32.mrb[49].mxu0 }
 0x51a   :  { %v5816_v28 = vadd.f32 %v17167_v53, %v5778_v54  ;;  %v5722_v41 = vadd.f32 %v17144_v26, %v5646_v36  ;;  %v5648_v31 = vpop.f32.mrb[50].mxu0 }
 0x51b   :  { %v17195_v2 = vpack.c.bf16 %v5815_v12, %v5813_v48  ;;  %v5741_v9 = vmax.f32 %v5721_v58, 0.0  ;;  %v5723_v63 = vadd.f32 %v17138_v11, %v5648_v31  ;;  %v5650_v56 = vpop.f32.mrb[51].mxu0 }
 0x51c   :  { %v17198_v40 = vpack.c.bf16 %v5816_v28, %v5814_v20  ;;  %v5742_v21 = vmax.f32 %v5722_v41, 0.0  ;;  %v5724_v10 = vadd.f32 %v17144_v26, %v5650_v56 }
 0x51d   :  { %v5779_v37 = vmul.f32 %v17151_v51, %v5741_v9  ;;  %v5743_v17 = vmax.f32 %v5723_v63, 0.0 }
 0x51e   :  { %v5780_v0 = vmul.f32 %v17156_v8, %v5742_v21  ;;  %v5744_v61 = vmax.f32 %v5724_v10, 0.0  ;;  %5876 = vmatprep.subr.bf16.mxu1 %v17198_v40 }
 0x51f   :  { %v5781_v30 = vmul.f32 %v17151_v51, %v5743_v17  ;;  %5877 = vmatpush1.bf16.msra.mxu1 %v17195_v2  ;;  %v5817_v16 = vadd.f32 %v17163_v6, %v5779_v37 }
 0x520   :  { %v5782_v18 = vmul.f32 %v17156_v8, %v5744_v61  ;;  %v5654_v45 = vpop.f32.mrb[52].mxu0  ;;  %v5818_v1 = vadd.f32 %v17167_v53, %v5780_v0 }
 0x521   :  { %v5819_v43 = vadd.f32 %v17163_v6, %v5781_v30  ;;  %v5725_v15 = vadd.f32 %v17138_v11, %v5654_v45  ;;  %v5656_v13 = vpop.f32.mrb[53].mxu0 }
 0x522   :  { %v5820_v33 = vadd.f32 %v17167_v53, %v5782_v18  ;;  %v5726_v3 = vadd.f32 %v17144_v26, %v5656_v13  ;;  %v5658_v38 = vpop.f32.mrb[54].mxu0  ;;  %v13169_v13 = vld [vmem:[%s18962_s6 + $0xf4] ss:$8 sps:$4 sm:$0xff]  }
 0x523   :  { %v17213_v46 = vpack.c.bf16 %v5819_v43, %v5817_v16  ;;  %v5745_v59 = vmax.f32 %v5725_v15, 0.0  ;;  %v5727_v14 = vadd.f32 %v17138_v11, %v5658_v38  ;;  %v5660_v47 = vpop.f32.mrb[55].mxu0  ;;  %v13161_v43 = vld [vmem:[%s18961_s5 + $0x14] sm:$0xff]   ;;  %v13164_v15 = vld [vmem:[%s18962_s6 + $0xe0] ss:$8 sps:$4 sm:$0xff]  }
 0x524   :  { %v17216_v57 = vpack.c.bf16 %v5820_v33, %v5818_v1  ;;  %v5746_v5 = vmax.f32 %v5726_v3, 0.0  ;;  %v5728_v19 = vadd.f32 %v17144_v26, %v5660_v47  ;;  %v13167_v1 = vld [vmem:[%s18962_s6 + $0xf0] ss:$8 sps:$4 sm:$0xff]   ;;  %v13172_v33 = vld [vmem:[%s18962_s6 + $0x104] ss:$8 sps:$4 sm:$0xff]   ;;  %v13162_v3 = vld [vmem:[%s18961_s5 + $0x1c] sm:$0xff]  }
 0x525   :  { %v5783_v50 = vmul.f32 %v17151_v51, %v5745_v59  ;;  %v5747_v60 = vmax.f32 %v5727_v14, 0.0  ;;  %v13170_v38 = vld [vmem:[%s18962_s6 + $0x100] ss:$8 sps:$4 sm:$0xff]   ;;  %v13175_v59 = vld [vmem:[%s18962_s6 + $0x114] ss:$8 sps:$4 sm:$0xff]  }
 0x526   :  { %v5784_v35 = vmul.f32 %v17156_v8, %v5746_v5  ;;  %v5748_v44 = vmax.f32 %v5728_v19, 0.0  ;;  %5878 = vmatprep.subr.bf16.mxu1 %v17216_v57  ;;  %v13173_v14 = vld [vmem:[%s18962_s6 + $0x110] ss:$8 sps:$4 sm:$0xff]   ;;  %v13178_v47 = vld [vmem:[%s18962_s6 + $0x124] ss:$8 sps:$4 sm:$0xff]  }
 0x527   :  { %v5785_v39 = vmul.f32 %v17151_v51, %v5747_v60  ;;  %5879 = vmatpush1.bf16.msra.mxu1 %v17213_v46  ;;  %v5821_v23 = vadd.f32 %v17163_v6, %v5783_v50  ;;  %v13163_v5 = vld [vmem:[%s18961_s5 + $0x24] ss:$0 sps:$4 sm:$0x11]   ;;  %v13176_v19 = vld [vmem:[%s18962_s6 + $0x120] ss:$8 sps:$4 sm:$0xff]  }
 0x528   :  { %v5786_v27 = vmul.f32 %v17156_v8, %v5748_v44  ;;  %v5664_v42 = vpop.f32.mrb[56].mxu0  ;;  %v5822_v4 = vadd.f32 %v17167_v53, %v5784_v35  ;;  %v13181_v50 = vld [vmem:[%s18962_s6 + $0x134] ss:$8 sps:$4 sm:$0xff]   ;;  %v13179_v60 = vld [vmem:[%s18962_s6 + $0x130] ss:$8 sps:$4 sm:$0xff]  }
 0x529   :  { %v5823_v24 = vadd.f32 %v17163_v6, %v5785_v39  ;;  %v5729_v29 = vadd.f32 %v17138_v11, %v5664_v42  ;;  %v5666_v54 = vpop.f32.mrb[57].mxu0  ;;  %v13184_v35 = vld [vmem:[%s18962_s6 + $0x144] ss:$8 sps:$4 sm:$0xff]   ;;  %v13182_v44 = vld [vmem:[%s18962_s6 + $0x140] ss:$8 sps:$4 sm:$0xff]  }
 0x52a   :  { %v5824_v48 = vadd.f32 %v17167_v53, %v5786_v27  ;;  %v5730_v12 = vadd.f32 %v17144_v26, %v5666_v54  ;;  %v5668_v58 = vpop.f32.mrb[58].mxu0  ;;  %v13187_v39 = vld [vmem:[%s18962_s6 + $0x154] ss:$8 sps:$4 sm:$0xff]   ;;  %v13185_v27 = vld [vmem:[%s18962_s6 + $0x150] ss:$8 sps:$4 sm:$0xff]  }
 0x52b   :  { %v17231_v36 = vpack.c.bf16 %v5823_v24, %v5821_v23  ;;  %v5749_v20 = vmax.f32 %v5729_v29, 0.0  ;;  %v5731_v28 = vadd.f32 %v17138_v11, %v5668_v58  ;;  %v5670_v41 = vpop.f32.mrb[59].mxu0  ;;  %v13188_v42 = vld [vmem:[%s18962_s6 + $0x160] ss:$8 sps:$4 sm:$0xff]   ;;  %v13190_v23 = vld [vmem:[%s18962_s6 + $0x164] ss:$8 sps:$4 sm:$0xff]  }
 0x52c   :  { %v17234_v31 = vpack.c.bf16 %v5824_v48, %v5822_v4  ;;  %v5750_v9 = vmax.f32 %v5730_v12, 0.0  ;;  %v5732_v63 = vadd.f32 %v17144_v26, %v5670_v41  ;;  %v13193_v24 = vld [vmem:[%s18962_s6 + $0x174] ss:$8 sps:$4 sm:$0xff]   ;;  %v13191_v29 = vld [vmem:[%s18962_s6 + $0x170] ss:$8 sps:$4 sm:$0xff]  }
 0x52d   :  { %v5787_v56 = vmul.f32 %v17151_v51, %v5749_v20  ;;  %v5751_v21 = vmax.f32 %v5731_v28, 0.0  ;;  %v13194_v54 = vld [vmem:[%s18962_s6 + $0x180] ss:$8 sps:$4 sm:$0xff]   ;;  %v13196_v4 = vld [vmem:[%s18962_s6 + $0x184] ss:$8 sps:$4 sm:$0xff]  }
 0x52e   :  { %v5788_v10 = vmul.f32 %v17156_v8, %v5750_v9  ;;  %v5752_v37 = vmax.f32 %v5732_v63, 0.0  ;;  %5880 = vmatprep.subr.bf16.mxu1 %v17234_v31  ;;  %v13199_v48 = vld [vmem:[%s18962_s6 + $0x194] ss:$8 sps:$4 sm:$0xff]   ;;  %v13197_v12 = vld [vmem:[%s18962_s6 + $0x190] ss:$8 sps:$4 sm:$0xff]  }
 0x52f   :  { %v5789_v17 = vmul.f32 %v17151_v51, %v5751_v21  ;;  %5881 = vmatpush1.bf16.msra.mxu1 %v17231_v36  ;;  %v5825_v0 = vadd.f32 %v17163_v6, %v5787_v56  ;;  %v13158_v51 = vld [vmem:[%s18961_s5] sm:$0xff]   ;;  %v13203_v28 = vld [vmem:[%s18962_s6 + $0x1b4] ss:$8 sps:$4 sm:$0x7f]  }
 0x530   :  { %v5790_v11 = vmul.f32 %v17156_v8, %v5752_v37  ;;  %v5826_v26 = vadd.f32 %v17167_v53, %v5788_v10  ;;  %v13159_v8 = vld [vmem:[%s18961_s5 + $0x8] sm:$0xff]   ;;  %v13205_v41 = vld [vmem:[%s18962_s6 + $0x1b0] ss:$8 sps:$4 sm:$0x7f]  }
 0x531   :  { %v5827_v61 = vadd.f32 %v17163_v6, %v5789_v17  ;;  %v13160_v6 = vld [vmem:[%s18961_s5 + $0x10] ss:$0 sps:$4 sm:$0x11]   ;;  %v13200_v58 = vld [vmem:[%s18962_s6 + $0x1a0] ss:$8 sps:$4 sm:$0xff]   ;;  %v6243_v9 = vsel %vm6241_vm4, %v13205_v41, 0 }
 0x532   :  { %v5828_v30 = vadd.f32 %v17167_v53, %v5790_v11  ;;  %v13166_v53 = vld [vmem:[%s18962_s6 + $0xe4] ss:$8 sps:$4 sm:$0xff]   ;;  %v13221_v41 = vld [vmem:[%s18962_s6 + $0x50] ss:$8 sps:$4 sm:$0xff]  }
 0x533   :  { %v5837_v18 = vpack.c.bf16 %v5827_v61, %v5825_v0  ;;  %v13202_v20 = vld [vmem:[%s18962_s6 + $0x1a4] ss:$8 sps:$4 sm:$0xff]  }
 0x534   :  { %v17247_v45 = vpack.c.bf16 %v5828_v30, %v5826_v26  ;;  %v13208_v63 = vld [vmem:[%s18962_s6 + $0x4] ss:$8 sps:$4 sm:$0xff]  }
 0x535   :  { %v17250_v16 = vsel %vm5867_vm2, %v5837_v18, 0 }
 0x536   :  { %11306 = vmatprep.subr.msk.bf16.mxu1 %vm5867_vm2, %v17247_v45 }
 0x537   :  { %5883 = vmatpush1.bf16.msra.mxu1 %v17250_v16 }
 0x538   :  { %5997 = vmatprep.subr.bf16.mxu1 %v17180_v55 }
 0x53a   :  { %11307 = vmatmul.mubr.msk.bf16.vlgmr.msra.gmra.mrb[24].mxu1 %vm5857_vm3, %v13158_v51 }
 0x53b   :  { %5998 = vmatpush1.bf16.msra.mxu1 %v17177_v32  ;;  %5916 = vmatprep.mubr.bf16.mxu1 %v19039_v25 }
 0x53c   :  { %5999 = vmatprep.subr.bf16.mxu1 %v17198_v40 }
 0x53f   :  { %6000 = vmatpush1.bf16.msra.mxu1 %v17195_v2 }
 0x540   :  { %6001 = vmatprep.subr.bf16.mxu1 %v17216_v57 }
 0x542   :  { %11308 = vmatmul.mubr.msk.bf16.gmra.mrb[28].mxu1 %vm5857_vm3, %v13159_v8 }
 0x543   :  { %6002 = vmatpush1.bf16.msra.mxu1 %v17213_v46  ;;  %5926 = vmatprep.mubr.bf16.mxu1 %v19039_v25 }
 0x544   :  { %6003 = vmatprep.subr.bf16.mxu1 %v17234_v31 }
 0x547   :  { %6004 = vmatpush1.bf16.msra.mxu1 %v17231_v36 }
 0x548   :  { %11318 = vmatprep.subr.msk.bf16.mxu1 %vm5867_vm2, %v17247_v45 }
 0x54a   :  { %11309 = vmatmul.mubr.msk.bf16.gmra.mrb[32].mxu1 %vm5857_vm3, %v13160_v6 }
 0x54b   :  { %6006 = vmatpush1.bf16.msra.mxu1 %v17250_v16  ;;  %6029 = vmatprep.mubr.bf16.mxu1 %v19039_v25 }
 0x54c   :  { %6248 = vmatprep.subr.bf16.mxu1 %v13166_v53 }
 0x552   :  { %11319 = vmatmul.mubr.msk.bf16.vlgmr.msra.gmra.mrb[36].mxu1 %vm5857_vm3, %v13161_v43 }
 0x553   :  { %6039 = vmatprep.mubr.bf16.mxu1 %v19039_v25  ;;  %6249 = vmatpush1.bf16.msra.mxu1 %v13164_v15 }
 0x554   :  { %6250 = vmatprep.subr.bf16.mxu1 %v13169_v13 }
 0x557   :  { %6251 = vmatpush1.bf16.msra.mxu1 %v13167_v1 }
 0x558   :  { %6252 = vmatprep.subr.bf16.mxu1 %v13172_v33 }
 0x55a   :  { %11320 = vmatmul.mubr.msk.bf16.gmra.mrb[40].mxu1 %vm5857_vm3, %v13162_v3 }
 0x55b   :  { %6049 = vmatprep.mubr.bf16.mxu1 %v19039_v25  ;;  %6253 = vmatpush1.bf16.msra.mxu1 %v13170_v38 }
 0x55c   :  { %6254 = vmatprep.subr.bf16.mxu1 %v13175_v59  ;;  %v13206_v59 = vld [vmem:[%s18962_s6] ss:$8 sps:$4 sm:$0xff]  }
 0x55f   :  { %6255 = vmatpush1.bf16.msra.mxu1 %v13173_v14  ;;  %v13211_v14 = vld [vmem:[%s18962_s6 + $0x14] ss:$8 sps:$4 sm:$0xff]  }
 0x560   :  { %6256 = vmatprep.subr.bf16.mxu1 %v13178_v47 }
 0x562   :  { %11321 = vmatmul.mubr.msk.bf16.gmra.mrb[44].mxu1 %vm5857_vm3, %v13163_v5  ;;  %v13209_v5 = vld [vmem:[%s18962_s6 + $0x10] ss:$8 sps:$4 sm:$0xff]  }
 0x563   :  { %6257 = vmatpush1.bf16.msra.mxu1 %v13176_v19 }
 0x564   :  { %6258 = vmatprep.subr.bf16.mxu1 %v13181_v50  ;;  %v13214_v50 = vld [vmem:[%s18962_s6 + $0x24] ss:$8 sps:$4 sm:$0xff]  }
 0x567   :  { %6259 = vmatpush1.bf16.msra.mxu1 %v13179_v60 }
 0x568   :  { %6260 = vmatprep.subr.bf16.mxu1 %v13184_v35 }
 0x56b   :  { %6261 = vmatpush1.bf16.msra.mxu1 %v13182_v44 }
 0x56c   :  { %6262 = vmatprep.subr.bf16.mxu1 %v13187_v39 }
 0x56f   :  { %6263 = vmatpush1.bf16.msra.mxu1 %v13185_v27  ;;  %v13212_v27 = vld [vmem:[%s18962_s6 + $0x20] ss:$8 sps:$4 sm:$0xff]  }
 0x570   :  { %6264 = vmatprep.subr.bf16.mxu1 %v13190_v23 }
 0x573   :  { %6265 = vmatpush1.bf16.msra.mxu1 %v13188_v42  ;;  %v13217_v42 = vld [vmem:[%s18962_s6 + $0x34] ss:$8 sps:$4 sm:$0xff]  }
 0x574   :  { %6266 = vmatprep.subr.bf16.mxu1 %v13193_v24  ;;  %v13215_v24 = vld [vmem:[%s18962_s6 + $0x30] ss:$8 sps:$4 sm:$0xff]  }
 0x577   :  { %6267 = vmatpush1.bf16.msra.mxu1 %v13191_v29 }
 0x578   :  { %6268 = vmatprep.subr.bf16.mxu1 %v13196_v4 }
 0x57b   :  { %6269 = vmatpush1.bf16.msra.mxu1 %v13194_v54  ;;  %v13220_v54 = vld [vmem:[%s18962_s6 + $0x44] ss:$8 sps:$4 sm:$0xff]  }
 0x57c   :  { %6270 = vmatprep.subr.bf16.mxu1 %v13199_v48 }
 0x57f   :  { %6271 = vmatpush1.bf16.msra.mxu1 %v13197_v12 }
 0x580   :  { %6272 = vmatprep.subr.bf16.mxu1 %v13202_v20  ;;  %v13218_v20 = vld [vmem:[%s18962_s6 + $0x40] ss:$8 sps:$4 sm:$0xff]  }
 0x583   :  { %6273 = vmatpush1.bf16.msra.mxu1 %v13200_v58 }
 0x584   :  { %11378 = vmatprep.subr.msk.bf16.mxu1 %vm6241_vm4, %v13203_v28  ;;  %v13223_v28 = vld [vmem:[%s18962_s6 + $0x54] ss:$8 sps:$4 sm:$0xff]  }
 0x587   :  { %6275 = vmatpush1.bf16.msra.mxu1 %v6243_v9  ;;  %v13226_v9 = vld [vmem:[%s18962_s6 + $0x64] ss:$8 sps:$4 sm:$0xff]  }
 0x588   :  { %6462 = vmatprep.subr.bf16.mxu1 %v13208_v63  ;;  %v13224_v63 = vld [vmem:[%s18962_s6 + $0x60] ss:$8 sps:$4 sm:$0xff]  }
 0x60d   :  { %v17384_v56 = vpop.f32.mrb[24].mxu1 }
 0x60e   :  { %v5910_v21 = vpop.f32.mrb[25].mxu1 }
 0x60f   :  { %v17386_v10 = vpop.f32.mrb[26].mxu1 }
 0x610   :  { %v5935_v37 = vpack.c.bf16 %v17386_v10, %v17384_v56  ;;  %v5914_v17 = vpop.f32.mrb[27].mxu1  ;;  %v13250_v10 = vld [vmem:[%s18962_s6 + $0x1c4] ss:$8 sps:$4 sm:$0xff]  }
 0x611   :  { %v5936_v11 = vpack.c.bf16 %v5914_v17, %v5910_v21  ;;  %v13229_v21 = vld [vmem:[%s18962_s6 + $0x74] ss:$8 sps:$4 sm:$0xff]   ;;  %v13227_v17 = vld [vmem:[%s18962_s6 + $0x70] ss:$8 sps:$4 sm:$0xff]  }
 0x615   :  { %v17390_v0 = vpop.f32.mrb[28].mxu1 }
 0x616   :  { %v17392_v61 = vpop.f32.mrb[29].mxu1 }
 0x617   :  { %v17394_v26 = vpop.f32.mrb[30].mxu1 }
 0x618   :  { %v5937_v30 = vpack.c.bf16 %v17394_v26, %v17390_v0  ;;  %v17398_v18 = vpop.f32.mrb[31].mxu1  ;;  %v13248_v0 = vld [vmem:[%s18962_s6 + $0x1c0] ss:$8 sps:$4 sm:$0xff]   ;;  %v13252_v26 = vld [vmem:[%s18962_s6 + $0x1d0] ss:$8 sps:$4 sm:$0xff]  }
 0x619   :  { %v5938_v51 = vpack.c.bf16 %v17398_v18, %v17392_v61  ;;  %v13254_v61 = vld [vmem:[%s18962_s6 + $0x1d4] ss:$8 sps:$4 sm:$0xff]  }
 0x61a   :  { %v13258_v18 = vld [vmem:[%s18961_s5 + $0x30] sm:$0xff]  }
 0x61d   :  { %v17402_v8 = vpop.f32.mrb[32].mxu1 }
 0x61e   :  { %v17404_v6 = vpop.f32.mrb[33].mxu1  ;;  %v5939_v56 = vpack.c.bf16 %v17402_v8, %v17402_v8  ;;  %v13261_v8 = vld [vmem:[%s18962_s6 + $0x1f4] ss:$8 sps:$4 sm:$0xff]  }
 0x61f   :  { %v5932_v53 = vpop.f32.mrb[34].mxu1 }
 0x620   :  { %v5933_v43 = vpop.f32.mrb[35].mxu1  ;;  %v13230_v53 = vld [vmem:[%s18962_s6 + $0x80] ss:$8 sps:$4 sm:$0xff]  }
 0x621   :  { %v13235_v43 = vld [vmem:[%s18962_s6 + $0x94] ss:$8 sps:$4 sm:$0xff]  }
 0x625   :  { %v6031_v15 = vpop.f32.mrb[36].mxu1 }
 0x626   :  { %v6033_v13 = vpop.f32.mrb[37].mxu1 }
 0x627   :  { %v6035_v1 = vpop.f32.mrb[38].mxu1 }
 0x628   :  { %v6058_v33 = vpack.c.bf16 %v6035_v1, %v6031_v15  ;;  %v6037_v3 = vpop.f32.mrb[39].mxu1  ;;  %v13233_v15 = vld [vmem:[%s18962_s6 + $0x90] ss:$8 sps:$4 sm:$0xff]   ;;  %v13236_v1 = vld [vmem:[%s18962_s6 + $0xa0] ss:$8 sps:$4 sm:$0xff]  }
 0x629   :  { %v6059_v38 = vpack.c.bf16 %v6037_v3, %v6033_v13  ;;  %v13238_v13 = vld [vmem:[%s18962_s6 + $0xa4] ss:$8 sps:$4 sm:$0xff]   ;;  %v13239_v3 = vld [vmem:[%s18962_s6 + $0xb0] ss:$8 sps:$4 sm:$0xff]  }
 0x62b   :  { %11379 = vmatprep.mubr.msk.bf16.mxu1 %vm6231_vm5, %v6059_v38  ;;  %v13244_v38 = vld [vmem:[%s18962_s6 + $0xc4] ss:$8 sps:$4 sm:$0xff]  }
 0x62c   :  { %6281 = vmatmul.mubr.bf16.vlgmr.msra.gmra.mrb[48].mxu1 %v6058_v33  ;;  %v13241_v33 = vld [vmem:[%s18962_s6 + $0xb4] ss:$8 sps:$4 sm:$0xff]  }
 0x62d   :  { %6463 = vmatpush1.bf16.msra.mxu1 %v13206_v59  ;;  %v6041_v47 = vpop.f32.mrb[40].mxu1  ;;  %v13242_v59 = vld [vmem:[%s18962_s6 + $0xc0] ss:$8 sps:$4 sm:$0xff]  }
 0x62e   :  { %v6043_v19 = vpop.f32.mrb[41].mxu1  ;;  %6464 = vmatprep.subr.bf16.mxu1 %v13211_v14  ;;  %v13245_v14 = vld [vmem:[%s18962_s6 + $0xd4] ss:$8 sps:$4 sm:$0x7f]  }
 0x62f   :  { %v6045_v60 = vpop.f32.mrb[42].mxu1 }
 0x630   :  { %v6060_v35 = vpack.c.bf16 %v6045_v60, %v6041_v47  ;;  %v6047_v44 = vpop.f32.mrb[43].mxu1  ;;  %v13247_v47 = vld [vmem:[%s18962_s6 + $0xd0] ss:$8 sps:$4 sm:$0x7f]  }
 0x631   :  { %v6061_v39 = vpack.c.bf16 %v6047_v44, %v6043_v19  ;;  %6465 = vmatpush1.bf16.msra.mxu1 %v13209_v5  ;;  %v6457_v5 = vsel %vm6241_vm4, %v13247_v47, 0  ;;  %v5940_v19 = vpack.c.bf16 %v17404_v6, %v17404_v6  ;;  %v13259_v6 = vld [vmem:[%s18962_s6 + $0x1f0] ss:$8 sps:$4 sm:$0xff]   ;;  %v13268_v44 = vld [vmem:[%s18962_s6 + $0x214] ss:$8 sps:$4 sm:$0xff]  }
 0x632   :  { %6466 = vmatprep.subr.bf16.mxu1 %v13214_v50  ;;  %v13264_v50 = vld [vmem:[%s18962_s6 + $0x204] ss:$8 sps:$4 sm:$0xff]   ;;  %v13265_v60 = vld [vmem:[%s18961_s5 + $0x38] ss:$0 sps:$4 sm:$0x11]  }
 0x633   :  { %11380 = vmatprep.mubr.msk.bf16.mxu1 %vm6231_vm5, %v6061_v39  ;;  %v13266_v39 = vld [vmem:[%s18962_s6 + $0x210] ss:$8 sps:$4 sm:$0xff]  }
 0x634   :  { %6291 = vmatmul.mubr.bf16.gmra.mrb[52].mxu1 %v6060_v35  ;;  %v13262_v35 = vld [vmem:[%s18962_s6 + $0x200] ss:$8 sps:$4 sm:$0xff]  }
 0x635   :  { %6467 = vmatpush1.bf16.msra.mxu1 %v13212_v27  ;;  %v6051_v23 = vpop.f32.mrb[44].mxu1  ;;  %v13271_v27 = vld [vmem:[%s18962_s6 + $0x224] ss:$8 sps:$4 sm:$0xff]  }
 0x636   :  { %6468 = vmatprep.subr.bf16.mxu1 %v13217_v42  ;;  %v6053_v29 = vpop.f32.mrb[45].mxu1  ;;  %v6062_v12 = vpack.c.bf16 %v6051_v23, %v6051_v23  ;;  %v13269_v42 = vld [vmem:[%s18962_s6 + $0x220] ss:$8 sps:$4 sm:$0xff]   ;;  %v13274_v23 = vld [vmem:[%s18962_s6 + $0x234] ss:$8 sps:$4 sm:$0xff]  }
 0x637   :  { %v6063_v4 = vpack.c.bf16 %v6053_v29, %v6053_v29  ;;  %v6055_v48 = vpop.f32.mrb[46].mxu1  ;;  %v13277_v29 = vld [vmem:[%s18962_s6 + $0x244] ss:$8 sps:$4 sm:$0xff]  }
 0x638   :  { %v6056_v58 = vpop.f32.mrb[47].mxu1  ;;  %v13278_v48 = vld [vmem:[%s18962_s6 + $0x250] ss:$8 sps:$4 sm:$0xff]  }
 0x639   :  { %6469 = vmatpush1.bf16.msra.mxu1 %v13215_v24  ;;  %11381 = vmatprep.mubr.msk.bf16.mxu1 %vm6231_vm5, %v6063_v4  ;;  %v13272_v24 = vld [vmem:[%s18962_s6 + $0x230] ss:$8 sps:$4 sm:$0xff]   ;;  %v13280_v4 = vld [vmem:[%s18962_s6 + $0x254] ss:$8 sps:$4 sm:$0xff]   ;;  %v13281_v58 = vld [vmem:[%s18962_s6 + $0x260] ss:$8 sps:$4 sm:$0xff]  }
 0x63a   :  { %6470 = vmatprep.subr.bf16.mxu1 %v13220_v54  ;;  %v13275_v54 = vld [vmem:[%s18962_s6 + $0x240] ss:$8 sps:$4 sm:$0xff]  }
 0x63c   :  { %6301 = vmatmul.mubr.bf16.gmra.mrb[56].mxu1 %v6062_v12  ;;  %v13283_v12 = vld [vmem:[%s18962_s6 + $0x264] ss:$8 sps:$4 sm:$0xff]  }
 0x63d   :  { %6471 = vmatpush1.bf16.msra.mxu1 %v13218_v20  ;;  %11411 = vmatprep.mubr.msk.bf16.mxu1 %vm6231_vm5, %v5936_v11  ;;  %v13232_v11 = vld [vmem:[%s18962_s6 + $0x84] ss:$8 sps:$4 sm:$0xff]   ;;  %v13286_v20 = vld [vmem:[%s18962_s6 + $0x274] ss:$8 sps:$4 sm:$0xff]  }
 0x63e   :  { %6472 = vmatprep.subr.bf16.mxu1 %v13223_v28  ;;  %v13284_v28 = vld [vmem:[%s18962_s6 + $0x270] ss:$8 sps:$4 sm:$0xff]  }
 0x641   :  { %6473 = vmatpush1.bf16.msra.mxu1 %v13221_v41  ;;  %v13289_v41 = vld [vmem:[%s18962_s6 + $0x284] ss:$8 sps:$4 sm:$0xff]  }
 0x642   :  { %6474 = vmatprep.subr.bf16.mxu1 %v13226_v9  ;;  %v13287_v9 = vld [vmem:[%s18962_s6 + $0x280] ss:$8 sps:$4 sm:$0xff]  }
 0x645   :  { %6475 = vmatpush1.bf16.msra.mxu1 %v13224_v63  ;;  %v13290_v63 = vld [vmem:[%s18962_s6 + $0x294] ss:$8 sps:$4 sm:$0x7f]  }
 0x646   :  { %6476 = vmatprep.subr.bf16.mxu1 %v13229_v21  ;;  %v13292_v21 = vld [vmem:[%s18962_s6 + $0x290] ss:$8 sps:$4 sm:$0x7f]  }
 0x649   :  { %6477 = vmatpush1.bf16.msra.mxu1 %v13227_v17  ;;  %v6795_v17 = vsel %vm6241_vm4, %v13292_v21, 0  ;;  %v13319_v21 = vld [vmem:[%s18962_s6 + $0x314] ss:$8 sps:$4 sm:$0xff]  }
 0x64a   :  { %6478 = vmatprep.subr.bf16.mxu1 %v13232_v11 }
 0x64d   :  { %6479 = vmatpush1.bf16.msra.mxu1 %v13230_v53 }
 0x64e   :  { %6480 = vmatprep.subr.bf16.mxu1 %v13235_v43 }
 0x651   :  { %6481 = vmatpush1.bf16.msra.mxu1 %v13233_v15 }
 0x652   :  { %6482 = vmatprep.subr.bf16.mxu1 %v13238_v13 }
 0x655   :  { %6483 = vmatpush1.bf16.msra.mxu1 %v13236_v1 }
 0x656   :  { %6484 = vmatprep.subr.bf16.mxu1 %v13241_v33 }
 0x659   :  { %6485 = vmatpush1.bf16.msra.mxu1 %v13239_v3 }
 0x65a   :  { %6486 = vmatprep.subr.bf16.mxu1 %v13244_v38 }
 0x65d   :  { %6487 = vmatpush1.bf16.msra.mxu1 %v13242_v59 }
 0x65e   :  { %11410 = vmatprep.subr.msk.bf16.mxu1 %vm6241_vm4, %v13245_v14 }
 0x661   :  { %6489 = vmatpush1.bf16.msra.mxu1 %v6457_v5 }
 0x662   :  { %6551 = vmatprep.subr.bf16.mxu1 %v17180_v55 }
 0x664   :  { %6495 = vmatmul.mubr.bf16.vlgmr.msra.gmra.mrb[48].mxu1 %v5935_v37  ;;  %v13251_v37 = vld [vmem:[%s18961_s5 + $0x28] sm:$0xff]  }
 0x665   :  { %11412 = vmatprep.mubr.msk.bf16.mxu1 %vm6231_vm5, %v5938_v51  ;;  %6552 = vmatpush1.bf16.msra.mxu1 %v17177_v32  ;;  %v13255_v51 = vld [vmem:[%s18962_s6 + $0x1e0] ss:$8 sps:$4 sm:$0xff]  }
 0x666   :  { %6553 = vmatprep.subr.bf16.mxu1 %v17198_v40 }
 0x669   :  { %6554 = vmatpush1.bf16.msra.mxu1 %v17195_v2 }
 0x66a   :  { %6555 = vmatprep.subr.bf16.mxu1 %v17216_v57 }
 0x66c   :  { %6505 = vmatmul.mubr.bf16.gmra.mrb[52].mxu1 %v5937_v30  ;;  %v13257_v30 = vld [vmem:[%s18962_s6 + $0x1e4] ss:$8 sps:$4 sm:$0xff]  }
 0x66d   :  { %11413 = vmatprep.mubr.msk.bf16.mxu1 %vm6231_vm5, %v5940_v19  ;;  %6556 = vmatpush1.bf16.msra.mxu1 %v17213_v46 }
 0x66e   :  { %6557 = vmatprep.subr.bf16.mxu1 %v17234_v31 }
 0x671   :  { %6558 = vmatpush1.bf16.msra.mxu1 %v17231_v36 }
 0x672   :  { %11422 = vmatprep.subr.msk.bf16.mxu1 %vm5867_vm2, %v17247_v45 }
 0x674   :  { %6515 = vmatmul.mubr.bf16.gmra.mrb[60].mxu1 %v5939_v56 }
 0x675   :  { %6560 = vmatpush1.bf16.msra.mxu1 %v17250_v16  ;;  %6583 = vmatprep.mubr.bf16.mxu1 %v19039_v25 }
 0x676   :  { %6800 = vmatprep.subr.bf16.mxu1 %v13250_v10 }
 0x67c   :  { %11423 = vmatmul.mubr.msk.bf16.vlgmr.msra.gmra.mrb[64].mxu1 %vm5857_vm3, %v13251_v37 }
 0x67d   :  { %6801 = vmatpush1.bf16.msra.mxu1 %v13248_v0  ;;  %6593 = vmatprep.mubr.bf16.mxu1 %v19039_v25 }
 0x67e   :  { %6802 = vmatprep.subr.bf16.mxu1 %v13254_v61 }
 0x681   :  { %6803 = vmatpush1.bf16.msra.mxu1 %v13252_v26 }
 0x682   :  { %6804 = vmatprep.subr.bf16.mxu1 %v13257_v30 }
 0x684   :  { %11424 = vmatmul.mubr.msk.bf16.gmra.mrb[68].mxu1 %vm5857_vm3, %v13258_v18 }
 0x685   :  { %6805 = vmatpush1.bf16.msra.mxu1 %v13255_v51  ;;  %6603 = vmatprep.mubr.bf16.mxu1 %v19039_v25 }
 0x686   :  { %6806 = vmatprep.subr.bf16.mxu1 %v13261_v8 }
 0x689   :  { %6807 = vmatpush1.bf16.msra.mxu1 %v13259_v6 }
 0x68a   :  { %6808 = vmatprep.subr.bf16.mxu1 %v13264_v50 }
 0x68c   :  { %11425 = vmatmul.mubr.msk.bf16.gmra.mrb[72].mxu1 %vm5857_vm3, %v13265_v60 }
 0x68d   :  { %6809 = vmatpush1.bf16.msra.mxu1 %v13262_v35 }
 0x68e   :  { %6810 = vmatprep.subr.bf16.mxu1 %v13268_v44  ;;  %v13295_v44 = vld [vmem:[%s18962_s6 + $0x2a4] ss:$8 sps:$4 sm:$0xff]  }
 0x691   :  { %6811 = vmatpush1.bf16.msra.mxu1 %v13266_v39  ;;  %v13296_v39 = vld [vmem:[%s18961_s5 + $0x3c] sm:$0xff]  }
 0x692   :  { %6812 = vmatprep.subr.bf16.mxu1 %v13271_v27  ;;  %v13293_v27 = vld [vmem:[%s18962_s6 + $0x2a0] ss:$8 sps:$4 sm:$0xff]  }
 0x695   :  { %6813 = vmatpush1.bf16.msra.mxu1 %v13269_v42  ;;  %v13299_v42 = vld [vmem:[%s18962_s6 + $0x2b4] ss:$8 sps:$4 sm:$0xff]  }
 0x696   :  { %6814 = vmatprep.subr.bf16.mxu1 %v13274_v23  ;;  %v13297_v23 = vld [vmem:[%s18962_s6 + $0x2b0] ss:$8 sps:$4 sm:$0xff]  }
 0x699   :  { %6815 = vmatpush1.bf16.msra.mxu1 %v13272_v24  ;;  %v13302_v24 = vld [vmem:[%s18962_s6 + $0x2c4] ss:$8 sps:$4 sm:$0xff]  }
 0x69a   :  { %6816 = vmatprep.subr.bf16.mxu1 %v13277_v29  ;;  %v13303_v29 = vld [vmem:[%s18961_s5 + $0x44] sm:$0xff]  }
 0x69d   :  { %6817 = vmatpush1.bf16.msra.mxu1 %v13275_v54  ;;  %v13300_v54 = vld [vmem:[%s18962_s6 + $0x2c0] ss:$8 sps:$4 sm:$0xff]  }
 0x69e   :  { %6818 = vmatprep.subr.bf16.mxu1 %v13280_v4  ;;  %v13306_v4 = vld [vmem:[%s18962_s6 + $0x2d4] ss:$8 sps:$4 sm:$0xff]  }
 0x6a1   :  { %6819 = vmatpush1.bf16.msra.mxu1 %v13278_v48  ;;  %v13304_v48 = vld [vmem:[%s18962_s6 + $0x2d0] ss:$8 sps:$4 sm:$0xff]  }
 0x6a2   :  { %6820 = vmatprep.subr.bf16.mxu1 %v13283_v12  ;;  %v13309_v12 = vld [vmem:[%s18962_s6 + $0x2e4] ss:$8 sps:$4 sm:$0xff]  }
 0x6a5   :  { %6821 = vmatpush1.bf16.msra.mxu1 %v13281_v58  ;;  %v13310_v58 = vld [vmem:[%s18961_s5 + $0x4c] ss:$0 sps:$4 sm:$0x11]  }
 0x6a6   :  { %6822 = vmatprep.subr.bf16.mxu1 %v13286_v20  ;;  %v13307_v20 = vld [vmem:[%s18962_s6 + $0x2e0] ss:$8 sps:$4 sm:$0xff]  }
 0x6a9   :  { %6823 = vmatpush1.bf16.msra.mxu1 %v13284_v28  ;;  %v13313_v28 = vld [vmem:[%s18962_s6 + $0x2f4] ss:$8 sps:$4 sm:$0xff]  }
 0x6aa   :  { %6824 = vmatprep.subr.bf16.mxu1 %v13289_v41  ;;  %v13311_v41 = vld [vmem:[%s18962_s6 + $0x2f0] ss:$8 sps:$4 sm:$0xff]  }
 0x6ad   :  { %6825 = vmatpush1.bf16.msra.mxu1 %v13287_v9  ;;  %v13316_v9 = vld [vmem:[%s18962_s6 + $0x304] ss:$8 sps:$4 sm:$0xff]  }
 0x6ae   :  { %11482 = vmatprep.subr.msk.bf16.mxu1 %vm6241_vm4, %v13290_v63  ;;  %v13314_v63 = vld [vmem:[%s18962_s6 + $0x300] ss:$8 sps:$4 sm:$0xff]  }
 0x6b1   :  { %6827 = vmatpush1.bf16.msra.mxu1 %v6795_v17  ;;  %v13317_v17 = vld [vmem:[%s18962_s6 + $0x310] ss:$8 sps:$4 sm:$0xff]  }
 0x6b2   :  { %6899 = vmatprep.subr.bf16.mxu1 %v17180_v55 }
 0x70f   :  { %v6302_v11 = vpop.f32.mrb[56].mxu1 }
 0x710   :  { %v6304_v53 = vpop.f32.mrb[57].mxu1 }
 0x711   :  { %v6306_v43 = vpop.f32.mrb[58].mxu1 }
 0x712   :  { %v6307_v15 = vpop.f32.mrb[59].mxu1  ;;  %v13325_v43 = vld [vmem:[%s18962_s6 + $0x334] ss:$8 sps:$4 sm:$0xff]  }
 0x713   :  { %v13323_v15 = vld [vmem:[%s18962_s6 + $0x330] ss:$8 sps:$4 sm:$0xff]  }
 0x747   :  { %v6516_v13 = vpop.f32.mrb[60].mxu1 }
 0x748   :  { %v17621_v1 = vadd.f32 %v6516_v13, %v6302_v11  ;;  %v6518_v33 = vpop.f32.mrb[61].mxu1  ;;  %v13322_v11 = vld [vmem:[%s18962_s6 + $0x324] ss:$8 sps:$4 sm:$0xff]  }
 0x749   :  { %v17623_v3 = vadd.f32 %v6518_v33, %v6304_v53  ;;  %v6520_v38 = vpop.f32.mrb[62].mxu1  ;;  %v13320_v53 = vld [vmem:[%s18962_s6 + $0x320] ss:$8 sps:$4 sm:$0xff]   ;;  %v13328_v13 = vld [vmem:[%s18962_s6 + $0x344] ss:$8 sps:$4 sm:$0xff]  }
 0x74a   :  { %v6521_v59 = vpop.f32.mrb[63].mxu1  ;;  %v13326_v33 = vld [vmem:[%s18962_s6 + $0x340] ss:$8 sps:$4 sm:$0xff]   ;;  %v13331_v38 = vld [vmem:[%s18962_s6 + $0x354] ss:$8 sps:$4 sm:$0xff]  }
 0x74b   :  { %v13329_v59 = vld [vmem:[%s18962_s6 + $0x350] ss:$8 sps:$4 sm:$0xff]  }
 0x74f   :  { %v6585_v14 = vpop.f32.mrb[64].mxu1 }
 0x750   :  { %v6587_v47 = vpop.f32.mrb[65].mxu1 }
 0x751   :  { %v6589_v5 = vpop.f32.mrb[66].mxu1 }
 0x752   :  { %v6612_v19 = vpack.c.bf16 %v6589_v5, %v6585_v14  ;;  %v6591_v56 = vpop.f32.mrb[67].mxu1  ;;  %v13334_v14 = vld [vmem:[%s18962_s6 + $0x364] ss:$8 sps:$4 sm:$0xff]   ;;  %v13335_v5 = vld [vmem:[%s18962_s6 + $0x374] ss:$8 sps:$4 sm:$0x7f]  }
 0x753   :  { %v6613_v10 = vpack.c.bf16 %v6591_v56, %v6587_v47  ;;  %v13332_v47 = vld [vmem:[%s18962_s6 + $0x360] ss:$8 sps:$4 sm:$0xff]  }
 0x755   :  { %11483 = vmatprep.mubr.msk.bf16.mxu1 %vm6231_vm5, %v6613_v10 }
 0x756   :  { %6833 = vmatmul.mubr.bf16.vlgmr.msra.gmra.mrb[48].mxu1 %v6612_v19  ;;  %v13337_v19 = vld [vmem:[%s18962_s6 + $0x370] ss:$8 sps:$4 sm:$0x7f]  }
 0x757   :  { %6900 = vmatpush1.bf16.msra.mxu1 %v17177_v32  ;;  %v6595_v37 = vpop.f32.mrb[68].mxu1  ;;  %v7143_v56 = vsel %vm6241_vm4, %v13337_v19, 0 }
 0x758   :  { %6901 = vmatprep.subr.bf16.mxu1 %v17198_v40  ;;  %v6597_v0 = vpop.f32.mrb[69].mxu1 }
 0x759   :  { %v6599_v61 = vpop.f32.mrb[70].mxu1 }
 0x75a   :  { %v6614_v26 = vpack.c.bf16 %v6599_v61, %v6595_v37  ;;  %v6601_v30 = vpop.f32.mrb[71].mxu1 }
 0x75b   :  { %v6615_v18 = vpack.c.bf16 %v6601_v30, %v6597_v0  ;;  %6902 = vmatpush1.bf16.msra.mxu1 %v17195_v2 }
 0x75c   :  { %6903 = vmatprep.subr.bf16.mxu1 %v17216_v57 }
 0x75d   :  { %11484 = vmatprep.mubr.msk.bf16.mxu1 %vm6231_vm5, %v6615_v18 }
 0x75e   :  { %6843 = vmatmul.mubr.bf16.gmra.mrb[52].mxu1 %v6614_v26 }
 0x75f   :  { %6904 = vmatpush1.bf16.msra.mxu1 %v17213_v46  ;;  %v6605_v51 = vpop.f32.mrb[72].mxu1 }
 0x760   :  { %6905 = vmatprep.subr.bf16.mxu1 %v17234_v31  ;;  %v6607_v8 = vpop.f32.mrb[73].mxu1  ;;  %v6616_v35 = vpack.c.bf16 %v6605_v51, %v6605_v51 }
 0x761   :  { %v6617_v6 = vpack.c.bf16 %v6607_v8, %v6607_v8  ;;  %v6609_v50 = vpop.f32.mrb[74].mxu1 }
 0x762   :  { %v6610_v60 = vpop.f32.mrb[75].mxu1 }
 0x763   :  { %6906 = vmatpush1.bf16.msra.mxu1 %v17231_v36  ;;  %11485 = vmatprep.mubr.msk.bf16.mxu1 %vm6231_vm5, %v6617_v6 }
 0x764   :  { %11494 = vmatprep.subr.msk.bf16.mxu1 %vm5867_vm2, %v17247_v45 }
 0x766   :  { %6853 = vmatmul.mubr.bf16.gmra.mrb[76].mxu1 %v6616_v35 }
 0x767   :  { %6908 = vmatpush1.bf16.msra.mxu1 %v17250_v16  ;;  %6931 = vmatprep.mubr.bf16.mxu1 %v19039_v25 }
 0x768   :  { %7148 = vmatprep.subr.bf16.mxu1 %v13295_v44 }
 0x76e   :  { %11495 = vmatmul.mubr.msk.bf16.vlgmr.msra.gmra.mrb[80].mxu1 %vm5857_vm3, %v13296_v39 }
 0x76f   :  { %7149 = vmatpush1.bf16.msra.mxu1 %v13293_v27  ;;  %6941 = vmatprep.mubr.bf16.mxu1 %v19039_v25 }
 0x770   :  { %7150 = vmatprep.subr.bf16.mxu1 %v13299_v42 }
 0x773   :  { %7151 = vmatpush1.bf16.msra.mxu1 %v13297_v23 }
 0x774   :  { %7152 = vmatprep.subr.bf16.mxu1 %v13302_v24 }
 0x776   :  { %11496 = vmatmul.mubr.msk.bf16.gmra.mrb[84].mxu1 %vm5857_vm3, %v13303_v29  ;;  %v13347_v29 = vld [vmem:[%s18962_s6 + $0x3a0] ss:$8 sps:$4 sm:$0xff]  }
 0x777   :  { %7153 = vmatpush1.bf16.msra.mxu1 %v13300_v54  ;;  %6951 = vmatprep.mubr.bf16.mxu1 %v19039_v25  ;;  %v13352_v54 = vld [vmem:[%s18962_s6 + $0x3b4] ss:$8 sps:$4 sm:$0xff]  }
 0x778   :  { %7154 = vmatprep.subr.bf16.mxu1 %v13306_v4  ;;  %v13350_v4 = vld [vmem:[%s18962_s6 + $0x3b0] ss:$8 sps:$4 sm:$0xff]  }
 0x77b   :  { %7155 = vmatpush1.bf16.msra.mxu1 %v13304_v48  ;;  %v13355_v48 = vld [vmem:[%s18962_s6 + $0x3c4] ss:$8 sps:$4 sm:$0xff]  }
 0x77c   :  { %7156 = vmatprep.subr.bf16.mxu1 %v13309_v12  ;;  %v13340_v12 = vld [vmem:[%s18961_s5 + $0x60] ss:$0 sps:$4 sm:$0x11]  }
 0x77e   :  { %11497 = vmatmul.mubr.msk.bf16.gmra.mrb[88].mxu1 %vm5857_vm3, %v13310_v58  ;;  %v13353_v58 = vld [vmem:[%s18962_s6 + $0x3c0] ss:$8 sps:$4 sm:$0xff]  }
 0x77f   :  { %7157 = vmatpush1.bf16.msra.mxu1 %v13307_v20  ;;  %v13358_v20 = vld [vmem:[%s18962_s6 + $0x3d4] ss:$8 sps:$4 sm:$0xff]  }
 0x780   :  { %7158 = vmatprep.subr.bf16.mxu1 %v13313_v28  ;;  %v13356_v28 = vld [vmem:[%s18962_s6 + $0x3d0] ss:$8 sps:$4 sm:$0xff]  }
 0x783   :  { %7159 = vmatpush1.bf16.msra.mxu1 %v13311_v41  ;;  %v13361_v41 = vld [vmem:[%s18962_s6 + $0x3e4] ss:$8 sps:$4 sm:$0xff]  }
 0x784   :  { %7160 = vmatprep.subr.bf16.mxu1 %v13316_v9  ;;  %v13359_v9 = vld [vmem:[%s18962_s6 + $0x3e0] ss:$8 sps:$4 sm:$0xff]  }
 0x787   :  { %7161 = vmatpush1.bf16.msra.mxu1 %v13314_v63  ;;  %v13364_v63 = vld [vmem:[%s18962_s6 + $0x3f4] ss:$8 sps:$4 sm:$0xff]  }
 0x788   :  { %7162 = vmatprep.subr.bf16.mxu1 %v13319_v21  ;;  %v13362_v21 = vld [vmem:[%s18962_s6 + $0x3f0] ss:$8 sps:$4 sm:$0xff]  }
 0x78b   :  { %7163 = vmatpush1.bf16.msra.mxu1 %v13317_v17  ;;  %v13367_v17 = vld [vmem:[%s18962_s6 + $0x404] ss:$8 sps:$4 sm:$0xff]  }
 0x78c   :  { %7164 = vmatprep.subr.bf16.mxu1 %v13322_v11  ;;  %v13365_v11 = vld [vmem:[%s18962_s6 + $0x400] ss:$8 sps:$4 sm:$0xff]  }
 0x78f   :  { %7165 = vmatpush1.bf16.msra.mxu1 %v13320_v53  ;;  %v13370_v53 = vld [vmem:[%s18962_s6 + $0x414] ss:$8 sps:$4 sm:$0xff]  }
 0x790   :  { %7166 = vmatprep.subr.bf16.mxu1 %v13325_v43  ;;  %v13368_v43 = vld [vmem:[%s18962_s6 + $0x410] ss:$8 sps:$4 sm:$0xff]  }
 0x793   :  { %7167 = vmatpush1.bf16.msra.mxu1 %v13323_v15  ;;  %v13373_v15 = vld [vmem:[%s18962_s6 + $0x424] ss:$8 sps:$4 sm:$0xff]  }
 0x794   :  { %7168 = vmatprep.subr.bf16.mxu1 %v13328_v13  ;;  %v13371_v13 = vld [vmem:[%s18962_s6 + $0x420] ss:$8 sps:$4 sm:$0xff]  }
 0x797   :  { %7169 = vmatpush1.bf16.msra.mxu1 %v13326_v33  ;;  %v13376_v33 = vld [vmem:[%s18962_s6 + $0x434] ss:$8 sps:$4 sm:$0xff]  }
 0x798   :  { %7170 = vmatprep.subr.bf16.mxu1 %v13331_v38  ;;  %v13374_v38 = vld [vmem:[%s18962_s6 + $0x430] ss:$8 sps:$4 sm:$0xff]  }
 0x79b   :  { %7171 = vmatpush1.bf16.msra.mxu1 %v13329_v59  ;;  %v13379_v59 = vld [vmem:[%s18962_s6 + $0x444] ss:$8 sps:$4 sm:$0xff]  }
 0x79c   :  { %7172 = vmatprep.subr.bf16.mxu1 %v13334_v14  ;;  %v13377_v14 = vld [vmem:[%s18962_s6 + $0x440] ss:$8 sps:$4 sm:$0xff]  }
 0x79f   :  { %7173 = vmatpush1.bf16.msra.mxu1 %v13332_v47  ;;  %v13380_v47 = vld [vmem:[%s18962_s6 + $0x454] ss:$8 sps:$4 sm:$0x7f]  }
 0x7a0   :  { %11554 = vmatprep.subr.msk.bf16.mxu1 %vm6241_vm4, %v13335_v5  ;;  %v13382_v5 = vld [vmem:[%s18962_s6 + $0x450] ss:$8 sps:$4 sm:$0x7f]  }
 0x7a1   :  { %v7491_v19 = vsel %vm6241_vm4, %v13382_v5, 0 }
 0x7a3   :  { %7175 = vmatpush1.bf16.msra.mxu1 %v7143_v56 }
 0x7a4   :  { %7247 = vmatprep.subr.bf16.mxu1 %v17180_v55 }
 0x839   :  { %v6854_v10 = vpop.f32.mrb[76].mxu1 }
 0x83a   :  { %v17741_v37 = vadd.f32 %v6854_v10, %v17621_v1  ;;  %v6856_v0 = vpop.f32.mrb[77].mxu1 }
 0x83b   :  { %v17744_v61 = vadd.f32 %v6856_v0, %v17623_v3  ;;  %v6858_v26 = vpop.f32.mrb[78].mxu1 }
 0x83c   :  { %v6859_v30 = vpop.f32.mrb[79].mxu1 }
 0x841   :  { %v6933_v18 = vpop.f32.mrb[80].mxu1 }
 0x842   :  { %v6935_v51 = vpop.f32.mrb[81].mxu1 }
 0x843   :  { %v6937_v8 = vpop.f32.mrb[82].mxu1 }
 0x844   :  { %v6960_v6 = vpack.c.bf16 %v6937_v8, %v6933_v18  ;;  %v6939_v50 = vpop.f32.mrb[83].mxu1 }
 0x845   :  { %v6961_v60 = vpack.c.bf16 %v6939_v50, %v6935_v51 }
 0x847   :  { %11555 = vmatprep.mubr.msk.bf16.mxu1 %vm6231_vm5, %v6961_v60 }
 0x848   :  { %7181 = vmatmul.mubr.bf16.vlgmr.msra.gmra.mrb[48].mxu1 %v6960_v6 }
 0x849   :  { %7248 = vmatpush1.bf16.msra.mxu1 %v17177_v32  ;;  %v6943_v55 = vpop.f32.mrb[84].mxu1 }
 0x84a   :  { %7249 = vmatprep.subr.bf16.mxu1 %v17198_v40  ;;  %v6945_v1 = vpop.f32.mrb[85].mxu1 }
 0x84b   :  { %v6947_v35 = vpop.f32.mrb[86].mxu1 }
 0x84c   :  { %v6962_v3 = vpack.c.bf16 %v6947_v35, %v6943_v55  ;;  %v6949_v44 = vpop.f32.mrb[87].mxu1 }
 0x84d   :  { %v6963_v39 = vpack.c.bf16 %v6949_v44, %v6945_v1  ;;  %7250 = vmatpush1.bf16.msra.mxu1 %v17195_v2  ;;  %v13343_v2 = vld [vmem:[%s18962_s6 + $0x384] ss:$8 sps:$4 sm:$0xff]  }
 0x84e   :  { %7251 = vmatprep.subr.bf16.mxu1 %v17216_v57  ;;  %v13341_v57 = vld [vmem:[%s18962_s6 + $0x380] ss:$8 sps:$4 sm:$0xff]  }
 0x84f   :  { %11556 = vmatprep.mubr.msk.bf16.mxu1 %vm6231_vm5, %v6963_v39 }
 0x850   :  { %7191 = vmatmul.mubr.bf16.gmra.mrb[52].mxu1 %v6962_v3 }
 0x851   :  { %7252 = vmatpush1.bf16.msra.mxu1 %v17213_v46  ;;  %v6953_v27 = vpop.f32.mrb[88].mxu1  ;;  %v13338_v46 = vld [vmem:[%s18961_s5 + $0x50] sm:$0xff]  }
 0x852   :  { %7253 = vmatprep.subr.bf16.mxu1 %v17234_v31  ;;  %v6955_v32 = vpop.f32.mrb[89].mxu1  ;;  %v6964_v24 = vpack.c.bf16 %v6953_v27, %v6953_v27  ;;  %v13344_v31 = vld [vmem:[%s18962_s6 + $0x390] ss:$8 sps:$4 sm:$0xff]  }
 0x853   :  { %v6965_v42 = vpack.c.bf16 %v6955_v32, %v6955_v32  ;;  %v6957_v40 = vpop.f32.mrb[90].mxu1 }
 0x854   :  { %v6958_v23 = vpop.f32.mrb[91].mxu1 }
 0x855   :  { %7254 = vmatpush1.bf16.msra.mxu1 %v17231_v36  ;;  %11557 = vmatprep.mubr.msk.bf16.mxu1 %vm6231_vm5, %v6965_v42  ;;  %v13346_v36 = vld [vmem:[%s18962_s6 + $0x394] ss:$8 sps:$4 sm:$0xff]  }
 0x856   :  { %11566 = vmatprep.subr.msk.bf16.mxu1 %vm5867_vm2, %v17247_v45  ;;  %v13349_v45 = vld [vmem:[%s18962_s6 + $0x3a4] ss:$8 sps:$4 sm:$0xff]  }
 0x858   :  { %7201 = vmatmul.mubr.bf16.gmra.mrb[92].mxu1 %v6964_v24  ;;  %v7567_v24 = vld [vmem:[%s18963_s7] sm:$0x77] }
 0x859   :  { %7256 = vmatpush1.bf16.msra.mxu1 %v17250_v16  ;;  %7279 = vmatprep.mubr.bf16.mxu1 %v19039_v25  ;;  %v13339_v16 = vld [vmem:[%s18961_s5 + $0x58] sm:$0xff]  }
 0x85a   :  { %7496 = vmatprep.subr.bf16.mxu1 %v13343_v2  ;;  %v7572_v2 = vrot.slane %v7567_v24, %v17124_v7 }
 0x860   :  { %11567 = vmatmul.mubr.msk.bf16.vlgmr.msra.gmra.mrb[96].mxu1 %vm5857_vm3, %v13338_v46  ;;  %v7576_v46 = vrot.slane %v7567_v24, %v17129_v34 }
 0x861   :  { %7289 = vmatprep.mubr.bf16.mxu1 %v19039_v25  ;;  %7497 = vmatpush1.bf16.msra.mxu1 %v13341_v57  ;;  %v7582_v57 = vrot.slane %v7572_v2, %v17124_v7 }
 0x862   :  { %7498 = vmatprep.subr.bf16.mxu1 %v13346_v36  ;;  %v7610_v36 = vrot.slane %v7567_v24, %v17132_v49 }
 0x865   :  { %7499 = vmatpush1.bf16.msra.mxu1 %v13344_v31  ;;  %v7586_v31 = vrot.slane %v7576_v46, %v17124_v7 }
 0x866   :  { %7500 = vmatprep.subr.bf16.mxu1 %v13349_v45  ;;  %v7614_v45 = vrot.slane %v7567_v24, %v17135_v52 }
 0x868   :  { %11568 = vmatmul.mubr.msk.bf16.gmra.mrb[100].mxu1 %vm5857_vm3, %v13339_v16 }
 0x869   :  { %7299 = vmatprep.mubr.bf16.mxu1 %v19039_v25  ;;  %7501 = vmatpush1.bf16.msra.mxu1 %v13347_v29 }
 0x86a   :  { %7502 = vmatprep.subr.bf16.mxu1 %v13352_v54  ;;  %v17880_v54 = vrot.slane %v7610_v36, %v17132_v49 }
 0x86d   :  { %7503 = vmatpush1.bf16.msra.mxu1 %v13350_v4  ;;  %v7638_v4 = vrot.slane %v7567_v24, %v17141_v62 }
 0x86e   :  { %7504 = vmatprep.subr.bf16.mxu1 %v13355_v48 }
 0x870   :  { %11569 = vmatmul.mubr.msk.bf16.gmra.mrb[104].mxu1 %vm5857_vm3, %v13340_v12 }
 0x871   :  { %7505 = vmatpush1.bf16.msra.mxu1 %v13353_v58  ;;  %v17884_v58 = vrot.slane %v7614_v45, %v17132_v49 }
 0x872   :  { %7506 = vmatprep.subr.bf16.mxu1 %v13358_v20  ;;  %v7642_v20 = vrot.slane %v7567_v24, %v17147_v22 }
 0x875   :  { %7507 = vmatpush1.bf16.msra.mxu1 %v13356_v28 }
 0x876   :  { %7508 = vmatprep.subr.bf16.mxu1 %v13361_v41 }
 0x879   :  { %7509 = vmatpush1.bf16.msra.mxu1 %v13359_v9 }
 0x87a   :  { %7510 = vmatprep.subr.bf16.mxu1 %v13364_v63 }
 0x87d   :  { %7511 = vmatpush1.bf16.msra.mxu1 %v13362_v21 }
 0x87e   :  { %7512 = vmatprep.subr.bf16.mxu1 %v13367_v17 }
 0x881   :  { %7513 = vmatpush1.bf16.msra.mxu1 %v13365_v11 }
 0x882   :  { %7514 = vmatprep.subr.bf16.mxu1 %v13370_v53  ;;  %v7648_v53 = vrot.slane %v7638_v4, %v17141_v62 }
 0x885   :  { %7515 = vmatpush1.bf16.msra.mxu1 %v13368_v43 }
 0x886   :  { %7516 = vmatprep.subr.bf16.mxu1 %v13373_v15 }
 0x889   :  { %7517 = vmatpush1.bf16.msra.mxu1 %v13371_v13  ;;  %v7652_v13 = vrot.slane %v7642_v20, %v17141_v62 }
 0x88a   :  { %7518 = vmatprep.subr.bf16.mxu1 %v13376_v33 }
 0x88d   :  { %7519 = vmatpush1.bf16.msra.mxu1 %v13374_v38 }
 0x88e   :  { %7520 = vmatprep.subr.bf16.mxu1 %v13379_v59 }
 0x891   :  { %7521 = vmatpush1.bf16.msra.mxu1 %v13377_v14 }
 0x892   :  { %11626 = vmatprep.subr.msk.bf16.mxu1 %vm6241_vm4, %v13380_v47 }
 0x895   :  { %7523 = vmatpush1.bf16.msra.mxu1 %v7491_v19 }
 0x92b   :  { %v7202_v56 = vpop.f32.mrb[92].mxu1 }
 0x92c   :  { %v17861_v10 = vadd.f32 %v7202_v56, %v17741_v37  ;;  %v7204_v0 = vpop.f32.mrb[93].mxu1 }
 0x92d   :  { %v17864_v26 = vadd.f32 %v7204_v0, %v17744_v61  ;;  %v7206_v30 = vpop.f32.mrb[94].mxu1 }
 0x92e   :  { %v7207_v18 = vpop.f32.mrb[95].mxu1 }
 0x933   :  { %v7281_v51 = vpop.f32.mrb[96].mxu1 }
 0x934   :  { %v7283_v8 = vpop.f32.mrb[97].mxu1 }
 0x935   :  { %v7285_v6 = vpop.f32.mrb[98].mxu1 }
 0x936   :  { %v7308_v50 = vpack.c.bf16 %v7285_v6, %v7281_v51  ;;  %v7287_v60 = vpop.f32.mrb[99].mxu1 }
 0x937   :  { %v7309_v55 = vpack.c.bf16 %v7287_v60, %v7283_v8 }
 0x939   :  { %11627 = vmatprep.mubr.msk.bf16.mxu1 %vm6231_vm5, %v7309_v55 }
 0x93a   :  { %7529 = vmatmul.mubr.bf16.vlgmr.msra.gmra.mrb[48].mxu1 %v7308_v50 }
 0x93b   :  { %v7291_v1 = vpop.f32.mrb[100].mxu1 }
 0x93c   :  { %v7293_v35 = vpop.f32.mrb[101].mxu1 }
 0x93d   :  { %v7295_v3 = vpop.f32.mrb[102].mxu1 }
 0x93e   :  { %v7310_v37 = vpack.c.bf16 %v7295_v3, %v7291_v1  ;;  %v7297_v44 = vpop.f32.mrb[103].mxu1 }
 0x93f   :  { %v7311_v39 = vpack.c.bf16 %v7297_v44, %v7293_v35 }
 0x941   :  { %11628 = vmatprep.mubr.msk.bf16.mxu1 %vm6231_vm5, %v7311_v39 }
 0x942   :  { %7539 = vmatmul.mubr.bf16.gmra.mrb[52].mxu1 %v7310_v37 }
 0x943   :  { %v7301_v61 = vpop.f32.mrb[104].mxu1 }
 0x944   :  { %v7303_v27 = vpop.f32.mrb[105].mxu1  ;;  %v7312_v23 = vpack.c.bf16 %v7301_v61, %v7301_v61 }
 0x945   :  { %v7313_v32 = vpack.c.bf16 %v7303_v27, %v7303_v27  ;;  %v7305_v42 = vpop.f32.mrb[106].mxu1 }
 0x946   :  { %v7306_v40 = vpop.f32.mrb[107].mxu1 }
 0x947   :  { %11629 = vmatprep.mubr.msk.bf16.mxu1 %vm6231_vm5, %v7313_v32 }
 0x94a   :  { %7549 = vmatmul.mubr.bf16.gmra.mrb[108].mxu1 %v7312_v23 }
 0x94b   :  { %7719 = vmatprep.mubr.bf16.mxu1 %v19039_v25 }
 0xa0d   :  { %v7530_v16 = vpop.f32.mrb[48].mxu1 }
 0xa0e   :  { %v7587_v29 = vadd.f32 %v7582_v57, %v7530_v16  ;;  %v7532_v48 = vpop.f32.mrb[49].mxu1 }
 0xa0f   :  { %v7588_v12 = vadd.f32 %v7586_v31, %v7532_v48  ;;  %v7534_v28 = vpop.f32.mrb[50].mxu1 }
 0xa10   :  { %v7597_v41 = vmax.f32 %v7587_v29, 0.0  ;;  %v7589_v9 = vadd.f32 %v7582_v57, %v7534_v28  ;;  %v7536_v63 = vpop.f32.mrb[51].mxu1 }
 0xa11   :  { %v7598_v21 = vmax.f32 %v7588_v12, 0.0  ;;  %v7590_v17 = vadd.f32 %v7586_v31, %v7536_v63 }
 0xa12   :  { %v7625_v11 = vmul.f32 %v17880_v54, %v7597_v41  ;;  %v7599_v43 = vmax.f32 %v7589_v9, 0.0 }
 0xa13   :  { %v7626_v15 = vmul.f32 %v17884_v58, %v7598_v21  ;;  %v7600_v33 = vmax.f32 %v7590_v17, 0.0  ;;  %v13386_v17 = vld [vmem:[%s18965_s9 + $0xd0] ss:$8 sps:$4 sm:$0xff]  }
 0xa14   :  { %v7627_v38 = vmul.f32 %v17880_v54, %v7599_v43  ;;  %v7653_v47 = vadd.f32 %v7648_v53, %v7625_v11  ;;  %v13391_v11 = vld [vmem:[%s18965_s9 + $0xe4] ss:$8 sps:$4 sm:$0xff]   ;;  %v13394_v43 = vld [vmem:[%s18965_s9 + $0xf4] ss:$8 sps:$4 sm:$0xff]  }
 0xa15   :  { %v7628_v59 = vmul.f32 %v17884_v58, %v7600_v33  ;;  %v7540_v14 = vpop.f32.mrb[52].mxu1  ;;  %v7654_v0 = vadd.f32 %v7652_v13, %v7626_v15  ;;  %v13392_v15 = vld [vmem:[%s18965_s9 + $0xf0] ss:$8 sps:$4 sm:$0xff]  }
 0xa16   :  { %v7655_v5 = vadd.f32 %v7648_v53, %v7627_v38  ;;  %v7591_v19 = vadd.f32 %v7582_v57, %v7540_v14  ;;  %v7542_v56 = vpop.f32.mrb[53].mxu1  ;;  %v13385_v33 = vld [vmem:[%s18964_s8 + $0x10] sm:$0xff]   ;;  %v13395_v38 = vld [vmem:[%s18965_s9 + $0x100] ss:$8 sps:$4 sm:$0xff]  }
 0xa17   :  { %v7656_v30 = vadd.f32 %v7652_v13, %v7628_v59  ;;  %v7592_v18 = vadd.f32 %v7586_v31, %v7542_v56  ;;  %v7544_v51 = vpop.f32.mrb[54].mxu1  ;;  %v13400_v59 = vld [vmem:[%s18965_s9 + $0x114] ss:$8 sps:$4 sm:$0xff]   ;;  %v13398_v14 = vld [vmem:[%s18965_s9 + $0x110] ss:$8 sps:$4 sm:$0xff]  }
 0xa18   :  { %v7663_v8 = vpack.c.bf16 %v7655_v5, %v7653_v47  ;;  %v7601_v6 = vmax.f32 %v7591_v19, 0.0  ;;  %v7593_v50 = vadd.f32 %v7582_v57, %v7544_v51  ;;  %v7546_v60 = vpop.f32.mrb[55].mxu1  ;;  %v13403_v47 = vld [vmem:[%s18965_s9 + $0x124] ss:$8 sps:$4 sm:$0xff]   ;;  %v13401_v5 = vld [vmem:[%s18965_s9 + $0x120] ss:$8 sps:$4 sm:$0xff]  }
 0xa19   :  { %v7602_v55 = vmax.f32 %v7592_v18, 0.0  ;;  %v7594_v1 = vadd.f32 %v7586_v31, %v7546_v60  ;;  %v7664_v35 = vpack.c.bf16 %v7656_v30, %v7654_v0  ;;  %v13406_v19 = vld [vmem:[%s18965_s9 + $0x134] ss:$8 sps:$4 sm:$0xff]   ;;  %v13404_v56 = vld [vmem:[%s18965_s9 + $0x130] ss:$8 sps:$4 sm:$0xff]  }
 0xa1a   :  { %v7629_v3 = vmul.f32 %v17880_v54, %v7601_v6  ;;  %v7603_v37 = vmax.f32 %v7593_v50, 0.0  ;;  %v13409_v0 = vld [vmem:[%s18965_s9 + $0x144] ss:$8 sps:$4 sm:$0xff]   ;;  %v13407_v30 = vld [vmem:[%s18965_s9 + $0x140] ss:$8 sps:$4 sm:$0xff]  }
 0xa1b   :  { %v7630_v44 = vmul.f32 %v17884_v58, %v7602_v55  ;;  %v7604_v39 = vmax.f32 %v7594_v1, 0.0  ;;  %7687 = vmatprep.subr.bf16.mxu1 %v7664_v35  ;;  %7769 = vmatprep.subr.bf16.mxu0 %v7664_v35  ;;  %v13412_v18 = vld [vmem:[%s18965_s9 + $0x154] ss:$8 sps:$4 sm:$0xff]   ;;  %v13410_v51 = vld [vmem:[%s18965_s9 + $0x150] ss:$8 sps:$4 sm:$0xff]  }
 0xa1c   :  { %v7631_v61 = vmul.f32 %v17880_v54, %v7603_v37  ;;  %7688 = vmatpush1.bf16.msra.mxu1 %v7663_v8  ;;  %7770 = vmatpush1.bf16.msra.mxu0 %v7663_v8  ;;  %v7657_v42 = vadd.f32 %v7648_v53, %v7629_v3  ;;  %v13413_v6 = vld [vmem:[%s18965_s9 + $0x160] ss:$8 sps:$4 sm:$0xff]   ;;  %v13418_v50 = vld [vmem:[%s18965_s9 + $0x174] ss:$8 sps:$4 sm:$0xff]   ;;  %v13416_v60 = vld [vmem:[%s18965_s9 + $0x170] ss:$8 sps:$4 sm:$0xff]  }
 0xa1d   :  { %v7632_v27 = vmul.f32 %v17884_v58, %v7604_v39  ;;  %v7550_v32 = vpop.f32.mrb[108].mxu1  ;;  %v7658_v2 = vadd.f32 %v7652_v13, %v7630_v44  ;;  %v13421_v55 = vld [vmem:[%s18965_s9 + $0x184] ss:$8 sps:$4 sm:$0xff]   ;;  %v13419_v1 = vld [vmem:[%s18965_s9 + $0x180] ss:$8 sps:$4 sm:$0xff]  }
 0xa1e   :  { %v7659_v40 = vadd.f32 %v7648_v53, %v7631_v61  ;;  %v7565_v23 = vadd.f32 %v7550_v32, %v17861_v10  ;;  %v7552_v24 = vpop.f32.mrb[109].mxu1  ;;  %v13424_v3 = vld [vmem:[%s18965_s9 + $0x190] ss:$8 sps:$4 sm:$0x3f]   ;;  %v13427_v44 = vld [vmem:[%s18965_s9 + $0x4] ss:$8 sps:$4 sm:$0xff]  }
 0xa1f   :  { %v7660_v46 = vadd.f32 %v7652_v13, %v7632_v27  ;;  %v7566_v36 = vadd.f32 %v7552_v24, %v17864_v26  ;;  %v7554_v45 = vpop.f32.mrb[110].mxu1  ;;  %v7975_v37 = vsel %vm7973_vm8, %v13424_v3, 0  ;;  %v8544_v39 = vld [vmem:[%s18968_s12] sm:$0x3]  ;;  %v13710_v61 = vmov 0.0   ;;  %v18027_v24 = vld [vmem:[%s18967_s11 + $0x10] sm:$0xff]  }
 0xa20   :  { %v7665_v16 = vpack.c.bf16 %v7659_v40, %v7657_v42  ;;  %v7595_v29 = vadd.f32 %v7582_v57, %v7565_v23  ;;  %v7555_v4 = vpop.f32.mrb[111].mxu1  ;;  %v13388_v57 = vld [vmem:[%s18965_s9 + $0xd4] ss:$8 sps:$4 sm:$0xff]   ;;  %v8551_v27 = vsel %vm8549_vm9, %v8544_v39, 0  ;;  %v8542_v32 = vld [vmem:[%s19204_s20] sm:$0x3] }
 0xa21   :  { %v7596_v48 = vadd.f32 %v7586_v31, %v7566_v36  ;;  %v7666_v12 = vpack.c.bf16 %v7660_v46, %v7658_v2  ;;  %v8543_v42 = vpack.c.bf16 %v8542_v32, %v8542_v32  ;;  %v18013_v40 = vld [vmem:[%s18967_s11] sm:$0xff]   ;;  %v18020_v23 = vld [vmem:[%s18967_s11 + $0x8] sm:$0xff]   ;;  %v18034_v2 = vld [vmem:[%s18967_s11 + $0x18] sm:$0xff]  }
 0xa22   :  { %v7605_v20 = vmax.f32 %v7595_v29, 0.0  ;;  %v18043_v29 = vld [vmem:[%s18967_s11 + $0x20] sm:$0xff]   ;;  %v13458_v3 = vld [vmem:[%s18965_s9 + $0xb0] ss:$8 sps:$4 sm:$0xff]  }
 0xa23   :  { %v7606_v28 = vmax.f32 %v7596_v48, 0.0  ;;  %7689 = vmatprep.subr.bf16.mxu1 %v7666_v12  ;;  %7771 = vmatprep.subr.bf16.mxu0 %v7666_v12  ;;  %v13464_v32 = vld [vmem:[%s18965_s9 + $0x1a0] ss:$8 sps:$4 sm:$0xff]  }
 0xa24   :  { %v7633_v41 = vmul.f32 %v17880_v54, %v7605_v20  ;;  %7690 = vmatpush1.bf16.msra.mxu1 %v7665_v16  ;;  %7772 = vmatpush1.bf16.msra.mxu0 %v7665_v16  ;;  %v13383_v54 = vld [vmem:[%s18964_s8 + $0x8] sm:$0xff]  }
 0xa25   :  { %v7634_v10 = vmul.f32 %v17884_v58, %v7606_v28  ;;  %v13384_v58 = vld [vmem:[%s18964_s8] sm:$0xff]   ;;  %s13712_s8 = smov [#allocation2]  }
 0xa26   :  { %v7661_v9 = vadd.f32 %v7648_v53, %v7633_v41  ;;  %v13389_v53 = vld [vmem:[%s18965_s9 + $0xe0] ss:$8 sps:$4 sm:$0xff]   ;;  %s10395_s23 = sshll.u32 %s13712_s8, 4  ;;  %s10396_s23 = int_to_ptr.vmem [resolvable:$true] %s10395_s23 }
 0xa27   :  { %v7662_v63 = vadd.f32 %v7652_v13, %v7634_v10  ;;  %v13397_v13 = vld [vmem:[%s18965_s9 + $0x104] ss:$8 sps:$4 sm:$0xff]   ;;  %p13690_p1 = scmp.lt.s32.totalorder %s10396_s23, %s10396_s23 }
 0xa28   :  { %v7667_v26 = vpack.c.bf16 %v7661_v9, %v7661_v9  ;;  %v13425_v9 = vld [vmem:[%s18965_s9] ss:$8 sps:$4 sm:$0xff]  }
 0xa29   :  { %v7668_v21 = vpack.c.bf16 %v7662_v63, %v7662_v63 }
 0xa2a   :  { %v7682_v31 = vsel %vm7680_vm6, %v7667_v26, 0  ;;  %v13430_v26 = vld [vmem:[%s18965_s9 + $0x14] ss:$8 sps:$4 sm:$0xff]  }
 0xa2b   :  { %11631 = vmatprep.subr.msk.bf16.mxu1 %vm7680_vm6, %v7668_v21  ;;  %11636 = vmatprep.subr.msk.bf16.mxu0 %vm7680_vm6, %v7668_v21 }
 0xa2c   :  { %7692 = vmatpush1.bf16.msra.mxu1 %v7682_v31  ;;  %7774 = vmatpush1.bf16.msra.mxu0 %v7682_v31 }
 0xa2d   :  { %8214 = vmatprep.subr.bf16.mxu1 %v7664_v35  ;;  %7980 = vmatprep.subr.bf16.mxu0 %v13388_v57  ;;  %v13422_v35 = vld [vmem:[%s18965_s9 + $0x194] ss:$8 sps:$4 sm:$0x3f]   ;;  %v13428_v57 = vld [vmem:[%s18965_s9 + $0x10] ss:$8 sps:$4 sm:$0xff]  }
 0xa2f   :  { %11637 = vmatmul.mubr.msk.bf16.vlgmr.msra.gmra.mrb[60].mxu0 %vm7676_vm7, %v13383_v54  ;;  %11632 = vmatmul.mubr.msk.bf16.vlgmr.msra.gmra.mrb[112].mxu1 %vm7676_vm7, %v13384_v58  ;;  %v18075_v54 = vld [vmem:[%s18967_s11 + $0x30] sm:$0xff]   ;;  %v13431_v58 = vld [vmem:[%s18965_s9 + $0x20] ss:$8 sps:$4 sm:$0xff]  }
 0xa30   :  { %8215 = vmatpush1.bf16.msra.mxu1 %v7663_v8  ;;  %8246 = vmatprep.mubr.bf16.mxu1 %v19039_v25  ;;  %v13415_v8 = vld [vmem:[%s18965_s9 + $0x164] ss:$8 sps:$4 sm:$0xff]  }
 0xa31   :  { %8216 = vmatprep.subr.bf16.mxu1 %v7666_v12  ;;  %7981 = vmatpush1.bf16.msra.mxu0 %v13386_v17 }
 0xa32   :  { %7982 = vmatprep.subr.bf16.mxu0 %v13391_v11  ;;  %v13436_v11 = vld [vmem:[%s18965_s9 + $0x34] ss:$8 sps:$4 sm:$0xff]  }
 0xa34   :  { %8217 = vmatpush1.bf16.msra.mxu1 %v7665_v16 }
 0xa35   :  { %11723 = vmatprep.subr.msk.bf16.mxu1 %vm7680_vm6, %v7668_v21  ;;  %7983 = vmatpush1.bf16.msra.mxu0 %v13389_v53  ;;  %v18060_v21 = vld [vmem:[%s18967_s11 + $0x28] sm:$0xff]  }
 0xa36   :  { %7984 = vmatprep.subr.bf16.mxu0 %v13394_v43  ;;  %v18090_v43 = vld [vmem:[%s18967_s11 + $0x38] sm:$0xff]  }
 0xa38   :  { %8219 = vmatpush1.bf16.msra.mxu1 %v7682_v31  ;;  %v13433_v31 = vld [vmem:[%s18965_s9 + $0x24] ss:$8 sps:$4 sm:$0xff]  }
 0xa39   :  { %7985 = vmatpush1.bf16.msra.mxu0 %v13392_v15  ;;  %12099 = vmatprep.subr.bf16.mxu1 %v13710_v61 }
 0xa3a   :  { %7986 = vmatprep.subr.bf16.mxu0 %v13397_v13 }
 0xa3b   :  { %11724 = vmatmul.mubr.msk.bf16.vlgmr.msra.gmra.mrb[116].mxu1 %vm7676_vm7, %v13385_v33 }
 0xa3c   :  { %12101 = vmatprep.mubr.msk.bf16.mxu1 %vm13711_vm10, %v13710_v61  ;;  %12100 = vmatpush3.bf16.msra.mxu1 %v8551_v27  ;;  %v13466_v27 = vld [vmem:[%s18965_s9 + $0x1a4] ss:$8 sps:$4 sm:$0xff]  }
 0xa3d   :  { %7987 = vmatpush1.bf16.msra.mxu0 %v13395_v38  ;;  %8694 = vmatprep.subr.bf16.mxu1 %v19039_v25  ;;  %v13434_v38 = vld [vmem:[%s18965_s9 + $0x30] ss:$8 sps:$4 sm:$0xff]  }
 0xa3e   :  { %7988 = vmatprep.subr.bf16.mxu0 %v13400_v59 }
 0xa41   :  { %7989 = vmatpush1.bf16.msra.mxu0 %v13398_v14  ;;  %v13439_v14 = vld [vmem:[%s18965_s9 + $0x44] ss:$8 sps:$4 sm:$0xff]  }
 0xa42   :  { %7990 = vmatprep.subr.bf16.mxu0 %v13403_v47  ;;  %v18107_v47 = vld [vmem:[%s18967_s11 + $0x40] sm:$0xff]  }
 0xa43   :  { %12102 = vmatmul.mubr.msk.bf16.vlgmr.msra.gmra.mrb[120].mxu1 %vm8545_vm11, %v8543_v42  ;;  %v13469_v42 = vld [vmem:[%s18965_s9 + $0x1b4] ss:$8 sps:$4 sm:$0xff]  }
 0xa44   :  { %8695 = vmatpush1.bf16.msra.mxu1 %v18013_v40 }
 0xa45   :  { %7991 = vmatpush1.bf16.msra.mxu0 %v13401_v5  ;;  %8696 = vmatprep.subr.bf16.mxu1 %v19039_v25  ;;  %v13437_v5 = vld [vmem:[%s18965_s9 + $0x40] ss:$8 sps:$4 sm:$0xff]  }
 0xa46   :  { %7992 = vmatprep.subr.bf16.mxu0 %v13406_v19  ;;  %v13442_v19 = vld [vmem:[%s18965_s9 + $0x54] ss:$8 sps:$4 sm:$0xff]  }
 0xa48   :  { %8697 = vmatpush1.bf16.msra.mxu1 %v18020_v23 }
 0xa49   :  { %7993 = vmatpush1.bf16.msra.mxu0 %v13404_v56  ;;  %8698 = vmatprep.subr.bf16.mxu1 %v19039_v25  ;;  %v13440_v56 = vld [vmem:[%s18965_s9 + $0x50] ss:$8 sps:$4 sm:$0xff]  }
 0xa4a   :  { %7994 = vmatprep.subr.bf16.mxu0 %v13409_v0  ;;  %v13445_v0 = vld [vmem:[%s18965_s9 + $0x64] ss:$8 sps:$4 sm:$0xff]  }
 0xa4c   :  { %8699 = vmatpush1.bf16.msra.mxu1 %v18027_v24 }
 0xa4d   :  { %7995 = vmatpush1.bf16.msra.mxu0 %v13407_v30  ;;  %8700 = vmatprep.subr.bf16.mxu1 %v19039_v25  ;;  %v13443_v30 = vld [vmem:[%s18965_s9 + $0x60] ss:$8 sps:$4 sm:$0xff]  }
 0xa4e   :  { %7996 = vmatprep.subr.bf16.mxu0 %v13412_v18  ;;  %v13448_v18 = vld [vmem:[%s18965_s9 + $0x74] ss:$8 sps:$4 sm:$0xff]  }
 0xa50   :  { %8701 = vmatpush1.bf16.msra.mxu1 %v18034_v2 }
 0xa51   :  { %7997 = vmatpush1.bf16.msra.mxu0 %v13410_v51  ;;  %8702 = vmatprep.subr.bf16.mxu1 %v19039_v25  ;;  %v13446_v51 = vld [vmem:[%s18965_s9 + $0x70] ss:$8 sps:$4 sm:$0xff]  }
 0xa52   :  { %7998 = vmatprep.subr.bf16.mxu0 %v13415_v8  ;;  %v13451_v8 = vld [vmem:[%s18965_s9 + $0x84] ss:$8 sps:$4 sm:$0xff]  }
 0xa54   :  { %8703 = vmatpush1.bf16.msra.mxu1 %v18043_v29 }
 0xa55   :  { %7999 = vmatpush1.bf16.msra.mxu0 %v13413_v6  ;;  %8704 = vmatprep.subr.bf16.mxu1 %v19039_v25  ;;  %v13449_v6 = vld [vmem:[%s18965_s9 + $0x80] ss:$8 sps:$4 sm:$0xff]  }
 0xa56   :  { %8000 = vmatprep.subr.bf16.mxu0 %v13418_v50  ;;  %v13454_v50 = vld [vmem:[%s18965_s9 + $0x94] ss:$8 sps:$4 sm:$0xff]  }
 0xa58   :  { %8705 = vmatpush1.bf16.msra.mxu1 %v18060_v21 }
 0xa59   :  { %8001 = vmatpush1.bf16.msra.mxu0 %v13416_v60  ;;  %8706 = vmatprep.subr.bf16.mxu1 %v19039_v25  ;;  %v13452_v60 = vld [vmem:[%s18965_s9 + $0x90] ss:$8 sps:$4 sm:$0xff]  }
 0xa5a   :  { %8002 = vmatprep.subr.bf16.mxu0 %v13421_v55  ;;  %v13457_v55 = vld [vmem:[%s18965_s9 + $0xa4] ss:$8 sps:$4 sm:$0xff]  }
 0xa5c   :  { %8707 = vmatpush1.bf16.msra.mxu1 %v18075_v54 }
 0xa5d   :  { %8003 = vmatpush1.bf16.msra.mxu0 %v13419_v1  ;;  %8708 = vmatprep.subr.bf16.mxu1 %v19039_v25  ;;  %v13455_v1 = vld [vmem:[%s18965_s9 + $0xa0] ss:$8 sps:$4 sm:$0xff]  }
 0xa5e   :  { %11690 = vmatprep.subr.msk.bf16.mxu0 %vm7973_vm8, %v13422_v35  ;;  %v13460_v35 = vld [vmem:[%s18965_s9 + $0xb4] ss:$8 sps:$4 sm:$0xff]  }
 0xa60   :  { %8709 = vmatpush1.bf16.msra.mxu1 %v18090_v43 }
 0xa61   :  { %8005 = vmatpush1.bf16.msra.mxu0 %v7975_v37  ;;  %8710 = vmatprep.subr.bf16.mxu1 %v19039_v25  ;;  %v13461_v37 = vld [vmem:[%s18965_s9 + $0xc4] ss:$8 sps:$4 sm:$0x3f]  }
 0xa62   :  { %8160 = vmatprep.subr.bf16.mxu0 %v13427_v44  ;;  %v13463_v44 = vld [vmem:[%s18965_s9 + $0xc0] ss:$8 sps:$4 sm:$0x3f]  }
 0xa63   :  { %v8155_v39 = vsel %vm7973_vm8, %v13463_v44, 0 }
 0xa64   :  { %8711 = vmatpush1.bf16.msra.mxu1 %v18107_v47 }
 0xa65   :  { %8712 = vmatprep.subr.bf16.mxu1 %v19039_v25 }
 0xb02   :  { %v7803_v46 = vpop.f32.mrb[60].mxu0  ;;  %v18037_v36 = vpop.f32.mrb[112].mxu1 }
 0xb03   :  { %v7805_v45 = vpop.f32.mrb[61].mxu0  ;;  %v7723_v16 = vpop.f32.mrb[113].mxu1 }
 0xb04   :  { %v7807_v4 = vpop.f32.mrb[62].mxu0  ;;  %v18045_v48 = vpop.f32.mrb[114].mxu1 }
 0xb05   :  { %v7812_v12 = vpack.c.bf16 %v7807_v4, %v7803_v46  ;;  %v7809_v20 = vpop.f32.mrb[63].mxu0  ;;  %v7730_v28 = vpack.c.bf16 %v18045_v48, %v18037_v36  ;;  %v7727_v41 = vpop.f32.mrb[115].mxu1  ;;  %v13467_v46 = vld [vmem:[%s18965_s9 + $0x1b0] ss:$8 sps:$4 sm:$0xff]   ;;  %v13475_v36 = vld [vmem:[%s18965_s9 + $0x1d4] ss:$8 sps:$4 sm:$0xff]  }
 0xb06   :  { %v7813_v10 = vpack.c.bf16 %v7809_v20, %v7805_v45  ;;  %v7731_v63 = vpack.c.bf16 %v7727_v41, %v7723_v16  ;;  %v13472_v45 = vld [vmem:[%s18965_s9 + $0x1c4] ss:$8 sps:$4 sm:$0xff]   ;;  %v13470_v16 = vld [vmem:[%s18965_s9 + $0x1c0] ss:$8 sps:$4 sm:$0xff]   ;;  %v13473_v4 = vld [vmem:[%s18965_s9 + $0x1d0] ss:$8 sps:$4 sm:$0xff]  }
 0xb07   :  { %v13478_v48 = vld [vmem:[%s18965_s9 + $0x1e4] ss:$8 sps:$4 sm:$0xff]   ;;  %v13481_v20 = vld [vmem:[%s18965_s9 + $0x1f4] ss:$8 sps:$4 sm:$0xff]  }
 0xb08   :  { %11691 = vmatprep.mubr.msk.bf16.mxu0 %vm7969_vm12, %v7813_v10  ;;  %v13484_v41 = vld [vmem:[%s18965_s9 + $0x204] ss:$8 sps:$4 sm:$0xff]   ;;  %v13482_v10 = vld [vmem:[%s18965_s9 + $0x200] ss:$8 sps:$4 sm:$0xff]  }
 0xb09   :  { %8013 = vmatmul.mubr.bf16.vlgmr.msra.gmra.mrb[64].mxu0 %v7812_v12  ;;  %v13476_v12 = vld [vmem:[%s18965_s9 + $0x1e0] ss:$8 sps:$4 sm:$0xff]  }
 0xb0a   :  { %8161 = vmatpush1.bf16.msra.mxu0 %v13425_v9  ;;  %11719 = vmatprep.mubr.msk.bf16.mxu0 %vm7969_vm12, %v7731_v63  ;;  %v13487_v9 = vld [vmem:[%s18965_s9 + $0x214] ss:$8 sps:$4 sm:$0xff]   ;;  %v13485_v63 = vld [vmem:[%s18965_s9 + $0x210] ss:$8 sps:$4 sm:$0xff]  }
 0xb0b   :  { %8162 = vmatprep.subr.bf16.mxu0 %v13430_v26  ;;  %v13490_v26 = vld [vmem:[%s18965_s9 + $0x224] ss:$8 sps:$4 sm:$0xff]  }
 0xb0e   :  { %8163 = vmatpush1.bf16.msra.mxu0 %v13428_v57  ;;  %v18081_v17 = vpop.f32.mrb[116].mxu1  ;;  %v13488_v57 = vld [vmem:[%s18965_s9 + $0x220] ss:$8 sps:$4 sm:$0xff]  }
 0xb0f   :  { %8164 = vmatprep.subr.bf16.mxu0 %v13433_v31  ;;  %v8250_v53 = vpop.f32.mrb[117].mxu1  ;;  %v13493_v31 = vld [vmem:[%s18965_s9 + $0x234] ss:$8 sps:$4 sm:$0xff]  }
 0xb10   :  { %v18092_v15 = vpop.f32.mrb[118].mxu1 }
 0xb11   :  { %v8257_v13 = vpack.c.bf16 %v18092_v15, %v18081_v17  ;;  %v8254_v33 = vpop.f32.mrb[119].mxu1 }
 0xb12   :  { %8165 = vmatpush1.bf16.msra.mxu0 %v13431_v58  ;;  %v8258_v59 = vpack.c.bf16 %v8254_v33, %v8250_v53  ;;  %v13491_v58 = vld [vmem:[%s18965_s9 + $0x230] ss:$8 sps:$4 sm:$0xff]   ;;  %v13494_v53 = vld [vmem:[%s18965_s9 + $0x240] ss:$8 sps:$4 sm:$0xff]   ;;  %v13499_v33 = vld [vmem:[%s18965_s9 + $0x254] ss:$8 sps:$4 sm:$0xff]  }
 0xb13   :  { %8166 = vmatprep.subr.bf16.mxu0 %v13436_v11  ;;  %v13496_v11 = vld [vmem:[%s18965_s9 + $0x244] ss:$8 sps:$4 sm:$0xff]  }
 0xb16   :  { %8167 = vmatpush1.bf16.msra.mxu0 %v13434_v38  ;;  %v13497_v38 = vld [vmem:[%s18965_s9 + $0x250] ss:$8 sps:$4 sm:$0xff]  }
 0xb17   :  { %8168 = vmatprep.subr.bf16.mxu0 %v13439_v14  ;;  %v13502_v14 = vld [vmem:[%s18965_s9 + $0x260] ss:$8 sps:$4 sm:$0x3f]  }
 0xb1a   :  { %8169 = vmatpush1.bf16.msra.mxu0 %v13437_v5  ;;  %v8418_v5 = vsel %vm7973_vm8, %v13502_v14, 0 }
 0xb1b   :  { %8170 = vmatprep.subr.bf16.mxu0 %v13442_v19 }
 0xb1e   :  { %8171 = vmatpush1.bf16.msra.mxu0 %v13440_v56 }
 0xb1f   :  { %8172 = vmatprep.subr.bf16.mxu0 %v13445_v0 }
 0xb22   :  { %8173 = vmatpush1.bf16.msra.mxu0 %v13443_v30 }
 0xb23   :  { %8174 = vmatprep.subr.bf16.mxu0 %v13448_v18 }
 0xb26   :  { %8175 = vmatpush1.bf16.msra.mxu0 %v13446_v51 }
 0xb27   :  { %8176 = vmatprep.subr.bf16.mxu0 %v13451_v8 }
 0xb2a   :  { %8177 = vmatpush1.bf16.msra.mxu0 %v13449_v6 }
 0xb2b   :  { %8178 = vmatprep.subr.bf16.mxu0 %v13454_v50 }
 0xb2e   :  { %8179 = vmatpush1.bf16.msra.mxu0 %v13452_v60 }
 0xb2f   :  { %8180 = vmatprep.subr.bf16.mxu0 %v13457_v55 }
 0xb32   :  { %8181 = vmatpush1.bf16.msra.mxu0 %v13455_v1 }
 0xb33   :  { %8182 = vmatprep.subr.bf16.mxu0 %v13460_v35 }
 0xb36   :  { %8183 = vmatpush1.bf16.msra.mxu0 %v13458_v3 }
 0xb37   :  { %11718 = vmatprep.subr.msk.bf16.mxu0 %vm7973_vm8, %v13461_v37 }
 0xb3a   :  { %8185 = vmatpush1.bf16.msra.mxu0 %v8155_v39 }
 0xb3b   :  { %8423 = vmatprep.subr.bf16.mxu0 %v13466_v27 }
 0xb3d   :  { %8193 = vmatmul.mubr.bf16.vlgmr.msra.gmra.mrb[64].mxu0 %v7730_v28  ;;  %v13479_v28 = vld [vmem:[%s18965_s9 + $0x1f0] ss:$8 sps:$4 sm:$0xff]  }
 0xb3e   :  { %8424 = vmatpush1.bf16.msra.mxu0 %v13464_v32  ;;  %11778 = vmatprep.mubr.msk.bf16.mxu0 %vm7969_vm12, %v8258_v59  ;;  %v13500_v59 = vld [vmem:[%s18965_s9 + $0x264] ss:$8 sps:$4 sm:$0x3f]  }
 0xb3f   :  { %8425 = vmatprep.subr.bf16.mxu0 %v13469_v42 }
 0xb42   :  { %8426 = vmatpush1.bf16.msra.mxu0 %v13467_v46  ;;  %v13515_v46 = vld [vmem:[%s18967_s11 + $0x60] sm:$0xff]  }
 0xb43   :  { %8427 = vmatprep.subr.bf16.mxu0 %v13472_v45 }
 0xb46   :  { %8428 = vmatpush1.bf16.msra.mxu0 %v13470_v16 }
 0xb47   :  { %8429 = vmatprep.subr.bf16.mxu0 %v13475_v36 }
 0xb4a   :  { %8430 = vmatpush1.bf16.msra.mxu0 %v13473_v4 }
 0xb4b   :  { %8431 = vmatprep.subr.bf16.mxu0 %v13478_v48  ;;  %v13516_v48 = vld [vmem:[%s18967_s11 + $0x68] sm:$0xff]  }
 0xb4e   :  { %8432 = vmatpush1.bf16.msra.mxu0 %v13476_v12  ;;  %v13517_v12 = vld [vmem:[%s18967_s11 + $0x70] sm:$0xff]  }
 0xb4f   :  { %8433 = vmatprep.subr.bf16.mxu0 %v13481_v20  ;;  %v13518_v20 = vld [vmem:[%s18967_s11 + $0x78] sm:$0xff]  }
 0xb52   :  { %8434 = vmatpush1.bf16.msra.mxu0 %v13479_v28  ;;  %v13519_v28 = vld [vmem:[%s18967_s11 + $0x80] sm:$0xff]  }
 0xb53   :  { %8435 = vmatprep.subr.bf16.mxu0 %v13484_v41  ;;  %v13520_v41 = vld [vmem:[%s18967_s11 + $0x88] sm:$0xff]  }
 0xb56   :  { %8436 = vmatpush1.bf16.msra.mxu0 %v13482_v10  ;;  %v13521_v10 = vld [vmem:[%s18967_s11 + $0x90] sm:$0xff]  }
 0xb57   :  { %8437 = vmatprep.subr.bf16.mxu0 %v13487_v9  ;;  %v13522_v9 = vld [vmem:[%s18967_s11 + $0x98] sm:$0xff]  }
 0xb5a   :  { %8438 = vmatpush1.bf16.msra.mxu0 %v13485_v63  ;;  %v13523_v63 = vld [vmem:[%s18967_s11 + $0xa0] sm:$0xff]  }
 0xb5b   :  { %8439 = vmatprep.subr.bf16.mxu0 %v13490_v26  ;;  %v13524_v26 = vld [vmem:[%s18967_s11 + $0xa8] sm:$0xff]  }
 0xb5e   :  { %8440 = vmatpush1.bf16.msra.mxu0 %v13488_v57  ;;  %v18372_v57 = vpop.f32.mrb[120].mxu1 }
 0xb5f   :  { %8441 = vmatprep.subr.bf16.mxu0 %v13493_v31  ;;  %v12103_v31 = vpop.f32.mrb[121].mxu1 }
 0xb62   :  { %8442 = vmatpush1.bf16.msra.mxu0 %v13491_v58  ;;  %v8590_v58 = vpop.f32.mrb[122].mxu1 }
 0xb63   :  { %8443 = vmatprep.subr.bf16.mxu0 %v13496_v11  ;;  %v13525_v11 = vld [vmem:[%s18967_s11 + $0xb0] sm:$0xff]  }
 0xb66   :  { %8444 = vmatpush1.bf16.msra.mxu0 %v13494_v53  ;;  %v12104_v53 = vpop.f32.mrb[123].mxu1 }
 0xb67   :  { %8445 = vmatprep.subr.bf16.mxu0 %v13499_v33  ;;  %v13526_v33 = vld [vmem:[%s18967_s11 + $0xb8] sm:$0xff]  }
 0xb6a   :  { %8446 = vmatpush1.bf16.msra.mxu0 %v13497_v38  ;;  %v13527_v38 = vld [vmem:[%s18967_s11 + $0xc0] sm:$0xff]  }
 0xb6b   :  { %11777 = vmatprep.subr.msk.bf16.mxu0 %vm7973_vm8, %v13500_v59 }
 0xb6e   :  { %8448 = vmatpush1.bf16.msra.mxu0 %v8418_v5 }
 0xb6f   :  { %9753 = vmatprep.subr.bf16.mxu0 %v19039_v25 }
 0xb71   :  { %8456 = vmatmul.mubr.bf16.vlgmr.msra.gmra.mrb[64].mxu0 %v8257_v13 }
 0xb72   :  { %9754 = vmatpush1.bf16.msra.mxu0 %v18013_v40  ;;  %v13512_v40 = vld [vmem:[%s18967_s11 + $0x48] sm:$0xff]  }
 0xb73   :  { %9755 = vmatprep.subr.bf16.mxu0 %v19039_v25  ;;  %8713 = vmatpush1.bf16.msra.mxu1 %v13512_v40 }
 0xb74   :  { %8714 = vmatprep.subr.bf16.mxu1 %v19039_v25 }
 0xb76   :  { %9756 = vmatpush1.bf16.msra.mxu0 %v18020_v23  ;;  %v13513_v23 = vld [vmem:[%s18967_s11 + $0x50] sm:$0xff]  }
 0xb77   :  { %9757 = vmatprep.subr.bf16.mxu0 %v19039_v25  ;;  %8715 = vmatpush1.bf16.msra.mxu1 %v13513_v23 }
 0xb78   :  { %8716 = vmatprep.subr.bf16.mxu1 %v19039_v25 }
 0xb7a   :  { %9758 = vmatpush1.bf16.msra.mxu0 %v18027_v24  ;;  %v13514_v24 = vld [vmem:[%s18967_s11 + $0x58] sm:$0xff]  }
 0xb7b   :  { %9759 = vmatprep.subr.bf16.mxu0 %v19039_v25  ;;  %8717 = vmatpush1.bf16.msra.mxu1 %v13514_v24 }
 0xb7c   :  { %8841 = vmatprep.subr.bf16.mxu1 %v19039_v25 }
 0xb7e   :  { %9760 = vmatpush1.bf16.msra.mxu0 %v18034_v2  ;;  %v8470_v2 = vld [vmem:[%s18966_s10] sm:$0x77] }
 0xb7f   :  { %9761 = vmatprep.subr.bf16.mxu0 %v19039_v25  ;;  %v8501_v17 = vrot.slane %v8470_v2, %v17132_v49  ;;  %v8505_v15 = vrot.slane %v8470_v2, %v17135_v52  ;;  %v8523_v13 = vrot.slane %v8470_v2, %v17141_v62  ;;  %v8527_v19 = vrot.slane %v8470_v2, %v17147_v22 }
 0xb81   :  { %v8511_v0 = vrot.slane %v8501_v17, %v17132_v49  ;;  %v8533_v6 = vrot.slane %v8523_v13, %v17141_v62  ;;  %v8537_v52 = vrot.slane %v8527_v19, %v17141_v62  ;;  %v13534_v17 = vld [vmem:[%s18967_s11 + $0xf8] sm:$0xff]   ;;  %v13537_v13 = vld [vmem:[%s18967_s11 + $0x110] sm:$0xff]   ;;  %v13539_v19 = vld [vmem:[%s18967_s11 + $0x120] sm:$0xff]  }
 0xb82   :  { %9762 = vmatpush1.bf16.msra.mxu0 %v18043_v29  ;;  %v8475_v29 = vrot.slane %v8470_v2, %v17124_v7 }
 0xb83   :  { %9763 = vmatprep.subr.bf16.mxu0 %v19039_v25 }
 0xb86   :  { %9764 = vmatpush1.bf16.msra.mxu0 %v18060_v21  ;;  %v8479_v21 = vrot.slane %v8470_v2, %v17129_v34  ;;  %v8515_v34 = vrot.slane %v8505_v15, %v17132_v49  ;;  %v13530_v2 = vld [vmem:[%s18967_s11 + $0xd8] sm:$0xff]   ;;  %v13536_v15 = vld [vmem:[%s18967_s11 + $0x108] sm:$0xff]  }
 0xb87   :  { %9765 = vmatprep.subr.bf16.mxu0 %v19039_v25 }
 0xb8a   :  { %9766 = vmatpush1.bf16.msra.mxu0 %v18075_v54  ;;  %v8485_v54 = vrot.slane %v8475_v29, %v17124_v7  ;;  %v13531_v29 = vld [vmem:[%s18967_s11 + $0xe0] sm:$0xff]  }
 0xb8b   :  { %9767 = vmatprep.subr.bf16.mxu0 %v19039_v25 }
 0xb8e   :  { %9768 = vmatpush1.bf16.msra.mxu0 %v18090_v43  ;;  %v8489_v43 = vrot.slane %v8479_v21, %v17124_v7  ;;  %v13532_v21 = vld [vmem:[%s18967_s11 + $0xe8] sm:$0xff]  }
 0xb8f   :  { %9769 = vmatprep.subr.bf16.mxu0 %v19039_v25 }
 0xb92   :  { %9770 = vmatpush1.bf16.msra.mxu0 %v18107_v47 }
 0xb93   :  { %9771 = vmatprep.subr.bf16.mxu0 %v19039_v25 }
 0xb96   :  { %9772 = vmatpush1.bf16.msra.mxu0 %v13512_v40  ;;  %v13528_v40 = vld [vmem:[%s18967_s11 + $0xc8] sm:$0xff]  }
 0xb97   :  { %9773 = vmatprep.subr.bf16.mxu0 %v19039_v25 }
 0xb9a   :  { %9774 = vmatpush1.bf16.msra.mxu0 %v13513_v23 }
 0xb9b   :  { %9775 = vmatprep.subr.bf16.mxu0 %v19039_v25 }
 0xb9e   :  { %9776 = vmatpush1.bf16.msra.mxu0 %v13514_v24  ;;  %v13529_v24 = vld [vmem:[%s18967_s11 + $0xd0] sm:$0xff]  }
 0xb9f   :  { %9806 = vmatprep.subr.bf16.mxu0 %v19039_v25 }
 0xc44   :  { %v8457_v47 = vpop.f32.mrb[64].mxu0 }
 0xc45   :  { %v8490_v56 = vadd.f32 %v8485_v54, %v8457_v47  ;;  %v8459_v30 = vpop.f32.mrb[65].mxu0  ;;  %v13538_v47 = vld [vmem:[%s18967_s11 + $0x118] sm:$0xff]  }
 0xc46   :  { %v8491_v18 = vadd.f32 %v8489_v43, %v8459_v30  ;;  %v8461_v51 = vpop.f32.mrb[66].mxu0 }
 0xc47   :  { %v8494_v8 = vmax.f32 %v8490_v56, 0.0  ;;  %v8492_v50 = vadd.f32 %v8485_v54, %v8461_v51  ;;  %v8463_v7 = vpop.f32.mrb[67].mxu0  ;;  %v13533_v54 = vld [vmem:[%s18967_s11 + $0xf0] sm:$0xff]  }
 0xc48   :  { %v8495_v60 = vmax.f32 %v8491_v18, 0.0  ;;  %v8493_v55 = vadd.f32 %v8489_v43, %v8463_v7  ;;  %v13535_v43 = vld [vmem:[%s18967_s11 + $0x100] sm:$0xff]   ;;  %v13540_v18 = vld [vmem:[%s18967_s11 + $0x128] sm:$0xff]   ;;  %v13541_v51 = vld [vmem:[%s18967_s11 + $0x130] sm:$0xff]  }
 0xc49   :  { %v8516_v1 = vmul.f32 %v8511_v0, %v8494_v8  ;;  %v8496_v35 = vmax.f32 %v8492_v50, 0.0  ;;  %v13542_v8 = vld [vmem:[%s18967_s11 + $0x138] sm:$0xff]   ;;  %v13544_v50 = vld [vmem:[%s18967_s11 + $0x148] sm:$0xff]   ;;  %v13545_v7 = vld [vmem:[%s18967_s11 + $0x150] sm:$0xff]  }
 0xc4a   :  { %v8517_v22 = vmul.f32 %v8515_v34, %v8495_v60  ;;  %v8497_v3 = vmax.f32 %v8493_v55, 0.0  ;;  %v13546_v60 = vld [vmem:[%s18967_s11 + $0x158] sm:$0xff]   ;;  %v13548_v55 = vld [vmem:[%s18967_s11 + $0x168] sm:$0xff]  }
 0xc4b   :  { %v8538_v37 = vadd.f32 %v8533_v6, %v8516_v1  ;;  %v8518_v44 = vmul.f32 %v8511_v0, %v8496_v35  ;;  %v13549_v1 = vld [vmem:[%s18967_s11 + $0x170] sm:$0xff]   ;;  %v13550_v35 = vld [vmem:[%s18967_s11 + $0x178] sm:$0xff]  }
 0xc4c   :  { %v8539_v39 = vadd.f32 %v8537_v52, %v8517_v22  ;;  %v8519_v27 = vmul.f32 %v8515_v34, %v8497_v3  ;;  %v13551_v22 = vld [vmem:[%s18967_s11 + $0x180] sm:$0xff]  }
 0xc4d   :  { %v8540_v49 = vadd.f32 %v8533_v6, %v8518_v44  ;;  %v18306_v45 = vpack.c.bf16 %v8538_v37, %v8538_v37  ;;  %v13543_v6 = vld [vmem:[%s18967_s11 + $0x140] sm:$0xff]  }
 0xc4e   :  { %v18301_v32 = vpack.c.bf16 %v8539_v39, %v8539_v39  ;;  %v8541_v42 = vadd.f32 %v8537_v52, %v8519_v27  ;;  %v13547_v52 = vld [vmem:[%s18967_s11 + $0x160] sm:$0xff]   ;;  %v13552_v39 = vld [vmem:[%s18967_s11 + $0x188] sm:$0xff]  }
 0xc4f   :  { %v18316_v36 = vpack.c.bf16 %v8540_v49, %v8540_v49  ;;  %v18389_v59 = vshrl.u32 %v18306_v45, 16  ;;  %v8909_v56 = vrot.slane %v18306_v45, 1  ;;  %v13553_v49 = vld [vmem:[%s18967_s11 + $0x190] sm:$0xff]  }
 0xc50   :  { %v18308_v62 = vpack.c.bf16 %v8541_v42, %v8541_v42  ;;  %11792 = vmatprep.mubr.msk.bf16.mxu1 %vm1026_vm1, %v18301_v32  ;;  %v18313_v16 = vshrl.u32 %v18301_v32, 16  ;;  %v8910_v14 = vrot.slane %v18301_v32, 1  ;;  %v9198_v37 = vrot.slane %v18301_v32, 2  ;;  %v13554_v42 = vld [vmem:[%s18967_s11 + $0x198] sm:$0xff]  }
 0xc51   :  { %8727 = vmatmul.mubr.bf16.vlgmr.msra.gmra.mrb[124].mxu1 %v18306_v45  ;;  %v18396_v5 = vshrl.u32 %v18316_v36, 16  ;;  %v9852_v30 = vrot.slane %v18316_v36, 1  ;;  %v9053_v3 = vrot.slane %v18389_v59, 1  ;;  %v9952_v58 = vrot.slane %v18316_v36, 2 }
 0xc52   :  { %8842 = vmatpush1.bf16.msra.mxu1 %v13515_v46  ;;  %11829 = vmatprep.mubr.msk.bf16.mxu1 %vm1026_vm1, %v18313_v16  ;;  %v18321_v4 = vshrl.u32 %v18308_v62, 16  ;;  %v9853_v23 = vrot.slane %v18308_v62, 1  ;;  %v9054_v0 = vrot.slane %v18313_v16, 1  ;;  %v9953_v27 = vrot.slane %v18308_v62, 2 }
 0xc53   :  { %12052 = vmatprep.mubr.msk.bf16.mxu0 %vm1026_vm1, %v18308_v62  ;;  %8843 = vmatprep.subr.bf16.mxu1 %v19039_v25  ;;  %v9902_v44 = vrot.slane %v18396_v5, 1  ;;  %v9342_v31 = vrot.slane %v18313_v16, 2 }
 0xc54   :  { %9786 = vmatmul.mubr.bf16.vlgmr.msra.gmra.mrb[68].mxu0 %v18316_v36  ;;  %v9903_v34 = vrot.slane %v18321_v4, 1  ;;  %v10003_v53 = vrot.slane %v18321_v4, 2 }
 0xc55   :  { %9807 = vmatpush1.bf16.msra.mxu0 %v13515_v46  ;;  %12053 = vmatprep.mubr.msk.bf16.mxu0 %vm1026_vm1, %v18321_v4  ;;  %v13555_v46 = vld [vmem:[%s18967_s11 + $0x1a0] sm:$0xff]  }
 0xc56   :  { %8844 = vmatpush1.bf16.msra.mxu1 %v13516_v48  ;;  %9808 = vmatprep.subr.bf16.mxu0 %v19039_v25 }
 0xc57   :  { %8845 = vmatprep.subr.bf16.mxu1 %v19039_v25 }
 0xc59   :  { %9809 = vmatpush1.bf16.msra.mxu0 %v13516_v48  ;;  %v13556_v48 = vld [vmem:[%s18967_s11 + $0x1a8] sm:$0xff]  }
 0xc5a   :  { %8846 = vmatpush1.bf16.msra.mxu1 %v13517_v12  ;;  %9810 = vmatprep.subr.bf16.mxu0 %v19039_v25 }
 0xc5b   :  { %8847 = vmatprep.subr.bf16.mxu1 %v19039_v25 }
 0xc5d   :  { %9811 = vmatpush1.bf16.msra.mxu0 %v13517_v12  ;;  %v13557_v12 = vld [vmem:[%s18967_s11 + $0x1b0] sm:$0xff]  }
 0xc5e   :  { %8848 = vmatpush1.bf16.msra.mxu1 %v13518_v20  ;;  %9812 = vmatprep.subr.bf16.mxu0 %v19039_v25 }
 0xc5f   :  { %8849 = vmatprep.subr.bf16.mxu1 %v19039_v25 }
 0xc61   :  { %9813 = vmatpush1.bf16.msra.mxu0 %v13518_v20  ;;  %v13558_v20 = vld [vmem:[%s18967_s11 + $0x1b8] sm:$0xff]  }
 0xc62   :  { %8850 = vmatpush1.bf16.msra.mxu1 %v13519_v28  ;;  %9814 = vmatprep.subr.bf16.mxu0 %v19039_v25 }
 0xc63   :  { %8851 = vmatprep.subr.bf16.mxu1 %v19039_v25 }
 0xc65   :  { %9815 = vmatpush1.bf16.msra.mxu0 %v13519_v28  ;;  %v13559_v28 = vld [vmem:[%s18967_s11 + $0x1c0] sm:$0xff]  }
 0xc66   :  { %8852 = vmatpush1.bf16.msra.mxu1 %v13520_v41  ;;  %9816 = vmatprep.subr.bf16.mxu0 %v19039_v25 }
 0xc67   :  { %8853 = vmatprep.subr.bf16.mxu1 %v19039_v25 }
 0xc69   :  { %9817 = vmatpush1.bf16.msra.mxu0 %v13520_v41  ;;  %v13560_v41 = vld [vmem:[%s18967_s11 + $0x1c8] sm:$0xff]  }
 0xc6a   :  { %8854 = vmatpush1.bf16.msra.mxu1 %v13521_v10  ;;  %9818 = vmatprep.subr.bf16.mxu0 %v19039_v25 }
 0xc6b   :  { %8855 = vmatprep.subr.bf16.mxu1 %v19039_v25 }
 0xc6d   :  { %9819 = vmatpush1.bf16.msra.mxu0 %v13521_v10  ;;  %v13561_v10 = vld [vmem:[%s18967_s11 + $0x1d0] sm:$0xff]  }
 0xc6e   :  { %8856 = vmatpush1.bf16.msra.mxu1 %v13522_v9  ;;  %9820 = vmatprep.subr.bf16.mxu0 %v19039_v25 }
 0xc6f   :  { %8857 = vmatprep.subr.bf16.mxu1 %v19039_v25 }
 0xc71   :  { %9821 = vmatpush1.bf16.msra.mxu0 %v13522_v9  ;;  %v13562_v9 = vld [vmem:[%s18967_s11 + $0x1d8] sm:$0xff]  }
 0xc72   :  { %8858 = vmatpush1.bf16.msra.mxu1 %v13523_v63  ;;  %9822 = vmatprep.subr.bf16.mxu0 %v19039_v25 }
 0xc73   :  { %8859 = vmatprep.subr.bf16.mxu1 %v19039_v25 }
 0xc75   :  { %9823 = vmatpush1.bf16.msra.mxu0 %v13523_v63  ;;  %v13563_v63 = vld [vmem:[%s18967_s11 + $0x1e0] sm:$0xff]  }
 0xc76   :  { %8860 = vmatpush1.bf16.msra.mxu1 %v13524_v26  ;;  %9824 = vmatprep.subr.bf16.mxu0 %v19039_v25 }
 0xc77   :  { %8861 = vmatprep.subr.bf16.mxu1 %v19039_v25 }
 0xc79   :  { %9825 = vmatpush1.bf16.msra.mxu0 %v13524_v26  ;;  %v9197_v26 = vrot.slane %v18306_v45, 2 }
 0xc7a   :  { %8862 = vmatpush1.bf16.msra.mxu1 %v13525_v11  ;;  %9826 = vmatprep.subr.bf16.mxu0 %v19039_v25 }
 0xc7b   :  { %8863 = vmatprep.subr.bf16.mxu1 %v19039_v25 }
 0xc7d   :  { %9827 = vmatpush1.bf16.msra.mxu0 %v13525_v11  ;;  %v13564_v11 = vld [vmem:[%s18967_s11 + $0x1e8] sm:$0xff]  }
 0xc7e   :  { %8864 = vmatpush1.bf16.msra.mxu1 %v13526_v33  ;;  %9828 = vmatprep.subr.bf16.mxu0 %v19039_v25 }
 0xc7f   :  { %8987 = vmatprep.subr.bf16.mxu1 %v19039_v25 }
 0xc81   :  { %9829 = vmatpush1.bf16.msra.mxu0 %v13526_v33  ;;  %8874 = vmatmul.mubr.bf16.vlgmr.msra.gmra.mrb[124].mxu1 %v18389_v59  ;;  %v13565_v33 = vld [vmem:[%s18967_s11 + $0x1f0] sm:$0xff]  }
 0xc82   :  { %8988 = vmatpush1.bf16.msra.mxu1 %v13527_v38  ;;  %11866 = vmatprep.mubr.msk.bf16.mxu1 %vm1026_vm1, %v8910_v14  ;;  %v13567_v14 = vld [vmem:[%s18967_s11 + $0x200] sm:$0xff]  }
 0xc83   :  { %9858 = vmatprep.subr.bf16.mxu0 %v19039_v25  ;;  %8989 = vmatprep.subr.bf16.mxu1 %v19039_v25 }
 0xc84   :  { %9839 = vmatmul.mubr.bf16.vlgmr.msra.gmra.mrb[72].mxu0 %v18396_v5 }
 0xc85   :  { %9859 = vmatpush1.bf16.msra.mxu0 %v13527_v38  ;;  %12054 = vmatprep.mubr.msk.bf16.mxu0 %vm1026_vm1, %v9853_v23  ;;  %v13566_v38 = vld [vmem:[%s18967_s11 + $0x1f8] sm:$0xff]   ;;  %v13569_v23 = vld [vmem:[%s18967_s11 + $0x210] sm:$0xff]  }
 0xc86   :  { %8990 = vmatpush1.bf16.msra.mxu1 %v13528_v40  ;;  %9860 = vmatprep.subr.bf16.mxu0 %v19039_v25 }
 0xc87   :  { %8991 = vmatprep.subr.bf16.mxu1 %v19039_v25 }
 0xc89   :  { %9861 = vmatpush1.bf16.msra.mxu0 %v13528_v40  ;;  %v13568_v40 = vld [vmem:[%s18967_s11 + $0x208] sm:$0xff]  }
 0xc8a   :  { %8992 = vmatpush1.bf16.msra.mxu1 %v13529_v24  ;;  %9862 = vmatprep.subr.bf16.mxu0 %v19039_v25 }
 0xc8b   :  { %8993 = vmatprep.subr.bf16.mxu1 %v19039_v25 }
 0xc8d   :  { %9863 = vmatpush1.bf16.msra.mxu0 %v13529_v24 }
 0xc8e   :  { %8994 = vmatpush1.bf16.msra.mxu1 %v13530_v2  ;;  %9864 = vmatprep.subr.bf16.mxu0 %v19039_v25 }
 0xc8f   :  { %8995 = vmatprep.subr.bf16.mxu1 %v19039_v25 }
 0xc91   :  { %9865 = vmatpush1.bf16.msra.mxu0 %v13530_v2 }
 0xc92   :  { %8996 = vmatpush1.bf16.msra.mxu1 %v13531_v29  ;;  %9866 = vmatprep.subr.bf16.mxu0 %v19039_v25 }
 0xc93   :  { %8997 = vmatprep.subr.bf16.mxu1 %v19039_v25 }
 0xc95   :  { %9867 = vmatpush1.bf16.msra.mxu0 %v13531_v29 }
 0xc96   :  { %8998 = vmatpush1.bf16.msra.mxu1 %v13532_v21  ;;  %9868 = vmatprep.subr.bf16.mxu0 %v19039_v25 }
 0xc97   :  { %8999 = vmatprep.subr.bf16.mxu1 %v19039_v25 }
 0xc99   :  { %9869 = vmatpush1.bf16.msra.mxu0 %v13532_v21 }
 0xc9a   :  { %9000 = vmatpush1.bf16.msra.mxu1 %v13533_v54  ;;  %9870 = vmatprep.subr.bf16.mxu0 %v19039_v25 }
 0xc9b   :  { %9001 = vmatprep.subr.bf16.mxu1 %v19039_v25 }
 0xc9d   :  { %9871 = vmatpush1.bf16.msra.mxu0 %v13533_v54 }
 0xc9e   :  { %9002 = vmatpush1.bf16.msra.mxu1 %v13534_v17  ;;  %9872 = vmatprep.subr.bf16.mxu0 %v19039_v25 }
 0xc9f   :  { %9003 = vmatprep.subr.bf16.mxu1 %v19039_v25 }
 0xca1   :  { %9873 = vmatpush1.bf16.msra.mxu0 %v13534_v17 }
 0xca2   :  { %9004 = vmatpush1.bf16.msra.mxu1 %v13535_v43  ;;  %9874 = vmatprep.subr.bf16.mxu0 %v19039_v25 }
 0xca3   :  { %9005 = vmatprep.subr.bf16.mxu1 %v19039_v25 }
 0xca5   :  { %9875 = vmatpush1.bf16.msra.mxu0 %v13535_v43  ;;  %v13570_v43 = vld [vmem:[%s18967_s11 + $0x218] sm:$0xff]  }
 0xca6   :  { %9006 = vmatpush1.bf16.msra.mxu1 %v13536_v15  ;;  %9876 = vmatprep.subr.bf16.mxu0 %v19039_v25 }
 0xca7   :  { %9007 = vmatprep.subr.bf16.mxu1 %v19039_v25 }
 0xca9   :  { %9877 = vmatpush1.bf16.msra.mxu0 %v13536_v15  ;;  %v13571_v15 = vld [vmem:[%s18967_s11 + $0x220] sm:$0xff]  }
 0xcaa   :  { %9008 = vmatpush1.bf16.msra.mxu1 %v13537_v13  ;;  %9878 = vmatprep.subr.bf16.mxu0 %v19039_v25 }
 0xcab   :  { %9009 = vmatprep.subr.bf16.mxu1 %v19039_v25 }
 0xcad   :  { %9879 = vmatpush1.bf16.msra.mxu0 %v13537_v13  ;;  %v13572_v13 = vld [vmem:[%s18967_s11 + $0x228] sm:$0xff]  }
 0xcae   :  { %9010 = vmatpush1.bf16.msra.mxu1 %v13538_v47  ;;  %9880 = vmatprep.subr.bf16.mxu0 %v19039_v25 }
 0xcaf   :  { %9131 = vmatprep.subr.bf16.mxu1 %v19039_v25 }
 0xcb1   :  { %9881 = vmatpush1.bf16.msra.mxu0 %v13538_v47  ;;  %9020 = vmatmul.mubr.bf16.vlgmr.msra.gmra.mrb[124].mxu1 %v8909_v56  ;;  %v13573_v47 = vld [vmem:[%s18967_s11 + $0x230] sm:$0xff]   ;;  %v18661_v56 = vld [vmem:[%s18967_s11 + $0x240] sm:$0xff]  }
 0xcb2   :  { %9132 = vmatpush1.bf16.msra.mxu1 %v13539_v19  ;;  %11903 = vmatprep.mubr.msk.bf16.mxu1 %vm1026_vm1, %v9054_v0  ;;  %v9341_v0 = vrot.slane %v18389_v59, 2 }
 0xcb3   :  { %9908 = vmatprep.subr.bf16.mxu0 %v19039_v25  ;;  %9133 = vmatprep.subr.bf16.mxu1 %v19039_v25 }
 0xcb4   :  { %9891 = vmatmul.mubr.bf16.vlgmr.msra.gmra.mrb[76].mxu0 %v9852_v30  ;;  %v9486_v30 = vrot.slane %v18301_v32, 3  ;;  %v10103_v32 = vrot.slane %v18321_v4, 3  ;;  %v18694_v4 = vld [vmem:[%s18967_s11 + $0x250] sm:$0xff]  }
 0xcb5   :  { %9909 = vmatpush1.bf16.msra.mxu0 %v13539_v19  ;;  %12055 = vmatprep.mubr.msk.bf16.mxu0 %vm1026_vm1, %v9903_v34  ;;  %v13574_v19 = vld [vmem:[%s18967_s11 + $0x238] sm:$0xff]   ;;  %v10002_v34 = vrot.slane %v18396_v5, 2 }
 0xcb6   :  { %9134 = vmatpush1.bf16.msra.mxu1 %v13540_v18  ;;  %9910 = vmatprep.subr.bf16.mxu0 %v19039_v25 }
 0xcb7   :  { %9135 = vmatprep.subr.bf16.mxu1 %v19039_v25 }
 0xcb9   :  { %9911 = vmatpush1.bf16.msra.mxu0 %v13540_v18  ;;  %v18669_v18 = vld [vmem:[%s18967_s11 + $0x2a0] sm:$0xff]  }
 0xcba   :  { %9136 = vmatpush1.bf16.msra.mxu1 %v13541_v51  ;;  %9912 = vmatprep.subr.bf16.mxu0 %v19039_v25 }
 0xcbb   :  { %9137 = vmatprep.subr.bf16.mxu1 %v19039_v25 }
 0xcbd   :  { %9913 = vmatpush1.bf16.msra.mxu0 %v13541_v51  ;;  %v18677_v51 = vld [vmem:[%s18967_s11 + $0x248] sm:$0xff]  }
 0xcbe   :  { %9138 = vmatpush1.bf16.msra.mxu1 %v13542_v8  ;;  %9914 = vmatprep.subr.bf16.mxu0 %v19039_v25 }
 0xcbf   :  { %9139 = vmatprep.subr.bf16.mxu1 %v19039_v25 }
 0xcc1   :  { %9915 = vmatpush1.bf16.msra.mxu0 %v13542_v8  ;;  %v18687_v8 = vld [vmem:[%s18967_s11 + $0x2a8] sm:$0xff]  }
 0xcc2   :  { %9140 = vmatpush1.bf16.msra.mxu1 %v13543_v6  ;;  %9916 = vmatprep.subr.bf16.mxu0 %v19039_v25 }
 0xcc3   :  { %9141 = vmatprep.subr.bf16.mxu1 %v19039_v25 }
 0xcc5   :  { %9917 = vmatpush1.bf16.msra.mxu0 %v13543_v6  ;;  %v18701_v6 = vld [vmem:[%s18967_s11 + $0x2b0] sm:$0xff]  }
 0xcc6   :  { %9142 = vmatpush1.bf16.msra.mxu1 %v13544_v50  ;;  %9918 = vmatprep.subr.bf16.mxu0 %v19039_v25 }
 0xcc7   :  { %9143 = vmatprep.subr.bf16.mxu1 %v19039_v25 }
 0xcc9   :  { %9919 = vmatpush1.bf16.msra.mxu0 %v13544_v50  ;;  %v18708_v50 = vld [vmem:[%s18967_s11 + $0x258] sm:$0xff]  }
 0xcca   :  { %9144 = vmatpush1.bf16.msra.mxu1 %v13545_v7  ;;  %9920 = vmatprep.subr.bf16.mxu0 %v19039_v25 }
 0xccb   :  { %9145 = vmatprep.subr.bf16.mxu1 %v19039_v25 }
 0xccd   :  { %9921 = vmatpush1.bf16.msra.mxu0 %v13545_v7  ;;  %v18715_v7 = vld [vmem:[%s18967_s11 + $0x2b8] sm:$0xff]  }
 0xcce   :  { %9146 = vmatpush1.bf16.msra.mxu1 %v13546_v60  ;;  %9922 = vmatprep.subr.bf16.mxu0 %v19039_v25 }
 0xccf   :  { %9147 = vmatprep.subr.bf16.mxu1 %v19039_v25 }
 0xcd1   :  { %9923 = vmatpush1.bf16.msra.mxu0 %v13546_v60  ;;  %v18722_v60 = vld [vmem:[%s18967_s11 + $0x260] sm:$0xff]  }
 0xcd2   :  { %9148 = vmatpush1.bf16.msra.mxu1 %v13547_v52  ;;  %9924 = vmatprep.subr.bf16.mxu0 %v19039_v25 }
 0xcd3   :  { %9149 = vmatprep.subr.bf16.mxu1 %v19039_v25 }
 0xcd5   :  { %9925 = vmatpush1.bf16.msra.mxu0 %v13547_v52  ;;  %v18729_v52 = vld [vmem:[%s18967_s11 + $0x2c0] sm:$0xff]  }
 0xcd6   :  { %9150 = vmatpush1.bf16.msra.mxu1 %v13548_v55  ;;  %9926 = vmatprep.subr.bf16.mxu0 %v19039_v25 }
 0xcd7   :  { %9151 = vmatprep.subr.bf16.mxu1 %v19039_v25 }
 0xcd9   :  { %9927 = vmatpush1.bf16.msra.mxu0 %v13548_v55  ;;  %v18736_v55 = vld [vmem:[%s18967_s11 + $0x268] sm:$0xff]  }
 0xcda   :  { %9152 = vmatpush1.bf16.msra.mxu1 %v13549_v1  ;;  %9928 = vmatprep.subr.bf16.mxu0 %v19039_v25 }
 0xcdb   :  { %9153 = vmatprep.subr.bf16.mxu1 %v19039_v25 }
 0xcdd   :  { %9929 = vmatpush1.bf16.msra.mxu0 %v13549_v1  ;;  %v18743_v1 = vld [vmem:[%s18967_s11 + $0x2c8] sm:$0xff]  }
 0xcde   :  { %9154 = vmatpush1.bf16.msra.mxu1 %v13550_v35  ;;  %9930 = vmatprep.subr.bf16.mxu0 %v19039_v25 }
 0xcdf   :  { %9275 = vmatprep.subr.bf16.mxu1 %v19039_v25 }
 0xce1   :  { %9931 = vmatpush1.bf16.msra.mxu0 %v13550_v35  ;;  %9164 = vmatmul.mubr.bf16.vlgmr.msra.gmra.mrb[124].mxu1 %v9053_v3  ;;  %v18750_v35 = vld [vmem:[%s18967_s11 + $0x270] sm:$0xff]  }
 0xce2   :  { %9276 = vmatpush1.bf16.msra.mxu1 %v13551_v22  ;;  %11940 = vmatprep.mubr.msk.bf16.mxu1 %vm1026_vm1, %v9198_v37 }
 0xce3   :  { %9958 = vmatprep.subr.bf16.mxu0 %v19039_v25  ;;  %9277 = vmatprep.subr.bf16.mxu1 %v19039_v25 }
 0xce4   :  { %9941 = vmatmul.mubr.bf16.vlgmr.msra.gmra.mrb[80].mxu0 %v9902_v44 }
 0xce5   :  { %9959 = vmatpush1.bf16.msra.mxu0 %v13551_v22  ;;  %12056 = vmatprep.mubr.msk.bf16.mxu0 %vm1026_vm1, %v9953_v27 }
 0xce6   :  { %9278 = vmatpush1.bf16.msra.mxu1 %v13552_v39  ;;  %9960 = vmatprep.subr.bf16.mxu0 %v19039_v25 }
 0xce7   :  { %9279 = vmatprep.subr.bf16.mxu1 %v19039_v25 }
 0xce9   :  { %9961 = vmatpush1.bf16.msra.mxu0 %v13552_v39  ;;  %v13588_v39 = vld [vmem:[%s18967_s11 + $0x2d0] sm:$0xff]  }
 0xcea   :  { %9280 = vmatpush1.bf16.msra.mxu1 %v13553_v49  ;;  %9962 = vmatprep.subr.bf16.mxu0 %v19039_v25 }
 0xceb   :  { %9281 = vmatprep.subr.bf16.mxu1 %v19039_v25 }
 0xced   :  { %9963 = vmatpush1.bf16.msra.mxu0 %v13553_v49 }
 0xcee   :  { %9282 = vmatpush1.bf16.msra.mxu1 %v13554_v42  ;;  %9964 = vmatprep.subr.bf16.mxu0 %v19039_v25 }
 0xcef   :  { %9283 = vmatprep.subr.bf16.mxu1 %v19039_v25 }
 0xcf1   :  { %9965 = vmatpush1.bf16.msra.mxu0 %v13554_v42  ;;  %v18763_v42 = vld [vmem:[%s18967_s11 + $0x278] sm:$0xff]  }
 0xcf2   :  { %9284 = vmatpush1.bf16.msra.mxu1 %v13555_v46  ;;  %9966 = vmatprep.subr.bf16.mxu0 %v19039_v25 }
 0xcf3   :  { %9285 = vmatprep.subr.bf16.mxu1 %v19039_v25 }
 0xcf5   :  { %9967 = vmatpush1.bf16.msra.mxu0 %v13555_v46  ;;  %v13590_v46 = vld [vmem:[%s18967_s11 + $0x2d8] sm:$0xff]  }
 0xcf6   :  { %9286 = vmatpush1.bf16.msra.mxu1 %v13556_v48  ;;  %9968 = vmatprep.subr.bf16.mxu0 %v19039_v25 }
 0xcf7   :  { %9287 = vmatprep.subr.bf16.mxu1 %v19039_v25 }
 0xcf9   :  { %9969 = vmatpush1.bf16.msra.mxu0 %v13556_v48  ;;  %v18774_v48 = vld [vmem:[%s18967_s11 + $0x280] sm:$0xff]  }
 0xcfa   :  { %9288 = vmatpush1.bf16.msra.mxu1 %v13557_v12  ;;  %9970 = vmatprep.subr.bf16.mxu0 %v19039_v25 }
 0xcfb   :  { %9289 = vmatprep.subr.bf16.mxu1 %v19039_v25 }
 0xcfd   :  { %9971 = vmatpush1.bf16.msra.mxu0 %v13557_v12  ;;  %v13592_v12 = vld [vmem:[%s18967_s11 + $0x2e0] sm:$0xff]  }
 0xcfe   :  { %9290 = vmatpush1.bf16.msra.mxu1 %v13558_v20  ;;  %9972 = vmatprep.subr.bf16.mxu0 %v19039_v25 }
 0xcff   :  { %9291 = vmatprep.subr.bf16.mxu1 %v19039_v25 }
 0xd01   :  { %9973 = vmatpush1.bf16.msra.mxu0 %v13558_v20  ;;  %v18785_v20 = vld [vmem:[%s18967_s11 + $0x288] sm:$0xff]  }
 0xd02   :  { %9292 = vmatpush1.bf16.msra.mxu1 %v13559_v28  ;;  %9974 = vmatprep.subr.bf16.mxu0 %v19039_v25 }
 0xd03   :  { %9293 = vmatprep.subr.bf16.mxu1 %v19039_v25 }
 0xd05   :  { %9975 = vmatpush1.bf16.msra.mxu0 %v13559_v28  ;;  %v13594_v28 = vld [vmem:[%s18967_s11 + $0x2e8] sm:$0xff]  }
 0xd06   :  { %9294 = vmatpush1.bf16.msra.mxu1 %v13560_v41  ;;  %9976 = vmatprep.subr.bf16.mxu0 %v19039_v25 }
 0xd07   :  { %9295 = vmatprep.subr.bf16.mxu1 %v19039_v25 }
 0xd09   :  { %9977 = vmatpush1.bf16.msra.mxu0 %v13560_v41  ;;  %v18796_v41 = vld [vmem:[%s18967_s11 + $0x290] sm:$0xff]  }
 0xd0a   :  { %9296 = vmatpush1.bf16.msra.mxu1 %v13561_v10  ;;  %9978 = vmatprep.subr.bf16.mxu0 %v19039_v25 }
 0xd0b   :  { %9297 = vmatprep.subr.bf16.mxu1 %v19039_v25 }
 0xd0d   :  { %9979 = vmatpush1.bf16.msra.mxu0 %v13561_v10  ;;  %v13596_v10 = vld [vmem:[%s18967_s11 + $0x2f0] sm:$0xff]  }
 0xd0e   :  { %9298 = vmatpush1.bf16.msra.mxu1 %v13562_v9  ;;  %9980 = vmatprep.subr.bf16.mxu0 %v19039_v25 }
 0xd0f   :  { %9419 = vmatprep.subr.bf16.mxu1 %v19039_v25 }
 0xd11   :  { %9981 = vmatpush1.bf16.msra.mxu0 %v13562_v9  ;;  %9308 = vmatmul.mubr.bf16.vlgmr.msra.gmra.mrb[124].mxu1 %v9197_v26  ;;  %v18807_v9 = vld [vmem:[%s18967_s11 + $0x298] sm:$0xff]   ;;  %v9485_v26 = vrot.slane %v18306_v45, 3 }
 0xd12   :  { %9420 = vmatpush1.bf16.msra.mxu1 %v13563_v63  ;;  %11977 = vmatprep.mubr.msk.bf16.mxu1 %vm1026_vm1, %v9342_v31  ;;  %v9630_v31 = vrot.slane %v18313_v16, 3 }
 0xd13   :  { %10008 = vmatprep.subr.bf16.mxu0 %v19039_v25  ;;  %9421 = vmatprep.subr.bf16.mxu1 %v19039_v25 }
 0xd14   :  { %9991 = vmatmul.mubr.bf16.vlgmr.msra.gmra.mrb[84].mxu0 %v9952_v58  ;;  %v10102_v58 = vrot.slane %v18396_v5, 3 }
 0xd15   :  { %10009 = vmatpush1.bf16.msra.mxu0 %v13563_v63  ;;  %12057 = vmatprep.mubr.msk.bf16.mxu0 %vm1026_vm1, %v10003_v53  ;;  %v13598_v63 = vld [vmem:[%s18967_s11 + $0x2f8] sm:$0xff]  }
 0xd16   :  { %9422 = vmatpush1.bf16.msra.mxu1 %v13564_v11  ;;  %10010 = vmatprep.subr.bf16.mxu0 %v19039_v25 }
 0xd17   :  { %9423 = vmatprep.subr.bf16.mxu1 %v19039_v25 }
 0xd19   :  { %10011 = vmatpush1.bf16.msra.mxu0 %v13564_v11 }
 0xd1a   :  { %9424 = vmatpush1.bf16.msra.mxu1 %v13565_v33  ;;  %10012 = vmatprep.subr.bf16.mxu0 %v19039_v25 }
 0xd1b   :  { %9425 = vmatprep.subr.bf16.mxu1 %v19039_v25 }
 0xd1d   :  { %10013 = vmatpush1.bf16.msra.mxu0 %v13565_v33 }
 0xd1e   :  { %9426 = vmatpush1.bf16.msra.mxu1 %v13566_v38  ;;  %10014 = vmatprep.subr.bf16.mxu0 %v19039_v25 }
 0xd1f   :  { %9427 = vmatprep.subr.bf16.mxu1 %v19039_v25 }
 0xd21   :  { %10015 = vmatpush1.bf16.msra.mxu0 %v13566_v38  ;;  %v9629_v38 = vrot.slane %v18389_v59, 3 }
 0xd22   :  { %9428 = vmatpush1.bf16.msra.mxu1 %v13567_v14  ;;  %10016 = vmatprep.subr.bf16.mxu0 %v19039_v25 }
 0xd23   :  { %9429 = vmatprep.subr.bf16.mxu1 %v19039_v25 }
 0xd25   :  { %10017 = vmatpush1.bf16.msra.mxu0 %v13567_v14  ;;  %v10053_v14 = vrot.slane %v18308_v62, 3 }
 0xd26   :  { %9430 = vmatpush1.bf16.msra.mxu1 %v13568_v40  ;;  %10018 = vmatprep.subr.bf16.mxu0 %v19039_v25 }
 0xd27   :  { %v9787_v24 = vpop.f32.mrb[68].mxu0  ;;  %9431 = vmatprep.subr.bf16.mxu1 %v19039_v25 }
 0xd28   :  { %v9794_v2 = vrot.slane %v9787_v24, 7  ;;  %v9789_v29 = vpop.f32.mrb[69].mxu0 }
 0xd29   :  { %10019 = vmatpush1.bf16.msra.mxu0 %v13568_v40  ;;  %v9790_v21 = vpop.f32.mrb[70].mxu0  ;;  %v10052_v29 = vrot.slane %v18316_v36, 3  ;;  %v13600_v36 = vld [vmem:[%s18970_s14 + $0x8] sm:$0xff]  }
 0xd2a   :  { %v18630_v54 = vadd.f32 %v9794_v2, %v18372_v57  ;;  %9432 = vmatpush1.bf16.msra.mxu1 %v13569_v23  ;;  %v9791_v17 = vpop.f32.mrb[71].mxu0  ;;  %10020 = vmatprep.subr.bf16.mxu0 %v19039_v25 }
 0xd2b   :  { %9433 = vmatprep.subr.bf16.mxu1 %v19039_v25 }
 0xd2d   :  { %10021 = vmatpush1.bf16.msra.mxu0 %v13569_v23 }
 0xd2e   :  { %9434 = vmatpush1.bf16.msra.mxu1 %v13570_v43  ;;  %10022 = vmatprep.subr.bf16.mxu0 %v19039_v25 }
 0xd2f   :  { %9435 = vmatprep.subr.bf16.mxu1 %v19039_v25 }
 0xd31   :  { %10023 = vmatpush1.bf16.msra.mxu0 %v13570_v43 }
 0xd32   :  { %9436 = vmatpush1.bf16.msra.mxu1 %v13571_v15  ;;  %10024 = vmatprep.subr.bf16.mxu0 %v19039_v25 }
 0xd33   :  { %9437 = vmatprep.subr.bf16.mxu1 %v19039_v25 }
 0xd35   :  { %10025 = vmatpush1.bf16.msra.mxu0 %v13571_v15 }
 0xd36   :  { %9438 = vmatpush1.bf16.msra.mxu1 %v13572_v13  ;;  %10026 = vmatprep.subr.bf16.mxu0 %v19039_v25 }
 0xd37   :  { %9439 = vmatprep.subr.bf16.mxu1 %v19039_v25 }
 0xd39   :  { %10027 = vmatpush1.bf16.msra.mxu0 %v13572_v13 }
 0xd3a   :  { %9440 = vmatpush1.bf16.msra.mxu1 %v13573_v47  ;;  %10028 = vmatprep.subr.bf16.mxu0 %v19039_v25 }
 0xd3b   :  { %9441 = vmatprep.subr.bf16.mxu1 %v19039_v25 }
 0xd3d   :  { %10029 = vmatpush1.bf16.msra.mxu0 %v13573_v47  ;;  %v13601_v47 = vld [vmem:[%s18970_s14 + $0x10] sm:$0xff]  }
 0xd3e   :  { %9442 = vmatpush1.bf16.msra.mxu1 %v13574_v19  ;;  %10030 = vmatprep.subr.bf16.mxu0 %v19039_v25 }
 0xd3f   :  { %9563 = vmatprep.subr.bf16.mxu1 %v19039_v25 }
 0xd41   :  { %10031 = vmatpush1.bf16.msra.mxu0 %v13574_v19  ;;  %9452 = vmatmul.mubr.bf16.vlgmr.msra.gmra.mrb[124].mxu1 %v9341_v0  ;;  %v13602_v19 = vld [vmem:[%s18970_s14 + $0x18] sm:$0xff]  }
 0xd42   :  { %9564 = vmatpush1.bf16.msra.mxu1 %v18661_v56  ;;  %12014 = vmatprep.mubr.msk.bf16.mxu1 %vm1026_vm1, %v9486_v30 }
 0xd43   :  { %10108 = vmatprep.subr.bf16.mxu0 %v19039_v25  ;;  %9565 = vmatprep.subr.bf16.mxu1 %v19039_v25 }
 0xd44   :  { %10041 = vmatmul.mubr.bf16.vlgmr.msra.gmra.mrb[88].mxu0 %v10002_v34 }
 0xd45   :  { %10109 = vmatpush1.bf16.msra.mxu0 %v18669_v18  ;;  %12059 = vmatprep.mubr.msk.bf16.mxu0 %vm1026_vm1, %v10103_v32 }
 0xd46   :  { %9566 = vmatpush1.bf16.msra.mxu1 %v18677_v51  ;;  %10110 = vmatprep.subr.bf16.mxu0 %v19039_v25 }
 0xd47   :  { %9567 = vmatprep.subr.bf16.mxu1 %v19039_v25 }
 0xd49   :  { %10111 = vmatpush1.bf16.msra.mxu0 %v18687_v8 }
 0xd4a   :  { %9568 = vmatpush1.bf16.msra.mxu1 %v18694_v4  ;;  %10112 = vmatprep.subr.bf16.mxu0 %v19039_v25 }
 0xd4b   :  { %9569 = vmatprep.subr.bf16.mxu1 %v19039_v25 }
 0xd4d   :  { %10113 = vmatpush1.bf16.msra.mxu0 %v18701_v6 }
 0xd4e   :  { %9570 = vmatpush1.bf16.msra.mxu1 %v18708_v50  ;;  %10114 = vmatprep.subr.bf16.mxu0 %v19039_v25 }
 0xd4f   :  { %9571 = vmatprep.subr.bf16.mxu1 %v19039_v25 }
 0xd51   :  { %10115 = vmatpush1.bf16.msra.mxu0 %v18715_v7 }
 0xd52   :  { %9572 = vmatpush1.bf16.msra.mxu1 %v18722_v60  ;;  %10116 = vmatprep.subr.bf16.mxu0 %v19039_v25 }
 0xd53   :  { %9573 = vmatprep.subr.bf16.mxu1 %v19039_v25 }
 0xd55   :  { %10117 = vmatpush1.bf16.msra.mxu0 %v18729_v52 }
 0xd56   :  { %9574 = vmatpush1.bf16.msra.mxu1 %v18736_v55  ;;  %10118 = vmatprep.subr.bf16.mxu0 %v19039_v25 }
 0xd57   :  { %v9840_v22 = vpop.f32.mrb[72].mxu0  ;;  %9575 = vmatprep.subr.bf16.mxu1 %v19039_v25 }
 0xd58   :  { %v9847_v3 = vrot.slane %v9840_v22, 7  ;;  %v9842_v37 = vpop.f32.mrb[73].mxu0 }
 0xd59   :  { %v9843_v44 = vpop.f32.mrb[74].mxu0  ;;  %10119 = vmatpush1.bf16.msra.mxu0 %v18743_v1 }
 0xd5a   :  { %v9849_v27 = vadd.f32 %v9847_v3, %v18630_v54  ;;  %v9844_v49 = vpop.f32.mrb[75].mxu0  ;;  %9576 = vmatpush1.bf16.msra.mxu1 %v18750_v35  ;;  %10120 = vmatprep.subr.bf16.mxu0 %v19039_v25 }
 0xd5b   :  { %9577 = vmatprep.subr.bf16.mxu1 %v19039_v25 }
 0xd5d   :  { %10121 = vmatpush1.bf16.msra.mxu0 %v13588_v39 }
 0xd5e   :  { %9578 = vmatpush1.bf16.msra.mxu1 %v18763_v42  ;;  %10122 = vmatprep.subr.bf16.mxu0 %v19039_v25 }
 0xd5f   :  { %9579 = vmatprep.subr.bf16.mxu1 %v19039_v25 }
 0xd61   :  { %10123 = vmatpush1.bf16.msra.mxu0 %v13590_v46 }
 0xd62   :  { %9580 = vmatpush1.bf16.msra.mxu1 %v18774_v48  ;;  %10124 = vmatprep.subr.bf16.mxu0 %v19039_v25 }
 0xd63   :  { %9581 = vmatprep.subr.bf16.mxu1 %v19039_v25 }
 0xd65   :  { %10125 = vmatpush1.bf16.msra.mxu0 %v13592_v12 }
 0xd66   :  { %9582 = vmatpush1.bf16.msra.mxu1 %v18785_v20  ;;  %10126 = vmatprep.subr.bf16.mxu0 %v19039_v25 }
 0xd67   :  { %9583 = vmatprep.subr.bf16.mxu1 %v19039_v25 }
 0xd69   :  { %10127 = vmatpush1.bf16.msra.mxu0 %v13594_v28 }
 0xd6a   :  { %9584 = vmatpush1.bf16.msra.mxu1 %v18796_v41  ;;  %10128 = vmatprep.subr.bf16.mxu0 %v19039_v25 }
 0xd6b   :  { %9585 = vmatprep.subr.bf16.mxu1 %v19039_v25 }
 0xd6d   :  { %10129 = vmatpush1.bf16.msra.mxu0 %v13596_v10 }
 0xd6e   :  { %9586 = vmatpush1.bf16.msra.mxu1 %v18807_v9  ;;  %10130 = vmatprep.subr.bf16.mxu0 %v19039_v25 }
 0xd6f   :  { %9707 = vmatprep.subr.bf16.mxu1 %v19039_v25 }
 0xd71   :  { %10131 = vmatpush1.bf16.msra.mxu0 %v13598_v63  ;;  %9596 = vmatmul.mubr.bf16.vlgmr.msra.gmra.mrb[124].mxu1 %v9485_v26 }
 0xd72   :  { %9708 = vmatpush1.bf16.msra.mxu1 %v18669_v18  ;;  %12051 = vmatprep.mubr.msk.bf16.mxu1 %vm1026_vm1, %v9630_v31 }
 0xd73   :  { %9709 = vmatprep.subr.bf16.mxu1 %v19039_v25  ;;  %12125 = vmatprep.subr.bf16.mxu0 %v13710_v61 }
 0xd74   :  { %10141 = vmatmul.mubr.bf16.vlgmr.msra.gmra.mrb[92].mxu0 %v10102_v58 }
 0xd75   :  { %12141 = vmatprep.mubr.msk.bf16.mxu0 %vm13711_vm10, %v13710_v61 }
 0xd76   :  { %9710 = vmatpush1.bf16.msra.mxu1 %v18687_v8  ;;  %v13604_v8 = vld [vmem:[%s18970_s14 + $0x28] sm:$0xff]  }
 0xd77   :  { %9711 = vmatprep.subr.bf16.mxu1 %v19039_v25 }
 0xd7a   :  { %9712 = vmatpush1.bf16.msra.mxu1 %v18701_v6  ;;  %v13606_v6 = vld [vmem:[%s18970_s14 + $0x38] sm:$0xff]  }
 0xd7b   :  { %9713 = vmatprep.subr.bf16.mxu1 %v19039_v25 }
 0xd7e   :  { %9714 = vmatpush1.bf16.msra.mxu1 %v18715_v7  ;;  %v13608_v7 = vld [vmem:[%s18972_s16 + $0x8] sm:$0xff]  }
 0xd7f   :  { %9715 = vmatprep.subr.bf16.mxu1 %v19039_v25 }
 0xd82   :  { %9716 = vmatpush1.bf16.msra.mxu1 %v18729_v52  ;;  %v13610_v52 = vld [vmem:[%s18972_s16 + $0x18] sm:$0xff]  }
 0xd83   :  { %9717 = vmatprep.subr.bf16.mxu1 %v19039_v25 }
 0xd86   :  { %9718 = vmatpush1.bf16.msra.mxu1 %v18743_v1  ;;  %v13612_v1 = vld [vmem:[%s18972_s16 + $0x28] sm:$0xff]  }
 0xd87   :  { %v9892_v45 = vpop.f32.mrb[76].mxu0  ;;  %9719 = vmatprep.subr.bf16.mxu1 %v19039_v25 }
 0xd88   :  { %v9899_v16 = vrot.slane %v9892_v45, 7  ;;  %v9894_v5 = vpop.f32.mrb[77].mxu0  ;;  %v13613_v45 = vld [vmem:[%s18972_s16 + $0x30] sm:$0xff]  }
 0xd89   :  { %v9895_v11 = vpop.f32.mrb[78].mxu0  ;;  %v12061_v5 = vld [vmem:[%s18971_s15] ss:$0 sm:$0xff]  ;;  %s13685_s15 = scalar_lea.vmem %s10396_s23, 32 }
 0xd8a   :  { %v9901_v53 = vadd.f32 %v9899_v16, %v9849_v27  ;;  %v9896_v33 = vpop.f32.mrb[79].mxu0  ;;  %9720 = vmatpush1.bf16.msra.mxu1 %v13588_v39  ;;  %v13614_v16 = vld [vmem:[%s18972_s16 + $0x38] sm:$0xff]   ;;  %p13686_p0 = scmp.ne.s32.totalorder %s10396_s23, %s13685_s15  ;;  %p13691_p2 = scmp.lt.s32.totalorder %s13685_s15, %s13685_s15 }
 0xd8b   :  { %9721 = vmatprep.subr.bf16.mxu1 %v19039_v25 }
 0xd8c   :  { %p13692_p3 = por %p13691_p2, %p13690_p1 }
 0xd8e   :  { %9722 = vmatpush1.bf16.msra.mxu1 %v13590_v46  ;;  %p13693_p4 = pnand %p13692_p3, %p13686_p0 }
 0xd8f   :  { %9723 = vmatprep.subr.bf16.mxu1 %v19039_v25 }
 0xd92   :  { %9724 = vmatpush1.bf16.msra.mxu1 %v13592_v12 }
 0xd93   :  { %9725 = vmatprep.subr.bf16.mxu1 %v19039_v25 }
 0xd96   :  { %9726 = vmatpush1.bf16.msra.mxu1 %v13594_v28 }
 0xd97   :  { %9727 = vmatprep.subr.bf16.mxu1 %v19039_v25 }
 0xd9a   :  { %9728 = vmatpush1.bf16.msra.mxu1 %v13596_v10 }
 0xd9b   :  { %9729 = vmatprep.subr.bf16.mxu1 %v19039_v25 }
 0xd9e   :  { %9730 = vmatpush1.bf16.msra.mxu1 %v13598_v63  ;;  %v12060_v63 = vld [vmem:[%s18969_s13] ss:$0 sm:$0xff] }
 0xd9f   :  { %10058 = vmatprep.subr.bf16.mxu1 %v19039_v25 }
 0xda1   :  { %9740 = vmatmul.mubr.bf16.vlgmr.msra.gmra.mrb[124].mxu1 %v9629_v38 }
 0xda2   :  { %10059 = vmatpush1.bf16.msra.mxu1 %v18661_v56  ;;  %12058 = vmatprep.mubr.msk.bf16.mxu1 %vm1026_vm1, %v10053_v14  ;;  %v13603_v56 = vld [vmem:[%s18970_s14 + $0x20] sm:$0xff]  }
 0xda3   :  { %10060 = vmatprep.subr.bf16.mxu1 %v19039_v25 }
 0xda6   :  { %10061 = vmatpush1.bf16.msra.mxu1 %v18677_v51 }
 0xda7   :  { %10062 = vmatprep.subr.bf16.mxu1 %v19039_v25 }
 0xdaa   :  { %10063 = vmatpush1.bf16.msra.mxu1 %v18694_v4  ;;  %v13605_v4 = vld [vmem:[%s18970_s14 + $0x30] sm:$0xff]  }
 0xdab   :  { %10064 = vmatprep.subr.bf16.mxu1 %v19039_v25 }
 0xdae   :  { %10065 = vmatpush1.bf16.msra.mxu1 %v18708_v50  ;;  %v13607_v50 = vld [vmem:[%s18972_s16] sm:$0xff]  }
 0xdaf   :  { %10066 = vmatprep.subr.bf16.mxu1 %v19039_v25  ;;  %12126 = vmatpush3.bf16.msra.mxu0 %v13607_v50 }
 0xdb0   :  { %12127 = vmatprep.subr.bf16.mxu0 %v13710_v61 }
 0xdb2   :  { %10067 = vmatpush1.bf16.msra.mxu1 %v18722_v60  ;;  %v13609_v60 = vld [vmem:[%s18972_s16 + $0x10] sm:$0xff]  }
 0xdb3   :  { %10068 = vmatprep.subr.bf16.mxu1 %v19039_v25  ;;  %12128 = vmatpush3.bf16.msra.mxu0 %v13608_v7 }
 0xdb4   :  { %12129 = vmatprep.subr.bf16.mxu0 %v13710_v61 }
 0xdb6   :  { %10069 = vmatpush1.bf16.msra.mxu1 %v18736_v55  ;;  %v13611_v55 = vld [vmem:[%s18972_s16 + $0x20] sm:$0xff]  }
 0xdb7   :  { %v9942_v62 = vpop.f32.mrb[80].mxu0  ;;  %10070 = vmatprep.subr.bf16.mxu1 %v19039_v25  ;;  %12130 = vmatpush3.bf16.msra.mxu0 %v13609_v60 }
 0xdb8   :  { %v9949_v59 = vrot.slane %v9942_v62, 7  ;;  %v9944_v40 = vpop.f32.mrb[81].mxu0  ;;  %12131 = vmatprep.subr.bf16.mxu0 %v13710_v61 }
 0xdb9   :  { %v9945_v23 = vpop.f32.mrb[82].mxu0 }
 0xdba   :  { %v9951_v24 = vadd.f32 %v9949_v59, %v9901_v53  ;;  %v9946_v2 = vpop.f32.mrb[83].mxu0  ;;  %10071 = vmatpush1.bf16.msra.mxu1 %v18750_v35 }
 0xdbb   :  { %10072 = vmatprep.subr.bf16.mxu1 %v19039_v25  ;;  %12132 = vmatpush3.bf16.msra.mxu0 %v13610_v52 }
 0xdbc   :  { %12133 = vmatprep.subr.bf16.mxu0 %v13710_v61 }
 0xdbe   :  { %10073 = vmatpush1.bf16.msra.mxu1 %v18763_v42 }
 0xdbf   :  { %10074 = vmatprep.subr.bf16.mxu1 %v19039_v25  ;;  %12134 = vmatpush3.bf16.msra.mxu0 %v13611_v55 }
 0xdc0   :  { %12135 = vmatprep.subr.bf16.mxu0 %v13710_v61 }
 0xdc2   :  { %10075 = vmatpush1.bf16.msra.mxu1 %v18774_v48 }
 0xdc3   :  { %10076 = vmatprep.subr.bf16.mxu1 %v19039_v25  ;;  %12136 = vmatpush3.bf16.msra.mxu0 %v13612_v1 }
 0xdc4   :  { %12137 = vmatprep.subr.bf16.mxu0 %v13710_v61 }
 0xdc6   :  { %10077 = vmatpush1.bf16.msra.mxu1 %v18785_v20 }
 0xdc7   :  { %10078 = vmatprep.subr.bf16.mxu1 %v19039_v25  ;;  %12138 = vmatpush3.bf16.msra.mxu0 %v13613_v45 }
 0xdc8   :  { %12139 = vmatprep.subr.bf16.mxu0 %v13710_v61 }
 0xdca   :  { %10079 = vmatpush1.bf16.msra.mxu1 %v18796_v41 }
 0xdcb   :  { %10080 = vmatprep.subr.bf16.mxu1 %v19039_v25  ;;  %v13599_v25 = vld [vmem:[%s18970_s14] sm:$0xff]   ;;  %12140 = vmatpush3.bf16.msra.mxu0 %v13614_v16 }
 0xdce   :  { %10081 = vmatpush1.bf16.msra.mxu1 %v18807_v9 }
 0xdcf   :  { %12105 = vmatprep.subr.bf16.mxu1 %v13710_v61 }
 0xdd1   :  { %10091 = vmatmul.mubr.bf16.vlgmr.msra.gmra.mrb[128].mxu1 %v10052_v29 }
 0xdd2   :  { %12121 = vmatprep.mubr.msk.bf16.mxu1 %vm13711_vm10, %v13710_v61  ;;  %12106 = vmatpush3.bf16.msra.mxu1 %v13599_v25 }
 0xdd3   :  { %12107 = vmatprep.subr.bf16.mxu1 %v13710_v61 }
 0xdd6   :  { %12108 = vmatpush3.bf16.msra.mxu1 %v13600_v36 }
 0xdd7   :  { %12109 = vmatprep.subr.bf16.mxu1 %v13710_v61 }
 0xdda   :  { %12110 = vmatpush3.bf16.msra.mxu1 %v13601_v47 }
 0xddb   :  { %12111 = vmatprep.subr.bf16.mxu1 %v13710_v61 }
 0xdde   :  { %12112 = vmatpush3.bf16.msra.mxu1 %v13602_v19 }
 0xddf   :  { %12113 = vmatprep.subr.bf16.mxu1 %v13710_v61 }
 0xde2   :  { %12114 = vmatpush3.bf16.msra.mxu1 %v13603_v56 }
 0xde3   :  { %12115 = vmatprep.subr.bf16.mxu1 %v13710_v61 }
 0xde6   :  { %12116 = vmatpush3.bf16.msra.mxu1 %v13604_v8 }
 0xde7   :  { %v9992_v21 = vpop.f32.mrb[84].mxu0  ;;  %12117 = vmatprep.subr.bf16.mxu1 %v13710_v61 }
 0xde8   :  { %v9999_v54 = vrot.slane %v9992_v21, 7  ;;  %v9994_v17 = vpop.f32.mrb[85].mxu0 }
 0xde9   :  { %v9995_v43 = vpop.f32.mrb[86].mxu0 }
 0xdea   :  { %v10001_v15 = vadd.f32 %v9999_v54, %v9951_v24  ;;  %v9996_v13 = vpop.f32.mrb[87].mxu0  ;;  %12118 = vmatpush3.bf16.msra.mxu1 %v13605_v4 }
 0xdeb   :  { %12119 = vmatprep.subr.bf16.mxu1 %v13710_v61  ;;  %v12070_v61 = vld [vmem:[%s18973_s17] ss:$0 sm:$0xff] }
 0xdee   :  { %12120 = vmatpush3.bf16.msra.mxu1 %v13606_v6 }
 0xe17   :  { %v10042_v0 = vpop.f32.mrb[88].mxu0 }
 0xe18   :  { %v10049_v30 = vrot.slane %v10042_v0, 7  ;;  %v10044_v18 = vpop.f32.mrb[89].mxu0 }
 0xe19   :  { %v10045_v34 = vpop.f32.mrb[90].mxu0 }
 0xe1a   :  { %v10051_v51 = vadd.f32 %v10049_v30, %v10001_v15  ;;  %v10046_v32 = vpop.f32.mrb[91].mxu0 }
 0xe47   :  { %v10142_v35 = vpop.f32.mrb[92].mxu0 }
 0xe48   :  { %v10144_v22 = vpop.f32.mrb[93].mxu0  ;;  %v10149_v28 = vrot.slane %v10142_v35, 7 }
 0xe49   :  { %v10145_v3 = vpop.f32.mrb[94].mxu0 }
 0xe4a   :  { %v10146_v37 = vpop.f32.mrb[95].mxu0 }
 0xe74   :  { %v9741_v44 = vpop.f32.mrb[124].mxu1 }
 0xe75   :  { %v12145_v39 = vadd.f32 %v9741_v44, %v18372_v57  ;;  %v9743_v27 = vpop.f32.mrb[125].mxu1 }
 0xe76   :  { %v9744_v49 = vpop.f32.mrb[126].mxu1 }
 0xe77   :  { %v9745_v42 = vpop.f32.mrb[127].mxu1 }
 0xea4   :  { %v10092_v46 = vpop.f32.mrb[128].mxu1 }
 0xea5   :  { %v10099_v48 = vrot.slane %v10092_v46, 7  ;;  %v10094_v12 = vpop.f32.mrb[129].mxu1 }
 0xea6   :  { %v10095_v20 = vpop.f32.mrb[130].mxu1 }
 0xea7   :  { %v10101_v41 = vadd.f32 %v10099_v48, %v10051_v51  ;;  %v10096_v10 = vpop.f32.mrb[131].mxu1 }
 0xea9   :  { %v10151_v9 = vadd.f32 %v10149_v28, %v10101_v41 }
 0xeab   :  { %v10152_v26 = vsel %vm7680_vm6, %v12145_v39, %v10151_v9 }
 0xeac   :  { %v10160_v31 = vadd.f32 %v12060_v63, %v10152_v26 }
 0xeae   :  { %v10161_v58 = vmax.f32 %v10160_v31, 0.0 }
 0xeb0   :  { %v10162_v57 = vpack.c.bf16 %v10161_v58, %v10161_v58 }
 0xeb2   :  { %12122 = vmatmul.mubr.bf16.vlgmr.msra.gmra.mrb[132].mxu1 %v10162_v57 }
 0xf85   :  { %v10268_v11 = vpop.f32.mrb[132].mxu1 }
 0xf86   :  { %v10269_v53 = vadd.f32 %v12061_v5, %v10268_v11  ;;  %v12123_v33 = vpop.f32.mrb[133].mxu1 }
 0xf87   :  { %v10271_v38 = vpop.f32.mrb[134].mxu1 }
 0xf88   :  { %v10274_v14 = vmax.f32 %v10269_v53, 0.0  ;;  %v12124_v62 = vpop.f32.mrb[135].mxu1 }
 0xf8a   :  { %v10275_v59 = vpack.c.bf16 %v10274_v14, %v10274_v14 }
 0xf8c   :  { %12142 = vmatmul.mubr.bf16.vlgmr.msra.gmra.mrb[96].mxu0 %v10275_v59 }
0x105f   :  { %v10381_v40 = vpop.f32.mrb[96].mxu0 }
0x1060   :  { %v10382_v23 = vadd.f32 %v12070_v61, %v10381_v40  ;;  %v12143_v24 = vpop.f32.mrb[97].mxu0 }
0x1061   :  { %v10384_v2 = vpop.f32.mrb[98].mxu0 }
0x1062   :  { %v12144_v29 = vpop.f32.mrb[99].mxu0  ;;  %10388 = vst.msk [vmem:[#allocation2] sm:$0x3] %vm10387_vm13, %v10382_v23 }
0x1063   :  { %13696 = shalt.err (!%p13693_p4)
}
0x1064   :  { %s13697_s17 = scalar_lea.hbm %s18974_s18, 32 }
0x1065   :  { %p13698_p5 = scmp.ne.s32.totalorder %s18974_s18, %s13697_s17  ;;  %p13701_p6 = scmp.lt.u32.totalorder %s13697_s17, %s18974_s18 }
0x1067   :  { %p13703_p7 = pnand %p13701_p6, %p13698_p5 }
0x1069   :  { %13706 = shalt.err (!%p13703_p7)
}
0x106a   :  { %10398 = dma.vmem_to_hbm [thread:$0]  %s10396_s23, 32, %s18974_s18, [#allocation3]  }
0x106b   :  { %13707 = dma.done.wait [#allocation3], 32  }
0x106c   :  { %13708 = vsyncadd [#allocation3], 4294967264 }
0x106d   :  { %10402 = vsyncpa [#allocation3], 1 }

</bundles_post_ra>
